<compile_context>
chip_gen: v5e
topology: v5e:2x2
jax: 0.10.0
libtpu: 0.0.40
codegen_flags: <defaults>
</compile_context>

<pallas_src>
import jax
import jax.numpy as jnp
from jax import lax
from jax.experimental import pallas as pl
from jax.experimental.pallas import tpu as pltpu

BN_EPS = 1e-5
IN_H, IN_W = 32, 64            # Generator.input_height / input_width
H0, W0 = IN_H // 4, IN_W // 4  # 8, 16 (fc output spatial grid)


# ----------------------------------------------------------------------------
# Kernel 1: fused Linear + BatchNorm1d(eval) + ReLU
#   out = relu((x @ W + b) * scale + shift)
# ----------------------------------------------------------------------------
def _linear_bn_relu_kernel(x_ref, w_ref, b_ref, s_ref, t_ref, o_ref):
    y = jnp.dot(x_ref[...], w_ref[...], preferred_element_type=jnp.float32)
    y = (y + b_ref[...]) * s_ref[...] + t_ref[...]
    o_ref[...] = jnp.maximum(y, 0.0)


def linear_bn_relu(x, w_t, b, scale, shift, tile_m=1024):
    """x: (N, K), w_t: (K, M); returns relu(bn(x @ w_t + b)) of shape (N, M)."""
    n, k = x.shape
    m = w_t.shape[1]
    tm = tile_m if m % tile_m == 0 else m
    row = lambda v: v.reshape(1, m).astype(jnp.float32)
    return pl.pallas_call(
        _linear_bn_relu_kernel,
        out_shape=jax.ShapeDtypeStruct((n, m), jnp.float32),
        grid=(m // tm,),
        in_specs=[
            pl.BlockSpec((n, k), lambda j: (0, 0)),
            pl.BlockSpec((k, tm), lambda j: (0, j)),
            pl.BlockSpec((1, tm), lambda j: (0, j)),
            pl.BlockSpec((1, tm), lambda j: (0, j)),
            pl.BlockSpec((1, tm), lambda j: (0, j)),
        ],
        out_specs=pl.BlockSpec((n, tm), lambda j: (0, j)),
        compiler_params=pltpu.CompilerParams(dimension_semantics=("parallel",)),
    )(x, w_t, row(b), row(scale), row(shift))


# ----------------------------------------------------------------------------
# Kernels 2/3: ConvTranspose2d(k=4, s=2, p=1) "tap" matmuls.
#   taps[n,h,w,co,ky,kx] = sum_ci x[n,h,w,ci] * W[ci,co,ky,kx]
# The (Cin) contraction runs on the MXU in Pallas; the col2im overlap-add into
# the 2x upsampled grid is done in the wrapper.
# ----------------------------------------------------------------------------
def _tap_matmul_kernel(x_ref, w_ref, o_ref):
    o_ref[...] = jnp.dot(x_ref[...], w_ref[...], preferred_element_type=jnp.float32)


def _act_tap_matmul_kernel(x_ref, b_ref, s_ref, t_ref, w_ref, o_ref):
    # Fused epilogue of the PREVIOUS deconv layer: relu((x + bias) * bn_scale + bn_shift)
    x = jnp.maximum((x_ref[...] + b_ref[...]) * s_ref[...] + t_ref[...], 0.0)
    o_ref[...] = jnp.dot(x, w_ref[...], preferred_element_type=jnp.float32)


def conv_transpose_s2_k4_p1(x_nhwc, w, *, tile_rows=256, pre_affine=None):
    """ConvTranspose2d(Cin, Cout, 4, stride=2, padding=1), WITHOUT output bias.

    x_nhwc : (N, H, W, Cin)
    w      : (Cin, Cout, 4, 4)  (PyTorch ConvTranspose2d weight layout)
    pre_affine : optional (bias, scale, shift) applied to the input as
                 relu((x + bias) * scale + shift) inside the kernel.
    Returns (N, 2H, 2W, Cout) in float32.
    """
    n, h, wd, cin = x_nhwc.shape
    cout = w.shape[1]
    rows = n * h * wd
    tr = tile_rows if rows % tile_rows == 0 else rows
    x2 = x_nhwc.reshape(rows, cin)
    w2 = w.reshape(cin, cout * 16).astype(jnp.float32)

    common = dict(
        out_shape=jax.ShapeDtypeStruct((rows, cout * 16), jnp.float32),
        grid=(rows // tr,),
        out_specs=pl.BlockSpec((tr, cout * 16), lambda r: (r, 0)),
        compiler_params=pltpu.CompilerParams(dimension_semantics=("parallel",)),
    )
    if pre_affine is None:
        taps = pl.pallas_call(
            _tap_matmul_kernel,
            in_specs=[pl.BlockSpec((tr, cin), lambda r: (r, 0)),
                      pl.BlockSpec((cin, cout * 16), lambda r: (0, 0))],
            **common,
        )(x2, w2)
    else:
        b, s, t = (v.reshape(1, cin).astype(jnp.float32) for v in pre_affine)
        taps = pl.pallas_call(
            _act_tap_matmul_kernel,
            in_specs=[pl.BlockSpec((tr, cin), lambda r: (r, 0)),
                      pl.BlockSpec((1, cin), lambda r: (0, 0)),
                      pl.BlockSpec((1, cin), lambda r: (0, 0)),
                      pl.BlockSpec((1, cin), lambda r: (0, 0)),
                      pl.BlockSpec((cin, cout * 16), lambda r: (0, 0))],
            **common,
        )(x2, b, s, t, w2)

    taps = taps.reshape(n, h, wd, cout, 4, 4)
    # TODO(synk): the col2im overlap-add (strided scatter into the 2x upsampled
    # output grid) runs as XLA index-adds in the wrapper; strided sublane writes
    # have no clean/robust Pallas TPU lowering.
    out = jnp.zeros((n, 2 * h + 2, 2 * wd + 2, cout), jnp.float32)
    for ky in range(4):
        for kx in range(4):
            out = out.at[:, ky:ky + 2 * h:2, kx:kx + 2 * wd:2, :].add(
                taps[:, :, :, :, ky, kx])
    return out[:, 1:2 * h + 1, 1:2 * wd + 1, :]


# ----------------------------------------------------------------------------
# Kernel 4: SoftmaxImage — softmax over the flattened H*W axis (dim=2).
# Lane-dense (H*W = 2048, a multiple of 128), one (1, C, HW) block per batch row.
# ----------------------------------------------------------------------------
def _softmax_image_kernel(x_ref, b_ref, o_ref):
    x = x_ref[...] + b_ref[0, 0]   # deconv2 bias (softmax is shift-invariant; kept for fidelity)
    m = jnp.max(x, axis=-1, keepdims=True)
    e = jnp.exp(x - m)
    denom = jnp.sum(e, axis=-1, keepdims=True)
    o_ref[...] = e * pl.reciprocal(denom, approx=False)


def softmax_image(x, bias):
    """x: (N, C, HW) logits (pre conv-bias), bias: (1,) conv bias. Softmax over HW."""
    n, c, hw = x.shape
    assert hw % 128 == 0, "H*W must be lane-dense (multiple of 128)"
    return pl.pallas_call(
        _softmax_image_kernel,
        out_shape=jax.ShapeDtypeStruct((n, c, hw), jnp.float32),
        grid=(n,),
        in_specs=[pl.BlockSpec((1, c, hw), lambda i: (i, 0, 0)),
                  pl.BlockSpec((1, 1), lambda i: (0, 0))],
        out_specs=pl.BlockSpec((1, c, hw), lambda i: (i, 0, 0)),
        compiler_params=pltpu.CompilerParams(dimension_semantics=("parallel",)),
        cost_estimate=pl.CostEstimate(flops=5 * n * c * hw,
                                      transcendentals=n * c * hw,
                                      bytes_accessed=2 * n * c * hw * 4),
    )(x, bias.reshape(1, 1).astype(jnp.float32))


# ----------------------------------------------------------------------------
# Full Generator forward (Pallas path)
# ----------------------------------------------------------------------------
def _bn_scale_shift(gamma, beta, mean, var):
    s = gamma / jnp.sqrt(var + BN_EPS)
    return s, beta - mean * s


def generator_forward(p, noise, label):
    n = noise.shape[0]
    s1, t1 = _bn_scale_shift(p["bn1_g"], p["bn1_b"], p["bn1_m"], p["bn1_v"])
    s2, t2 = _bn_scale_shift(p["bn2_g"], p["bn2_b"], p["bn2_m"], p["bn2_v"])
    s3, t3 = _bn_scale_shift(p["bn3_g"], p["bn3_b"], p["bn3_m"], p["bn3_v"])

    x = jnp.concatenate([noise, label], axis=1)                          # (N, noise+4)
    x = linear_bn_relu(x, p["fc1_w"].T, p["fc1_b"], s1, t1, tile_m=512)  # (N, 1024)
    x = linear_bn_relu(x, p["fc2_w"].T, p["fc2_b"], s2, t2, tile_m=1024) # (N, 16384)
    x = x.reshape(n, 128, H0, W0).transpose(0, 2, 3, 1)                  # (N, 8, 16, 128) NHWC

    z1 = conv_transpose_s2_k4_p1(x, p["dc1_w"], tile_rows=256)           # (N,16,32,64), pre-bias
    z2 = conv_transpose_s2_k4_p1(z1, p["dc2_w"], tile_rows=512,
                                 pre_affine=(p["dc1_b"], s3, t3))        # (N,32,64,1), pre-bias
    z2 = z2.reshape(n, 1, IN_H * IN_W)                                   # C_out == 1
    out = softmax_image(z2, p["dc2_b"])                                  # SoftmaxImage over H*W
    return out.reshape(n, 1, IN_H, IN_W)


# ----------------------------------------------------------------------------
# Pure-JAX reference (independent math: lax.conv_general_dilated for deconv)
# ----------------------------------------------------------------------------
def _bn_eval_ref(x, gamma, beta, mean, var, axis):
    shp = [1] * x.ndim
    shp[axis] = -1
    rs = lambda v: v.reshape(shp)
    return (x - rs(mean)) / jnp.sqrt(rs(var) + BN_EPS) * rs(gamma) + rs(beta)


def _conv_transpose_ref(x_nchw, w, b):
    wf = jnp.flip(w, axis=(2, 3)).transpose(1, 0, 2, 3)   # (Cout, Cin, 4, 4)
    y = lax.conv_general_dilated(
        x_nchw, wf, window_strides=(1, 1), padding=[(2, 2), (2, 2)],
        lhs_dilation=(2, 2), dimension_numbers=("NCHW", "OIHW", "NCHW"))
    return y + b.reshape(1, -1, 1, 1)


def generator_reference(p, noise, label):
    x = jnp.concatenate([noise, label], axis=1)
    x = jnp.maximum(_bn_eval_ref(x @ p["fc1_w"].T + p["fc1_b"],
                                 p["bn1_g"], p["bn1_b"], p["bn1_m"], p["bn1_v"], 1), 0.0)
    x = jnp.maximum(_bn_eval_ref(x @ p["fc2_w"].T + p["fc2_b"],
                                 p["bn2_g"], p["bn2_b"], p["bn2_m"], p["bn2_v"], 1), 0.0)
    n = x.shape[0]
    x = x.reshape(n, 128, H0, W0)
    x = _conv_transpose_ref(x, p["dc1_w"], p["dc1_b"])
    x = jnp.maximum(_bn_eval_ref(x, p["bn3_g"], p["bn3_b"], p["bn3_m"], p["bn3_v"], 1), 0.0)
    x = _conv_transpose_ref(x, p["dc2_w"], p["dc2_b"])
    x = jax.nn.softmax(x.reshape(n, 1, IN_H * IN_W), axis=2)
    return x.reshape(n, 1, IN_H, IN_W)


# ----------------------------------------------------------------------------
# Deterministic parameter init (matches PyTorch layer shapes)
# ----------------------------------------------------------------------------
def init_params(key, noise_size):
    input_dim = noise_size + 4
    fc2_out = 128 * H0 * W0
    ks = iter(jax.random.split(key, 24))
    nrm = lambda shape, sc: sc * jax.random.normal(next(ks), shape, jnp.float32)
    uni = lambda shape, lo, hi: jax.random.uniform(next(ks), shape, jnp.float32, lo, hi)
    return {
        "fc1_w": nrm((1024, input_dim), 0.1), "fc1_b": nrm((1024,), 0.1),
        "bn1_g": uni((1024,), 0.8, 1.2), "bn1_b": nrm((1024,), 0.1),
        "bn1_m": nrm((1024,), 0.1), "bn1_v": uni((1024,), 0.5, 1.5),
        "fc2_w": nrm((fc2_out, 1024), 0.05), "fc2_b": nrm((fc2_out,), 0.1),
        "bn2_g": uni((fc2_out,), 0.8, 1.2), "bn2_b": nrm((fc2_out,), 0.1),
        "bn2_m": nrm((fc2_out,), 0.1), "bn2_v": uni((fc2_out,), 0.5, 1.5),
        "dc1_w": nrm((128, 64, 4, 4), 0.05), "dc1_b": nrm((64,), 0.1),
        "bn3_g": uni((64,), 0.8, 1.2), "bn3_b": nrm((64,), 0.1),
        "bn3_m": nrm((64,), 0.1), "bn3_v": uni((64,), 0.5, 1.5),
        "dc2_w": nrm((64, 1, 4, 4), 0.05), "dc2_b": nrm((1,), 0.1),
    }


if __name__ == "__main__":
    key = jax.random.PRNGKey(0)
    k_param, k_noise, k_label = jax.random.split(key, 3)
    batch, noise_size = 8, 12

    params = init_params(k_param, noise_size)
    noise = jax.random.normal(k_noise, (batch, noise_size), jnp.float32)
    label = jax.random.normal(k_label, (batch, 4), jnp.float32)

    fwd = jax.jit(generator_forward)
    out = jax.block_until_ready(fwd(params, noise, label))

    ref = generator_reference(params, noise, label)
    assert out.shape == (batch, 1, IN_H, IN_W), out.shape
    assert bool(jnp.all(jnp.isfinite(out))), "non-finite outputs"
    assert jnp.allclose(out.sum(axis=(2, 3)), 1.0, atol=1e-4), "softmax images must sum to 1"
    err = float(jnp.max(jnp.abs(out - ref)))
    assert jnp.allclose(out, ref, atol=1e-5, rtol=1e-4), f"mismatch vs reference (max abs err {err})"
    print("KERNEL_OK")
</pallas_src>

<mosaic_0001>
module attributes {stable_mosaic.version = 11 : i64} {
  func.func @_linear_bn_relu_kernel(%arg0: i32, %arg1: memref<8x16xf32, #tpu.memory_space<vmem>>, %arg2: memref<16x512xf32, #tpu.memory_space<vmem>>, %arg3: memref<1x512xf32, #tpu.memory_space<vmem>>, %arg4: memref<1x512xf32, #tpu.memory_space<vmem>>, %arg5: memref<1x512xf32, #tpu.memory_space<vmem>>, %arg6: memref<8x512xf32, #tpu.memory_space<vmem>>) attributes {dimension_semantics = [#tpu.dimension_semantics<parallel>], iteration_bounds = array<i64: 2>, scalar_prefetch = 0 : i64, scratch_operands = 0 : i64, tpu.core_type = #tpu.core_type<tc>, window_params = [{pipeline_mode = #tpu.pipeline_mode<synchronous>, transform_indices = @transform_0, window_bounds = array<i64: 8, 16>}, {transform_indices = @transform_1, window_bounds = array<i64: 16, 512>}, {transform_indices = @transform_2, window_bounds = array<i64: 1, 512>}, {transform_indices = @transform_3, window_bounds = array<i64: 1, 512>}, {transform_indices = @transform_4, window_bounds = array<i64: 1, 512>}, {transform_indices = @transform_5, window_bounds = array<i64: 8, 512>}]} {
    %c0 = arith.constant 0 : index
    %c0_0 = arith.constant 0 : index
    %0 = vector.load %arg1[%c0, %c0_0] : memref<8x16xf32, #tpu.memory_space<vmem>>, vector<8x16xf32>
    %c0_1 = arith.constant 0 : index
    %c0_2 = arith.constant 0 : index
    %1 = vector.load %arg2[%c0_1, %c0_2] : memref<16x512xf32, #tpu.memory_space<vmem>>, vector<16x512xf32>
    %cst = arith.constant dense<0.000000e+00> : vector<8x512xf32>
    %2 = tpu.matmul %0, %1, %cst {dimension_numbers = #tpu.dot_dimension_numbers<[1], [0], [0], [1], [0, 0, 1, 1], [], []>} : vector<8x16xf32>, vector<16x512xf32>, vector<8x512xf32> -> vector<8x512xf32>
    %c0_3 = arith.constant 0 : index
    %c0_4 = arith.constant 0 : index
    %3 = vector.load %arg3[%c0_3, %c0_4] : memref<1x512xf32, #tpu.memory_space<vmem>>, vector<1x512xf32>
    %4 = vector.broadcast %3 : vector<1x512xf32> to vector<8x512xf32>
    %5 = arith.addf %2, %4 : vector<8x512xf32>
    %c0_5 = arith.constant 0 : index
    %c0_6 = arith.constant 0 : index
    %6 = vector.load %arg4[%c0_5, %c0_6] : memref<1x512xf32, #tpu.memory_space<vmem>>, vector<1x512xf32>
    %7 = vector.broadcast %6 : vector<1x512xf32> to vector<8x512xf32>
    %8 = arith.mulf %5, %7 : vector<8x512xf32>
    %c0_7 = arith.constant 0 : index
    %c0_8 = arith.constant 0 : index
    %9 = vector.load %arg5[%c0_7, %c0_8] : memref<1x512xf32, #tpu.memory_space<vmem>>, vector<1x512xf32>
    %10 = vector.broadcast %9 : vector<1x512xf32> to vector<8x512xf32>
    %11 = arith.addf %8, %10 : vector<8x512xf32>
    %cst_9 = arith.constant 0.000000e+00 : f32
    %12 = vector.broadcast %cst_9 : f32 to vector<8x512xf32>
    %13 = arith.maximumf %11, %12 : vector<8x512xf32>
    %c0_10 = arith.constant 0 : index
    %c0_11 = arith.constant 0 : index
    %14 = vector.load %arg6[%c0_10, %c0_11] : memref<8x512xf32, #tpu.memory_space<vmem>>, vector<8x512xf32>
    tpu.vector_store %arg6[%c0_10, %c0_11], %13 {strides = array<i32>} : memref<8x512xf32, #tpu.memory_space<vmem>>, vector<8x512xf32>,
    return
  }
  func.func @transform_0(%arg0: i32) -> (i32, i32) {
    %c0_i32 = arith.constant 0 : i32
    %c0_i32_0 = arith.constant 0 : i32
    %c0_i32_1 = arith.constant 0 : i32
    return %c0_i32, %c0_i32_0 : i32, i32
  }
  func.func @transform_1(%arg0: i32) -> (i32, i32) {
    %c0_i32 = arith.constant 0 : i32
    %c0_i32_0 = arith.constant 0 : i32
    return %c0_i32, %arg0 : i32, i32
  }
  func.func @transform_2(%arg0: i32) -> (i32, i32) {
    %c0_i32 = arith.constant 0 : i32
    %c0_i32_0 = arith.constant 0 : i32
    return %c0_i32, %arg0 : i32, i32
  }
  func.func @transform_3(%arg0: i32) -> (i32, i32) {
    %c0_i32 = arith.constant 0 : i32
    %c0_i32_0 = arith.constant 0 : i32
    return %c0_i32, %arg0 : i32, i32
  }
  func.func @transform_4(%arg0: i32) -> (i32, i32) {
    %c0_i32 = arith.constant 0 : i32
    %c0_i32_0 = arith.constant 0 : i32
    return %c0_i32, %arg0 : i32, i32
  }
  func.func @transform_5(%arg0: i32) -> (i32, i32) {
    %c0_i32 = arith.constant 0 : i32
    %c0_i32_0 = arith.constant 0 : i32
    return %c0_i32, %arg0 : i32, i32
  }
}

module attributes {stable_mosaic.version = 11 : i64} {
  func.func @_linear_bn_relu_kernel(%arg0: i32, %arg1: memref<8x1024xf32, #tpu.memory_space<vmem>>, %arg2: memref<1024x1024xf32, #tpu.memory_space<vmem>>, %arg3: memref<1x1024xf32, #tpu.memory_space<vmem>>, %arg4: memref<1x1024xf32, #tpu.memory_space<vmem>>, %arg5: memref<1x1024xf32, #tpu.memory_space<vmem>>, %arg6: memref<8x1024xf32, #tpu.memory_space<vmem>>) attributes {dimension_semantics = [#tpu.dimension_semantics<parallel>], iteration_bounds = array<i64: 16>, scalar_prefetch = 0 : i64, scratch_operands = 0 : i64, tpu.core_type = #tpu.core_type<tc>, window_params = [{pipeline_mode = #tpu.pipeline_mode<synchronous>, transform_indices = @transform_0, window_bounds = array<i64: 8, 1024>}, {transform_indices = @transform_1, window_bounds = array<i64: 1024, 1024>}, {transform_indices = @transform_2, window_bounds = array<i64: 1, 1024>}, {transform_indices = @transform_3, window_bounds = array<i64: 1, 1024>}, {transform_indices = @transform_4, window_bounds = array<i64: 1, 1024>}, {transform_indices = @transform_5, window_bounds = array<i64: 8, 1024>}]} {
    %c0 = arith.constant 0 : index
    %c0_0 = arith.constant 0 : index
    %0 = vector.load %arg1[%c0, %c0_0] : memref<8x1024xf32, #tpu.memory_space<vmem>>, vector<8x1024xf32>
    %c0_1 = arith.constant 0 : index
    %c0_2 = arith.constant 0 : index
    %1 = vector.load %arg2[%c0_1, %c0_2] : memref<1024x1024xf32, #tpu.memory_space<vmem>>, vector<1024x1024xf32>
    %cst = arith.constant dense<0.000000e+00> : vector<8x1024xf32>
    %2 = tpu.matmul %0, %1, %cst {dimension_numbers = #tpu.dot_dimension_numbers<[1], [0], [0], [1], [0, 0, 1, 1], [], []>} : vector<8x1024xf32>, vector<1024x1024xf32>, vector<8x1024xf32> -> vector<8x1024xf32>
    %c0_3 = arith.constant 0 : index
    %c0_4 = arith.constant 0 : index
    %3 = vector.load %arg3[%c0_3, %c0_4] : memref<1x1024xf32, #tpu.memory_space<vmem>>, vector<1x1024xf32>
    %4 = vector.broadcast %3 : vector<1x1024xf32> to vector<8x1024xf32>
    %5 = arith.addf %2, %4 : vector<8x1024xf32>
    %c0_5 = arith.constant 0 : index
    %c0_6 = arith.constant 0 : index
    %6 = vector.load %arg4[%c0_5, %c0_6] : memref<1x1024xf32, #tpu.memory_space<vmem>>, vector<1x1024xf32>
    %7 = vector.broadcast %6 : vector<1x1024xf32> to vector<8x1024xf32>
    %8 = arith.mulf %5, %7 : vector<8x1024xf32>
    %c0_7 = arith.constant 0 : index
    %c0_8 = arith.constant 0 : index
    %9 = vector.load %arg5[%c0_7, %c0_8] : memref<1x1024xf32, #tpu.memory_space<vmem>>, vector<1x1024xf32>
    %10 = vector.broadcast %9 : vector<1x1024xf32> to vector<8x1024xf32>
    %11 = arith.addf %8, %10 : vector<8x1024xf32>
    %cst_9 = arith.constant 0.000000e+00 : f32
    %12 = vector.broadcast %cst_9 : f32 to vector<8x1024xf32>
    %13 = arith.maximumf %11, %12 : vector<8x1024xf32>
    %c0_10 = arith.constant 0 : index
    %c0_11 = arith.constant 0 : index
    %14 = vector.load %arg6[%c0_10, %c0_11] : memref<8x1024xf32, #tpu.memory_space<vmem>>, vector<8x1024xf32>
    tpu.vector_store %arg6[%c0_10, %c0_11], %13 {strides = array<i32>} : memref<8x1024xf32, #tpu.memory_space<vmem>>, vector<8x1024xf32>,
    return
  }
  func.func @transform_0(%arg0: i32) -> (i32, i32) {
    %c0_i32 = arith.constant 0 : i32
    %c0_i32_0 = arith.constant 0 : i32
    %c0_i32_1 = arith.constant 0 : i32
    return %c0_i32, %c0_i32_0 : i32, i32
  }
  func.func @transform_1(%arg0: i32) -> (i32, i32) {
    %c0_i32 = arith.constant 0 : i32
    %c0_i32_0 = arith.constant 0 : i32
    return %c0_i32, %arg0 : i32, i32
  }
  func.func @transform_2(%arg0: i32) -> (i32, i32) {
    %c0_i32 = arith.constant 0 : i32
    %c0_i32_0 = arith.constant 0 : i32
    return %c0_i32, %arg0 : i32, i32
  }
  func.func @transform_3(%arg0: i32) -> (i32, i32) {
    %c0_i32 = arith.constant 0 : i32
    %c0_i32_0 = arith.constant 0 : i32
    return %c0_i32, %arg0 : i32, i32
  }
  func.func @transform_4(%arg0: i32) -> (i32, i32) {
    %c0_i32 = arith.constant 0 : i32
    %c0_i32_0 = arith.constant 0 : i32
    return %c0_i32, %arg0 : i32, i32
  }
  func.func @transform_5(%arg0: i32) -> (i32, i32) {
    %c0_i32 = arith.constant 0 : i32
    %c0_i32_0 = arith.constant 0 : i32
    return %c0_i32, %arg0 : i32, i32
  }
}

module attributes {stable_mosaic.version = 11 : i64} {
  func.func @_tap_matmul_kernel(%arg0: i32, %arg1: memref<256x128xf32, #tpu.memory_space<vmem>>, %arg2: memref<128x1024xf32, #tpu.memory_space<vmem>>, %arg3: memref<256x1024xf32, #tpu.memory_space<vmem>>) attributes {dimension_semantics = [#tpu.dimension_semantics<parallel>], iteration_bounds = array<i64: 4>, scalar_prefetch = 0 : i64, scratch_operands = 0 : i64, tpu.core_type = #tpu.core_type<tc>, window_params = [{transform_indices = @transform_0, window_bounds = array<i64: 256, 128>}, {pipeline_mode = #tpu.pipeline_mode<synchronous>, transform_indices = @transform_1, window_bounds = array<i64: 128, 1024>}, {transform_indices = @transform_2, window_bounds = array<i64: 256, 1024>}]} {
    %c0 = arith.constant 0 : index
    %c0_0 = arith.constant 0 : index
    %0 = vector.load %arg1[%c0, %c0_0] : memref<256x128xf32, #tpu.memory_space<vmem>>, vector<256x128xf32>
    %c0_1 = arith.constant 0 : index
    %c0_2 = arith.constant 0 : index
    %1 = vector.load %arg2[%c0_1, %c0_2] : memref<128x1024xf32, #tpu.memory_space<vmem>>, vector<128x1024xf32>
    %cst = arith.constant dense<0.000000e+00> : vector<256x1024xf32>
    %2 = tpu.matmul %0, %1, %cst {dimension_numbers = #tpu.dot_dimension_numbers<[1], [0], [0], [1], [0, 0, 1, 1], [], []>} : vector<256x128xf32>, vector<128x1024xf32>, vector<256x1024xf32> -> vector<256x1024xf32>
    %c0_3 = arith.constant 0 : index
    %c0_4 = arith.constant 0 : index
    %3 = vector.load %arg3[%c0_3, %c0_4] : memref<256x1024xf32, #tpu.memory_space<vmem>>, vector<256x1024xf32>
    tpu.vector_store %arg3[%c0_3, %c0_4], %2 {strides = array<i32>} : memref<256x1024xf32, #tpu.memory_space<vmem>>, vector<256x1024xf32>,
    return
  }
  func.func @transform_0(%arg0: i32) -> (i32, i32) {
    %c0_i32 = arith.constant 0 : i32
    %c0_i32_0 = arith.constant 0 : i32
    return %arg0, %c0_i32 : i32, i32
  }
  func.func @transform_1(%arg0: i32) -> (i32, i32) {
    %c0_i32 = arith.constant 0 : i32
    %c0_i32_0 = arith.constant 0 : i32
    %c0_i32_1 = arith.constant 0 : i32
    return %c0_i32, %c0_i32_0 : i32, i32
  }
  func.func @transform_2(%arg0: i32) -> (i32, i32) {
    %c0_i32 = arith.constant 0 : i32
    %c0_i32_0 = arith.constant 0 : i32
    return %arg0, %c0_i32 : i32, i32
  }
}

module attributes {stable_mosaic.version = 11 : i64} {
  func.func @_act_tap_matmul_kernel(%arg0: i32, %arg1: memref<512x64xf32, #tpu.memory_space<vmem>>, %arg2: memref<1x64xf32, #tpu.memory_space<vmem>>, %arg3: memref<1x64xf32, #tpu.memory_space<vmem>>, %arg4: memref<1x64xf32, #tpu.memory_space<vmem>>, %arg5: memref<64x16xf32, #tpu.memory_space<vmem>>, %arg6: memref<512x16xf32, #tpu.memory_space<vmem>>) attributes {dimension_semantics = [#tpu.dimension_semantics<parallel>], iteration_bounds = array<i64: 8>, scalar_prefetch = 0 : i64, scratch_operands = 0 : i64, tpu.core_type = #tpu.core_type<tc>, window_params = [{transform_indices = @transform_0, window_bounds = array<i64: 512, 64>}, {pipeline_mode = #tpu.pipeline_mode<synchronous>, transform_indices = @transform_1, window_bounds = array<i64: 1, 64>}, {pipeline_mode = #tpu.pipeline_mode<synchronous>, transform_indices = @transform_2, window_bounds = array<i64: 1, 64>}, {pipeline_mode = #tpu.pipeline_mode<synchronous>, transform_indices = @transform_3, window_bounds = array<i64: 1, 64>}, {pipeline_mode = #tpu.pipeline_mode<synchronous>, transform_indices = @transform_4, window_bounds = array<i64: 64, 16>}, {transform_indices = @transform_5, window_bounds = array<i64: 512, 16>}]} {
    %c0 = arith.constant 0 : index
    %c0_0 = arith.constant 0 : index
    %0 = vector.load %arg1[%c0, %c0_0] : memref<512x64xf32, #tpu.memory_space<vmem>>, vector<512x64xf32>
    %c0_1 = arith.constant 0 : index
    %c0_2 = arith.constant 0 : index
    %1 = vector.load %arg2[%c0_1, %c0_2] : memref<1x64xf32, #tpu.memory_space<vmem>>, vector<1x64xf32>
    %2 = vector.broadcast %1 : vector<1x64xf32> to vector<512x64xf32>
    %3 = arith.addf %0, %2 : vector<512x64xf32>
    %c0_3 = arith.constant 0 : index
    %c0_4 = arith.constant 0 : index
    %4 = vector.load %arg3[%c0_3, %c0_4] : memref<1x64xf32, #tpu.memory_space<vmem>>, vector<1x64xf32>
    %5 = vector.broadcast %4 : vector<1x64xf32> to vector<512x64xf32>
    %6 = arith.mulf %3, %5 : vector<512x64xf32>
    %c0_5 = arith.constant 0 : index
    %c0_6 = arith.constant 0 : index
    %7 = vector.load %arg4[%c0_5, %c0_6] : memref<1x64xf32, #tpu.memory_space<vmem>>, vector<1x64xf32>
    %8 = vector.broadcast %7 : vector<1x64xf32> to vector<512x64xf32>
    %9 = arith.addf %6, %8 : vector<512x64xf32>
    %cst = arith.constant 0.000000e+00 : f32
    %10 = vector.broadcast %cst : f32 to vector<512x64xf32>
    %11 = arith.maximumf %9, %10 : vector<512x64xf32>
    %c0_7 = arith.constant 0 : index
    %c0_8 = arith.constant 0 : index
    %12 = vector.load %arg5[%c0_7, %c0_8] : memref<64x16xf32, #tpu.memory_space<vmem>>, vector<64x16xf32>
    %cst_9 = arith.constant dense<0.000000e+00> : vector<512x16xf32>
    %13 = tpu.matmul %11, %12, %cst_9 {dimension_numbers = #tpu.dot_dimension_numbers<[1], [0], [0], [1], [0, 0, 1, 1], [], []>} : vector<512x64xf32>, vector<64x16xf32>, vector<512x16xf32> -> vector<512x16xf32>
    %c0_10 = arith.constant 0 : index
    %c0_11 = arith.constant 0 : index
    %14 = vector.load %arg6[%c0_10, %c0_11] : memref<512x16xf32, #tpu.memory_space<vmem>>, vector<512x16xf32>
    tpu.vector_store %arg6[%c0_10, %c0_11], %13 {strides = array<i32>} : memref<512x16xf32, #tpu.memory_space<vmem>>, vector<512x16xf32>,
    return
  }
  func.func @transform_0(%arg0: i32) -> (i32, i32) {
    %c0_i32 = arith.constant 0 : i32
    %c0_i32_0 = arith.constant 0 : i32
    return %arg0, %c0_i32 : i32, i32
  }
  func.func @transform_1(%arg0: i32) -> (i32, i32) {
    %c0_i32 = arith.constant 0 : i32
    %c0_i32_0 = arith.constant 0 : i32
    %c0_i32_1 = arith.constant 0 : i32
    return %c0_i32, %c0_i32_0 : i32, i32
  }
  func.func @transform_2(%arg0: i32) -> (i32, i32) {
    %c0_i32 = arith.constant 0 : i32
    %c0_i32_0 = arith.constant 0 : i32
    %c0_i32_1 = arith.constant 0 : i32
    return %c0_i32, %c0_i32_0 : i32, i32
  }
  func.func @transform_3(%arg0: i32) -> (i32, i32) {
    %c0_i32 = arith.constant 0 : i32
    %c0_i32_0 = arith.constant 0 : i32
    %c0_i32_1 = arith.constant 0 : i32
    return %c0_i32, %c0_i32_0 : i32, i32
  }
  func.func @transform_4(%arg0: i32) -> (i32, i32) {
    %c0_i32 = arith.constant 0 : i32
    %c0_i32_0 = arith.constant 0 : i32
    %c0_i32_1 = arith.constant 0 : i32
    return %c0_i32, %c0_i32_0 : i32, i32
  }
  func.func @transform_5(%arg0: i32) -> (i32, i32) {
    %c0_i32 = arith.constant 0 : i32
    %c0_i32_0 = arith.constant 0 : i32
    return %arg0, %c0_i32 : i32, i32
  }
}

module attributes {stable_mosaic.version = 11 : i64} {
  func.func @_softmax_image_kernel(%arg0: i32, %arg1: memref<1x1x2048xf32, #tpu.memory_space<vmem>>, %arg2: memref<1x1xf32, #tpu.memory_space<vmem>>, %arg3: memref<1x1x2048xf32, #tpu.memory_space<vmem>>) attributes {dimension_semantics = [#tpu.dimension_semantics<parallel>], iteration_bounds = array<i64: 8>, scalar_prefetch = 0 : i64, scratch_operands = 0 : i64, tpu.core_type = #tpu.core_type<tc>, window_params = [{transform_indices = @transform_0, window_bounds = array<i64: 1, 1, 2048>}, {pipeline_mode = #tpu.pipeline_mode<synchronous>, transform_indices = @transform_1, window_bounds = array<i64: 1, 1>}, {transform_indices = @transform_2, window_bounds = array<i64: 1, 1, 2048>}]} {
    %c0 = arith.constant 0 : index
    %c0_0 = arith.constant 0 : index
    %c0_1 = arith.constant 0 : index
    %0 = vector.load %arg1[%c0, %c0_0, %c0_1] : memref<1x1x2048xf32, #tpu.memory_space<vmem>>, vector<1x1x2048xf32>
    %c0_2 = arith.constant 0 : index
    %c0_3 = arith.constant 0 : index
    %1 = vector.load %arg2[%c0_2, %c0_3] : memref<1x1xf32, #tpu.memory_space<vmem>>, vector<1x1xf32>
    %2 = vector.extract %1[0, 0] : f32 from vector<1x1xf32>
    %3 = vector.broadcast %2 : f32 to vector<1x1x2048xf32>
    %4 = arith.addf %0, %3 : vector<1x1x2048xf32>
    %cst = arith.constant dense<0xFF800000> : vector<1x1xf32>
    %5 = vector.multi_reduction <maximumf>, %4, %cst [2] : vector<1x1x2048xf32> to vector<1x1xf32>
    %6 = vector.shape_cast %5 : vector<1x1xf32> to vector<1x1x1xf32>
    %7 = vector.broadcast %6 : vector<1x1x1xf32> to vector<1x1x2048xf32>
    %8 = arith.subf %4, %7 : vector<1x1x2048xf32>
    %9 = math.exp %8 : vector<1x1x2048xf32>
    %cst_4 = arith.constant dense<0.000000e+00> : vector<1x1xf32>
    %10 = vector.multi_reduction <add>, %9, %cst_4 [2] : vector<1x1x2048xf32> to vector<1x1xf32>
    %11 = vector.shape_cast %10 : vector<1x1xf32> to vector<1x1x1xf32>
    %12 = tpu.reciprocal %11 : vector<1x1x1xf32> -> vector<1x1x1xf32>
    %13 = vector.broadcast %12 : vector<1x1x1xf32> to vector<1x1x2048xf32>
    %14 = arith.mulf %9, %13 : vector<1x1x2048xf32>
    %c0_5 = arith.constant 0 : index
    %c0_6 = arith.constant 0 : index
    %c0_7 = arith.constant 0 : index
    %15 = vector.load %arg3[%c0_5, %c0_6, %c0_7] : memref<1x1x2048xf32, #tpu.memory_space<vmem>>, vector<1x1x2048xf32>
    tpu.vector_store %arg3[%c0_5, %c0_6, %c0_7], %14 {strides = array<i32>} : memref<1x1x2048xf32, #tpu.memory_space<vmem>>, vector<1x1x2048xf32>,
    return
  }
  func.func @transform_0(%arg0: i32) -> (i32, i32, i32) {
    %c0_i32 = arith.constant 0 : i32
    %c0_i32_0 = arith.constant 0 : i32
    %c0_i32_1 = arith.constant 0 : i32
    return %arg0, %c0_i32, %c0_i32_0 : i32, i32, i32
  }
  func.func @transform_1(%arg0: i32) -> (i32, i32) {
    %c0_i32 = arith.constant 0 : i32
    %c0_i32_0 = arith.constant 0 : i32
    %c0_i32_1 = arith.constant 0 : i32
    return %c0_i32, %c0_i32_0 : i32, i32
  }
  func.func @transform_2(%arg0: i32) -> (i32, i32, i32) {
    %c0_i32 = arith.constant 0 : i32
    %c0_i32_0 = arith.constant 0 : i32
    %c0_i32_1 = arith.constant 0 : i32
    return %arg0, %c0_i32, %c0_i32_0 : i32, i32, i32
  }
}

</mosaic_0001>

<bundles_post_ra>
// kernel: generator_forward.5
= control target key start
LH: loop header
LB: loop body
LE: loop exit
PB: predicated region body
PF: predicated region fallthrough
CT: control target
= control target key end

     0   :  { %10 = vsyncpa [#allocation3], 0  ;;  %s917_s0 = inlined_call_operand.vmem [shape: f32[8,16], index: 0, kind: input, shape index: {}]   ;;  %s918_s1 = inlined_call_operand.hbm [shape: f32[16,1024], index: 1, kind: input, shape index: {}]   ;;  %s919_s2 = inlined_call_operand.hbm [shape: f32[1,1024], index: 2, kind: input, shape index: {}]   ;;  %s920_s3 = inlined_call_operand.vmem [shape: f32[1,1024], index: 3, kind: input, shape index: {}]   ;;  %s921_s4 = inlined_call_operand.vmem [shape: f32[1,1024], index: 4, kind: input, shape index: {}]   ;;  %s922_s5 = inlined_call_operand.vmem [shape: f32[8,1024], index: 5, kind: output, shape index: {}]  }
   0x1   :  { %12 = vsyncpa [#allocation3 + $0x1], 0 }
   0x2   :  { %13 = vsyncpa [#allocation5], 0 }
   0x3   :  { %15 = vsyncpa [#allocation5 + $0x1], 0  ;;  %s777_s18 = smov 0   ;;  %s779_s19 = smov 0  }
   0x4   :  { %s781_s20 = smov 0   ;;  %s783_s21 = smov 0  }
   0x5 LB: > { %s574_s22 = sadd.s32 4294967295, %s742_s21   ;;  %s797_s23 = sadd.s32 1, %s742_s21   ;;  %s742_s21 = sphi %s783_s21, %s930_s21   ;;  %s738_s20 = sphi %s781_s20, %s929_s20   ;;  %s734_s19 = sphi %s779_s19, %s928_s19   ;;  %s730_s18 = sphi %s777_s18, %s927_s18  }
   0x6   : > { %s46_s24 = ssub.s32 %s742_s21, %s797_s23  ;;  %s49_s25 = sadd.s32 1, %s738_s20 }
   0x7   : > { %p47_p0 = scmp.eq.s32.totalorder %s46_s24, 0  ;;  %p56_p1 = scmp.ne.s32.totalorder %s738_s20, %s734_s19 }
   0x8   : > { %p57_p2 = scmp.eq.s32.totalorder %s742_s21, 0  ;;  %p62_p3 = scmp.ne.s32.totalorder %s734_s19, %s730_s18 }
   0x9   : > { %s807_s26 = scalar_select %p47_p0, %s738_s20, %s49_s25  }
   0xa   : > { %p809_p4 = por %p57_p2, %p56_p1  ;;  %p63_p5 = scmp.eq.s32.totalorder %s574_s22, 0 }
   0xb   : > { %p608_p6 = scmp.lt.s32.totalorder %s742_s21, 2  ;;  %s821_s29 = sand.u32 1, %s738_s20  }
   0xc   : > { %p816_p7 = por %p63_p5, %p62_p3  ;;  %s578_s30 = sshll.u32 %s821_s29, 6 }
   0xd   : > { %s596_s6 = sshll.u32 %s742_s21, 5  ;;  %s197_s10 = scalar_lea.vmem [#allocation2], %s578_s30 }
   0xe   : > { %s202_s9 = scalar_lea.hbm %s918_s1, %s596_s6  ;;  %s205_s11 = sshll.u32 %s197_s10, 4  ;;  %s206_s11 = int_to_ptr.vmem [resolvable:$true] %s205_s11 }
   0xf   : > { %s203_s12 = sshll.u32 %s202_s9, 4  ;;  %p830_p8 = pnand %p608_p6, %p809_p4  ;;  %s204_s12 = int_to_ptr.hbm [resolvable:$true] %s203_s12 }
  0x10   : > { %s194_s14 = scalar_lea.sflag [#allocation3], %s821_s29  ;;  %s644_s15 = sshra.s32 %s204_s12, 4  ;;  %s645_s15 = int_to_ptr.hbm [resolvable:$true] %s644_s15 }
  0x11   : > { %s646_s16 = scalar_lea.hbm %s645_s15, 64  ;;  %p648_p10 = pneg %p830_p8 }
  0x12   : > { %p647_p9 = scmp.ne.s32.totalorder %s645_s15, %s646_s16  ;;  %s651_s24 = scalar_lea.hbm %s918_s1, 128 }
  0x13   : > { %p652_p13 = scmp.lt.s32.totalorder %s645_s15, %s918_s1  ;;  %p653_p0 = scmp.lt.s32.totalorder %s651_s24, %s646_s16 }
  0x14   : > { %p649_p11 = pnand %p648_p10, %p647_p9 }
  0x15   : > { %p654_p1 = por %p653_p0, %p652_p13 }
  0x16   : > { %p650_p12 = pneg %p649_p11 }
  0x18   : > { %p655_p2 = pnand %p654_p1, %p650_p12 }
  0x1a   : > { %658 = shalt.err (!%p655_p2)
}
  0x1b   : > { %s744_s30 = smov 1024   ;;  %s745_s6 = smov 512  }
  0x1c   : > { %s746_s7 = smov 32   ;;  %p583_p3 = scmp.ge.s32.totalorder %s742_s21, 1 }
  0x1d   : > { %604 = dma.hbm_to_vmem [thread:$0]  (!%p830_p8), %s204_s12, 1024, %s206_s11, %s194_s14, %s744_s30, %s745_s6, %s746_s7  }
  0x1e   : > { %p248_p4 = scmp.lt.s32.totalorder %s742_s21, 3  ;;  %s581_s8 = sshll.u32 %s821_s29, 2 }
  0x1f   : > { %s582_s10 = sshll.u32 %s742_s21, 2  ;;  %s219_s15 = scalar_lea.vmem [#allocation4], %s581_s8 }
  0x20   : > { %p851_p5 = pnand %p583_p3, %p248_p4  ;;  %s227_s16 = sshll.u32 %s219_s15, 4  ;;  %s228_s16 = int_to_ptr.vmem [resolvable:$true] %s227_s16 }
  0x21   : > { %s223_s24 = scalar_lea.hbm %s919_s2, %s582_s10  ;;  %s216_s27 = scalar_lea.sflag [#allocation5], %s821_s29 }
  0x22   : > { %s225_s25 = sshll.u32 %s223_s24, 4  ;;  %s681_s6 = scalar_lea.hbm %s919_s2, 8  ;;  %s226_s25 = int_to_ptr.hbm [resolvable:$true] %s225_s25 }
  0x23   : > { %s674_s11 = sshra.s32 %s226_s25, 4  ;;  %s675_s11 = int_to_ptr.hbm [resolvable:$true] %s674_s11 }
  0x24   : > { %s676_s12 = scalar_lea.hbm %s675_s11, 4  ;;  %p682_p12 = scmp.lt.s32.totalorder %s675_s11, %s919_s2 }
  0x25   : > { %p677_p6 = scmp.ne.s32.totalorder %s675_s11, %s676_s12  ;;  %p683_p13 = scmp.lt.s32.totalorder %s681_s6, %s676_s12 }
  0x27   : > { %p679_p9 = pnand %p677_p6, %p648_p10  ;;  %p684_p0 = por %p683_p13, %p682_p12 }
  0x29   : > { %p680_p11 = pneg %p679_p9 }
  0x2b   : > { %p685_p1 = pnand %p684_p0, %p680_p11 }
  0x2d   : > { %688 = shalt.err (!%p685_p1)
}
  0x2e   : > { %607 = dma.hbm_to_vmem [thread:$0]  (!%p830_p8), %s226_s25, 64, %s228_s16, %s216_s27  }
  0x2f   : > { %252 = sbr.rel (%p851_p5) target bundleno = 202 (0xca), region = 40  ;;  %s254_s29 = sand.u32 (!%p851_p5), 1, %s734_s19  }
  0x30   : > { %s584_s10 = sshll.u32 (!%p851_p5), %s254_s29, 6  ;;  %s255_s15 = scalar_lea.sflag (!%p851_p5), [#allocation3], %s254_s29 }
  0x31   : > { %s258_s17 = scalar_lea.vmem (!%p851_p5), [#allocation2], %s584_s10 }
  0x34   : > { %721 = dma.done.wait (%p816_p7), %s255_s15, 1024  }
  0x35   : > { %723 = vsyncadd (%p816_p7), %s255_s15, 4294966272  ;;  %s585_s18 = sshll.u32 %s254_s29, 2  ;;  %s265_s24 = scalar_lea.sflag [#allocation5], %s254_s29 }
  0x36   : > { %s878_s11 = scalar_lea.vmem [#allocation4], %s585_s18 }
  0x37   : > { %725 = dma.done.wait (%p816_p7), %s265_s24, 64  }
  0x38   : > { %727 = vsyncadd (%p816_p7), %s265_s24, 4294967232  ;;  %v334_v0 = vld [vmem:[%s258_s17 + $0x30] sm:$0xff]  ;;  %v335_v1 = vld [vmem:[%s258_s17 + $0x38] sm:$0xff]  ;;  %vm346_vm0 = vcmask 130048   ;;  %s586_s28 = sshll.u32 %s574_s22, 2 }
  0x39   : > { %v330_v2 = vld [vmem:[%s258_s17 + $0x10] sm:$0xff]  ;;  %404 = vmatpush.msra.mxu2 %v334_v0  ;;  %424 = vmatpush.msra.mxu3 %v335_v1  ;;  %v327_v3 = vld [vmem:[%s917_s0] sm:$0xff]  ;;  %v331_v4 = vld [vmem:[%s258_s17 + $0x18] sm:$0xff]  ;;  %p312_p7 = scmp.lt.s32.totalorder %s586_s28, 7 }
  0x3a   : > { %v332_v5 = vld [vmem:[%s258_s17 + $0x20] sm:$0xff]  ;;  %v333_v6 = vld [vmem:[%s258_s17 + $0x28] sm:$0xff] }
  0x3b   : > { %364 = vmatpush.msra.mxu0 %v332_v5  ;;  %v328_v7 = vld [vmem:[%s258_s17] sm:$0xff]  ;;  %405 = vmatpush.msra.mxu2 %v330_v2  ;;  %v329_v8 = vld [vmem:[%s258_s17 + $0x8] sm:$0xff]  ;;  %s932_s28 = smov (!%p312_p7, %s586_s28), 7 }
  0x3c   : > { %425 = vmatpush.msra.mxu3 %v331_v4  ;;  %592 = vmatmul.msk.f32.vlgmr.msra.gmra.mxu2 %vm346_vm0, %v327_v3  ;;  %s314_s27 = scalar_lea.vmem %s920_s3, %s932_s28  ;;  %v336_v9 = vld [vmem:[%s878_s11] sm:$0xf]  ;;  %s319_s30 = scalar_lea.vmem %s921_s4, %s932_s28 }
  0x3d   : > { %593 = vmatmul.msk.f32.vlgmr.msra.gmra.mxu3 %vm346_vm0, %v327_v3  ;;  %384 = vmatpush.msra.mxu1 %v333_v6  ;;  %v430_v10 = vld [vmem:[%s314_s27] sm:$0xf]  ;;  %v338_v11 = vperm.slane %v336_v9, 0  ;;  %v339_v14 = vperm.slane %v336_v9, 1  ;;  %v340_v16 = vperm.slane %v336_v9, 2  ;;  %v341_v20 = vperm.slane %v336_v9, 3 }
  0x3e   : > { %365 = vmatpush.msra.mxu0 %v328_v7  ;;  %v444_v12 = vld [vmem:[%s319_s30] sm:$0xf]  ;;  %v432_v13 = vperm.slane %v430_v10, 0  ;;  %v433_v19 = vperm.slane %v430_v10, 1  ;;  %v434_v22 = vperm.slane %v430_v10, 2  ;;  %s589_s21 = sshll.u32 %s932_s28, 3 }
  0x3f   : > { %590 = vmatmul.msk.f32.vlgmr.msra.gmra.mxu0 %vm346_vm0, %v327_v3  ;;  %385 = vmatpush.msra.mxu1 %v329_v8  ;;  %v446_v18 = vperm.slane %v444_v12, 0  ;;  %v447_v25 = vperm.slane %v444_v12, 1  ;;  %v435_v26 = vperm.slane %v430_v10, 3  ;;  %v448_v28 = vperm.slane %v444_v12, 2  ;;  %s325_s7 = scalar_lea.vmem %s922_s5, %s589_s21 }
  0x40   : > { %591 = vmatmul.msk.f32.vlgmr.msra.gmra.mxu1 %vm346_vm0, %v327_v3  ;;  %v449_v30 = vperm.slane %v444_v12, 3 }
  0xbc   : > { %v367_v15 = vpop.f32.mrf.mxu0 }
  0xbd   : > { %v368_v17 = vadd.f32 %v367_v15, %v338_v11  ;;  %v387_v21 = vpop.f32.mrf.mxu1 }
  0xbe   : > { %v388_v24 = vadd.f32 %v387_v21, %v339_v14 }
  0xbf   : > { %v440_v23 = vmul.f32 %v432_v13, %v368_v17  ;;  %v407_v27 = vpop.f32.mrf.mxu2 }
  0xc0   : > { %v427_v29 = vpop.f32.mrf.mxu3  ;;  %v441_v32 = vmul.f32 %v433_v19, %v388_v24  ;;  %v408_v33 = vadd.f32 %v407_v27, %v340_v16 }
  0xc1   : > { %v454_v31 = vadd.f32 %v446_v18, %v440_v23  ;;  %v428_v34 = vadd.f32 %v427_v29, %v341_v20 }
  0xc2   : > { %v455_v36 = vadd.f32 %v447_v25, %v441_v32  ;;  %v442_v37 = vmul.f32 %v434_v22, %v408_v33 }
  0xc3   : > { %v458_v35 = vmax.f32 %v454_v31, 0.0  ;;  %v443_v38 = vmul.f32 %v435_v26, %v428_v34 }
  0xc4   : > { %v459_v39 = vmax.f32 %v455_v36, 0.0  ;;  %v456_v40 = vadd.f32 %v448_v28, %v442_v37 }
  0xc5   : > { %462 = vst [vmem:[%s325_s7] sm:$0xff] %v458_v35  ;;  %v457_v41 = vadd.f32 %v449_v30, %v443_v38 }
  0xc6   : > { %463 = vst [vmem:[%s325_s7 + $0x8] sm:$0xff] %v459_v39  ;;  %v460_v42 = vmax.f32 %v456_v40, 0.0 }
  0xc7   : > { %v461_v43 = vmax.f32 %v457_v41, 0.0 }
  0xc8   : > { %464 = vst [vmem:[%s325_s7 + $0x10] sm:$0xff] %v460_v42 }
  0xc9   : > { %465 = vst [vmem:[%s325_s7 + $0x18] sm:$0xff] %v461_v43 }
  0xca PF: > { %p18_p8 = scmp.ge.s32.totalorder %s797_s23, 4   ;;  %s927_s18 = smov %s734_s19 }
  0xcb   : > { %s928_s19 = smov %s738_s20  ;;  %s929_s20 = smov %s807_s26 }
  0xcc   : > { %s930_s21 = smov %s797_s23  ;;  %20 = sbr.rel (!%p18_p8) target bundleno = 5 (0x5), region = 99 }
  0xd1   :  { %488 = vsyncpa [#allocation3], 1 }
  0xd2   :  { %490 = vsyncpa [#allocation3 + $0x1], 1 }
  0xd3   :  { %491 = vsyncpa [#allocation5], 1 }
  0xd4   :  { %493 = vsyncpa [#allocation5 + $0x1], 1 }

// kernel: generator_forward.6
= control target key start
LH: loop header
LB: loop body
LE: loop exit
PB: predicated region body
PF: predicated region fallthrough
CT: control target
= control target key end

     0   :  { %s4962_s18 = smov 0   ;;  %s4964_s19 = smov 0   ;;  %s8404_s0 = inlined_call_operand.vmem [shape: f32[8,1024], index: 0, kind: input, shape index: {}]   ;;  %s8405_s1 = inlined_call_operand.vmem [shape: f32[1024,16384], index: 1, kind: input, shape index: {}]   ;;  %s8406_s2 = inlined_call_operand.vmem [shape: f32[1,16384], index: 2, kind: input, shape index: {}]   ;;  %s8407_s3 = inlined_call_operand.vmem [shape: f32[1,16384], index: 3, kind: input, shape index: {}]   ;;  %s8408_s4 = inlined_call_operand.vmem [shape: f32[1,16384], index: 4, kind: input, shape index: {}]   ;;  %s8409_s5 = inlined_call_operand.vmem [shape: f32[8,16384], index: 5, kind: output, shape index: {}]  }
   0x1   :  { %s4966_s20 = smov 0  }
   0x2 LB: > { %s4837_s21 = sadd.s32 4294967295, %s4930_s20   ;;  %s4979_s22 = sadd.s32 1, %s4930_s20   ;;  %s4930_s20 = sphi %s4966_s20, %s8412_s20   ;;  %s4926_s19 = sphi %s4964_s19, %s8411_s19   ;;  %s4922_s18 = sphi %s4962_s18, %s8410_s18  }
   0x3   : > { %s40_s23 = ssub.s32 %s4930_s20, %s4979_s22  ;;  %s43_s24 = sadd.s32 1, %s4926_s19 }
   0x4   : > { %p41_p0 = scmp.eq.s32.totalorder %s40_s23, 0  ;;  %p50_p1 = scmp.ne.s32.totalorder %s4926_s19, %s4922_s18 }
   0x5   : > { %p51_p2 = scmp.eq.s32.totalorder %s4930_s20, 0  ;;  %p4840_p4 = scmp.ge.s32.totalorder %s4930_s20, 16 }
   0x6   : > { %s4988_s25 = scalar_select %p41_p0, %s4926_s19, %s43_s24  }
   0x7   : > { %p52_p3 = por %p51_p2, %p50_p1  ;;  %183 = sbr.rel (%p4840_p4) target bundleno = 1040 (0x410), region = 20 }
   0xc   : > { %186 = sbr.rel (!%p52_p3) target bundleno = 1040 (0x410), region = 24  ;;  %s188_s26 = sand.u32 (%p52_p3), 1, %s4926_s19  }
   0xd   : > { %s4853_s27 = sshll.u32 (%p52_p3), %s4930_s20, 6  ;;  %s4841_s28 = sshll.u32 (%p52_p3), %s188_s26, 13 }
   0xe   : > { %s4996_s6 = scalar_lea.vmem (%p52_p3), %s8405_s1, %s4853_s27  ;;  %s5001_s7 = scalar_lea.vmem (%p52_p3), [#allocation2], %s4841_s28 }
   0xf   : > { %v206_v0 = vld [vmem:[%s4996_s6] sm:$0xff] (%p52_p3)  ;;  %v208_v1 = vld [vmem:[%s4996_s6 + $0x8] sm:$0xff] (%p52_p3)  ;;  %v210_v2 = vld [vmem:[%s4996_s6 + $0x10] sm:$0xff] (%p52_p3) }
  0x10   : > { %207 = vst [vmem:[%s5001_s7] sm:$0xff] (%p52_p3), %v206_v0  ;;  %v212_v3 = vld [vmem:[%s4996_s6 + $0x18] sm:$0xff] (%p52_p3)  ;;  %v214_v4 = vld [vmem:[%s4996_s6 + $0x20] sm:$0xff] (%p52_p3)  ;;  %v216_v5 = vld [vmem:[%s4996_s6 + $0x28] sm:$0xff] (%p52_p3) }
  0x11   : > { %209 = vst [vmem:[%s5001_s7 + $0x8] sm:$0xff] %v208_v1  ;;  %v218_v6 = vld [vmem:[%s4996_s6 + $0x30] sm:$0xff]  ;;  %v220_v7 = vld [vmem:[%s4996_s6 + $0x38] sm:$0xff]  ;;  %v222_v8 = vld [vmem:[%s4996_s6 + $0x400] sm:$0xff] }
  0x12   : > { %211 = vst [vmem:[%s5001_s7 + $0x10] sm:$0xff] %v210_v2  ;;  %v224_v9 = vld [vmem:[%s4996_s6 + $0x408] sm:$0xff]  ;;  %v226_v10 = vld [vmem:[%s4996_s6 + $0x410] sm:$0xff]  ;;  %v228_v11 = vld [vmem:[%s4996_s6 + $0x418] sm:$0xff] }
  0x13   : > { %213 = vst [vmem:[%s5001_s7 + $0x18] sm:$0xff] %v212_v3  ;;  %v230_v12 = vld [vmem:[%s4996_s6 + $0x420] sm:$0xff]  ;;  %v232_v13 = vld [vmem:[%s4996_s6 + $0x428] sm:$0xff]  ;;  %v234_v14 = vld [vmem:[%s4996_s6 + $0x430] sm:$0xff] }
  0x14   : > { %215 = vst [vmem:[%s5001_s7 + $0x20] sm:$0xff] %v214_v4  ;;  %v236_v15 = vld [vmem:[%s4996_s6 + $0x438] sm:$0xff]  ;;  %v238_v16 = vld [vmem:[%s4996_s6 + $0x800] sm:$0xff]  ;;  %v240_v17 = vld [vmem:[%s4996_s6 + $0x808] sm:$0xff] }
  0x15   : > { %217 = vst [vmem:[%s5001_s7 + $0x28] sm:$0xff] %v216_v5  ;;  %v242_v18 = vld [vmem:[%s4996_s6 + $0x810] sm:$0xff]  ;;  %v244_v19 = vld [vmem:[%s4996_s6 + $0x818] sm:$0xff]  ;;  %v246_v20 = vld [vmem:[%s4996_s6 + $0x820] sm:$0xff] }
  0x16   : > { %219 = vst [vmem:[%s5001_s7 + $0x30] sm:$0xff] %v218_v6  ;;  %v248_v21 = vld [vmem:[%s4996_s6 + $0x828] sm:$0xff]  ;;  %v250_v22 = vld [vmem:[%s4996_s6 + $0x830] sm:$0xff]  ;;  %v252_v23 = vld [vmem:[%s4996_s6 + $0x838] sm:$0xff] }
  0x17   : > { %221 = vst [vmem:[%s5001_s7 + $0x38] sm:$0xff] %v220_v7  ;;  %v254_v24 = vld [vmem:[%s4996_s6 + $0xc00] sm:$0xff]  ;;  %v256_v25 = vld [vmem:[%s4996_s6 + $0xc08] sm:$0xff]  ;;  %v258_v26 = vld [vmem:[%s4996_s6 + $0xc10] sm:$0xff] }
  0x18   : > { %223 = vst [vmem:[%s5001_s7 + $0x40] sm:$0xff] %v222_v8  ;;  %v260_v27 = vld [vmem:[%s4996_s6 + $0xc18] sm:$0xff]  ;;  %v262_v28 = vld [vmem:[%s4996_s6 + $0xc20] sm:$0xff]  ;;  %v264_v29 = vld [vmem:[%s4996_s6 + $0xc28] sm:$0xff] }
  0x19   : > { %225 = vst [vmem:[%s5001_s7 + $0x48] sm:$0xff] %v224_v9  ;;  %v266_v30 = vld [vmem:[%s4996_s6 + $0xc30] sm:$0xff]  ;;  %v268_v31 = vld [vmem:[%s4996_s6 + $0xc38] sm:$0xff]  ;;  %v270_v32 = vld [vmem:[%s4996_s6 + $0x1000] sm:$0xff] }
  0x1a   : > { %227 = vst [vmem:[%s5001_s7 + $0x50] sm:$0xff] %v226_v10  ;;  %v272_v33 = vld [vmem:[%s4996_s6 + $0x1008] sm:$0xff]  ;;  %v274_v34 = vld [vmem:[%s4996_s6 + $0x1010] sm:$0xff]  ;;  %v276_v35 = vld [vmem:[%s4996_s6 + $0x1018] sm:$0xff] }
  0x1b   : > { %229 = vst [vmem:[%s5001_s7 + $0x58] sm:$0xff] %v228_v11  ;;  %v278_v36 = vld [vmem:[%s4996_s6 + $0x1020] sm:$0xff]  ;;  %v280_v37 = vld [vmem:[%s4996_s6 + $0x1028] sm:$0xff]  ;;  %v282_v38 = vld [vmem:[%s4996_s6 + $0x1030] sm:$0xff] }
  0x1c   : > { %231 = vst [vmem:[%s5001_s7 + $0x60] sm:$0xff] %v230_v12  ;;  %v284_v39 = vld [vmem:[%s4996_s6 + $0x1038] sm:$0xff]  ;;  %v286_v40 = vld [vmem:[%s4996_s6 + $0x1400] sm:$0xff]  ;;  %v288_v41 = vld [vmem:[%s4996_s6 + $0x1408] sm:$0xff] }
  0x1d   : > { %233 = vst [vmem:[%s5001_s7 + $0x68] sm:$0xff] %v232_v13  ;;  %v290_v42 = vld [vmem:[%s4996_s6 + $0x1410] sm:$0xff]  ;;  %v292_v43 = vld [vmem:[%s4996_s6 + $0x1418] sm:$0xff]  ;;  %v294_v44 = vld [vmem:[%s4996_s6 + $0x1420] sm:$0xff] }
  0x1e   : > { %235 = vst [vmem:[%s5001_s7 + $0x70] sm:$0xff] %v234_v14  ;;  %v296_v45 = vld [vmem:[%s4996_s6 + $0x1428] sm:$0xff]  ;;  %v298_v46 = vld [vmem:[%s4996_s6 + $0x1430] sm:$0xff]  ;;  %v300_v47 = vld [vmem:[%s4996_s6 + $0x1438] sm:$0xff] }
  0x1f   : > { %237 = vst [vmem:[%s5001_s7 + $0x78] sm:$0xff] %v236_v15  ;;  %v302_v48 = vld [vmem:[%s4996_s6 + $0x1800] sm:$0xff]  ;;  %v304_v49 = vld [vmem:[%s4996_s6 + $0x1808] sm:$0xff]  ;;  %v306_v50 = vld [vmem:[%s4996_s6 + $0x1810] sm:$0xff] }
  0x20   : > { %239 = vst [vmem:[%s5001_s7 + $0x80] sm:$0xff] %v238_v16  ;;  %v308_v51 = vld [vmem:[%s4996_s6 + $0x1818] sm:$0xff]  ;;  %v310_v52 = vld [vmem:[%s4996_s6 + $0x1820] sm:$0xff]  ;;  %v312_v53 = vld [vmem:[%s4996_s6 + $0x1828] sm:$0xff] }
  0x21   : > { %241 = vst [vmem:[%s5001_s7 + $0x88] sm:$0xff] %v240_v17  ;;  %v314_v54 = vld [vmem:[%s4996_s6 + $0x1830] sm:$0xff]  ;;  %v316_v55 = vld [vmem:[%s4996_s6 + $0x1838] sm:$0xff]  ;;  %v318_v56 = vld [vmem:[%s4996_s6 + $0x1c00] sm:$0xff] }
  0x22   : > { %243 = vst [vmem:[%s5001_s7 + $0x90] sm:$0xff] %v242_v18  ;;  %v320_v57 = vld [vmem:[%s4996_s6 + $0x1c08] sm:$0xff]  ;;  %v322_v58 = vld [vmem:[%s4996_s6 + $0x1c10] sm:$0xff]  ;;  %v324_v59 = vld [vmem:[%s4996_s6 + $0x1c18] sm:$0xff] }
  0x23   : > { %245 = vst [vmem:[%s5001_s7 + $0x98] sm:$0xff] %v244_v19  ;;  %v326_v60 = vld [vmem:[%s4996_s6 + $0x1c20] sm:$0xff]  ;;  %v328_v61 = vld [vmem:[%s4996_s6 + $0x1c28] sm:$0xff]  ;;  %v330_v62 = vld [vmem:[%s4996_s6 + $0x1c30] sm:$0xff] }
  0x24   : > { %247 = vst [vmem:[%s5001_s7 + $0xa0] sm:$0xff] %v246_v20  ;;  %v332_v63 = vld [vmem:[%s4996_s6 + $0x1c38] sm:$0xff]  ;;  %v334_v0 = vld [vmem:[%s4996_s6 + $0x2000] sm:$0xff]  ;;  %v336_v1 = vld [vmem:[%s4996_s6 + $0x2008] sm:$0xff] }
  0x25   : > { %249 = vst [vmem:[%s5001_s7 + $0xa8] sm:$0xff] %v248_v21  ;;  %v338_v2 = vld [vmem:[%s4996_s6 + $0x2010] sm:$0xff]  ;;  %v340_v3 = vld [vmem:[%s4996_s6 + $0x2018] sm:$0xff]  ;;  %v342_v4 = vld [vmem:[%s4996_s6 + $0x2020] sm:$0xff] }
  0x26   : > { %251 = vst [vmem:[%s5001_s7 + $0xb0] sm:$0xff] %v250_v22  ;;  %v344_v5 = vld [vmem:[%s4996_s6 + $0x2028] sm:$0xff]  ;;  %v346_v6 = vld [vmem:[%s4996_s6 + $0x2030] sm:$0xff]  ;;  %v348_v7 = vld [vmem:[%s4996_s6 + $0x2038] sm:$0xff] }
  0x27   : > { %253 = vst [vmem:[%s5001_s7 + $0xb8] sm:$0xff] %v252_v23  ;;  %v350_v8 = vld [vmem:[%s4996_s6 + $0x2400] sm:$0xff]  ;;  %v352_v9 = vld [vmem:[%s4996_s6 + $0x2408] sm:$0xff]  ;;  %v354_v10 = vld [vmem:[%s4996_s6 + $0x2410] sm:$0xff] }
  0x28   : > { %255 = vst [vmem:[%s5001_s7 + $0xc0] sm:$0xff] %v254_v24  ;;  %v356_v11 = vld [vmem:[%s4996_s6 + $0x2418] sm:$0xff]  ;;  %v358_v12 = vld [vmem:[%s4996_s6 + $0x2420] sm:$0xff]  ;;  %v360_v13 = vld [vmem:[%s4996_s6 + $0x2428] sm:$0xff] }
  0x29   : > { %257 = vst [vmem:[%s5001_s7 + $0xc8] sm:$0xff] %v256_v25  ;;  %v362_v14 = vld [vmem:[%s4996_s6 + $0x2430] sm:$0xff]  ;;  %v364_v15 = vld [vmem:[%s4996_s6 + $0x2438] sm:$0xff]  ;;  %v366_v16 = vld [vmem:[%s4996_s6 + $0x2800] sm:$0xff] }
  0x2a   : > { %259 = vst [vmem:[%s5001_s7 + $0xd0] sm:$0xff] %v258_v26  ;;  %v368_v17 = vld [vmem:[%s4996_s6 + $0x2808] sm:$0xff]  ;;  %v370_v18 = vld [vmem:[%s4996_s6 + $0x2810] sm:$0xff]  ;;  %v372_v19 = vld [vmem:[%s4996_s6 + $0x2818] sm:$0xff] }
  0x2b   : > { %261 = vst [vmem:[%s5001_s7 + $0xd8] sm:$0xff] %v260_v27  ;;  %v374_v20 = vld [vmem:[%s4996_s6 + $0x2820] sm:$0xff]  ;;  %v376_v21 = vld [vmem:[%s4996_s6 + $0x2828] sm:$0xff]  ;;  %v378_v22 = vld [vmem:[%s4996_s6 + $0x2830] sm:$0xff] }
  0x2c   : > { %263 = vst [vmem:[%s5001_s7 + $0xe0] sm:$0xff] %v262_v28  ;;  %v380_v23 = vld [vmem:[%s4996_s6 + $0x2838] sm:$0xff]  ;;  %v382_v24 = vld [vmem:[%s4996_s6 + $0x2c00] sm:$0xff]  ;;  %v384_v25 = vld [vmem:[%s4996_s6 + $0x2c08] sm:$0xff] }
  0x2d   : > { %265 = vst [vmem:[%s5001_s7 + $0xe8] sm:$0xff] %v264_v29  ;;  %v386_v26 = vld [vmem:[%s4996_s6 + $0x2c10] sm:$0xff]  ;;  %v388_v27 = vld [vmem:[%s4996_s6 + $0x2c18] sm:$0xff]  ;;  %v390_v28 = vld [vmem:[%s4996_s6 + $0x2c20] sm:$0xff] }
  0x2e   : > { %267 = vst [vmem:[%s5001_s7 + $0xf0] sm:$0xff] %v266_v30  ;;  %v392_v29 = vld [vmem:[%s4996_s6 + $0x2c28] sm:$0xff]  ;;  %v394_v30 = vld [vmem:[%s4996_s6 + $0x2c30] sm:$0xff] }
  0x2f   : > { %269 = vst [vmem:[%s5001_s7 + $0xf8] sm:$0xff] %v268_v31  ;;  %v396_v31 = vld [vmem:[%s4996_s6 + $0x2c38] sm:$0xff] }
  0x30   : > { %271 = vst [vmem:[%s5001_s7 + $0x100] sm:$0xff] %v270_v32  ;;  %v398_v32 = vld [vmem:[%s4996_s6 + $0x3000] sm:$0xff] }
  0x31   : > { %273 = vst [vmem:[%s5001_s7 + $0x108] sm:$0xff] %v272_v33  ;;  %v400_v33 = vld [vmem:[%s4996_s6 + $0x3008] sm:$0xff] }
  0x32   : > { %275 = vst [vmem:[%s5001_s7 + $0x110] sm:$0xff] %v274_v34  ;;  %v402_v34 = vld [vmem:[%s4996_s6 + $0x3010] sm:$0xff] }
  0x33   : > { %277 = vst [vmem:[%s5001_s7 + $0x118] sm:$0xff] %v276_v35  ;;  %v404_v35 = vld [vmem:[%s4996_s6 + $0x3018] sm:$0xff] }
  0x34   : > { %279 = vst [vmem:[%s5001_s7 + $0x120] sm:$0xff] %v278_v36  ;;  %v406_v36 = vld [vmem:[%s4996_s6 + $0x3020] sm:$0xff] }
  0x35   : > { %281 = vst [vmem:[%s5001_s7 + $0x128] sm:$0xff] %v280_v37  ;;  %v408_v37 = vld [vmem:[%s4996_s6 + $0x3028] sm:$0xff] }
  0x36   : > { %283 = vst [vmem:[%s5001_s7 + $0x130] sm:$0xff] %v282_v38  ;;  %v410_v38 = vld [vmem:[%s4996_s6 + $0x3030] sm:$0xff] }
  0x37   : > { %285 = vst [vmem:[%s5001_s7 + $0x138] sm:$0xff] %v284_v39  ;;  %v412_v39 = vld [vmem:[%s4996_s6 + $0x3038] sm:$0xff] }
  0x38   : > { %287 = vst [vmem:[%s5001_s7 + $0x140] sm:$0xff] %v286_v40  ;;  %v414_v40 = vld [vmem:[%s4996_s6 + $0x3400] sm:$0xff] }
  0x39   : > { %289 = vst [vmem:[%s5001_s7 + $0x148] sm:$0xff] %v288_v41  ;;  %v416_v41 = vld [vmem:[%s4996_s6 + $0x3408] sm:$0xff] }
  0x3a   : > { %291 = vst [vmem:[%s5001_s7 + $0x150] sm:$0xff] %v290_v42  ;;  %v418_v42 = vld [vmem:[%s4996_s6 + $0x3410] sm:$0xff] }
  0x3b   : > { %293 = vst [vmem:[%s5001_s7 + $0x158] sm:$0xff] %v292_v43  ;;  %v420_v43 = vld [vmem:[%s4996_s6 + $0x3418] sm:$0xff] }
  0x3c   : > { %295 = vst [vmem:[%s5001_s7 + $0x160] sm:$0xff] %v294_v44  ;;  %v422_v44 = vld [vmem:[%s4996_s6 + $0x3420] sm:$0xff] }
  0x3d   : > { %297 = vst [vmem:[%s5001_s7 + $0x168] sm:$0xff] %v296_v45  ;;  %v424_v45 = vld [vmem:[%s4996_s6 + $0x3428] sm:$0xff] }
  0x3e   : > { %299 = vst [vmem:[%s5001_s7 + $0x170] sm:$0xff] %v298_v46  ;;  %v426_v46 = vld [vmem:[%s4996_s6 + $0x3430] sm:$0xff] }
  0x3f   : > { %301 = vst [vmem:[%s5001_s7 + $0x178] sm:$0xff] %v300_v47  ;;  %v428_v47 = vld [vmem:[%s4996_s6 + $0x3438] sm:$0xff] }
  0x40   : > { %303 = vst [vmem:[%s5001_s7 + $0x180] sm:$0xff] %v302_v48  ;;  %v430_v48 = vld [vmem:[%s4996_s6 + $0x3800] sm:$0xff] }
  0x41   : > { %305 = vst [vmem:[%s5001_s7 + $0x188] sm:$0xff] %v304_v49  ;;  %v432_v49 = vld [vmem:[%s4996_s6 + $0x3808] sm:$0xff] }
  0x42   : > { %307 = vst [vmem:[%s5001_s7 + $0x190] sm:$0xff] %v306_v50  ;;  %v434_v50 = vld [vmem:[%s4996_s6 + $0x3810] sm:$0xff] }
  0x43   : > { %309 = vst [vmem:[%s5001_s7 + $0x198] sm:$0xff] %v308_v51  ;;  %v436_v51 = vld [vmem:[%s4996_s6 + $0x3818] sm:$0xff] }
  0x44   : > { %311 = vst [vmem:[%s5001_s7 + $0x1a0] sm:$0xff] %v310_v52  ;;  %v438_v52 = vld [vmem:[%s4996_s6 + $0x3820] sm:$0xff] }
  0x45   : > { %313 = vst [vmem:[%s5001_s7 + $0x1a8] sm:$0xff] %v312_v53  ;;  %v440_v53 = vld [vmem:[%s4996_s6 + $0x3828] sm:$0xff] }
  0x46   : > { %315 = vst [vmem:[%s5001_s7 + $0x1b0] sm:$0xff] %v314_v54  ;;  %v442_v54 = vld [vmem:[%s4996_s6 + $0x3830] sm:$0xff] }
  0x47   : > { %317 = vst [vmem:[%s5001_s7 + $0x1b8] sm:$0xff] %v316_v55  ;;  %v444_v55 = vld [vmem:[%s4996_s6 + $0x3838] sm:$0xff] }
  0x48   : > { %319 = vst [vmem:[%s5001_s7 + $0x1c0] sm:$0xff] %v318_v56  ;;  %v446_v56 = vld [vmem:[%s4996_s6 + $0x3c00] sm:$0xff] }
  0x49   : > { %321 = vst [vmem:[%s5001_s7 + $0x1c8] sm:$0xff] %v320_v57  ;;  %v448_v57 = vld [vmem:[%s4996_s6 + $0x3c08] sm:$0xff] }
  0x4a   : > { %323 = vst [vmem:[%s5001_s7 + $0x1d0] sm:$0xff] %v322_v58  ;;  %v450_v58 = vld [vmem:[%s4996_s6 + $0x3c10] sm:$0xff] }
  0x4b   : > { %325 = vst [vmem:[%s5001_s7 + $0x1d8] sm:$0xff] %v324_v59  ;;  %v452_v59 = vld [vmem:[%s4996_s6 + $0x3c18] sm:$0xff] }
  0x4c   : > { %327 = vst [vmem:[%s5001_s7 + $0x1e0] sm:$0xff] %v326_v60  ;;  %v454_v60 = vld [vmem:[%s4996_s6 + $0x3c20] sm:$0xff] }
  0x4d   : > { %329 = vst [vmem:[%s5001_s7 + $0x1e8] sm:$0xff] %v328_v61  ;;  %v456_v61 = vld [vmem:[%s4996_s6 + $0x3c28] sm:$0xff] }
  0x4e   : > { %331 = vst [vmem:[%s5001_s7 + $0x1f0] sm:$0xff] %v330_v62  ;;  %v458_v62 = vld [vmem:[%s4996_s6 + $0x3c30] sm:$0xff] }
  0x4f   : > { %333 = vst [vmem:[%s5001_s7 + $0x1f8] sm:$0xff] %v332_v63  ;;  %v460_v63 = vld [vmem:[%s4996_s6 + $0x3c38] sm:$0xff] }
  0x50   : > { %335 = vst [vmem:[%s5001_s7 + $0x200] sm:$0xff] %v334_v0  ;;  %v462_v0 = vld [vmem:[%s4996_s6 + $0x4000] sm:$0xff] }
  0x51   : > { %337 = vst [vmem:[%s5001_s7 + $0x208] sm:$0xff] %v336_v1  ;;  %v464_v1 = vld [vmem:[%s4996_s6 + $0x4008] sm:$0xff] }
  0x52   : > { %339 = vst [vmem:[%s5001_s7 + $0x210] sm:$0xff] %v338_v2  ;;  %v466_v2 = vld [vmem:[%s4996_s6 + $0x4010] sm:$0xff] }
  0x53   : > { %341 = vst [vmem:[%s5001_s7 + $0x218] sm:$0xff] %v340_v3  ;;  %v468_v3 = vld [vmem:[%s4996_s6 + $0x4018] sm:$0xff] }
  0x54   : > { %343 = vst [vmem:[%s5001_s7 + $0x220] sm:$0xff] %v342_v4  ;;  %v470_v4 = vld [vmem:[%s4996_s6 + $0x4020] sm:$0xff] }
  0x55   : > { %345 = vst [vmem:[%s5001_s7 + $0x228] sm:$0xff] %v344_v5  ;;  %v472_v5 = vld [vmem:[%s4996_s6 + $0x4028] sm:$0xff] }
  0x56   : > { %347 = vst [vmem:[%s5001_s7 + $0x230] sm:$0xff] %v346_v6  ;;  %v474_v6 = vld [vmem:[%s4996_s6 + $0x4030] sm:$0xff] }
  0x57   : > { %349 = vst [vmem:[%s5001_s7 + $0x238] sm:$0xff] %v348_v7  ;;  %v476_v7 = vld [vmem:[%s4996_s6 + $0x4038] sm:$0xff] }
  0x58   : > { %351 = vst [vmem:[%s5001_s7 + $0x240] sm:$0xff] %v350_v8  ;;  %v478_v8 = vld [vmem:[%s4996_s6 + $0x4400] sm:$0xff] }
  0x59   : > { %353 = vst [vmem:[%s5001_s7 + $0x248] sm:$0xff] %v352_v9  ;;  %v480_v9 = vld [vmem:[%s4996_s6 + $0x4408] sm:$0xff] }
  0x5a   : > { %355 = vst [vmem:[%s5001_s7 + $0x250] sm:$0xff] %v354_v10  ;;  %v482_v10 = vld [vmem:[%s4996_s6 + $0x4410] sm:$0xff] }
  0x5b   : > { %357 = vst [vmem:[%s5001_s7 + $0x258] sm:$0xff] %v356_v11  ;;  %v484_v11 = vld [vmem:[%s4996_s6 + $0x4418] sm:$0xff] }
  0x5c   : > { %359 = vst [vmem:[%s5001_s7 + $0x260] sm:$0xff] %v358_v12  ;;  %v486_v12 = vld [vmem:[%s4996_s6 + $0x4420] sm:$0xff] }
  0x5d   : > { %361 = vst [vmem:[%s5001_s7 + $0x268] sm:$0xff] %v360_v13  ;;  %v488_v13 = vld [vmem:[%s4996_s6 + $0x4428] sm:$0xff] }
  0x5e   : > { %363 = vst [vmem:[%s5001_s7 + $0x270] sm:$0xff] %v362_v14  ;;  %v490_v14 = vld [vmem:[%s4996_s6 + $0x4430] sm:$0xff] }
  0x5f   : > { %365 = vst [vmem:[%s5001_s7 + $0x278] sm:$0xff] %v364_v15  ;;  %v492_v15 = vld [vmem:[%s4996_s6 + $0x4438] sm:$0xff] }
  0x60   : > { %367 = vst [vmem:[%s5001_s7 + $0x280] sm:$0xff] %v366_v16  ;;  %v494_v16 = vld [vmem:[%s4996_s6 + $0x4800] sm:$0xff] }
  0x61   : > { %369 = vst [vmem:[%s5001_s7 + $0x288] sm:$0xff] %v368_v17  ;;  %v496_v17 = vld [vmem:[%s4996_s6 + $0x4808] sm:$0xff] }
  0x62   : > { %371 = vst [vmem:[%s5001_s7 + $0x290] sm:$0xff] %v370_v18  ;;  %v498_v18 = vld [vmem:[%s4996_s6 + $0x4810] sm:$0xff] }
  0x63   : > { %373 = vst [vmem:[%s5001_s7 + $0x298] sm:$0xff] %v372_v19  ;;  %v500_v19 = vld [vmem:[%s4996_s6 + $0x4818] sm:$0xff] }
  0x64   : > { %375 = vst [vmem:[%s5001_s7 + $0x2a0] sm:$0xff] %v374_v20  ;;  %v502_v20 = vld [vmem:[%s4996_s6 + $0x4820] sm:$0xff] }
  0x65   : > { %377 = vst [vmem:[%s5001_s7 + $0x2a8] sm:$0xff] %v376_v21  ;;  %v504_v21 = vld [vmem:[%s4996_s6 + $0x4828] sm:$0xff] }
  0x66   : > { %379 = vst [vmem:[%s5001_s7 + $0x2b0] sm:$0xff] %v378_v22  ;;  %v506_v22 = vld [vmem:[%s4996_s6 + $0x4830] sm:$0xff] }
  0x67   : > { %381 = vst [vmem:[%s5001_s7 + $0x2b8] sm:$0xff] %v380_v23  ;;  %v508_v23 = vld [vmem:[%s4996_s6 + $0x4838] sm:$0xff] }
  0x68   : > { %383 = vst [vmem:[%s5001_s7 + $0x2c0] sm:$0xff] %v382_v24  ;;  %v510_v24 = vld [vmem:[%s4996_s6 + $0x4c00] sm:$0xff] }
  0x69   : > { %385 = vst [vmem:[%s5001_s7 + $0x2c8] sm:$0xff] %v384_v25  ;;  %v512_v25 = vld [vmem:[%s4996_s6 + $0x4c08] sm:$0xff] }
  0x6a   : > { %387 = vst [vmem:[%s5001_s7 + $0x2d0] sm:$0xff] %v386_v26  ;;  %v514_v26 = vld [vmem:[%s4996_s6 + $0x4c10] sm:$0xff] }
  0x6b   : > { %389 = vst [vmem:[%s5001_s7 + $0x2d8] sm:$0xff] %v388_v27  ;;  %v516_v27 = vld [vmem:[%s4996_s6 + $0x4c18] sm:$0xff] }
  0x6c   : > { %391 = vst [vmem:[%s5001_s7 + $0x2e0] sm:$0xff] %v390_v28  ;;  %v518_v28 = vld [vmem:[%s4996_s6 + $0x4c20] sm:$0xff] }
  0x6d   : > { %393 = vst [vmem:[%s5001_s7 + $0x2e8] sm:$0xff] %v392_v29  ;;  %v520_v29 = vld [vmem:[%s4996_s6 + $0x4c28] sm:$0xff] }
  0x6e   : > { %395 = vst [vmem:[%s5001_s7 + $0x2f0] sm:$0xff] %v394_v30  ;;  %v522_v30 = vld [vmem:[%s4996_s6 + $0x4c30] sm:$0xff] }
  0x6f   : > { %397 = vst [vmem:[%s5001_s7 + $0x2f8] sm:$0xff] %v396_v31  ;;  %v524_v31 = vld [vmem:[%s4996_s6 + $0x4c38] sm:$0xff] }
  0x70   : > { %399 = vst [vmem:[%s5001_s7 + $0x300] sm:$0xff] %v398_v32  ;;  %v526_v32 = vld [vmem:[%s4996_s6 + $0x5000] sm:$0xff] }
  0x71   : > { %401 = vst [vmem:[%s5001_s7 + $0x308] sm:$0xff] %v400_v33  ;;  %v528_v33 = vld [vmem:[%s4996_s6 + $0x5008] sm:$0xff] }
  0x72   : > { %403 = vst [vmem:[%s5001_s7 + $0x310] sm:$0xff] %v402_v34  ;;  %v530_v34 = vld [vmem:[%s4996_s6 + $0x5010] sm:$0xff] }
  0x73   : > { %405 = vst [vmem:[%s5001_s7 + $0x318] sm:$0xff] %v404_v35  ;;  %v532_v35 = vld [vmem:[%s4996_s6 + $0x5018] sm:$0xff] }
  0x74   : > { %407 = vst [vmem:[%s5001_s7 + $0x320] sm:$0xff] %v406_v36  ;;  %v534_v36 = vld [vmem:[%s4996_s6 + $0x5020] sm:$0xff] }
  0x75   : > { %409 = vst [vmem:[%s5001_s7 + $0x328] sm:$0xff] %v408_v37  ;;  %v536_v37 = vld [vmem:[%s4996_s6 + $0x5028] sm:$0xff] }
  0x76   : > { %411 = vst [vmem:[%s5001_s7 + $0x330] sm:$0xff] %v410_v38  ;;  %v538_v38 = vld [vmem:[%s4996_s6 + $0x5030] sm:$0xff] }
  0x77   : > { %413 = vst [vmem:[%s5001_s7 + $0x338] sm:$0xff] %v412_v39  ;;  %v540_v39 = vld [vmem:[%s4996_s6 + $0x5038] sm:$0xff] }
  0x78   : > { %415 = vst [vmem:[%s5001_s7 + $0x340] sm:$0xff] %v414_v40  ;;  %v542_v40 = vld [vmem:[%s4996_s6 + $0x5400] sm:$0xff] }
  0x79   : > { %417 = vst [vmem:[%s5001_s7 + $0x348] sm:$0xff] %v416_v41  ;;  %v544_v41 = vld [vmem:[%s4996_s6 + $0x5408] sm:$0xff] }
  0x7a   : > { %419 = vst [vmem:[%s5001_s7 + $0x350] sm:$0xff] %v418_v42  ;;  %v546_v42 = vld [vmem:[%s4996_s6 + $0x5410] sm:$0xff] }
  0x7b   : > { %421 = vst [vmem:[%s5001_s7 + $0x358] sm:$0xff] %v420_v43  ;;  %v548_v43 = vld [vmem:[%s4996_s6 + $0x5418] sm:$0xff] }
  0x7c   : > { %423 = vst [vmem:[%s5001_s7 + $0x360] sm:$0xff] %v422_v44  ;;  %v550_v44 = vld [vmem:[%s4996_s6 + $0x5420] sm:$0xff] }
  0x7d   : > { %425 = vst [vmem:[%s5001_s7 + $0x368] sm:$0xff] %v424_v45  ;;  %v552_v45 = vld [vmem:[%s4996_s6 + $0x5428] sm:$0xff] }
  0x7e   : > { %427 = vst [vmem:[%s5001_s7 + $0x370] sm:$0xff] %v426_v46  ;;  %v554_v46 = vld [vmem:[%s4996_s6 + $0x5430] sm:$0xff] }
  0x7f   : > { %429 = vst [vmem:[%s5001_s7 + $0x378] sm:$0xff] %v428_v47  ;;  %v556_v47 = vld [vmem:[%s4996_s6 + $0x5438] sm:$0xff] }
  0x80   : > { %431 = vst [vmem:[%s5001_s7 + $0x380] sm:$0xff] %v430_v48  ;;  %v558_v48 = vld [vmem:[%s4996_s6 + $0x5800] sm:$0xff] }
  0x81   : > { %433 = vst [vmem:[%s5001_s7 + $0x388] sm:$0xff] %v432_v49  ;;  %v560_v49 = vld [vmem:[%s4996_s6 + $0x5808] sm:$0xff] }
  0x82   : > { %435 = vst [vmem:[%s5001_s7 + $0x390] sm:$0xff] %v434_v50  ;;  %v562_v50 = vld [vmem:[%s4996_s6 + $0x5810] sm:$0xff] }
  0x83   : > { %437 = vst [vmem:[%s5001_s7 + $0x398] sm:$0xff] %v436_v51  ;;  %v564_v51 = vld [vmem:[%s4996_s6 + $0x5818] sm:$0xff] }
  0x84   : > { %439 = vst [vmem:[%s5001_s7 + $0x3a0] sm:$0xff] %v438_v52  ;;  %v566_v52 = vld [vmem:[%s4996_s6 + $0x5820] sm:$0xff] }
  0x85   : > { %441 = vst [vmem:[%s5001_s7 + $0x3a8] sm:$0xff] %v440_v53  ;;  %v568_v53 = vld [vmem:[%s4996_s6 + $0x5828] sm:$0xff] }
  0x86   : > { %443 = vst [vmem:[%s5001_s7 + $0x3b0] sm:$0xff] %v442_v54  ;;  %v570_v54 = vld [vmem:[%s4996_s6 + $0x5830] sm:$0xff] }
  0x87   : > { %445 = vst [vmem:[%s5001_s7 + $0x3b8] sm:$0xff] %v444_v55  ;;  %v572_v55 = vld [vmem:[%s4996_s6 + $0x5838] sm:$0xff] }
  0x88   : > { %447 = vst [vmem:[%s5001_s7 + $0x3c0] sm:$0xff] %v446_v56  ;;  %v574_v56 = vld [vmem:[%s4996_s6 + $0x5c00] sm:$0xff] }
  0x89   : > { %449 = vst [vmem:[%s5001_s7 + $0x3c8] sm:$0xff] %v448_v57  ;;  %v576_v57 = vld [vmem:[%s4996_s6 + $0x5c08] sm:$0xff] }
  0x8a   : > { %451 = vst [vmem:[%s5001_s7 + $0x3d0] sm:$0xff] %v450_v58  ;;  %v578_v58 = vld [vmem:[%s4996_s6 + $0x5c10] sm:$0xff] }
  0x8b   : > { %453 = vst [vmem:[%s5001_s7 + $0x3d8] sm:$0xff] %v452_v59  ;;  %v580_v59 = vld [vmem:[%s4996_s6 + $0x5c18] sm:$0xff] }
  0x8c   : > { %455 = vst [vmem:[%s5001_s7 + $0x3e0] sm:$0xff] %v454_v60  ;;  %v582_v60 = vld [vmem:[%s4996_s6 + $0x5c20] sm:$0xff] }
  0x8d   : > { %457 = vst [vmem:[%s5001_s7 + $0x3e8] sm:$0xff] %v456_v61  ;;  %v584_v61 = vld [vmem:[%s4996_s6 + $0x5c28] sm:$0xff] }
  0x8e   : > { %459 = vst [vmem:[%s5001_s7 + $0x3f0] sm:$0xff] %v458_v62  ;;  %v586_v62 = vld [vmem:[%s4996_s6 + $0x5c30] sm:$0xff] }
  0x8f   : > { %461 = vst [vmem:[%s5001_s7 + $0x3f8] sm:$0xff] %v460_v63  ;;  %v588_v63 = vld [vmem:[%s4996_s6 + $0x5c38] sm:$0xff] }
  0x90   : > { %463 = vst [vmem:[%s5001_s7 + $0x400] sm:$0xff] %v462_v0  ;;  %v590_v0 = vld [vmem:[%s4996_s6 + $0x6000] sm:$0xff] }
  0x91   : > { %465 = vst [vmem:[%s5001_s7 + $0x408] sm:$0xff] %v464_v1  ;;  %v592_v1 = vld [vmem:[%s4996_s6 + $0x6008] sm:$0xff] }
  0x92   : > { %467 = vst [vmem:[%s5001_s7 + $0x410] sm:$0xff] %v466_v2  ;;  %v594_v2 = vld [vmem:[%s4996_s6 + $0x6010] sm:$0xff] }
  0x93   : > { %469 = vst [vmem:[%s5001_s7 + $0x418] sm:$0xff] %v468_v3  ;;  %v596_v3 = vld [vmem:[%s4996_s6 + $0x6018] sm:$0xff] }
  0x94   : > { %471 = vst [vmem:[%s5001_s7 + $0x420] sm:$0xff] %v470_v4  ;;  %v598_v4 = vld [vmem:[%s4996_s6 + $0x6020] sm:$0xff] }
  0x95   : > { %473 = vst [vmem:[%s5001_s7 + $0x428] sm:$0xff] %v472_v5  ;;  %v600_v5 = vld [vmem:[%s4996_s6 + $0x6028] sm:$0xff] }
  0x96   : > { %475 = vst [vmem:[%s5001_s7 + $0x430] sm:$0xff] %v474_v6  ;;  %v602_v6 = vld [vmem:[%s4996_s6 + $0x6030] sm:$0xff] }
  0x97   : > { %477 = vst [vmem:[%s5001_s7 + $0x438] sm:$0xff] %v476_v7  ;;  %v604_v7 = vld [vmem:[%s4996_s6 + $0x6038] sm:$0xff] }
  0x98   : > { %479 = vst [vmem:[%s5001_s7 + $0x440] sm:$0xff] %v478_v8  ;;  %v606_v8 = vld [vmem:[%s4996_s6 + $0x6400] sm:$0xff] }
  0x99   : > { %481 = vst [vmem:[%s5001_s7 + $0x448] sm:$0xff] %v480_v9  ;;  %v608_v9 = vld [vmem:[%s4996_s6 + $0x6408] sm:$0xff] }
  0x9a   : > { %483 = vst [vmem:[%s5001_s7 + $0x450] sm:$0xff] %v482_v10  ;;  %v610_v10 = vld [vmem:[%s4996_s6 + $0x6410] sm:$0xff] }
  0x9b   : > { %485 = vst [vmem:[%s5001_s7 + $0x458] sm:$0xff] %v484_v11  ;;  %v612_v11 = vld [vmem:[%s4996_s6 + $0x6418] sm:$0xff] }
  0x9c   : > { %487 = vst [vmem:[%s5001_s7 + $0x460] sm:$0xff] %v486_v12  ;;  %v614_v12 = vld [vmem:[%s4996_s6 + $0x6420] sm:$0xff] }
  0x9d   : > { %489 = vst [vmem:[%s5001_s7 + $0x468] sm:$0xff] %v488_v13  ;;  %v616_v13 = vld [vmem:[%s4996_s6 + $0x6428] sm:$0xff] }
  0x9e   : > { %491 = vst [vmem:[%s5001_s7 + $0x470] sm:$0xff] %v490_v14  ;;  %v618_v14 = vld [vmem:[%s4996_s6 + $0x6430] sm:$0xff] }
  0x9f   : > { %493 = vst [vmem:[%s5001_s7 + $0x478] sm:$0xff] %v492_v15  ;;  %v620_v15 = vld [vmem:[%s4996_s6 + $0x6438] sm:$0xff] }
  0xa0   : > { %495 = vst [vmem:[%s5001_s7 + $0x480] sm:$0xff] %v494_v16  ;;  %v622_v16 = vld [vmem:[%s4996_s6 + $0x6800] sm:$0xff] }
  0xa1   : > { %497 = vst [vmem:[%s5001_s7 + $0x488] sm:$0xff] %v496_v17  ;;  %v624_v17 = vld [vmem:[%s4996_s6 + $0x6808] sm:$0xff] }
  0xa2   : > { %499 = vst [vmem:[%s5001_s7 + $0x490] sm:$0xff] %v498_v18  ;;  %v626_v18 = vld [vmem:[%s4996_s6 + $0x6810] sm:$0xff] }
  0xa3   : > { %501 = vst [vmem:[%s5001_s7 + $0x498] sm:$0xff] %v500_v19  ;;  %v628_v19 = vld [vmem:[%s4996_s6 + $0x6818] sm:$0xff] }
  0xa4   : > { %503 = vst [vmem:[%s5001_s7 + $0x4a0] sm:$0xff] %v502_v20  ;;  %v630_v20 = vld [vmem:[%s4996_s6 + $0x6820] sm:$0xff] }
  0xa5   : > { %505 = vst [vmem:[%s5001_s7 + $0x4a8] sm:$0xff] %v504_v21  ;;  %v632_v21 = vld [vmem:[%s4996_s6 + $0x6828] sm:$0xff] }
  0xa6   : > { %507 = vst [vmem:[%s5001_s7 + $0x4b0] sm:$0xff] %v506_v22  ;;  %v634_v22 = vld [vmem:[%s4996_s6 + $0x6830] sm:$0xff] }
  0xa7   : > { %509 = vst [vmem:[%s5001_s7 + $0x4b8] sm:$0xff] %v508_v23  ;;  %v636_v23 = vld [vmem:[%s4996_s6 + $0x6838] sm:$0xff] }
  0xa8   : > { %511 = vst [vmem:[%s5001_s7 + $0x4c0] sm:$0xff] %v510_v24  ;;  %v638_v24 = vld [vmem:[%s4996_s6 + $0x6c00] sm:$0xff] }
  0xa9   : > { %513 = vst [vmem:[%s5001_s7 + $0x4c8] sm:$0xff] %v512_v25  ;;  %v640_v25 = vld [vmem:[%s4996_s6 + $0x6c08] sm:$0xff] }
  0xaa   : > { %515 = vst [vmem:[%s5001_s7 + $0x4d0] sm:$0xff] %v514_v26  ;;  %v642_v26 = vld [vmem:[%s4996_s6 + $0x6c10] sm:$0xff] }
  0xab   : > { %517 = vst [vmem:[%s5001_s7 + $0x4d8] sm:$0xff] %v516_v27  ;;  %v644_v27 = vld [vmem:[%s4996_s6 + $0x6c18] sm:$0xff] }
  0xac   : > { %519 = vst [vmem:[%s5001_s7 + $0x4e0] sm:$0xff] %v518_v28  ;;  %v646_v28 = vld [vmem:[%s4996_s6 + $0x6c20] sm:$0xff] }
  0xad   : > { %521 = vst [vmem:[%s5001_s7 + $0x4e8] sm:$0xff] %v520_v29  ;;  %v648_v29 = vld [vmem:[%s4996_s6 + $0x6c28] sm:$0xff] }
  0xae   : > { %523 = vst [vmem:[%s5001_s7 + $0x4f0] sm:$0xff] %v522_v30  ;;  %v650_v30 = vld [vmem:[%s4996_s6 + $0x6c30] sm:$0xff] }
  0xaf   : > { %525 = vst [vmem:[%s5001_s7 + $0x4f8] sm:$0xff] %v524_v31  ;;  %v652_v31 = vld [vmem:[%s4996_s6 + $0x6c38] sm:$0xff] }
  0xb0   : > { %527 = vst [vmem:[%s5001_s7 + $0x500] sm:$0xff] %v526_v32  ;;  %v654_v32 = vld [vmem:[%s4996_s6 + $0x7000] sm:$0xff] }
  0xb1   : > { %529 = vst [vmem:[%s5001_s7 + $0x508] sm:$0xff] %v528_v33  ;;  %v656_v33 = vld [vmem:[%s4996_s6 + $0x7008] sm:$0xff] }
  0xb2   : > { %531 = vst [vmem:[%s5001_s7 + $0x510] sm:$0xff] %v530_v34  ;;  %v658_v34 = vld [vmem:[%s4996_s6 + $0x7010] sm:$0xff] }
  0xb3   : > { %533 = vst [vmem:[%s5001_s7 + $0x518] sm:$0xff] %v532_v35  ;;  %v660_v35 = vld [vmem:[%s4996_s6 + $0x7018] sm:$0xff] }
  0xb4   : > { %535 = vst [vmem:[%s5001_s7 + $0x520] sm:$0xff] %v534_v36  ;;  %v662_v36 = vld [vmem:[%s4996_s6 + $0x7020] sm:$0xff] }
  0xb5   : > { %537 = vst [vmem:[%s5001_s7 + $0x528] sm:$0xff] %v536_v37  ;;  %v664_v37 = vld [vmem:[%s4996_s6 + $0x7028] sm:$0xff] }
  0xb6   : > { %539 = vst [vmem:[%s5001_s7 + $0x530] sm:$0xff] %v538_v38  ;;  %v666_v38 = vld [vmem:[%s4996_s6 + $0x7030] sm:$0xff] }
  0xb7   : > { %541 = vst [vmem:[%s5001_s7 + $0x538] sm:$0xff] %v540_v39  ;;  %v668_v39 = vld [vmem:[%s4996_s6 + $0x7038] sm:$0xff] }
  0xb8   : > { %543 = vst [vmem:[%s5001_s7 + $0x540] sm:$0xff] %v542_v40  ;;  %v670_v40 = vld [vmem:[%s4996_s6 + $0x7400] sm:$0xff] }
  0xb9   : > { %545 = vst [vmem:[%s5001_s7 + $0x548] sm:$0xff] %v544_v41  ;;  %v672_v41 = vld [vmem:[%s4996_s6 + $0x7408] sm:$0xff] }
  0xba   : > { %547 = vst [vmem:[%s5001_s7 + $0x550] sm:$0xff] %v546_v42  ;;  %v674_v42 = vld [vmem:[%s4996_s6 + $0x7410] sm:$0xff] }
  0xbb   : > { %549 = vst [vmem:[%s5001_s7 + $0x558] sm:$0xff] %v548_v43  ;;  %v676_v43 = vld [vmem:[%s4996_s6 + $0x7418] sm:$0xff] }
  0xbc   : > { %551 = vst [vmem:[%s5001_s7 + $0x560] sm:$0xff] %v550_v44  ;;  %v678_v44 = vld [vmem:[%s4996_s6 + $0x7420] sm:$0xff] }
  0xbd   : > { %553 = vst [vmem:[%s5001_s7 + $0x568] sm:$0xff] %v552_v45  ;;  %v680_v45 = vld [vmem:[%s4996_s6 + $0x7428] sm:$0xff] }
  0xbe   : > { %555 = vst [vmem:[%s5001_s7 + $0x570] sm:$0xff] %v554_v46  ;;  %v682_v46 = vld [vmem:[%s4996_s6 + $0x7430] sm:$0xff] }
  0xbf   : > { %557 = vst [vmem:[%s5001_s7 + $0x578] sm:$0xff] %v556_v47  ;;  %v684_v47 = vld [vmem:[%s4996_s6 + $0x7438] sm:$0xff] }
  0xc0   : > { %559 = vst [vmem:[%s5001_s7 + $0x580] sm:$0xff] %v558_v48  ;;  %v686_v48 = vld [vmem:[%s4996_s6 + $0x7800] sm:$0xff] }
  0xc1   : > { %561 = vst [vmem:[%s5001_s7 + $0x588] sm:$0xff] %v560_v49  ;;  %v688_v49 = vld [vmem:[%s4996_s6 + $0x7808] sm:$0xff] }
  0xc2   : > { %563 = vst [vmem:[%s5001_s7 + $0x590] sm:$0xff] %v562_v50  ;;  %v690_v50 = vld [vmem:[%s4996_s6 + $0x7810] sm:$0xff] }
  0xc3   : > { %565 = vst [vmem:[%s5001_s7 + $0x598] sm:$0xff] %v564_v51  ;;  %v692_v51 = vld [vmem:[%s4996_s6 + $0x7818] sm:$0xff] }
  0xc4   : > { %567 = vst [vmem:[%s5001_s7 + $0x5a0] sm:$0xff] %v566_v52  ;;  %v694_v52 = vld [vmem:[%s4996_s6 + $0x7820] sm:$0xff] }
  0xc5   : > { %569 = vst [vmem:[%s5001_s7 + $0x5a8] sm:$0xff] %v568_v53  ;;  %v696_v53 = vld [vmem:[%s4996_s6 + $0x7828] sm:$0xff] }
  0xc6   : > { %571 = vst [vmem:[%s5001_s7 + $0x5b0] sm:$0xff] %v570_v54  ;;  %v698_v54 = vld [vmem:[%s4996_s6 + $0x7830] sm:$0xff] }
  0xc7   : > { %573 = vst [vmem:[%s5001_s7 + $0x5b8] sm:$0xff] %v572_v55  ;;  %v700_v55 = vld [vmem:[%s4996_s6 + $0x7838] sm:$0xff] }
  0xc8   : > { %575 = vst [vmem:[%s5001_s7 + $0x5c0] sm:$0xff] %v574_v56  ;;  %v702_v56 = vld [vmem:[%s4996_s6 + $0x7c00] sm:$0xff] }
  0xc9   : > { %577 = vst [vmem:[%s5001_s7 + $0x5c8] sm:$0xff] %v576_v57  ;;  %v704_v57 = vld [vmem:[%s4996_s6 + $0x7c08] sm:$0xff] }
  0xca   : > { %579 = vst [vmem:[%s5001_s7 + $0x5d0] sm:$0xff] %v578_v58  ;;  %v706_v58 = vld [vmem:[%s4996_s6 + $0x7c10] sm:$0xff] }
  0xcb   : > { %581 = vst [vmem:[%s5001_s7 + $0x5d8] sm:$0xff] %v580_v59  ;;  %v708_v59 = vld [vmem:[%s4996_s6 + $0x7c18] sm:$0xff] }
  0xcc   : > { %583 = vst [vmem:[%s5001_s7 + $0x5e0] sm:$0xff] %v582_v60  ;;  %v710_v60 = vld [vmem:[%s4996_s6 + $0x7c20] sm:$0xff] }
  0xcd   : > { %585 = vst [vmem:[%s5001_s7 + $0x5e8] sm:$0xff] %v584_v61  ;;  %v712_v61 = vld [vmem:[%s4996_s6 + $0x7c28] sm:$0xff] }
  0xce   : > { %587 = vst [vmem:[%s5001_s7 + $0x5f0] sm:$0xff] %v586_v62  ;;  %v714_v62 = vld [vmem:[%s4996_s6 + $0x7c30] sm:$0xff] }
  0xcf   : > { %589 = vst [vmem:[%s5001_s7 + $0x5f8] sm:$0xff] %v588_v63  ;;  %v716_v63 = vld [vmem:[%s4996_s6 + $0x7c38] sm:$0xff] }
  0xd0   : > { %591 = vst [vmem:[%s5001_s7 + $0x600] sm:$0xff] %v590_v0  ;;  %v718_v0 = vld [vmem:[%s4996_s6 + $0x8000] sm:$0xff] }
  0xd1   : > { %593 = vst [vmem:[%s5001_s7 + $0x608] sm:$0xff] %v592_v1  ;;  %v720_v1 = vld [vmem:[%s4996_s6 + $0x8008] sm:$0xff] }
  0xd2   : > { %595 = vst [vmem:[%s5001_s7 + $0x610] sm:$0xff] %v594_v2  ;;  %v722_v2 = vld [vmem:[%s4996_s6 + $0x8010] sm:$0xff] }
  0xd3   : > { %597 = vst [vmem:[%s5001_s7 + $0x618] sm:$0xff] %v596_v3  ;;  %v724_v3 = vld [vmem:[%s4996_s6 + $0x8018] sm:$0xff] }
  0xd4   : > { %599 = vst [vmem:[%s5001_s7 + $0x620] sm:$0xff] %v598_v4  ;;  %v726_v4 = vld [vmem:[%s4996_s6 + $0x8020] sm:$0xff] }
  0xd5   : > { %601 = vst [vmem:[%s5001_s7 + $0x628] sm:$0xff] %v600_v5  ;;  %v728_v5 = vld [vmem:[%s4996_s6 + $0x8028] sm:$0xff] }
  0xd6   : > { %603 = vst [vmem:[%s5001_s7 + $0x630] sm:$0xff] %v602_v6  ;;  %v730_v6 = vld [vmem:[%s4996_s6 + $0x8030] sm:$0xff] }
  0xd7   : > { %605 = vst [vmem:[%s5001_s7 + $0x638] sm:$0xff] %v604_v7  ;;  %v732_v7 = vld [vmem:[%s4996_s6 + $0x8038] sm:$0xff] }
  0xd8   : > { %607 = vst [vmem:[%s5001_s7 + $0x640] sm:$0xff] %v606_v8  ;;  %v734_v8 = vld [vmem:[%s4996_s6 + $0x8400] sm:$0xff] }
  0xd9   : > { %609 = vst [vmem:[%s5001_s7 + $0x648] sm:$0xff] %v608_v9  ;;  %v736_v9 = vld [vmem:[%s4996_s6 + $0x8408] sm:$0xff] }
  0xda   : > { %611 = vst [vmem:[%s5001_s7 + $0x650] sm:$0xff] %v610_v10  ;;  %v738_v10 = vld [vmem:[%s4996_s6 + $0x8410] sm:$0xff] }
  0xdb   : > { %613 = vst [vmem:[%s5001_s7 + $0x658] sm:$0xff] %v612_v11  ;;  %v740_v11 = vld [vmem:[%s4996_s6 + $0x8418] sm:$0xff] }
  0xdc   : > { %615 = vst [vmem:[%s5001_s7 + $0x660] sm:$0xff] %v614_v12  ;;  %v742_v12 = vld [vmem:[%s4996_s6 + $0x8420] sm:$0xff] }
  0xdd   : > { %617 = vst [vmem:[%s5001_s7 + $0x668] sm:$0xff] %v616_v13  ;;  %v744_v13 = vld [vmem:[%s4996_s6 + $0x8428] sm:$0xff] }
  0xde   : > { %619 = vst [vmem:[%s5001_s7 + $0x670] sm:$0xff] %v618_v14  ;;  %v746_v14 = vld [vmem:[%s4996_s6 + $0x8430] sm:$0xff] }
  0xdf   : > { %621 = vst [vmem:[%s5001_s7 + $0x678] sm:$0xff] %v620_v15  ;;  %v748_v15 = vld [vmem:[%s4996_s6 + $0x8438] sm:$0xff] }
  0xe0   : > { %623 = vst [vmem:[%s5001_s7 + $0x680] sm:$0xff] %v622_v16  ;;  %v750_v16 = vld [vmem:[%s4996_s6 + $0x8800] sm:$0xff] }
  0xe1   : > { %625 = vst [vmem:[%s5001_s7 + $0x688] sm:$0xff] %v624_v17  ;;  %v752_v17 = vld [vmem:[%s4996_s6 + $0x8808] sm:$0xff] }
  0xe2   : > { %627 = vst [vmem:[%s5001_s7 + $0x690] sm:$0xff] %v626_v18  ;;  %v754_v18 = vld [vmem:[%s4996_s6 + $0x8810] sm:$0xff] }
  0xe3   : > { %629 = vst [vmem:[%s5001_s7 + $0x698] sm:$0xff] %v628_v19  ;;  %v756_v19 = vld [vmem:[%s4996_s6 + $0x8818] sm:$0xff] }
  0xe4   : > { %631 = vst [vmem:[%s5001_s7 + $0x6a0] sm:$0xff] %v630_v20  ;;  %v758_v20 = vld [vmem:[%s4996_s6 + $0x8820] sm:$0xff] }
  0xe5   : > { %633 = vst [vmem:[%s5001_s7 + $0x6a8] sm:$0xff] %v632_v21  ;;  %v760_v21 = vld [vmem:[%s4996_s6 + $0x8828] sm:$0xff] }
  0xe6   : > { %635 = vst [vmem:[%s5001_s7 + $0x6b0] sm:$0xff] %v634_v22  ;;  %v762_v22 = vld [vmem:[%s4996_s6 + $0x8830] sm:$0xff] }
  0xe7   : > { %637 = vst [vmem:[%s5001_s7 + $0x6b8] sm:$0xff] %v636_v23  ;;  %v764_v23 = vld [vmem:[%s4996_s6 + $0x8838] sm:$0xff] }
  0xe8   : > { %639 = vst [vmem:[%s5001_s7 + $0x6c0] sm:$0xff] %v638_v24  ;;  %v766_v24 = vld [vmem:[%s4996_s6 + $0x8c00] sm:$0xff] }
  0xe9   : > { %641 = vst [vmem:[%s5001_s7 + $0x6c8] sm:$0xff] %v640_v25  ;;  %v768_v25 = vld [vmem:[%s4996_s6 + $0x8c08] sm:$0xff] }
  0xea   : > { %643 = vst [vmem:[%s5001_s7 + $0x6d0] sm:$0xff] %v642_v26  ;;  %v770_v26 = vld [vmem:[%s4996_s6 + $0x8c10] sm:$0xff] }
  0xeb   : > { %645 = vst [vmem:[%s5001_s7 + $0x6d8] sm:$0xff] %v644_v27  ;;  %v772_v27 = vld [vmem:[%s4996_s6 + $0x8c18] sm:$0xff] }
  0xec   : > { %647 = vst [vmem:[%s5001_s7 + $0x6e0] sm:$0xff] %v646_v28  ;;  %v774_v28 = vld [vmem:[%s4996_s6 + $0x8c20] sm:$0xff] }
  0xed   : > { %649 = vst [vmem:[%s5001_s7 + $0x6e8] sm:$0xff] %v648_v29  ;;  %v776_v29 = vld [vmem:[%s4996_s6 + $0x8c28] sm:$0xff] }
  0xee   : > { %651 = vst [vmem:[%s5001_s7 + $0x6f0] sm:$0xff] %v650_v30  ;;  %v778_v30 = vld [vmem:[%s4996_s6 + $0x8c30] sm:$0xff] }
  0xef   : > { %653 = vst [vmem:[%s5001_s7 + $0x6f8] sm:$0xff] %v652_v31  ;;  %v780_v31 = vld [vmem:[%s4996_s6 + $0x8c38] sm:$0xff] }
  0xf0   : > { %655 = vst [vmem:[%s5001_s7 + $0x700] sm:$0xff] %v654_v32  ;;  %v782_v32 = vld [vmem:[%s4996_s6 + $0x9000] sm:$0xff] }
  0xf1   : > { %657 = vst [vmem:[%s5001_s7 + $0x708] sm:$0xff] %v656_v33  ;;  %v784_v33 = vld [vmem:[%s4996_s6 + $0x9008] sm:$0xff] }
  0xf2   : > { %659 = vst [vmem:[%s5001_s7 + $0x710] sm:$0xff] %v658_v34  ;;  %v786_v34 = vld [vmem:[%s4996_s6 + $0x9010] sm:$0xff] }
  0xf3   : > { %661 = vst [vmem:[%s5001_s7 + $0x718] sm:$0xff] %v660_v35  ;;  %v788_v35 = vld [vmem:[%s4996_s6 + $0x9018] sm:$0xff] }
  0xf4   : > { %663 = vst [vmem:[%s5001_s7 + $0x720] sm:$0xff] %v662_v36  ;;  %v790_v36 = vld [vmem:[%s4996_s6 + $0x9020] sm:$0xff] }
  0xf5   : > { %665 = vst [vmem:[%s5001_s7 + $0x728] sm:$0xff] %v664_v37  ;;  %v792_v37 = vld [vmem:[%s4996_s6 + $0x9028] sm:$0xff] }
  0xf6   : > { %667 = vst [vmem:[%s5001_s7 + $0x730] sm:$0xff] %v666_v38  ;;  %v794_v38 = vld [vmem:[%s4996_s6 + $0x9030] sm:$0xff] }
  0xf7   : > { %669 = vst [vmem:[%s5001_s7 + $0x738] sm:$0xff] %v668_v39  ;;  %v796_v39 = vld [vmem:[%s4996_s6 + $0x9038] sm:$0xff] }
  0xf8   : > { %671 = vst [vmem:[%s5001_s7 + $0x740] sm:$0xff] %v670_v40  ;;  %v798_v40 = vld [vmem:[%s4996_s6 + $0x9400] sm:$0xff] }
  0xf9   : > { %673 = vst [vmem:[%s5001_s7 + $0x748] sm:$0xff] %v672_v41  ;;  %v800_v41 = vld [vmem:[%s4996_s6 + $0x9408] sm:$0xff] }
  0xfa   : > { %675 = vst [vmem:[%s5001_s7 + $0x750] sm:$0xff] %v674_v42  ;;  %v802_v42 = vld [vmem:[%s4996_s6 + $0x9410] sm:$0xff] }
  0xfb   : > { %677 = vst [vmem:[%s5001_s7 + $0x758] sm:$0xff] %v676_v43  ;;  %v804_v43 = vld [vmem:[%s4996_s6 + $0x9418] sm:$0xff] }
  0xfc   : > { %679 = vst [vmem:[%s5001_s7 + $0x760] sm:$0xff] %v678_v44  ;;  %v806_v44 = vld [vmem:[%s4996_s6 + $0x9420] sm:$0xff] }
  0xfd   : > { %681 = vst [vmem:[%s5001_s7 + $0x768] sm:$0xff] %v680_v45  ;;  %v808_v45 = vld [vmem:[%s4996_s6 + $0x9428] sm:$0xff] }
  0xfe   : > { %683 = vst [vmem:[%s5001_s7 + $0x770] sm:$0xff] %v682_v46  ;;  %v810_v46 = vld [vmem:[%s4996_s6 + $0x9430] sm:$0xff] }
  0xff   : > { %685 = vst [vmem:[%s5001_s7 + $0x778] sm:$0xff] %v684_v47  ;;  %v812_v47 = vld [vmem:[%s4996_s6 + $0x9438] sm:$0xff] }
 0x100   : > { %687 = vst [vmem:[%s5001_s7 + $0x780] sm:$0xff] %v686_v48  ;;  %v814_v48 = vld [vmem:[%s4996_s6 + $0x9800] sm:$0xff] }
 0x101   : > { %689 = vst [vmem:[%s5001_s7 + $0x788] sm:$0xff] %v688_v49  ;;  %v816_v49 = vld [vmem:[%s4996_s6 + $0x9808] sm:$0xff] }
 0x102   : > { %691 = vst [vmem:[%s5001_s7 + $0x790] sm:$0xff] %v690_v50  ;;  %v818_v50 = vld [vmem:[%s4996_s6 + $0x9810] sm:$0xff] }
 0x103   : > { %693 = vst [vmem:[%s5001_s7 + $0x798] sm:$0xff] %v692_v51  ;;  %v820_v51 = vld [vmem:[%s4996_s6 + $0x9818] sm:$0xff] }
 0x104   : > { %695 = vst [vmem:[%s5001_s7 + $0x7a0] sm:$0xff] %v694_v52  ;;  %v822_v52 = vld [vmem:[%s4996_s6 + $0x9820] sm:$0xff] }
 0x105   : > { %697 = vst [vmem:[%s5001_s7 + $0x7a8] sm:$0xff] %v696_v53  ;;  %v824_v53 = vld [vmem:[%s4996_s6 + $0x9828] sm:$0xff] }
 0x106   : > { %699 = vst [vmem:[%s5001_s7 + $0x7b0] sm:$0xff] %v698_v54  ;;  %v826_v54 = vld [vmem:[%s4996_s6 + $0x9830] sm:$0xff] }
 0x107   : > { %701 = vst [vmem:[%s5001_s7 + $0x7b8] sm:$0xff] %v700_v55  ;;  %v828_v55 = vld [vmem:[%s4996_s6 + $0x9838] sm:$0xff] }
 0x108   : > { %703 = vst [vmem:[%s5001_s7 + $0x7c0] sm:$0xff] %v702_v56  ;;  %v830_v56 = vld [vmem:[%s4996_s6 + $0x9c00] sm:$0xff] }
 0x109   : > { %705 = vst [vmem:[%s5001_s7 + $0x7c8] sm:$0xff] %v704_v57  ;;  %v832_v57 = vld [vmem:[%s4996_s6 + $0x9c08] sm:$0xff] }
 0x10a   : > { %707 = vst [vmem:[%s5001_s7 + $0x7d0] sm:$0xff] %v706_v58  ;;  %v834_v58 = vld [vmem:[%s4996_s6 + $0x9c10] sm:$0xff] }
 0x10b   : > { %709 = vst [vmem:[%s5001_s7 + $0x7d8] sm:$0xff] %v708_v59  ;;  %v836_v59 = vld [vmem:[%s4996_s6 + $0x9c18] sm:$0xff] }
 0x10c   : > { %711 = vst [vmem:[%s5001_s7 + $0x7e0] sm:$0xff] %v710_v60  ;;  %v838_v60 = vld [vmem:[%s4996_s6 + $0x9c20] sm:$0xff] }
 0x10d   : > { %713 = vst [vmem:[%s5001_s7 + $0x7e8] sm:$0xff] %v712_v61  ;;  %v840_v61 = vld [vmem:[%s4996_s6 + $0x9c28] sm:$0xff] }
 0x10e   : > { %715 = vst [vmem:[%s5001_s7 + $0x7f0] sm:$0xff] %v714_v62  ;;  %v842_v62 = vld [vmem:[%s4996_s6 + $0x9c30] sm:$0xff] }
 0x10f   : > { %717 = vst [vmem:[%s5001_s7 + $0x7f8] sm:$0xff] %v716_v63  ;;  %v844_v63 = vld [vmem:[%s4996_s6 + $0x9c38] sm:$0xff] }
 0x110   : > { %719 = vst [vmem:[%s5001_s7 + $0x800] sm:$0xff] %v718_v0  ;;  %v846_v0 = vld [vmem:[%s4996_s6 + $0xa000] sm:$0xff] }
 0x111   : > { %721 = vst [vmem:[%s5001_s7 + $0x808] sm:$0xff] %v720_v1  ;;  %v848_v1 = vld [vmem:[%s4996_s6 + $0xa008] sm:$0xff] }
 0x112   : > { %723 = vst [vmem:[%s5001_s7 + $0x810] sm:$0xff] %v722_v2  ;;  %v850_v2 = vld [vmem:[%s4996_s6 + $0xa010] sm:$0xff] }
 0x113   : > { %725 = vst [vmem:[%s5001_s7 + $0x818] sm:$0xff] %v724_v3  ;;  %v852_v3 = vld [vmem:[%s4996_s6 + $0xa018] sm:$0xff] }
 0x114   : > { %727 = vst [vmem:[%s5001_s7 + $0x820] sm:$0xff] %v726_v4  ;;  %v854_v4 = vld [vmem:[%s4996_s6 + $0xa020] sm:$0xff] }
 0x115   : > { %729 = vst [vmem:[%s5001_s7 + $0x828] sm:$0xff] %v728_v5  ;;  %v856_v5 = vld [vmem:[%s4996_s6 + $0xa028] sm:$0xff] }
 0x116   : > { %731 = vst [vmem:[%s5001_s7 + $0x830] sm:$0xff] %v730_v6  ;;  %v858_v6 = vld [vmem:[%s4996_s6 + $0xa030] sm:$0xff] }
 0x117   : > { %733 = vst [vmem:[%s5001_s7 + $0x838] sm:$0xff] %v732_v7  ;;  %v860_v7 = vld [vmem:[%s4996_s6 + $0xa038] sm:$0xff] }
 0x118   : > { %735 = vst [vmem:[%s5001_s7 + $0x840] sm:$0xff] %v734_v8  ;;  %v862_v8 = vld [vmem:[%s4996_s6 + $0xa400] sm:$0xff] }
 0x119   : > { %737 = vst [vmem:[%s5001_s7 + $0x848] sm:$0xff] %v736_v9  ;;  %v864_v9 = vld [vmem:[%s4996_s6 + $0xa408] sm:$0xff] }
 0x11a   : > { %739 = vst [vmem:[%s5001_s7 + $0x850] sm:$0xff] %v738_v10  ;;  %v866_v10 = vld [vmem:[%s4996_s6 + $0xa410] sm:$0xff] }
 0x11b   : > { %741 = vst [vmem:[%s5001_s7 + $0x858] sm:$0xff] %v740_v11  ;;  %v868_v11 = vld [vmem:[%s4996_s6 + $0xa418] sm:$0xff] }
 0x11c   : > { %743 = vst [vmem:[%s5001_s7 + $0x860] sm:$0xff] %v742_v12  ;;  %v870_v12 = vld [vmem:[%s4996_s6 + $0xa420] sm:$0xff] }
 0x11d   : > { %745 = vst [vmem:[%s5001_s7 + $0x868] sm:$0xff] %v744_v13  ;;  %v872_v13 = vld [vmem:[%s4996_s6 + $0xa428] sm:$0xff] }
 0x11e   : > { %747 = vst [vmem:[%s5001_s7 + $0x870] sm:$0xff] %v746_v14  ;;  %v874_v14 = vld [vmem:[%s4996_s6 + $0xa430] sm:$0xff] }
 0x11f   : > { %749 = vst [vmem:[%s5001_s7 + $0x878] sm:$0xff] %v748_v15  ;;  %v876_v15 = vld [vmem:[%s4996_s6 + $0xa438] sm:$0xff] }
 0x120   : > { %751 = vst [vmem:[%s5001_s7 + $0x880] sm:$0xff] %v750_v16  ;;  %v878_v16 = vld [vmem:[%s4996_s6 + $0xa800] sm:$0xff] }
 0x121   : > { %753 = vst [vmem:[%s5001_s7 + $0x888] sm:$0xff] %v752_v17  ;;  %v880_v17 = vld [vmem:[%s4996_s6 + $0xa808] sm:$0xff] }
 0x122   : > { %755 = vst [vmem:[%s5001_s7 + $0x890] sm:$0xff] %v754_v18  ;;  %v882_v18 = vld [vmem:[%s4996_s6 + $0xa810] sm:$0xff] }
 0x123   : > { %757 = vst [vmem:[%s5001_s7 + $0x898] sm:$0xff] %v756_v19  ;;  %v884_v19 = vld [vmem:[%s4996_s6 + $0xa818] sm:$0xff] }
 0x124   : > { %759 = vst [vmem:[%s5001_s7 + $0x8a0] sm:$0xff] %v758_v20  ;;  %v886_v20 = vld [vmem:[%s4996_s6 + $0xa820] sm:$0xff] }
 0x125   : > { %761 = vst [vmem:[%s5001_s7 + $0x8a8] sm:$0xff] %v760_v21  ;;  %v888_v21 = vld [vmem:[%s4996_s6 + $0xa828] sm:$0xff] }
 0x126   : > { %763 = vst [vmem:[%s5001_s7 + $0x8b0] sm:$0xff] %v762_v22  ;;  %v890_v22 = vld [vmem:[%s4996_s6 + $0xa830] sm:$0xff] }
 0x127   : > { %765 = vst [vmem:[%s5001_s7 + $0x8b8] sm:$0xff] %v764_v23  ;;  %v892_v23 = vld [vmem:[%s4996_s6 + $0xa838] sm:$0xff] }
 0x128   : > { %767 = vst [vmem:[%s5001_s7 + $0x8c0] sm:$0xff] %v766_v24  ;;  %v894_v24 = vld [vmem:[%s4996_s6 + $0xac00] sm:$0xff] }
 0x129   : > { %769 = vst [vmem:[%s5001_s7 + $0x8c8] sm:$0xff] %v768_v25  ;;  %v896_v25 = vld [vmem:[%s4996_s6 + $0xac08] sm:$0xff] }
 0x12a   : > { %771 = vst [vmem:[%s5001_s7 + $0x8d0] sm:$0xff] %v770_v26  ;;  %v898_v26 = vld [vmem:[%s4996_s6 + $0xac10] sm:$0xff] }
 0x12b   : > { %773 = vst [vmem:[%s5001_s7 + $0x8d8] sm:$0xff] %v772_v27  ;;  %v900_v27 = vld [vmem:[%s4996_s6 + $0xac18] sm:$0xff] }
 0x12c   : > { %775 = vst [vmem:[%s5001_s7 + $0x8e0] sm:$0xff] %v774_v28  ;;  %v902_v28 = vld [vmem:[%s4996_s6 + $0xac20] sm:$0xff] }
 0x12d   : > { %777 = vst [vmem:[%s5001_s7 + $0x8e8] sm:$0xff] %v776_v29  ;;  %v904_v29 = vld [vmem:[%s4996_s6 + $0xac28] sm:$0xff] }
 0x12e   : > { %779 = vst [vmem:[%s5001_s7 + $0x8f0] sm:$0xff] %v778_v30  ;;  %v906_v30 = vld [vmem:[%s4996_s6 + $0xac30] sm:$0xff] }
 0x12f   : > { %781 = vst [vmem:[%s5001_s7 + $0x8f8] sm:$0xff] %v780_v31  ;;  %v908_v31 = vld [vmem:[%s4996_s6 + $0xac38] sm:$0xff] }
 0x130   : > { %783 = vst [vmem:[%s5001_s7 + $0x900] sm:$0xff] %v782_v32  ;;  %v910_v32 = vld [vmem:[%s4996_s6 + $0xb000] sm:$0xff] }
 0x131   : > { %785 = vst [vmem:[%s5001_s7 + $0x908] sm:$0xff] %v784_v33  ;;  %v912_v33 = vld [vmem:[%s4996_s6 + $0xb008] sm:$0xff] }
 0x132   : > { %787 = vst [vmem:[%s5001_s7 + $0x910] sm:$0xff] %v786_v34  ;;  %v914_v34 = vld [vmem:[%s4996_s6 + $0xb010] sm:$0xff] }
 0x133   : > { %789 = vst [vmem:[%s5001_s7 + $0x918] sm:$0xff] %v788_v35  ;;  %v916_v35 = vld [vmem:[%s4996_s6 + $0xb018] sm:$0xff] }
 0x134   : > { %791 = vst [vmem:[%s5001_s7 + $0x920] sm:$0xff] %v790_v36  ;;  %v918_v36 = vld [vmem:[%s4996_s6 + $0xb020] sm:$0xff] }
 0x135   : > { %793 = vst [vmem:[%s5001_s7 + $0x928] sm:$0xff] %v792_v37  ;;  %v920_v37 = vld [vmem:[%s4996_s6 + $0xb028] sm:$0xff] }
 0x136   : > { %795 = vst [vmem:[%s5001_s7 + $0x930] sm:$0xff] %v794_v38  ;;  %v922_v38 = vld [vmem:[%s4996_s6 + $0xb030] sm:$0xff] }
 0x137   : > { %797 = vst [vmem:[%s5001_s7 + $0x938] sm:$0xff] %v796_v39  ;;  %v924_v39 = vld [vmem:[%s4996_s6 + $0xb038] sm:$0xff] }
 0x138   : > { %799 = vst [vmem:[%s5001_s7 + $0x940] sm:$0xff] %v798_v40  ;;  %v926_v40 = vld [vmem:[%s4996_s6 + $0xb400] sm:$0xff] }
 0x139   : > { %801 = vst [vmem:[%s5001_s7 + $0x948] sm:$0xff] %v800_v41  ;;  %v928_v41 = vld [vmem:[%s4996_s6 + $0xb408] sm:$0xff] }
 0x13a   : > { %803 = vst [vmem:[%s5001_s7 + $0x950] sm:$0xff] %v802_v42  ;;  %v930_v42 = vld [vmem:[%s4996_s6 + $0xb410] sm:$0xff] }
 0x13b   : > { %805 = vst [vmem:[%s5001_s7 + $0x958] sm:$0xff] %v804_v43  ;;  %v932_v43 = vld [vmem:[%s4996_s6 + $0xb418] sm:$0xff] }
 0x13c   : > { %807 = vst [vmem:[%s5001_s7 + $0x960] sm:$0xff] %v806_v44  ;;  %v934_v44 = vld [vmem:[%s4996_s6 + $0xb420] sm:$0xff] }
 0x13d   : > { %809 = vst [vmem:[%s5001_s7 + $0x968] sm:$0xff] %v808_v45  ;;  %v936_v45 = vld [vmem:[%s4996_s6 + $0xb428] sm:$0xff] }
 0x13e   : > { %811 = vst [vmem:[%s5001_s7 + $0x970] sm:$0xff] %v810_v46  ;;  %v938_v46 = vld [vmem:[%s4996_s6 + $0xb430] sm:$0xff] }
 0x13f   : > { %813 = vst [vmem:[%s5001_s7 + $0x978] sm:$0xff] %v812_v47  ;;  %v940_v47 = vld [vmem:[%s4996_s6 + $0xb438] sm:$0xff] }
 0x140   : > { %815 = vst [vmem:[%s5001_s7 + $0x980] sm:$0xff] %v814_v48  ;;  %v942_v48 = vld [vmem:[%s4996_s6 + $0xb800] sm:$0xff] }
 0x141   : > { %817 = vst [vmem:[%s5001_s7 + $0x988] sm:$0xff] %v816_v49  ;;  %v944_v49 = vld [vmem:[%s4996_s6 + $0xb808] sm:$0xff] }
 0x142   : > { %819 = vst [vmem:[%s5001_s7 + $0x990] sm:$0xff] %v818_v50  ;;  %v946_v50 = vld [vmem:[%s4996_s6 + $0xb810] sm:$0xff] }
 0x143   : > { %821 = vst [vmem:[%s5001_s7 + $0x998] sm:$0xff] %v820_v51  ;;  %v948_v51 = vld [vmem:[%s4996_s6 + $0xb818] sm:$0xff] }
 0x144   : > { %823 = vst [vmem:[%s5001_s7 + $0x9a0] sm:$0xff] %v822_v52  ;;  %v950_v52 = vld [vmem:[%s4996_s6 + $0xb820] sm:$0xff] }
 0x145   : > { %825 = vst [vmem:[%s5001_s7 + $0x9a8] sm:$0xff] %v824_v53  ;;  %v952_v53 = vld [vmem:[%s4996_s6 + $0xb828] sm:$0xff] }
 0x146   : > { %827 = vst [vmem:[%s5001_s7 + $0x9b0] sm:$0xff] %v826_v54  ;;  %v954_v54 = vld [vmem:[%s4996_s6 + $0xb830] sm:$0xff] }
 0x147   : > { %829 = vst [vmem:[%s5001_s7 + $0x9b8] sm:$0xff] %v828_v55  ;;  %v956_v55 = vld [vmem:[%s4996_s6 + $0xb838] sm:$0xff] }
 0x148   : > { %831 = vst [vmem:[%s5001_s7 + $0x9c0] sm:$0xff] %v830_v56  ;;  %v958_v56 = vld [vmem:[%s4996_s6 + $0xbc00] sm:$0xff] }
 0x149   : > { %833 = vst [vmem:[%s5001_s7 + $0x9c8] sm:$0xff] %v832_v57  ;;  %v960_v57 = vld [vmem:[%s4996_s6 + $0xbc08] sm:$0xff] }
 0x14a   : > { %835 = vst [vmem:[%s5001_s7 + $0x9d0] sm:$0xff] %v834_v58  ;;  %v962_v58 = vld [vmem:[%s4996_s6 + $0xbc10] sm:$0xff] }
 0x14b   : > { %837 = vst [vmem:[%s5001_s7 + $0x9d8] sm:$0xff] %v836_v59  ;;  %v964_v59 = vld [vmem:[%s4996_s6 + $0xbc18] sm:$0xff] }
 0x14c   : > { %839 = vst [vmem:[%s5001_s7 + $0x9e0] sm:$0xff] %v838_v60  ;;  %v966_v60 = vld [vmem:[%s4996_s6 + $0xbc20] sm:$0xff] }
 0x14d   : > { %841 = vst [vmem:[%s5001_s7 + $0x9e8] sm:$0xff] %v840_v61  ;;  %v968_v61 = vld [vmem:[%s4996_s6 + $0xbc28] sm:$0xff] }
 0x14e   : > { %843 = vst [vmem:[%s5001_s7 + $0x9f0] sm:$0xff] %v842_v62  ;;  %v970_v62 = vld [vmem:[%s4996_s6 + $0xbc30] sm:$0xff] }
 0x14f   : > { %845 = vst [vmem:[%s5001_s7 + $0x9f8] sm:$0xff] %v844_v63  ;;  %v972_v63 = vld [vmem:[%s4996_s6 + $0xbc38] sm:$0xff] }
 0x150   : > { %847 = vst [vmem:[%s5001_s7 + $0xa00] sm:$0xff] %v846_v0  ;;  %v974_v0 = vld [vmem:[%s4996_s6 + $0xc000] sm:$0xff] }
 0x151   : > { %849 = vst [vmem:[%s5001_s7 + $0xa08] sm:$0xff] %v848_v1  ;;  %v976_v1 = vld [vmem:[%s4996_s6 + $0xc008] sm:$0xff] }
 0x152   : > { %851 = vst [vmem:[%s5001_s7 + $0xa10] sm:$0xff] %v850_v2  ;;  %v978_v2 = vld [vmem:[%s4996_s6 + $0xc010] sm:$0xff] }
 0x153   : > { %853 = vst [vmem:[%s5001_s7 + $0xa18] sm:$0xff] %v852_v3  ;;  %v980_v3 = vld [vmem:[%s4996_s6 + $0xc018] sm:$0xff] }
 0x154   : > { %855 = vst [vmem:[%s5001_s7 + $0xa20] sm:$0xff] %v854_v4  ;;  %v982_v4 = vld [vmem:[%s4996_s6 + $0xc020] sm:$0xff] }
 0x155   : > { %857 = vst [vmem:[%s5001_s7 + $0xa28] sm:$0xff] %v856_v5  ;;  %v984_v5 = vld [vmem:[%s4996_s6 + $0xc028] sm:$0xff] }
 0x156   : > { %859 = vst [vmem:[%s5001_s7 + $0xa30] sm:$0xff] %v858_v6  ;;  %v986_v6 = vld [vmem:[%s4996_s6 + $0xc030] sm:$0xff] }
 0x157   : > { %861 = vst [vmem:[%s5001_s7 + $0xa38] sm:$0xff] %v860_v7  ;;  %v988_v7 = vld [vmem:[%s4996_s6 + $0xc038] sm:$0xff] }
 0x158   : > { %863 = vst [vmem:[%s5001_s7 + $0xa40] sm:$0xff] %v862_v8  ;;  %v990_v8 = vld [vmem:[%s4996_s6 + $0xc400] sm:$0xff] }
 0x159   : > { %865 = vst [vmem:[%s5001_s7 + $0xa48] sm:$0xff] %v864_v9  ;;  %v992_v9 = vld [vmem:[%s4996_s6 + $0xc408] sm:$0xff] }
 0x15a   : > { %867 = vst [vmem:[%s5001_s7 + $0xa50] sm:$0xff] %v866_v10  ;;  %v994_v10 = vld [vmem:[%s4996_s6 + $0xc410] sm:$0xff] }
 0x15b   : > { %869 = vst [vmem:[%s5001_s7 + $0xa58] sm:$0xff] %v868_v11  ;;  %v996_v11 = vld [vmem:[%s4996_s6 + $0xc418] sm:$0xff] }
 0x15c   : > { %871 = vst [vmem:[%s5001_s7 + $0xa60] sm:$0xff] %v870_v12  ;;  %v998_v12 = vld [vmem:[%s4996_s6 + $0xc420] sm:$0xff] }
 0x15d   : > { %873 = vst [vmem:[%s5001_s7 + $0xa68] sm:$0xff] %v872_v13  ;;  %v1000_v13 = vld [vmem:[%s4996_s6 + $0xc428] sm:$0xff] }
 0x15e   : > { %875 = vst [vmem:[%s5001_s7 + $0xa70] sm:$0xff] %v874_v14  ;;  %v1002_v14 = vld [vmem:[%s4996_s6 + $0xc430] sm:$0xff] }
 0x15f   : > { %877 = vst [vmem:[%s5001_s7 + $0xa78] sm:$0xff] %v876_v15  ;;  %v1004_v15 = vld [vmem:[%s4996_s6 + $0xc438] sm:$0xff] }
 0x160   : > { %879 = vst [vmem:[%s5001_s7 + $0xa80] sm:$0xff] %v878_v16  ;;  %v1006_v16 = vld [vmem:[%s4996_s6 + $0xc800] sm:$0xff] }
 0x161   : > { %881 = vst [vmem:[%s5001_s7 + $0xa88] sm:$0xff] %v880_v17  ;;  %v1008_v17 = vld [vmem:[%s4996_s6 + $0xc808] sm:$0xff] }
 0x162   : > { %883 = vst [vmem:[%s5001_s7 + $0xa90] sm:$0xff] %v882_v18  ;;  %v1010_v18 = vld [vmem:[%s4996_s6 + $0xc810] sm:$0xff] }
 0x163   : > { %885 = vst [vmem:[%s5001_s7 + $0xa98] sm:$0xff] %v884_v19  ;;  %v1012_v19 = vld [vmem:[%s4996_s6 + $0xc818] sm:$0xff] }
 0x164   : > { %887 = vst [vmem:[%s5001_s7 + $0xaa0] sm:$0xff] %v886_v20  ;;  %v1014_v20 = vld [vmem:[%s4996_s6 + $0xc820] sm:$0xff] }
 0x165   : > { %889 = vst [vmem:[%s5001_s7 + $0xaa8] sm:$0xff] %v888_v21  ;;  %v1016_v21 = vld [vmem:[%s4996_s6 + $0xc828] sm:$0xff] }
 0x166   : > { %891 = vst [vmem:[%s5001_s7 + $0xab0] sm:$0xff] %v890_v22  ;;  %v1018_v22 = vld [vmem:[%s4996_s6 + $0xc830] sm:$0xff] }
 0x167   : > { %893 = vst [vmem:[%s5001_s7 + $0xab8] sm:$0xff] %v892_v23  ;;  %v1020_v23 = vld [vmem:[%s4996_s6 + $0xc838] sm:$0xff] }
 0x168   : > { %895 = vst [vmem:[%s5001_s7 + $0xac0] sm:$0xff] %v894_v24  ;;  %v1022_v24 = vld [vmem:[%s4996_s6 + $0xcc00] sm:$0xff] }
 0x169   : > { %897 = vst [vmem:[%s5001_s7 + $0xac8] sm:$0xff] %v896_v25  ;;  %v1024_v25 = vld [vmem:[%s4996_s6 + $0xcc08] sm:$0xff] }
 0x16a   : > { %899 = vst [vmem:[%s5001_s7 + $0xad0] sm:$0xff] %v898_v26  ;;  %v1026_v26 = vld [vmem:[%s4996_s6 + $0xcc10] sm:$0xff] }
 0x16b   : > { %901 = vst [vmem:[%s5001_s7 + $0xad8] sm:$0xff] %v900_v27  ;;  %v1028_v27 = vld [vmem:[%s4996_s6 + $0xcc18] sm:$0xff] }
 0x16c   : > { %903 = vst [vmem:[%s5001_s7 + $0xae0] sm:$0xff] %v902_v28  ;;  %v1030_v28 = vld [vmem:[%s4996_s6 + $0xcc20] sm:$0xff] }
 0x16d   : > { %905 = vst [vmem:[%s5001_s7 + $0xae8] sm:$0xff] %v904_v29  ;;  %v1032_v29 = vld [vmem:[%s4996_s6 + $0xcc28] sm:$0xff] }
 0x16e   : > { %907 = vst [vmem:[%s5001_s7 + $0xaf0] sm:$0xff] %v906_v30  ;;  %v1034_v30 = vld [vmem:[%s4996_s6 + $0xcc30] sm:$0xff] }
 0x16f   : > { %909 = vst [vmem:[%s5001_s7 + $0xaf8] sm:$0xff] %v908_v31  ;;  %v1036_v31 = vld [vmem:[%s4996_s6 + $0xcc38] sm:$0xff] }
 0x170   : > { %911 = vst [vmem:[%s5001_s7 + $0xb00] sm:$0xff] %v910_v32  ;;  %v1038_v32 = vld [vmem:[%s4996_s6 + $0xd000] sm:$0xff] }
 0x171   : > { %913 = vst [vmem:[%s5001_s7 + $0xb08] sm:$0xff] %v912_v33  ;;  %v1040_v33 = vld [vmem:[%s4996_s6 + $0xd008] sm:$0xff] }
 0x172   : > { %915 = vst [vmem:[%s5001_s7 + $0xb10] sm:$0xff] %v914_v34  ;;  %v1042_v34 = vld [vmem:[%s4996_s6 + $0xd010] sm:$0xff] }
 0x173   : > { %917 = vst [vmem:[%s5001_s7 + $0xb18] sm:$0xff] %v916_v35  ;;  %v1044_v35 = vld [vmem:[%s4996_s6 + $0xd018] sm:$0xff] }
 0x174   : > { %919 = vst [vmem:[%s5001_s7 + $0xb20] sm:$0xff] %v918_v36  ;;  %v1046_v36 = vld [vmem:[%s4996_s6 + $0xd020] sm:$0xff] }
 0x175   : > { %921 = vst [vmem:[%s5001_s7 + $0xb28] sm:$0xff] %v920_v37  ;;  %v1048_v37 = vld [vmem:[%s4996_s6 + $0xd028] sm:$0xff] }
 0x176   : > { %923 = vst [vmem:[%s5001_s7 + $0xb30] sm:$0xff] %v922_v38  ;;  %v1050_v38 = vld [vmem:[%s4996_s6 + $0xd030] sm:$0xff] }
 0x177   : > { %925 = vst [vmem:[%s5001_s7 + $0xb38] sm:$0xff] %v924_v39  ;;  %v1052_v39 = vld [vmem:[%s4996_s6 + $0xd038] sm:$0xff] }
 0x178   : > { %927 = vst [vmem:[%s5001_s7 + $0xb40] sm:$0xff] %v926_v40  ;;  %v1054_v40 = vld [vmem:[%s4996_s6 + $0xd400] sm:$0xff] }
 0x179   : > { %929 = vst [vmem:[%s5001_s7 + $0xb48] sm:$0xff] %v928_v41  ;;  %v1056_v41 = vld [vmem:[%s4996_s6 + $0xd408] sm:$0xff] }
 0x17a   : > { %931 = vst [vmem:[%s5001_s7 + $0xb50] sm:$0xff] %v930_v42  ;;  %v1058_v42 = vld [vmem:[%s4996_s6 + $0xd410] sm:$0xff] }
 0x17b   : > { %933 = vst [vmem:[%s5001_s7 + $0xb58] sm:$0xff] %v932_v43  ;;  %v1060_v43 = vld [vmem:[%s4996_s6 + $0xd418] sm:$0xff] }
 0x17c   : > { %935 = vst [vmem:[%s5001_s7 + $0xb60] sm:$0xff] %v934_v44  ;;  %v1062_v44 = vld [vmem:[%s4996_s6 + $0xd420] sm:$0xff] }
 0x17d   : > { %937 = vst [vmem:[%s5001_s7 + $0xb68] sm:$0xff] %v936_v45  ;;  %v1064_v45 = vld [vmem:[%s4996_s6 + $0xd428] sm:$0xff] }
 0x17e   : > { %939 = vst [vmem:[%s5001_s7 + $0xb70] sm:$0xff] %v938_v46  ;;  %v1066_v46 = vld [vmem:[%s4996_s6 + $0xd430] sm:$0xff] }
 0x17f   : > { %941 = vst [vmem:[%s5001_s7 + $0xb78] sm:$0xff] %v940_v47  ;;  %v1068_v47 = vld [vmem:[%s4996_s6 + $0xd438] sm:$0xff] }
 0x180   : > { %943 = vst [vmem:[%s5001_s7 + $0xb80] sm:$0xff] %v942_v48  ;;  %v1070_v48 = vld [vmem:[%s4996_s6 + $0xd800] sm:$0xff] }
 0x181   : > { %945 = vst [vmem:[%s5001_s7 + $0xb88] sm:$0xff] %v944_v49  ;;  %v1072_v49 = vld [vmem:[%s4996_s6 + $0xd808] sm:$0xff] }
 0x182   : > { %947 = vst [vmem:[%s5001_s7 + $0xb90] sm:$0xff] %v946_v50  ;;  %v1074_v50 = vld [vmem:[%s4996_s6 + $0xd810] sm:$0xff] }
 0x183   : > { %949 = vst [vmem:[%s5001_s7 + $0xb98] sm:$0xff] %v948_v51  ;;  %v1076_v51 = vld [vmem:[%s4996_s6 + $0xd818] sm:$0xff] }
 0x184   : > { %951 = vst [vmem:[%s5001_s7 + $0xba0] sm:$0xff] %v950_v52  ;;  %v1078_v52 = vld [vmem:[%s4996_s6 + $0xd820] sm:$0xff] }
 0x185   : > { %953 = vst [vmem:[%s5001_s7 + $0xba8] sm:$0xff] %v952_v53  ;;  %v1080_v53 = vld [vmem:[%s4996_s6 + $0xd828] sm:$0xff] }
 0x186   : > { %955 = vst [vmem:[%s5001_s7 + $0xbb0] sm:$0xff] %v954_v54  ;;  %v1082_v54 = vld [vmem:[%s4996_s6 + $0xd830] sm:$0xff] }
 0x187   : > { %957 = vst [vmem:[%s5001_s7 + $0xbb8] sm:$0xff] %v956_v55  ;;  %v1084_v55 = vld [vmem:[%s4996_s6 + $0xd838] sm:$0xff] }
 0x188   : > { %959 = vst [vmem:[%s5001_s7 + $0xbc0] sm:$0xff] %v958_v56  ;;  %v1086_v56 = vld [vmem:[%s4996_s6 + $0xdc00] sm:$0xff] }
 0x189   : > { %961 = vst [vmem:[%s5001_s7 + $0xbc8] sm:$0xff] %v960_v57  ;;  %v1088_v57 = vld [vmem:[%s4996_s6 + $0xdc08] sm:$0xff] }
 0x18a   : > { %963 = vst [vmem:[%s5001_s7 + $0xbd0] sm:$0xff] %v962_v58  ;;  %v1090_v58 = vld [vmem:[%s4996_s6 + $0xdc10] sm:$0xff] }
 0x18b   : > { %965 = vst [vmem:[%s5001_s7 + $0xbd8] sm:$0xff] %v964_v59  ;;  %v1092_v59 = vld [vmem:[%s4996_s6 + $0xdc18] sm:$0xff] }
 0x18c   : > { %967 = vst [vmem:[%s5001_s7 + $0xbe0] sm:$0xff] %v966_v60  ;;  %v1094_v60 = vld [vmem:[%s4996_s6 + $0xdc20] sm:$0xff] }
 0x18d   : > { %969 = vst [vmem:[%s5001_s7 + $0xbe8] sm:$0xff] %v968_v61  ;;  %v1096_v61 = vld [vmem:[%s4996_s6 + $0xdc28] sm:$0xff] }
 0x18e   : > { %971 = vst [vmem:[%s5001_s7 + $0xbf0] sm:$0xff] %v970_v62  ;;  %v1098_v62 = vld [vmem:[%s4996_s6 + $0xdc30] sm:$0xff] }
 0x18f   : > { %973 = vst [vmem:[%s5001_s7 + $0xbf8] sm:$0xff] %v972_v63  ;;  %v1100_v63 = vld [vmem:[%s4996_s6 + $0xdc38] sm:$0xff] }
 0x190   : > { %975 = vst [vmem:[%s5001_s7 + $0xc00] sm:$0xff] %v974_v0  ;;  %v1102_v0 = vld [vmem:[%s4996_s6 + $0xe000] sm:$0xff] }
 0x191   : > { %977 = vst [vmem:[%s5001_s7 + $0xc08] sm:$0xff] %v976_v1  ;;  %v1104_v1 = vld [vmem:[%s4996_s6 + $0xe008] sm:$0xff] }
 0x192   : > { %979 = vst [vmem:[%s5001_s7 + $0xc10] sm:$0xff] %v978_v2  ;;  %v1106_v2 = vld [vmem:[%s4996_s6 + $0xe010] sm:$0xff] }
 0x193   : > { %981 = vst [vmem:[%s5001_s7 + $0xc18] sm:$0xff] %v980_v3  ;;  %v1108_v3 = vld [vmem:[%s4996_s6 + $0xe018] sm:$0xff] }
 0x194   : > { %983 = vst [vmem:[%s5001_s7 + $0xc20] sm:$0xff] %v982_v4  ;;  %v1110_v4 = vld [vmem:[%s4996_s6 + $0xe020] sm:$0xff] }
 0x195   : > { %985 = vst [vmem:[%s5001_s7 + $0xc28] sm:$0xff] %v984_v5  ;;  %v1112_v5 = vld [vmem:[%s4996_s6 + $0xe028] sm:$0xff] }
 0x196   : > { %987 = vst [vmem:[%s5001_s7 + $0xc30] sm:$0xff] %v986_v6  ;;  %v1114_v6 = vld [vmem:[%s4996_s6 + $0xe030] sm:$0xff] }
 0x197   : > { %989 = vst [vmem:[%s5001_s7 + $0xc38] sm:$0xff] %v988_v7  ;;  %v1116_v7 = vld [vmem:[%s4996_s6 + $0xe038] sm:$0xff] }
 0x198   : > { %991 = vst [vmem:[%s5001_s7 + $0xc40] sm:$0xff] %v990_v8  ;;  %v1118_v8 = vld [vmem:[%s4996_s6 + $0xe400] sm:$0xff] }
 0x199   : > { %993 = vst [vmem:[%s5001_s7 + $0xc48] sm:$0xff] %v992_v9  ;;  %v1120_v9 = vld [vmem:[%s4996_s6 + $0xe408] sm:$0xff] }
 0x19a   : > { %995 = vst [vmem:[%s5001_s7 + $0xc50] sm:$0xff] %v994_v10  ;;  %v1122_v10 = vld [vmem:[%s4996_s6 + $0xe410] sm:$0xff] }
 0x19b   : > { %997 = vst [vmem:[%s5001_s7 + $0xc58] sm:$0xff] %v996_v11  ;;  %v1124_v11 = vld [vmem:[%s4996_s6 + $0xe418] sm:$0xff] }
 0x19c   : > { %999 = vst [vmem:[%s5001_s7 + $0xc60] sm:$0xff] %v998_v12  ;;  %v1126_v12 = vld [vmem:[%s4996_s6 + $0xe420] sm:$0xff] }
 0x19d   : > { %1001 = vst [vmem:[%s5001_s7 + $0xc68] sm:$0xff] %v1000_v13  ;;  %v1128_v13 = vld [vmem:[%s4996_s6 + $0xe428] sm:$0xff] }
 0x19e   : > { %1003 = vst [vmem:[%s5001_s7 + $0xc70] sm:$0xff] %v1002_v14  ;;  %v1130_v14 = vld [vmem:[%s4996_s6 + $0xe430] sm:$0xff] }
 0x19f   : > { %1005 = vst [vmem:[%s5001_s7 + $0xc78] sm:$0xff] %v1004_v15  ;;  %v1132_v15 = vld [vmem:[%s4996_s6 + $0xe438] sm:$0xff] }
 0x1a0   : > { %1007 = vst [vmem:[%s5001_s7 + $0xc80] sm:$0xff] %v1006_v16  ;;  %v1134_v16 = vld [vmem:[%s4996_s6 + $0xe800] sm:$0xff] }
 0x1a1   : > { %1009 = vst [vmem:[%s5001_s7 + $0xc88] sm:$0xff] %v1008_v17  ;;  %v1136_v17 = vld [vmem:[%s4996_s6 + $0xe808] sm:$0xff] }
 0x1a2   : > { %1011 = vst [vmem:[%s5001_s7 + $0xc90] sm:$0xff] %v1010_v18  ;;  %v1138_v18 = vld [vmem:[%s4996_s6 + $0xe810] sm:$0xff] }
 0x1a3   : > { %1013 = vst [vmem:[%s5001_s7 + $0xc98] sm:$0xff] %v1012_v19  ;;  %v1140_v19 = vld [vmem:[%s4996_s6 + $0xe818] sm:$0xff] }
 0x1a4   : > { %1015 = vst [vmem:[%s5001_s7 + $0xca0] sm:$0xff] %v1014_v20  ;;  %v1142_v20 = vld [vmem:[%s4996_s6 + $0xe820] sm:$0xff] }
 0x1a5   : > { %1017 = vst [vmem:[%s5001_s7 + $0xca8] sm:$0xff] %v1016_v21  ;;  %v1144_v21 = vld [vmem:[%s4996_s6 + $0xe828] sm:$0xff] }
 0x1a6   : > { %1019 = vst [vmem:[%s5001_s7 + $0xcb0] sm:$0xff] %v1018_v22  ;;  %v1146_v22 = vld [vmem:[%s4996_s6 + $0xe830] sm:$0xff] }
 0x1a7   : > { %1021 = vst [vmem:[%s5001_s7 + $0xcb8] sm:$0xff] %v1020_v23  ;;  %v1148_v23 = vld [vmem:[%s4996_s6 + $0xe838] sm:$0xff] }
 0x1a8   : > { %1023 = vst [vmem:[%s5001_s7 + $0xcc0] sm:$0xff] %v1022_v24  ;;  %v1150_v24 = vld [vmem:[%s4996_s6 + $0xec00] sm:$0xff] }
 0x1a9   : > { %1025 = vst [vmem:[%s5001_s7 + $0xcc8] sm:$0xff] %v1024_v25  ;;  %v1152_v25 = vld [vmem:[%s4996_s6 + $0xec08] sm:$0xff] }
 0x1aa   : > { %1027 = vst [vmem:[%s5001_s7 + $0xcd0] sm:$0xff] %v1026_v26  ;;  %v1154_v26 = vld [vmem:[%s4996_s6 + $0xec10] sm:$0xff] }
 0x1ab   : > { %1029 = vst [vmem:[%s5001_s7 + $0xcd8] sm:$0xff] %v1028_v27  ;;  %v1156_v27 = vld [vmem:[%s4996_s6 + $0xec18] sm:$0xff] }
 0x1ac   : > { %1031 = vst [vmem:[%s5001_s7 + $0xce0] sm:$0xff] %v1030_v28  ;;  %v1158_v28 = vld [vmem:[%s4996_s6 + $0xec20] sm:$0xff] }
 0x1ad   : > { %1033 = vst [vmem:[%s5001_s7 + $0xce8] sm:$0xff] %v1032_v29  ;;  %v1160_v29 = vld [vmem:[%s4996_s6 + $0xec28] sm:$0xff] }
 0x1ae   : > { %1035 = vst [vmem:[%s5001_s7 + $0xcf0] sm:$0xff] %v1034_v30  ;;  %v1162_v30 = vld [vmem:[%s4996_s6 + $0xec30] sm:$0xff] }
 0x1af   : > { %1037 = vst [vmem:[%s5001_s7 + $0xcf8] sm:$0xff] %v1036_v31  ;;  %v1164_v31 = vld [vmem:[%s4996_s6 + $0xec38] sm:$0xff] }
 0x1b0   : > { %1039 = vst [vmem:[%s5001_s7 + $0xd00] sm:$0xff] %v1038_v32  ;;  %v1166_v32 = vld [vmem:[%s4996_s6 + $0xf000] sm:$0xff] }
 0x1b1   : > { %1041 = vst [vmem:[%s5001_s7 + $0xd08] sm:$0xff] %v1040_v33  ;;  %v1168_v33 = vld [vmem:[%s4996_s6 + $0xf008] sm:$0xff] }
 0x1b2   : > { %1043 = vst [vmem:[%s5001_s7 + $0xd10] sm:$0xff] %v1042_v34  ;;  %v1170_v34 = vld [vmem:[%s4996_s6 + $0xf010] sm:$0xff] }
 0x1b3   : > { %1045 = vst [vmem:[%s5001_s7 + $0xd18] sm:$0xff] %v1044_v35  ;;  %v1172_v35 = vld [vmem:[%s4996_s6 + $0xf018] sm:$0xff] }
 0x1b4   : > { %1047 = vst [vmem:[%s5001_s7 + $0xd20] sm:$0xff] %v1046_v36  ;;  %v1174_v36 = vld [vmem:[%s4996_s6 + $0xf020] sm:$0xff] }
 0x1b5   : > { %1049 = vst [vmem:[%s5001_s7 + $0xd28] sm:$0xff] %v1048_v37  ;;  %v1176_v37 = vld [vmem:[%s4996_s6 + $0xf028] sm:$0xff] }
 0x1b6   : > { %1051 = vst [vmem:[%s5001_s7 + $0xd30] sm:$0xff] %v1050_v38  ;;  %v1178_v38 = vld [vmem:[%s4996_s6 + $0xf030] sm:$0xff] }
 0x1b7   : > { %1053 = vst [vmem:[%s5001_s7 + $0xd38] sm:$0xff] %v1052_v39  ;;  %v1180_v39 = vld [vmem:[%s4996_s6 + $0xf038] sm:$0xff] }
 0x1b8   : > { %1055 = vst [vmem:[%s5001_s7 + $0xd40] sm:$0xff] %v1054_v40  ;;  %v1182_v40 = vld [vmem:[%s4996_s6 + $0xf400] sm:$0xff] }
 0x1b9   : > { %1057 = vst [vmem:[%s5001_s7 + $0xd48] sm:$0xff] %v1056_v41  ;;  %v1184_v41 = vld [vmem:[%s4996_s6 + $0xf408] sm:$0xff] }
 0x1ba   : > { %1059 = vst [vmem:[%s5001_s7 + $0xd50] sm:$0xff] %v1058_v42  ;;  %v1186_v42 = vld [vmem:[%s4996_s6 + $0xf410] sm:$0xff] }
 0x1bb   : > { %1061 = vst [vmem:[%s5001_s7 + $0xd58] sm:$0xff] %v1060_v43  ;;  %v1188_v43 = vld [vmem:[%s4996_s6 + $0xf418] sm:$0xff] }
 0x1bc   : > { %1063 = vst [vmem:[%s5001_s7 + $0xd60] sm:$0xff] %v1062_v44  ;;  %v1190_v44 = vld [vmem:[%s4996_s6 + $0xf420] sm:$0xff] }
 0x1bd   : > { %1065 = vst [vmem:[%s5001_s7 + $0xd68] sm:$0xff] %v1064_v45  ;;  %v1192_v45 = vld [vmem:[%s4996_s6 + $0xf428] sm:$0xff] }
 0x1be   : > { %1067 = vst [vmem:[%s5001_s7 + $0xd70] sm:$0xff] %v1066_v46  ;;  %v1194_v46 = vld [vmem:[%s4996_s6 + $0xf430] sm:$0xff] }
 0x1bf   : > { %1069 = vst [vmem:[%s5001_s7 + $0xd78] sm:$0xff] %v1068_v47  ;;  %v1196_v47 = vld [vmem:[%s4996_s6 + $0xf438] sm:$0xff] }
 0x1c0   : > { %1071 = vst [vmem:[%s5001_s7 + $0xd80] sm:$0xff] %v1070_v48  ;;  %v1198_v48 = vld [vmem:[%s4996_s6 + $0xf800] sm:$0xff] }
 0x1c1   : > { %1073 = vst [vmem:[%s5001_s7 + $0xd88] sm:$0xff] %v1072_v49  ;;  %v1200_v49 = vld [vmem:[%s4996_s6 + $0xf808] sm:$0xff] }
 0x1c2   : > { %1075 = vst [vmem:[%s5001_s7 + $0xd90] sm:$0xff] %v1074_v50  ;;  %v1202_v50 = vld [vmem:[%s4996_s6 + $0xf810] sm:$0xff] }
 0x1c3   : > { %1077 = vst [vmem:[%s5001_s7 + $0xd98] sm:$0xff] %v1076_v51  ;;  %v1204_v51 = vld [vmem:[%s4996_s6 + $0xf818] sm:$0xff] }
 0x1c4   : > { %1079 = vst [vmem:[%s5001_s7 + $0xda0] sm:$0xff] %v1078_v52  ;;  %v1206_v52 = vld [vmem:[%s4996_s6 + $0xf820] sm:$0xff] }
 0x1c5   : > { %1081 = vst [vmem:[%s5001_s7 + $0xda8] sm:$0xff] %v1080_v53  ;;  %v1208_v53 = vld [vmem:[%s4996_s6 + $0xf828] sm:$0xff] }
 0x1c6   : > { %1083 = vst [vmem:[%s5001_s7 + $0xdb0] sm:$0xff] %v1082_v54  ;;  %v1210_v54 = vld [vmem:[%s4996_s6 + $0xf830] sm:$0xff] }
 0x1c7   : > { %1085 = vst [vmem:[%s5001_s7 + $0xdb8] sm:$0xff] %v1084_v55  ;;  %v1212_v55 = vld [vmem:[%s4996_s6 + $0xf838] sm:$0xff] }
 0x1c8   : > { %1087 = vst [vmem:[%s5001_s7 + $0xdc0] sm:$0xff] %v1086_v56  ;;  %v1214_v56 = vld [vmem:[%s4996_s6 + $0xfc00] sm:$0xff] }
 0x1c9   : > { %1089 = vst [vmem:[%s5001_s7 + $0xdc8] sm:$0xff] %v1088_v57  ;;  %v1216_v57 = vld [vmem:[%s4996_s6 + $0xfc08] sm:$0xff] }
 0x1ca   : > { %1091 = vst [vmem:[%s5001_s7 + $0xdd0] sm:$0xff] %v1090_v58  ;;  %v1218_v58 = vld [vmem:[%s4996_s6 + $0xfc10] sm:$0xff] }
 0x1cb   : > { %1093 = vst [vmem:[%s5001_s7 + $0xdd8] sm:$0xff] %v1092_v59  ;;  %v1220_v59 = vld [vmem:[%s4996_s6 + $0xfc18] sm:$0xff] }
 0x1cc   : > { %1095 = vst [vmem:[%s5001_s7 + $0xde0] sm:$0xff] %v1094_v60  ;;  %v1222_v60 = vld [vmem:[%s4996_s6 + $0xfc20] sm:$0xff] }
 0x1cd   : > { %1097 = vst [vmem:[%s5001_s7 + $0xde8] sm:$0xff] %v1096_v61  ;;  %v1224_v61 = vld [vmem:[%s4996_s6 + $0xfc28] sm:$0xff] }
 0x1ce   : > { %1099 = vst [vmem:[%s5001_s7 + $0xdf0] sm:$0xff] %v1098_v62  ;;  %v1226_v62 = vld [vmem:[%s4996_s6 + $0xfc30] sm:$0xff] }
 0x1cf   : > { %1101 = vst [vmem:[%s5001_s7 + $0xdf8] sm:$0xff] %v1100_v63  ;;  %v1228_v63 = vld [vmem:[%s4996_s6 + $0xfc38] sm:$0xff] }
 0x1d0   : > { %1103 = vst [vmem:[%s5001_s7 + $0xe00] sm:$0xff] %v1102_v0  ;;  %v1230_v0 = vld [vmem:[%s4996_s6 + $0x10000] sm:$0xff] }
 0x1d1   : > { %1105 = vst [vmem:[%s5001_s7 + $0xe08] sm:$0xff] %v1104_v1  ;;  %v1232_v1 = vld [vmem:[%s4996_s6 + $0x10008] sm:$0xff] }
 0x1d2   : > { %1107 = vst [vmem:[%s5001_s7 + $0xe10] sm:$0xff] %v1106_v2  ;;  %v1234_v2 = vld [vmem:[%s4996_s6 + $0x10010] sm:$0xff] }
 0x1d3   : > { %1109 = vst [vmem:[%s5001_s7 + $0xe18] sm:$0xff] %v1108_v3  ;;  %v1236_v3 = vld [vmem:[%s4996_s6 + $0x10018] sm:$0xff] }
 0x1d4   : > { %1111 = vst [vmem:[%s5001_s7 + $0xe20] sm:$0xff] %v1110_v4  ;;  %v1238_v4 = vld [vmem:[%s4996_s6 + $0x10020] sm:$0xff] }
 0x1d5   : > { %1113 = vst [vmem:[%s5001_s7 + $0xe28] sm:$0xff] %v1112_v5  ;;  %v1240_v5 = vld [vmem:[%s4996_s6 + $0x10028] sm:$0xff] }
 0x1d6   : > { %1115 = vst [vmem:[%s5001_s7 + $0xe30] sm:$0xff] %v1114_v6  ;;  %v1242_v6 = vld [vmem:[%s4996_s6 + $0x10030] sm:$0xff] }
 0x1d7   : > { %1117 = vst [vmem:[%s5001_s7 + $0xe38] sm:$0xff] %v1116_v7  ;;  %v1244_v7 = vld [vmem:[%s4996_s6 + $0x10038] sm:$0xff] }
 0x1d8   : > { %1119 = vst [vmem:[%s5001_s7 + $0xe40] sm:$0xff] %v1118_v8  ;;  %v1246_v8 = vld [vmem:[%s4996_s6 + $0x10400] sm:$0xff] }
 0x1d9   : > { %1121 = vst [vmem:[%s5001_s7 + $0xe48] sm:$0xff] %v1120_v9  ;;  %v1248_v9 = vld [vmem:[%s4996_s6 + $0x10408] sm:$0xff] }
 0x1da   : > { %1123 = vst [vmem:[%s5001_s7 + $0xe50] sm:$0xff] %v1122_v10  ;;  %v1250_v10 = vld [vmem:[%s4996_s6 + $0x10410] sm:$0xff] }
 0x1db   : > { %1125 = vst [vmem:[%s5001_s7 + $0xe58] sm:$0xff] %v1124_v11  ;;  %v1252_v11 = vld [vmem:[%s4996_s6 + $0x10418] sm:$0xff] }
 0x1dc   : > { %1127 = vst [vmem:[%s5001_s7 + $0xe60] sm:$0xff] %v1126_v12  ;;  %v1254_v12 = vld [vmem:[%s4996_s6 + $0x10420] sm:$0xff] }
 0x1dd   : > { %1129 = vst [vmem:[%s5001_s7 + $0xe68] sm:$0xff] %v1128_v13  ;;  %v1256_v13 = vld [vmem:[%s4996_s6 + $0x10428] sm:$0xff] }
 0x1de   : > { %1131 = vst [vmem:[%s5001_s7 + $0xe70] sm:$0xff] %v1130_v14  ;;  %v1258_v14 = vld [vmem:[%s4996_s6 + $0x10430] sm:$0xff] }
 0x1df   : > { %1133 = vst [vmem:[%s5001_s7 + $0xe78] sm:$0xff] %v1132_v15  ;;  %v1260_v15 = vld [vmem:[%s4996_s6 + $0x10438] sm:$0xff] }
 0x1e0   : > { %1135 = vst [vmem:[%s5001_s7 + $0xe80] sm:$0xff] %v1134_v16  ;;  %v1262_v16 = vld [vmem:[%s4996_s6 + $0x10800] sm:$0xff] }
 0x1e1   : > { %1137 = vst [vmem:[%s5001_s7 + $0xe88] sm:$0xff] %v1136_v17  ;;  %v1264_v17 = vld [vmem:[%s4996_s6 + $0x10808] sm:$0xff] }
 0x1e2   : > { %1139 = vst [vmem:[%s5001_s7 + $0xe90] sm:$0xff] %v1138_v18  ;;  %v1266_v18 = vld [vmem:[%s4996_s6 + $0x10810] sm:$0xff] }
 0x1e3   : > { %1141 = vst [vmem:[%s5001_s7 + $0xe98] sm:$0xff] %v1140_v19  ;;  %v1268_v19 = vld [vmem:[%s4996_s6 + $0x10818] sm:$0xff] }
 0x1e4   : > { %1143 = vst [vmem:[%s5001_s7 + $0xea0] sm:$0xff] %v1142_v20  ;;  %v1270_v20 = vld [vmem:[%s4996_s6 + $0x10820] sm:$0xff] }
 0x1e5   : > { %1145 = vst [vmem:[%s5001_s7 + $0xea8] sm:$0xff] %v1144_v21  ;;  %v1272_v21 = vld [vmem:[%s4996_s6 + $0x10828] sm:$0xff] }
 0x1e6   : > { %1147 = vst [vmem:[%s5001_s7 + $0xeb0] sm:$0xff] %v1146_v22  ;;  %v1274_v22 = vld [vmem:[%s4996_s6 + $0x10830] sm:$0xff] }
 0x1e7   : > { %1149 = vst [vmem:[%s5001_s7 + $0xeb8] sm:$0xff] %v1148_v23  ;;  %v1276_v23 = vld [vmem:[%s4996_s6 + $0x10838] sm:$0xff] }
 0x1e8   : > { %1151 = vst [vmem:[%s5001_s7 + $0xec0] sm:$0xff] %v1150_v24  ;;  %v1278_v24 = vld [vmem:[%s4996_s6 + $0x10c00] sm:$0xff] }
 0x1e9   : > { %1153 = vst [vmem:[%s5001_s7 + $0xec8] sm:$0xff] %v1152_v25  ;;  %v1280_v25 = vld [vmem:[%s4996_s6 + $0x10c08] sm:$0xff] }
 0x1ea   : > { %1155 = vst [vmem:[%s5001_s7 + $0xed0] sm:$0xff] %v1154_v26  ;;  %v1282_v26 = vld [vmem:[%s4996_s6 + $0x10c10] sm:$0xff] }
 0x1eb   : > { %1157 = vst [vmem:[%s5001_s7 + $0xed8] sm:$0xff] %v1156_v27  ;;  %v1284_v27 = vld [vmem:[%s4996_s6 + $0x10c18] sm:$0xff] }
 0x1ec   : > { %1159 = vst [vmem:[%s5001_s7 + $0xee0] sm:$0xff] %v1158_v28  ;;  %v1286_v28 = vld [vmem:[%s4996_s6 + $0x10c20] sm:$0xff] }
 0x1ed   : > { %1161 = vst [vmem:[%s5001_s7 + $0xee8] sm:$0xff] %v1160_v29  ;;  %v1288_v29 = vld [vmem:[%s4996_s6 + $0x10c28] sm:$0xff] }
 0x1ee   : > { %1163 = vst [vmem:[%s5001_s7 + $0xef0] sm:$0xff] %v1162_v30  ;;  %v1290_v30 = vld [vmem:[%s4996_s6 + $0x10c30] sm:$0xff] }
 0x1ef   : > { %1165 = vst [vmem:[%s5001_s7 + $0xef8] sm:$0xff] %v1164_v31  ;;  %v1292_v31 = vld [vmem:[%s4996_s6 + $0x10c38] sm:$0xff] }
 0x1f0   : > { %1167 = vst [vmem:[%s5001_s7 + $0xf00] sm:$0xff] %v1166_v32  ;;  %v1294_v32 = vld [vmem:[%s4996_s6 + $0x11000] sm:$0xff] }
 0x1f1   : > { %1169 = vst [vmem:[%s5001_s7 + $0xf08] sm:$0xff] %v1168_v33  ;;  %v1296_v33 = vld [vmem:[%s4996_s6 + $0x11008] sm:$0xff] }
 0x1f2   : > { %1171 = vst [vmem:[%s5001_s7 + $0xf10] sm:$0xff] %v1170_v34  ;;  %v1298_v34 = vld [vmem:[%s4996_s6 + $0x11010] sm:$0xff] }
 0x1f3   : > { %1173 = vst [vmem:[%s5001_s7 + $0xf18] sm:$0xff] %v1172_v35  ;;  %v1300_v35 = vld [vmem:[%s4996_s6 + $0x11018] sm:$0xff] }
 0x1f4   : > { %1175 = vst [vmem:[%s5001_s7 + $0xf20] sm:$0xff] %v1174_v36  ;;  %v1302_v36 = vld [vmem:[%s4996_s6 + $0x11020] sm:$0xff] }
 0x1f5   : > { %1177 = vst [vmem:[%s5001_s7 + $0xf28] sm:$0xff] %v1176_v37  ;;  %v1304_v37 = vld [vmem:[%s4996_s6 + $0x11028] sm:$0xff] }
 0x1f6   : > { %1179 = vst [vmem:[%s5001_s7 + $0xf30] sm:$0xff] %v1178_v38  ;;  %v1306_v38 = vld [vmem:[%s4996_s6 + $0x11030] sm:$0xff] }
 0x1f7   : > { %1181 = vst [vmem:[%s5001_s7 + $0xf38] sm:$0xff] %v1180_v39  ;;  %v1308_v39 = vld [vmem:[%s4996_s6 + $0x11038] sm:$0xff] }
 0x1f8   : > { %1183 = vst [vmem:[%s5001_s7 + $0xf40] sm:$0xff] %v1182_v40  ;;  %v1310_v40 = vld [vmem:[%s4996_s6 + $0x11400] sm:$0xff] }
 0x1f9   : > { %1185 = vst [vmem:[%s5001_s7 + $0xf48] sm:$0xff] %v1184_v41  ;;  %v1312_v41 = vld [vmem:[%s4996_s6 + $0x11408] sm:$0xff] }
 0x1fa   : > { %1187 = vst [vmem:[%s5001_s7 + $0xf50] sm:$0xff] %v1186_v42  ;;  %v1314_v42 = vld [vmem:[%s4996_s6 + $0x11410] sm:$0xff] }
 0x1fb   : > { %1189 = vst [vmem:[%s5001_s7 + $0xf58] sm:$0xff] %v1188_v43  ;;  %v1316_v43 = vld [vmem:[%s4996_s6 + $0x11418] sm:$0xff] }
 0x1fc   : > { %1191 = vst [vmem:[%s5001_s7 + $0xf60] sm:$0xff] %v1190_v44  ;;  %v1318_v44 = vld [vmem:[%s4996_s6 + $0x11420] sm:$0xff] }
 0x1fd   : > { %1193 = vst [vmem:[%s5001_s7 + $0xf68] sm:$0xff] %v1192_v45  ;;  %v1320_v45 = vld [vmem:[%s4996_s6 + $0x11428] sm:$0xff] }
 0x1fe   : > { %1195 = vst [vmem:[%s5001_s7 + $0xf70] sm:$0xff] %v1194_v46  ;;  %v1322_v46 = vld [vmem:[%s4996_s6 + $0x11430] sm:$0xff] }
 0x1ff   : > { %1197 = vst [vmem:[%s5001_s7 + $0xf78] sm:$0xff] %v1196_v47  ;;  %v1324_v47 = vld [vmem:[%s4996_s6 + $0x11438] sm:$0xff] }
 0x200   : > { %1199 = vst [vmem:[%s5001_s7 + $0xf80] sm:$0xff] %v1198_v48  ;;  %v1326_v48 = vld [vmem:[%s4996_s6 + $0x11800] sm:$0xff] }
 0x201   : > { %1201 = vst [vmem:[%s5001_s7 + $0xf88] sm:$0xff] %v1200_v49  ;;  %v1328_v49 = vld [vmem:[%s4996_s6 + $0x11808] sm:$0xff] }
 0x202   : > { %1203 = vst [vmem:[%s5001_s7 + $0xf90] sm:$0xff] %v1202_v50  ;;  %v1330_v50 = vld [vmem:[%s4996_s6 + $0x11810] sm:$0xff] }
 0x203   : > { %1205 = vst [vmem:[%s5001_s7 + $0xf98] sm:$0xff] %v1204_v51  ;;  %v1332_v51 = vld [vmem:[%s4996_s6 + $0x11818] sm:$0xff] }
 0x204   : > { %1207 = vst [vmem:[%s5001_s7 + $0xfa0] sm:$0xff] %v1206_v52  ;;  %v1334_v52 = vld [vmem:[%s4996_s6 + $0x11820] sm:$0xff] }
 0x205   : > { %1209 = vst [vmem:[%s5001_s7 + $0xfa8] sm:$0xff] %v1208_v53  ;;  %v1336_v53 = vld [vmem:[%s4996_s6 + $0x11828] sm:$0xff] }
 0x206   : > { %1211 = vst [vmem:[%s5001_s7 + $0xfb0] sm:$0xff] %v1210_v54  ;;  %v1338_v54 = vld [vmem:[%s4996_s6 + $0x11830] sm:$0xff] }
 0x207   : > { %1213 = vst [vmem:[%s5001_s7 + $0xfb8] sm:$0xff] %v1212_v55  ;;  %v1340_v55 = vld [vmem:[%s4996_s6 + $0x11838] sm:$0xff] }
 0x208   : > { %1215 = vst [vmem:[%s5001_s7 + $0xfc0] sm:$0xff] %v1214_v56  ;;  %v1342_v56 = vld [vmem:[%s4996_s6 + $0x11c00] sm:$0xff] }
 0x209   : > { %1217 = vst [vmem:[%s5001_s7 + $0xfc8] sm:$0xff] %v1216_v57  ;;  %v1344_v57 = vld [vmem:[%s4996_s6 + $0x11c08] sm:$0xff] }
 0x20a   : > { %1219 = vst [vmem:[%s5001_s7 + $0xfd0] sm:$0xff] %v1218_v58  ;;  %v1346_v58 = vld [vmem:[%s4996_s6 + $0x11c10] sm:$0xff] }
 0x20b   : > { %1221 = vst [vmem:[%s5001_s7 + $0xfd8] sm:$0xff] %v1220_v59  ;;  %v1348_v59 = vld [vmem:[%s4996_s6 + $0x11c18] sm:$0xff] }
 0x20c   : > { %1223 = vst [vmem:[%s5001_s7 + $0xfe0] sm:$0xff] %v1222_v60  ;;  %v1350_v60 = vld [vmem:[%s4996_s6 + $0x11c20] sm:$0xff] }
 0x20d   : > { %1225 = vst [vmem:[%s5001_s7 + $0xfe8] sm:$0xff] %v1224_v61  ;;  %v1352_v61 = vld [vmem:[%s4996_s6 + $0x11c28] sm:$0xff] }
 0x20e   : > { %1227 = vst [vmem:[%s5001_s7 + $0xff0] sm:$0xff] %v1226_v62  ;;  %v1354_v62 = vld [vmem:[%s4996_s6 + $0x11c30] sm:$0xff] }
 0x20f   : > { %1229 = vst [vmem:[%s5001_s7 + $0xff8] sm:$0xff] %v1228_v63  ;;  %v1356_v63 = vld [vmem:[%s4996_s6 + $0x11c38] sm:$0xff] }
 0x210   : > { %1231 = vst [vmem:[%s5001_s7 + $0x1000] sm:$0xff] %v1230_v0  ;;  %v1358_v0 = vld [vmem:[%s4996_s6 + $0x12000] sm:$0xff] }
 0x211   : > { %1233 = vst [vmem:[%s5001_s7 + $0x1008] sm:$0xff] %v1232_v1  ;;  %v1360_v1 = vld [vmem:[%s4996_s6 + $0x12008] sm:$0xff] }
 0x212   : > { %1235 = vst [vmem:[%s5001_s7 + $0x1010] sm:$0xff] %v1234_v2  ;;  %v1362_v2 = vld [vmem:[%s4996_s6 + $0x12010] sm:$0xff] }
 0x213   : > { %1237 = vst [vmem:[%s5001_s7 + $0x1018] sm:$0xff] %v1236_v3  ;;  %v1364_v3 = vld [vmem:[%s4996_s6 + $0x12018] sm:$0xff] }
 0x214   : > { %1239 = vst [vmem:[%s5001_s7 + $0x1020] sm:$0xff] %v1238_v4  ;;  %v1366_v4 = vld [vmem:[%s4996_s6 + $0x12020] sm:$0xff] }
 0x215   : > { %1241 = vst [vmem:[%s5001_s7 + $0x1028] sm:$0xff] %v1240_v5  ;;  %v1368_v5 = vld [vmem:[%s4996_s6 + $0x12028] sm:$0xff] }
 0x216   : > { %1243 = vst [vmem:[%s5001_s7 + $0x1030] sm:$0xff] %v1242_v6  ;;  %v1370_v6 = vld [vmem:[%s4996_s6 + $0x12030] sm:$0xff] }
 0x217   : > { %1245 = vst [vmem:[%s5001_s7 + $0x1038] sm:$0xff] %v1244_v7  ;;  %v1372_v7 = vld [vmem:[%s4996_s6 + $0x12038] sm:$0xff] }
 0x218   : > { %1247 = vst [vmem:[%s5001_s7 + $0x1040] sm:$0xff] %v1246_v8  ;;  %v1374_v8 = vld [vmem:[%s4996_s6 + $0x12400] sm:$0xff] }
 0x219   : > { %1249 = vst [vmem:[%s5001_s7 + $0x1048] sm:$0xff] %v1248_v9  ;;  %v1376_v9 = vld [vmem:[%s4996_s6 + $0x12408] sm:$0xff] }
 0x21a   : > { %1251 = vst [vmem:[%s5001_s7 + $0x1050] sm:$0xff] %v1250_v10  ;;  %v1378_v10 = vld [vmem:[%s4996_s6 + $0x12410] sm:$0xff] }
 0x21b   : > { %1253 = vst [vmem:[%s5001_s7 + $0x1058] sm:$0xff] %v1252_v11  ;;  %v1380_v11 = vld [vmem:[%s4996_s6 + $0x12418] sm:$0xff] }
 0x21c   : > { %1255 = vst [vmem:[%s5001_s7 + $0x1060] sm:$0xff] %v1254_v12  ;;  %v1382_v12 = vld [vmem:[%s4996_s6 + $0x12420] sm:$0xff] }
 0x21d   : > { %1257 = vst [vmem:[%s5001_s7 + $0x1068] sm:$0xff] %v1256_v13  ;;  %v1384_v13 = vld [vmem:[%s4996_s6 + $0x12428] sm:$0xff] }
 0x21e   : > { %1259 = vst [vmem:[%s5001_s7 + $0x1070] sm:$0xff] %v1258_v14  ;;  %v1386_v14 = vld [vmem:[%s4996_s6 + $0x12430] sm:$0xff] }
 0x21f   : > { %1261 = vst [vmem:[%s5001_s7 + $0x1078] sm:$0xff] %v1260_v15  ;;  %v1388_v15 = vld [vmem:[%s4996_s6 + $0x12438] sm:$0xff] }
 0x220   : > { %1263 = vst [vmem:[%s5001_s7 + $0x1080] sm:$0xff] %v1262_v16  ;;  %v1390_v16 = vld [vmem:[%s4996_s6 + $0x12800] sm:$0xff] }
 0x221   : > { %1265 = vst [vmem:[%s5001_s7 + $0x1088] sm:$0xff] %v1264_v17  ;;  %v1392_v17 = vld [vmem:[%s4996_s6 + $0x12808] sm:$0xff] }
 0x222   : > { %1267 = vst [vmem:[%s5001_s7 + $0x1090] sm:$0xff] %v1266_v18  ;;  %v1394_v18 = vld [vmem:[%s4996_s6 + $0x12810] sm:$0xff] }
 0x223   : > { %1269 = vst [vmem:[%s5001_s7 + $0x1098] sm:$0xff] %v1268_v19  ;;  %v1396_v19 = vld [vmem:[%s4996_s6 + $0x12818] sm:$0xff] }
 0x224   : > { %1271 = vst [vmem:[%s5001_s7 + $0x10a0] sm:$0xff] %v1270_v20  ;;  %v1398_v20 = vld [vmem:[%s4996_s6 + $0x12820] sm:$0xff] }
 0x225   : > { %1273 = vst [vmem:[%s5001_s7 + $0x10a8] sm:$0xff] %v1272_v21  ;;  %v1400_v21 = vld [vmem:[%s4996_s6 + $0x12828] sm:$0xff] }
 0x226   : > { %1275 = vst [vmem:[%s5001_s7 + $0x10b0] sm:$0xff] %v1274_v22  ;;  %v1402_v22 = vld [vmem:[%s4996_s6 + $0x12830] sm:$0xff] }
 0x227   : > { %1277 = vst [vmem:[%s5001_s7 + $0x10b8] sm:$0xff] %v1276_v23  ;;  %v1404_v23 = vld [vmem:[%s4996_s6 + $0x12838] sm:$0xff] }
 0x228   : > { %1279 = vst [vmem:[%s5001_s7 + $0x10c0] sm:$0xff] %v1278_v24  ;;  %v1406_v24 = vld [vmem:[%s4996_s6 + $0x12c00] sm:$0xff] }
 0x229   : > { %1281 = vst [vmem:[%s5001_s7 + $0x10c8] sm:$0xff] %v1280_v25  ;;  %v1408_v25 = vld [vmem:[%s4996_s6 + $0x12c08] sm:$0xff] }
 0x22a   : > { %1283 = vst [vmem:[%s5001_s7 + $0x10d0] sm:$0xff] %v1282_v26  ;;  %v1410_v26 = vld [vmem:[%s4996_s6 + $0x12c10] sm:$0xff] }
 0x22b   : > { %1285 = vst [vmem:[%s5001_s7 + $0x10d8] sm:$0xff] %v1284_v27  ;;  %v1412_v27 = vld [vmem:[%s4996_s6 + $0x12c18] sm:$0xff] }
 0x22c   : > { %1287 = vst [vmem:[%s5001_s7 + $0x10e0] sm:$0xff] %v1286_v28  ;;  %v1414_v28 = vld [vmem:[%s4996_s6 + $0x12c20] sm:$0xff] }
 0x22d   : > { %1289 = vst [vmem:[%s5001_s7 + $0x10e8] sm:$0xff] %v1288_v29  ;;  %v1416_v29 = vld [vmem:[%s4996_s6 + $0x12c28] sm:$0xff] }
 0x22e   : > { %1291 = vst [vmem:[%s5001_s7 + $0x10f0] sm:$0xff] %v1290_v30  ;;  %v1418_v30 = vld [vmem:[%s4996_s6 + $0x12c30] sm:$0xff] }
 0x22f   : > { %1293 = vst [vmem:[%s5001_s7 + $0x10f8] sm:$0xff] %v1292_v31  ;;  %v1420_v31 = vld [vmem:[%s4996_s6 + $0x12c38] sm:$0xff] }
 0x230   : > { %1295 = vst [vmem:[%s5001_s7 + $0x1100] sm:$0xff] %v1294_v32  ;;  %v1422_v32 = vld [vmem:[%s4996_s6 + $0x13000] sm:$0xff] }
 0x231   : > { %1297 = vst [vmem:[%s5001_s7 + $0x1108] sm:$0xff] %v1296_v33  ;;  %v1424_v33 = vld [vmem:[%s4996_s6 + $0x13008] sm:$0xff] }
 0x232   : > { %1299 = vst [vmem:[%s5001_s7 + $0x1110] sm:$0xff] %v1298_v34  ;;  %v1426_v34 = vld [vmem:[%s4996_s6 + $0x13010] sm:$0xff] }
 0x233   : > { %1301 = vst [vmem:[%s5001_s7 + $0x1118] sm:$0xff] %v1300_v35  ;;  %v1428_v35 = vld [vmem:[%s4996_s6 + $0x13018] sm:$0xff] }
 0x234   : > { %1303 = vst [vmem:[%s5001_s7 + $0x1120] sm:$0xff] %v1302_v36  ;;  %v1430_v36 = vld [vmem:[%s4996_s6 + $0x13020] sm:$0xff] }
 0x235   : > { %1305 = vst [vmem:[%s5001_s7 + $0x1128] sm:$0xff] %v1304_v37  ;;  %v1432_v37 = vld [vmem:[%s4996_s6 + $0x13028] sm:$0xff] }
 0x236   : > { %1307 = vst [vmem:[%s5001_s7 + $0x1130] sm:$0xff] %v1306_v38  ;;  %v1434_v38 = vld [vmem:[%s4996_s6 + $0x13030] sm:$0xff] }
 0x237   : > { %1309 = vst [vmem:[%s5001_s7 + $0x1138] sm:$0xff] %v1308_v39  ;;  %v1436_v39 = vld [vmem:[%s4996_s6 + $0x13038] sm:$0xff] }
 0x238   : > { %1311 = vst [vmem:[%s5001_s7 + $0x1140] sm:$0xff] %v1310_v40  ;;  %v1438_v40 = vld [vmem:[%s4996_s6 + $0x13400] sm:$0xff] }
 0x239   : > { %1313 = vst [vmem:[%s5001_s7 + $0x1148] sm:$0xff] %v1312_v41  ;;  %v1440_v41 = vld [vmem:[%s4996_s6 + $0x13408] sm:$0xff] }
 0x23a   : > { %1315 = vst [vmem:[%s5001_s7 + $0x1150] sm:$0xff] %v1314_v42  ;;  %v1442_v42 = vld [vmem:[%s4996_s6 + $0x13410] sm:$0xff] }
 0x23b   : > { %1317 = vst [vmem:[%s5001_s7 + $0x1158] sm:$0xff] %v1316_v43  ;;  %v1444_v43 = vld [vmem:[%s4996_s6 + $0x13418] sm:$0xff] }
 0x23c   : > { %1319 = vst [vmem:[%s5001_s7 + $0x1160] sm:$0xff] %v1318_v44  ;;  %v1446_v44 = vld [vmem:[%s4996_s6 + $0x13420] sm:$0xff] }
 0x23d   : > { %1321 = vst [vmem:[%s5001_s7 + $0x1168] sm:$0xff] %v1320_v45  ;;  %v1448_v45 = vld [vmem:[%s4996_s6 + $0x13428] sm:$0xff] }
 0x23e   : > { %1323 = vst [vmem:[%s5001_s7 + $0x1170] sm:$0xff] %v1322_v46  ;;  %v1450_v46 = vld [vmem:[%s4996_s6 + $0x13430] sm:$0xff] }
 0x23f   : > { %1325 = vst [vmem:[%s5001_s7 + $0x1178] sm:$0xff] %v1324_v47  ;;  %v1452_v47 = vld [vmem:[%s4996_s6 + $0x13438] sm:$0xff] }
 0x240   : > { %1327 = vst [vmem:[%s5001_s7 + $0x1180] sm:$0xff] %v1326_v48  ;;  %v1454_v48 = vld [vmem:[%s4996_s6 + $0x13800] sm:$0xff] }
 0x241   : > { %1329 = vst [vmem:[%s5001_s7 + $0x1188] sm:$0xff] %v1328_v49  ;;  %v1456_v49 = vld [vmem:[%s4996_s6 + $0x13808] sm:$0xff] }
 0x242   : > { %1331 = vst [vmem:[%s5001_s7 + $0x1190] sm:$0xff] %v1330_v50  ;;  %v1458_v50 = vld [vmem:[%s4996_s6 + $0x13810] sm:$0xff] }
 0x243   : > { %1333 = vst [vmem:[%s5001_s7 + $0x1198] sm:$0xff] %v1332_v51  ;;  %v1460_v51 = vld [vmem:[%s4996_s6 + $0x13818] sm:$0xff] }
 0x244   : > { %1335 = vst [vmem:[%s5001_s7 + $0x11a0] sm:$0xff] %v1334_v52  ;;  %v1462_v52 = vld [vmem:[%s4996_s6 + $0x13820] sm:$0xff] }
 0x245   : > { %1337 = vst [vmem:[%s5001_s7 + $0x11a8] sm:$0xff] %v1336_v53  ;;  %v1464_v53 = vld [vmem:[%s4996_s6 + $0x13828] sm:$0xff] }
 0x246   : > { %1339 = vst [vmem:[%s5001_s7 + $0x11b0] sm:$0xff] %v1338_v54  ;;  %v1466_v54 = vld [vmem:[%s4996_s6 + $0x13830] sm:$0xff] }
 0x247   : > { %1341 = vst [vmem:[%s5001_s7 + $0x11b8] sm:$0xff] %v1340_v55  ;;  %v1468_v55 = vld [vmem:[%s4996_s6 + $0x13838] sm:$0xff] }
 0x248   : > { %1343 = vst [vmem:[%s5001_s7 + $0x11c0] sm:$0xff] %v1342_v56  ;;  %v1470_v56 = vld [vmem:[%s4996_s6 + $0x13c00] sm:$0xff] }
 0x249   : > { %1345 = vst [vmem:[%s5001_s7 + $0x11c8] sm:$0xff] %v1344_v57  ;;  %v1472_v57 = vld [vmem:[%s4996_s6 + $0x13c08] sm:$0xff] }
 0x24a   : > { %1347 = vst [vmem:[%s5001_s7 + $0x11d0] sm:$0xff] %v1346_v58  ;;  %v1474_v58 = vld [vmem:[%s4996_s6 + $0x13c10] sm:$0xff] }
 0x24b   : > { %1349 = vst [vmem:[%s5001_s7 + $0x11d8] sm:$0xff] %v1348_v59  ;;  %v1476_v59 = vld [vmem:[%s4996_s6 + $0x13c18] sm:$0xff] }
 0x24c   : > { %1351 = vst [vmem:[%s5001_s7 + $0x11e0] sm:$0xff] %v1350_v60  ;;  %v1478_v60 = vld [vmem:[%s4996_s6 + $0x13c20] sm:$0xff] }
 0x24d   : > { %1353 = vst [vmem:[%s5001_s7 + $0x11e8] sm:$0xff] %v1352_v61  ;;  %v1480_v61 = vld [vmem:[%s4996_s6 + $0x13c28] sm:$0xff] }
 0x24e   : > { %1355 = vst [vmem:[%s5001_s7 + $0x11f0] sm:$0xff] %v1354_v62  ;;  %v1482_v62 = vld [vmem:[%s4996_s6 + $0x13c30] sm:$0xff] }
 0x24f   : > { %1357 = vst [vmem:[%s5001_s7 + $0x11f8] sm:$0xff] %v1356_v63  ;;  %v1484_v63 = vld [vmem:[%s4996_s6 + $0x13c38] sm:$0xff] }
 0x250   : > { %1359 = vst [vmem:[%s5001_s7 + $0x1200] sm:$0xff] %v1358_v0  ;;  %v1486_v0 = vld [vmem:[%s4996_s6 + $0x14000] sm:$0xff] }
 0x251   : > { %1361 = vst [vmem:[%s5001_s7 + $0x1208] sm:$0xff] %v1360_v1  ;;  %v1488_v1 = vld [vmem:[%s4996_s6 + $0x14008] sm:$0xff] }
 0x252   : > { %1363 = vst [vmem:[%s5001_s7 + $0x1210] sm:$0xff] %v1362_v2  ;;  %v1490_v2 = vld [vmem:[%s4996_s6 + $0x14010] sm:$0xff] }
 0x253   : > { %1365 = vst [vmem:[%s5001_s7 + $0x1218] sm:$0xff] %v1364_v3  ;;  %v1492_v3 = vld [vmem:[%s4996_s6 + $0x14018] sm:$0xff] }
 0x254   : > { %1367 = vst [vmem:[%s5001_s7 + $0x1220] sm:$0xff] %v1366_v4  ;;  %v1494_v4 = vld [vmem:[%s4996_s6 + $0x14020] sm:$0xff] }
 0x255   : > { %1369 = vst [vmem:[%s5001_s7 + $0x1228] sm:$0xff] %v1368_v5  ;;  %v1496_v5 = vld [vmem:[%s4996_s6 + $0x14028] sm:$0xff] }
 0x256   : > { %1371 = vst [vmem:[%s5001_s7 + $0x1230] sm:$0xff] %v1370_v6  ;;  %v1498_v6 = vld [vmem:[%s4996_s6 + $0x14030] sm:$0xff] }
 0x257   : > { %1373 = vst [vmem:[%s5001_s7 + $0x1238] sm:$0xff] %v1372_v7  ;;  %v1500_v7 = vld [vmem:[%s4996_s6 + $0x14038] sm:$0xff] }
 0x258   : > { %1375 = vst [vmem:[%s5001_s7 + $0x1240] sm:$0xff] %v1374_v8  ;;  %v1502_v8 = vld [vmem:[%s4996_s6 + $0x14400] sm:$0xff] }
 0x259   : > { %1377 = vst [vmem:[%s5001_s7 + $0x1248] sm:$0xff] %v1376_v9  ;;  %v1504_v9 = vld [vmem:[%s4996_s6 + $0x14408] sm:$0xff] }
 0x25a   : > { %1379 = vst [vmem:[%s5001_s7 + $0x1250] sm:$0xff] %v1378_v10  ;;  %v1506_v10 = vld [vmem:[%s4996_s6 + $0x14410] sm:$0xff] }
 0x25b   : > { %1381 = vst [vmem:[%s5001_s7 + $0x1258] sm:$0xff] %v1380_v11  ;;  %v1508_v11 = vld [vmem:[%s4996_s6 + $0x14418] sm:$0xff] }
 0x25c   : > { %1383 = vst [vmem:[%s5001_s7 + $0x1260] sm:$0xff] %v1382_v12  ;;  %v1510_v12 = vld [vmem:[%s4996_s6 + $0x14420] sm:$0xff] }
 0x25d   : > { %1385 = vst [vmem:[%s5001_s7 + $0x1268] sm:$0xff] %v1384_v13  ;;  %v1512_v13 = vld [vmem:[%s4996_s6 + $0x14428] sm:$0xff] }
 0x25e   : > { %1387 = vst [vmem:[%s5001_s7 + $0x1270] sm:$0xff] %v1386_v14  ;;  %v1514_v14 = vld [vmem:[%s4996_s6 + $0x14430] sm:$0xff] }
 0x25f   : > { %1389 = vst [vmem:[%s5001_s7 + $0x1278] sm:$0xff] %v1388_v15  ;;  %v1516_v15 = vld [vmem:[%s4996_s6 + $0x14438] sm:$0xff] }
 0x260   : > { %1391 = vst [vmem:[%s5001_s7 + $0x1280] sm:$0xff] %v1390_v16  ;;  %v1518_v16 = vld [vmem:[%s4996_s6 + $0x14800] sm:$0xff] }
 0x261   : > { %1393 = vst [vmem:[%s5001_s7 + $0x1288] sm:$0xff] %v1392_v17  ;;  %v1520_v17 = vld [vmem:[%s4996_s6 + $0x14808] sm:$0xff] }
 0x262   : > { %1395 = vst [vmem:[%s5001_s7 + $0x1290] sm:$0xff] %v1394_v18  ;;  %v1522_v18 = vld [vmem:[%s4996_s6 + $0x14810] sm:$0xff] }
 0x263   : > { %1397 = vst [vmem:[%s5001_s7 + $0x1298] sm:$0xff] %v1396_v19  ;;  %v1524_v19 = vld [vmem:[%s4996_s6 + $0x14818] sm:$0xff] }
 0x264   : > { %1399 = vst [vmem:[%s5001_s7 + $0x12a0] sm:$0xff] %v1398_v20  ;;  %v1526_v20 = vld [vmem:[%s4996_s6 + $0x14820] sm:$0xff] }
 0x265   : > { %1401 = vst [vmem:[%s5001_s7 + $0x12a8] sm:$0xff] %v1400_v21  ;;  %v1528_v21 = vld [vmem:[%s4996_s6 + $0x14828] sm:$0xff] }
 0x266   : > { %1403 = vst [vmem:[%s5001_s7 + $0x12b0] sm:$0xff] %v1402_v22  ;;  %v1530_v22 = vld [vmem:[%s4996_s6 + $0x14830] sm:$0xff] }
 0x267   : > { %1405 = vst [vmem:[%s5001_s7 + $0x12b8] sm:$0xff] %v1404_v23  ;;  %v1532_v23 = vld [vmem:[%s4996_s6 + $0x14838] sm:$0xff] }
 0x268   : > { %1407 = vst [vmem:[%s5001_s7 + $0x12c0] sm:$0xff] %v1406_v24  ;;  %v1534_v24 = vld [vmem:[%s4996_s6 + $0x14c00] sm:$0xff] }
 0x269   : > { %1409 = vst [vmem:[%s5001_s7 + $0x12c8] sm:$0xff] %v1408_v25  ;;  %v1536_v25 = vld [vmem:[%s4996_s6 + $0x14c08] sm:$0xff] }
 0x26a   : > { %1411 = vst [vmem:[%s5001_s7 + $0x12d0] sm:$0xff] %v1410_v26  ;;  %v1538_v26 = vld [vmem:[%s4996_s6 + $0x14c10] sm:$0xff] }
 0x26b   : > { %1413 = vst [vmem:[%s5001_s7 + $0x12d8] sm:$0xff] %v1412_v27  ;;  %v1540_v27 = vld [vmem:[%s4996_s6 + $0x14c18] sm:$0xff] }
 0x26c   : > { %1415 = vst [vmem:[%s5001_s7 + $0x12e0] sm:$0xff] %v1414_v28  ;;  %v1542_v28 = vld [vmem:[%s4996_s6 + $0x14c20] sm:$0xff] }
 0x26d   : > { %1417 = vst [vmem:[%s5001_s7 + $0x12e8] sm:$0xff] %v1416_v29  ;;  %v1544_v29 = vld [vmem:[%s4996_s6 + $0x14c28] sm:$0xff] }
 0x26e   : > { %1419 = vst [vmem:[%s5001_s7 + $0x12f0] sm:$0xff] %v1418_v30  ;;  %v1546_v30 = vld [vmem:[%s4996_s6 + $0x14c30] sm:$0xff] }
 0x26f   : > { %1421 = vst [vmem:[%s5001_s7 + $0x12f8] sm:$0xff] %v1420_v31  ;;  %v1548_v31 = vld [vmem:[%s4996_s6 + $0x14c38] sm:$0xff] }
 0x270   : > { %1423 = vst [vmem:[%s5001_s7 + $0x1300] sm:$0xff] %v1422_v32  ;;  %v1550_v32 = vld [vmem:[%s4996_s6 + $0x15000] sm:$0xff] }
 0x271   : > { %1425 = vst [vmem:[%s5001_s7 + $0x1308] sm:$0xff] %v1424_v33  ;;  %v1552_v33 = vld [vmem:[%s4996_s6 + $0x15008] sm:$0xff] }
 0x272   : > { %1427 = vst [vmem:[%s5001_s7 + $0x1310] sm:$0xff] %v1426_v34  ;;  %v1554_v34 = vld [vmem:[%s4996_s6 + $0x15010] sm:$0xff] }
 0x273   : > { %1429 = vst [vmem:[%s5001_s7 + $0x1318] sm:$0xff] %v1428_v35  ;;  %v1556_v35 = vld [vmem:[%s4996_s6 + $0x15018] sm:$0xff] }
 0x274   : > { %1431 = vst [vmem:[%s5001_s7 + $0x1320] sm:$0xff] %v1430_v36  ;;  %v1558_v36 = vld [vmem:[%s4996_s6 + $0x15020] sm:$0xff] }
 0x275   : > { %1433 = vst [vmem:[%s5001_s7 + $0x1328] sm:$0xff] %v1432_v37  ;;  %v1560_v37 = vld [vmem:[%s4996_s6 + $0x15028] sm:$0xff] }
 0x276   : > { %1435 = vst [vmem:[%s5001_s7 + $0x1330] sm:$0xff] %v1434_v38  ;;  %v1562_v38 = vld [vmem:[%s4996_s6 + $0x15030] sm:$0xff] }
 0x277   : > { %1437 = vst [vmem:[%s5001_s7 + $0x1338] sm:$0xff] %v1436_v39  ;;  %v1564_v39 = vld [vmem:[%s4996_s6 + $0x15038] sm:$0xff] }
 0x278   : > { %1439 = vst [vmem:[%s5001_s7 + $0x1340] sm:$0xff] %v1438_v40  ;;  %v1566_v40 = vld [vmem:[%s4996_s6 + $0x15400] sm:$0xff] }
 0x279   : > { %1441 = vst [vmem:[%s5001_s7 + $0x1348] sm:$0xff] %v1440_v41  ;;  %v1568_v41 = vld [vmem:[%s4996_s6 + $0x15408] sm:$0xff] }
 0x27a   : > { %1443 = vst [vmem:[%s5001_s7 + $0x1350] sm:$0xff] %v1442_v42  ;;  %v1570_v42 = vld [vmem:[%s4996_s6 + $0x15410] sm:$0xff] }
 0x27b   : > { %1445 = vst [vmem:[%s5001_s7 + $0x1358] sm:$0xff] %v1444_v43  ;;  %v1572_v43 = vld [vmem:[%s4996_s6 + $0x15418] sm:$0xff] }
 0x27c   : > { %1447 = vst [vmem:[%s5001_s7 + $0x1360] sm:$0xff] %v1446_v44  ;;  %v1574_v44 = vld [vmem:[%s4996_s6 + $0x15420] sm:$0xff] }
 0x27d   : > { %1449 = vst [vmem:[%s5001_s7 + $0x1368] sm:$0xff] %v1448_v45  ;;  %v1576_v45 = vld [vmem:[%s4996_s6 + $0x15428] sm:$0xff] }
 0x27e   : > { %1451 = vst [vmem:[%s5001_s7 + $0x1370] sm:$0xff] %v1450_v46  ;;  %v1578_v46 = vld [vmem:[%s4996_s6 + $0x15430] sm:$0xff] }
 0x27f   : > { %1453 = vst [vmem:[%s5001_s7 + $0x1378] sm:$0xff] %v1452_v47  ;;  %v1580_v47 = vld [vmem:[%s4996_s6 + $0x15438] sm:$0xff] }
 0x280   : > { %1455 = vst [vmem:[%s5001_s7 + $0x1380] sm:$0xff] %v1454_v48  ;;  %v1582_v48 = vld [vmem:[%s4996_s6 + $0x15800] sm:$0xff] }
 0x281   : > { %1457 = vst [vmem:[%s5001_s7 + $0x1388] sm:$0xff] %v1456_v49  ;;  %v1584_v49 = vld [vmem:[%s4996_s6 + $0x15808] sm:$0xff] }
 0x282   : > { %1459 = vst [vmem:[%s5001_s7 + $0x1390] sm:$0xff] %v1458_v50  ;;  %v1586_v50 = vld [vmem:[%s4996_s6 + $0x15810] sm:$0xff] }
 0x283   : > { %1461 = vst [vmem:[%s5001_s7 + $0x1398] sm:$0xff] %v1460_v51  ;;  %v1588_v51 = vld [vmem:[%s4996_s6 + $0x15818] sm:$0xff] }
 0x284   : > { %1463 = vst [vmem:[%s5001_s7 + $0x13a0] sm:$0xff] %v1462_v52  ;;  %v1590_v52 = vld [vmem:[%s4996_s6 + $0x15820] sm:$0xff] }
 0x285   : > { %1465 = vst [vmem:[%s5001_s7 + $0x13a8] sm:$0xff] %v1464_v53  ;;  %v1592_v53 = vld [vmem:[%s4996_s6 + $0x15828] sm:$0xff] }
 0x286   : > { %1467 = vst [vmem:[%s5001_s7 + $0x13b0] sm:$0xff] %v1466_v54  ;;  %v1594_v54 = vld [vmem:[%s4996_s6 + $0x15830] sm:$0xff] }
 0x287   : > { %1469 = vst [vmem:[%s5001_s7 + $0x13b8] sm:$0xff] %v1468_v55  ;;  %v1596_v55 = vld [vmem:[%s4996_s6 + $0x15838] sm:$0xff] }
 0x288   : > { %1471 = vst [vmem:[%s5001_s7 + $0x13c0] sm:$0xff] %v1470_v56  ;;  %v1598_v56 = vld [vmem:[%s4996_s6 + $0x15c00] sm:$0xff] }
 0x289   : > { %1473 = vst [vmem:[%s5001_s7 + $0x13c8] sm:$0xff] %v1472_v57  ;;  %v1600_v57 = vld [vmem:[%s4996_s6 + $0x15c08] sm:$0xff] }
 0x28a   : > { %1475 = vst [vmem:[%s5001_s7 + $0x13d0] sm:$0xff] %v1474_v58  ;;  %v1602_v58 = vld [vmem:[%s4996_s6 + $0x15c10] sm:$0xff] }
 0x28b   : > { %1477 = vst [vmem:[%s5001_s7 + $0x13d8] sm:$0xff] %v1476_v59  ;;  %v1604_v59 = vld [vmem:[%s4996_s6 + $0x15c18] sm:$0xff] }
 0x28c   : > { %1479 = vst [vmem:[%s5001_s7 + $0x13e0] sm:$0xff] %v1478_v60  ;;  %v1606_v60 = vld [vmem:[%s4996_s6 + $0x15c20] sm:$0xff] }
 0x28d   : > { %1481 = vst [vmem:[%s5001_s7 + $0x13e8] sm:$0xff] %v1480_v61  ;;  %v1608_v61 = vld [vmem:[%s4996_s6 + $0x15c28] sm:$0xff] }
 0x28e   : > { %1483 = vst [vmem:[%s5001_s7 + $0x13f0] sm:$0xff] %v1482_v62  ;;  %v1610_v62 = vld [vmem:[%s4996_s6 + $0x15c30] sm:$0xff] }
 0x28f   : > { %1485 = vst [vmem:[%s5001_s7 + $0x13f8] sm:$0xff] %v1484_v63  ;;  %v1612_v63 = vld [vmem:[%s4996_s6 + $0x15c38] sm:$0xff] }
 0x290   : > { %1487 = vst [vmem:[%s5001_s7 + $0x1400] sm:$0xff] %v1486_v0  ;;  %v1614_v0 = vld [vmem:[%s4996_s6 + $0x16000] sm:$0xff] }
 0x291   : > { %1489 = vst [vmem:[%s5001_s7 + $0x1408] sm:$0xff] %v1488_v1  ;;  %v1616_v1 = vld [vmem:[%s4996_s6 + $0x16008] sm:$0xff] }
 0x292   : > { %1491 = vst [vmem:[%s5001_s7 + $0x1410] sm:$0xff] %v1490_v2  ;;  %v1618_v2 = vld [vmem:[%s4996_s6 + $0x16010] sm:$0xff] }
 0x293   : > { %1493 = vst [vmem:[%s5001_s7 + $0x1418] sm:$0xff] %v1492_v3  ;;  %v1620_v3 = vld [vmem:[%s4996_s6 + $0x16018] sm:$0xff] }
 0x294   : > { %1495 = vst [vmem:[%s5001_s7 + $0x1420] sm:$0xff] %v1494_v4  ;;  %v1622_v4 = vld [vmem:[%s4996_s6 + $0x16020] sm:$0xff] }
 0x295   : > { %1497 = vst [vmem:[%s5001_s7 + $0x1428] sm:$0xff] %v1496_v5  ;;  %v1624_v5 = vld [vmem:[%s4996_s6 + $0x16028] sm:$0xff] }
 0x296   : > { %1499 = vst [vmem:[%s5001_s7 + $0x1430] sm:$0xff] %v1498_v6  ;;  %v1626_v6 = vld [vmem:[%s4996_s6 + $0x16030] sm:$0xff] }
 0x297   : > { %1501 = vst [vmem:[%s5001_s7 + $0x1438] sm:$0xff] %v1500_v7  ;;  %v1628_v7 = vld [vmem:[%s4996_s6 + $0x16038] sm:$0xff] }
 0x298   : > { %1503 = vst [vmem:[%s5001_s7 + $0x1440] sm:$0xff] %v1502_v8  ;;  %v1630_v8 = vld [vmem:[%s4996_s6 + $0x16400] sm:$0xff] }
 0x299   : > { %1505 = vst [vmem:[%s5001_s7 + $0x1448] sm:$0xff] %v1504_v9  ;;  %v1632_v9 = vld [vmem:[%s4996_s6 + $0x16408] sm:$0xff] }
 0x29a   : > { %1507 = vst [vmem:[%s5001_s7 + $0x1450] sm:$0xff] %v1506_v10  ;;  %v1634_v10 = vld [vmem:[%s4996_s6 + $0x16410] sm:$0xff] }
 0x29b   : > { %1509 = vst [vmem:[%s5001_s7 + $0x1458] sm:$0xff] %v1508_v11  ;;  %v1636_v11 = vld [vmem:[%s4996_s6 + $0x16418] sm:$0xff] }
 0x29c   : > { %1511 = vst [vmem:[%s5001_s7 + $0x1460] sm:$0xff] %v1510_v12  ;;  %v1638_v12 = vld [vmem:[%s4996_s6 + $0x16420] sm:$0xff] }
 0x29d   : > { %1513 = vst [vmem:[%s5001_s7 + $0x1468] sm:$0xff] %v1512_v13  ;;  %v1640_v13 = vld [vmem:[%s4996_s6 + $0x16428] sm:$0xff] }
 0x29e   : > { %1515 = vst [vmem:[%s5001_s7 + $0x1470] sm:$0xff] %v1514_v14  ;;  %v1642_v14 = vld [vmem:[%s4996_s6 + $0x16430] sm:$0xff] }
 0x29f   : > { %1517 = vst [vmem:[%s5001_s7 + $0x1478] sm:$0xff] %v1516_v15  ;;  %v1644_v15 = vld [vmem:[%s4996_s6 + $0x16438] sm:$0xff] }
 0x2a0   : > { %1519 = vst [vmem:[%s5001_s7 + $0x1480] sm:$0xff] %v1518_v16  ;;  %v1646_v16 = vld [vmem:[%s4996_s6 + $0x16800] sm:$0xff] }
 0x2a1   : > { %1521 = vst [vmem:[%s5001_s7 + $0x1488] sm:$0xff] %v1520_v17  ;;  %v1648_v17 = vld [vmem:[%s4996_s6 + $0x16808] sm:$0xff] }
 0x2a2   : > { %1523 = vst [vmem:[%s5001_s7 + $0x1490] sm:$0xff] %v1522_v18  ;;  %v1650_v18 = vld [vmem:[%s4996_s6 + $0x16810] sm:$0xff] }
 0x2a3   : > { %1525 = vst [vmem:[%s5001_s7 + $0x1498] sm:$0xff] %v1524_v19  ;;  %v1652_v19 = vld [vmem:[%s4996_s6 + $0x16818] sm:$0xff] }
 0x2a4   : > { %1527 = vst [vmem:[%s5001_s7 + $0x14a0] sm:$0xff] %v1526_v20  ;;  %v1654_v20 = vld [vmem:[%s4996_s6 + $0x16820] sm:$0xff] }
 0x2a5   : > { %1529 = vst [vmem:[%s5001_s7 + $0x14a8] sm:$0xff] %v1528_v21  ;;  %v1656_v21 = vld [vmem:[%s4996_s6 + $0x16828] sm:$0xff] }
 0x2a6   : > { %1531 = vst [vmem:[%s5001_s7 + $0x14b0] sm:$0xff] %v1530_v22  ;;  %v1658_v22 = vld [vmem:[%s4996_s6 + $0x16830] sm:$0xff] }
 0x2a7   : > { %1533 = vst [vmem:[%s5001_s7 + $0x14b8] sm:$0xff] %v1532_v23  ;;  %v1660_v23 = vld [vmem:[%s4996_s6 + $0x16838] sm:$0xff] }
 0x2a8   : > { %1535 = vst [vmem:[%s5001_s7 + $0x14c0] sm:$0xff] %v1534_v24  ;;  %v1662_v24 = vld [vmem:[%s4996_s6 + $0x16c00] sm:$0xff] }
 0x2a9   : > { %1537 = vst [vmem:[%s5001_s7 + $0x14c8] sm:$0xff] %v1536_v25  ;;  %v1664_v25 = vld [vmem:[%s4996_s6 + $0x16c08] sm:$0xff] }
 0x2aa   : > { %1539 = vst [vmem:[%s5001_s7 + $0x14d0] sm:$0xff] %v1538_v26  ;;  %v1666_v26 = vld [vmem:[%s4996_s6 + $0x16c10] sm:$0xff] }
 0x2ab   : > { %1541 = vst [vmem:[%s5001_s7 + $0x14d8] sm:$0xff] %v1540_v27  ;;  %v1668_v27 = vld [vmem:[%s4996_s6 + $0x16c18] sm:$0xff] }
 0x2ac   : > { %1543 = vst [vmem:[%s5001_s7 + $0x14e0] sm:$0xff] %v1542_v28  ;;  %v1670_v28 = vld [vmem:[%s4996_s6 + $0x16c20] sm:$0xff] }
 0x2ad   : > { %1545 = vst [vmem:[%s5001_s7 + $0x14e8] sm:$0xff] %v1544_v29  ;;  %v1672_v29 = vld [vmem:[%s4996_s6 + $0x16c28] sm:$0xff] }
 0x2ae   : > { %1547 = vst [vmem:[%s5001_s7 + $0x14f0] sm:$0xff] %v1546_v30  ;;  %v1674_v30 = vld [vmem:[%s4996_s6 + $0x16c30] sm:$0xff] }
 0x2af   : > { %1549 = vst [vmem:[%s5001_s7 + $0x14f8] sm:$0xff] %v1548_v31  ;;  %v1676_v31 = vld [vmem:[%s4996_s6 + $0x16c38] sm:$0xff] }
 0x2b0   : > { %1551 = vst [vmem:[%s5001_s7 + $0x1500] sm:$0xff] %v1550_v32  ;;  %v1678_v32 = vld [vmem:[%s4996_s6 + $0x17000] sm:$0xff] }
 0x2b1   : > { %1553 = vst [vmem:[%s5001_s7 + $0x1508] sm:$0xff] %v1552_v33  ;;  %v1680_v33 = vld [vmem:[%s4996_s6 + $0x17008] sm:$0xff] }
 0x2b2   : > { %1555 = vst [vmem:[%s5001_s7 + $0x1510] sm:$0xff] %v1554_v34  ;;  %v1682_v34 = vld [vmem:[%s4996_s6 + $0x17010] sm:$0xff] }
 0x2b3   : > { %1557 = vst [vmem:[%s5001_s7 + $0x1518] sm:$0xff] %v1556_v35  ;;  %v1684_v35 = vld [vmem:[%s4996_s6 + $0x17018] sm:$0xff] }
 0x2b4   : > { %1559 = vst [vmem:[%s5001_s7 + $0x1520] sm:$0xff] %v1558_v36  ;;  %v1686_v36 = vld [vmem:[%s4996_s6 + $0x17020] sm:$0xff] }
 0x2b5   : > { %1561 = vst [vmem:[%s5001_s7 + $0x1528] sm:$0xff] %v1560_v37  ;;  %v1688_v37 = vld [vmem:[%s4996_s6 + $0x17028] sm:$0xff] }
 0x2b6   : > { %1563 = vst [vmem:[%s5001_s7 + $0x1530] sm:$0xff] %v1562_v38  ;;  %v1690_v38 = vld [vmem:[%s4996_s6 + $0x17030] sm:$0xff] }
 0x2b7   : > { %1565 = vst [vmem:[%s5001_s7 + $0x1538] sm:$0xff] %v1564_v39  ;;  %v1692_v39 = vld [vmem:[%s4996_s6 + $0x17038] sm:$0xff] }
 0x2b8   : > { %1567 = vst [vmem:[%s5001_s7 + $0x1540] sm:$0xff] %v1566_v40  ;;  %v1694_v40 = vld [vmem:[%s4996_s6 + $0x17400] sm:$0xff] }
 0x2b9   : > { %1569 = vst [vmem:[%s5001_s7 + $0x1548] sm:$0xff] %v1568_v41  ;;  %v1696_v41 = vld [vmem:[%s4996_s6 + $0x17408] sm:$0xff] }
 0x2ba   : > { %1571 = vst [vmem:[%s5001_s7 + $0x1550] sm:$0xff] %v1570_v42  ;;  %v1698_v42 = vld [vmem:[%s4996_s6 + $0x17410] sm:$0xff] }
 0x2bb   : > { %1573 = vst [vmem:[%s5001_s7 + $0x1558] sm:$0xff] %v1572_v43  ;;  %v1700_v43 = vld [vmem:[%s4996_s6 + $0x17418] sm:$0xff] }
 0x2bc   : > { %1575 = vst [vmem:[%s5001_s7 + $0x1560] sm:$0xff] %v1574_v44  ;;  %v1702_v44 = vld [vmem:[%s4996_s6 + $0x17420] sm:$0xff] }
 0x2bd   : > { %1577 = vst [vmem:[%s5001_s7 + $0x1568] sm:$0xff] %v1576_v45  ;;  %v1704_v45 = vld [vmem:[%s4996_s6 + $0x17428] sm:$0xff] }
 0x2be   : > { %1579 = vst [vmem:[%s5001_s7 + $0x1570] sm:$0xff] %v1578_v46  ;;  %v1706_v46 = vld [vmem:[%s4996_s6 + $0x17430] sm:$0xff] }
 0x2bf   : > { %1581 = vst [vmem:[%s5001_s7 + $0x1578] sm:$0xff] %v1580_v47  ;;  %v1708_v47 = vld [vmem:[%s4996_s6 + $0x17438] sm:$0xff] }
 0x2c0   : > { %1583 = vst [vmem:[%s5001_s7 + $0x1580] sm:$0xff] %v1582_v48  ;;  %v1710_v48 = vld [vmem:[%s4996_s6 + $0x17800] sm:$0xff] }
 0x2c1   : > { %1585 = vst [vmem:[%s5001_s7 + $0x1588] sm:$0xff] %v1584_v49  ;;  %v1712_v49 = vld [vmem:[%s4996_s6 + $0x17808] sm:$0xff] }
 0x2c2   : > { %1587 = vst [vmem:[%s5001_s7 + $0x1590] sm:$0xff] %v1586_v50  ;;  %v1714_v50 = vld [vmem:[%s4996_s6 + $0x17810] sm:$0xff] }
 0x2c3   : > { %1589 = vst [vmem:[%s5001_s7 + $0x1598] sm:$0xff] %v1588_v51  ;;  %v1716_v51 = vld [vmem:[%s4996_s6 + $0x17818] sm:$0xff] }
 0x2c4   : > { %1591 = vst [vmem:[%s5001_s7 + $0x15a0] sm:$0xff] %v1590_v52  ;;  %v1718_v52 = vld [vmem:[%s4996_s6 + $0x17820] sm:$0xff] }
 0x2c5   : > { %1593 = vst [vmem:[%s5001_s7 + $0x15a8] sm:$0xff] %v1592_v53  ;;  %v1720_v53 = vld [vmem:[%s4996_s6 + $0x17828] sm:$0xff] }
 0x2c6   : > { %1595 = vst [vmem:[%s5001_s7 + $0x15b0] sm:$0xff] %v1594_v54  ;;  %v1722_v54 = vld [vmem:[%s4996_s6 + $0x17830] sm:$0xff] }
 0x2c7   : > { %1597 = vst [vmem:[%s5001_s7 + $0x15b8] sm:$0xff] %v1596_v55  ;;  %v1724_v55 = vld [vmem:[%s4996_s6 + $0x17838] sm:$0xff] }
 0x2c8   : > { %1599 = vst [vmem:[%s5001_s7 + $0x15c0] sm:$0xff] %v1598_v56  ;;  %v1726_v56 = vld [vmem:[%s4996_s6 + $0x17c00] sm:$0xff] }
 0x2c9   : > { %1601 = vst [vmem:[%s5001_s7 + $0x15c8] sm:$0xff] %v1600_v57  ;;  %v1728_v57 = vld [vmem:[%s4996_s6 + $0x17c08] sm:$0xff] }
 0x2ca   : > { %1603 = vst [vmem:[%s5001_s7 + $0x15d0] sm:$0xff] %v1602_v58  ;;  %v1730_v58 = vld [vmem:[%s4996_s6 + $0x17c10] sm:$0xff] }
 0x2cb   : > { %1605 = vst [vmem:[%s5001_s7 + $0x15d8] sm:$0xff] %v1604_v59  ;;  %v1732_v59 = vld [vmem:[%s4996_s6 + $0x17c18] sm:$0xff] }
 0x2cc   : > { %1607 = vst [vmem:[%s5001_s7 + $0x15e0] sm:$0xff] %v1606_v60  ;;  %v1734_v60 = vld [vmem:[%s4996_s6 + $0x17c20] sm:$0xff] }
 0x2cd   : > { %1609 = vst [vmem:[%s5001_s7 + $0x15e8] sm:$0xff] %v1608_v61  ;;  %v1736_v61 = vld [vmem:[%s4996_s6 + $0x17c28] sm:$0xff] }
 0x2ce   : > { %1611 = vst [vmem:[%s5001_s7 + $0x15f0] sm:$0xff] %v1610_v62  ;;  %v1738_v62 = vld [vmem:[%s4996_s6 + $0x17c30] sm:$0xff] }
 0x2cf   : > { %1613 = vst [vmem:[%s5001_s7 + $0x15f8] sm:$0xff] %v1612_v63  ;;  %v1740_v63 = vld [vmem:[%s4996_s6 + $0x17c38] sm:$0xff] }
 0x2d0   : > { %1615 = vst [vmem:[%s5001_s7 + $0x1600] sm:$0xff] %v1614_v0  ;;  %v1742_v0 = vld [vmem:[%s4996_s6 + $0x18000] sm:$0xff] }
 0x2d1   : > { %1617 = vst [vmem:[%s5001_s7 + $0x1608] sm:$0xff] %v1616_v1  ;;  %v1744_v1 = vld [vmem:[%s4996_s6 + $0x18008] sm:$0xff] }
 0x2d2   : > { %1619 = vst [vmem:[%s5001_s7 + $0x1610] sm:$0xff] %v1618_v2  ;;  %v1746_v2 = vld [vmem:[%s4996_s6 + $0x18010] sm:$0xff] }
 0x2d3   : > { %1621 = vst [vmem:[%s5001_s7 + $0x1618] sm:$0xff] %v1620_v3  ;;  %v1748_v3 = vld [vmem:[%s4996_s6 + $0x18018] sm:$0xff] }
 0x2d4   : > { %1623 = vst [vmem:[%s5001_s7 + $0x1620] sm:$0xff] %v1622_v4  ;;  %v1750_v4 = vld [vmem:[%s4996_s6 + $0x18020] sm:$0xff] }
 0x2d5   : > { %1625 = vst [vmem:[%s5001_s7 + $0x1628] sm:$0xff] %v1624_v5  ;;  %v1752_v5 = vld [vmem:[%s4996_s6 + $0x18028] sm:$0xff] }
 0x2d6   : > { %1627 = vst [vmem:[%s5001_s7 + $0x1630] sm:$0xff] %v1626_v6  ;;  %v1754_v6 = vld [vmem:[%s4996_s6 + $0x18030] sm:$0xff] }
 0x2d7   : > { %1629 = vst [vmem:[%s5001_s7 + $0x1638] sm:$0xff] %v1628_v7  ;;  %v1756_v7 = vld [vmem:[%s4996_s6 + $0x18038] sm:$0xff] }
 0x2d8   : > { %1631 = vst [vmem:[%s5001_s7 + $0x1640] sm:$0xff] %v1630_v8  ;;  %v1758_v8 = vld [vmem:[%s4996_s6 + $0x18400] sm:$0xff] }
 0x2d9   : > { %1633 = vst [vmem:[%s5001_s7 + $0x1648] sm:$0xff] %v1632_v9  ;;  %v1760_v9 = vld [vmem:[%s4996_s6 + $0x18408] sm:$0xff] }
 0x2da   : > { %1635 = vst [vmem:[%s5001_s7 + $0x1650] sm:$0xff] %v1634_v10  ;;  %v1762_v10 = vld [vmem:[%s4996_s6 + $0x18410] sm:$0xff] }
 0x2db   : > { %1637 = vst [vmem:[%s5001_s7 + $0x1658] sm:$0xff] %v1636_v11  ;;  %v1764_v11 = vld [vmem:[%s4996_s6 + $0x18418] sm:$0xff] }
 0x2dc   : > { %1639 = vst [vmem:[%s5001_s7 + $0x1660] sm:$0xff] %v1638_v12  ;;  %v1766_v12 = vld [vmem:[%s4996_s6 + $0x18420] sm:$0xff] }
 0x2dd   : > { %1641 = vst [vmem:[%s5001_s7 + $0x1668] sm:$0xff] %v1640_v13  ;;  %v1768_v13 = vld [vmem:[%s4996_s6 + $0x18428] sm:$0xff] }
 0x2de   : > { %1643 = vst [vmem:[%s5001_s7 + $0x1670] sm:$0xff] %v1642_v14  ;;  %v1770_v14 = vld [vmem:[%s4996_s6 + $0x18430] sm:$0xff] }
 0x2df   : > { %1645 = vst [vmem:[%s5001_s7 + $0x1678] sm:$0xff] %v1644_v15  ;;  %v1772_v15 = vld [vmem:[%s4996_s6 + $0x18438] sm:$0xff] }
 0x2e0   : > { %1647 = vst [vmem:[%s5001_s7 + $0x1680] sm:$0xff] %v1646_v16  ;;  %v1774_v16 = vld [vmem:[%s4996_s6 + $0x18800] sm:$0xff] }
 0x2e1   : > { %1649 = vst [vmem:[%s5001_s7 + $0x1688] sm:$0xff] %v1648_v17  ;;  %v1776_v17 = vld [vmem:[%s4996_s6 + $0x18808] sm:$0xff] }
 0x2e2   : > { %1651 = vst [vmem:[%s5001_s7 + $0x1690] sm:$0xff] %v1650_v18  ;;  %v1778_v18 = vld [vmem:[%s4996_s6 + $0x18810] sm:$0xff] }
 0x2e3   : > { %1653 = vst [vmem:[%s5001_s7 + $0x1698] sm:$0xff] %v1652_v19  ;;  %v1780_v19 = vld [vmem:[%s4996_s6 + $0x18818] sm:$0xff] }
 0x2e4   : > { %1655 = vst [vmem:[%s5001_s7 + $0x16a0] sm:$0xff] %v1654_v20  ;;  %v1782_v20 = vld [vmem:[%s4996_s6 + $0x18820] sm:$0xff] }
 0x2e5   : > { %1657 = vst [vmem:[%s5001_s7 + $0x16a8] sm:$0xff] %v1656_v21  ;;  %v1784_v21 = vld [vmem:[%s4996_s6 + $0x18828] sm:$0xff] }
 0x2e6   : > { %1659 = vst [vmem:[%s5001_s7 + $0x16b0] sm:$0xff] %v1658_v22  ;;  %v1786_v22 = vld [vmem:[%s4996_s6 + $0x18830] sm:$0xff] }
 0x2e7   : > { %1661 = vst [vmem:[%s5001_s7 + $0x16b8] sm:$0xff] %v1660_v23  ;;  %v1788_v23 = vld [vmem:[%s4996_s6 + $0x18838] sm:$0xff] }
 0x2e8   : > { %1663 = vst [vmem:[%s5001_s7 + $0x16c0] sm:$0xff] %v1662_v24  ;;  %v1790_v24 = vld [vmem:[%s4996_s6 + $0x18c00] sm:$0xff] }
 0x2e9   : > { %1665 = vst [vmem:[%s5001_s7 + $0x16c8] sm:$0xff] %v1664_v25  ;;  %v1792_v25 = vld [vmem:[%s4996_s6 + $0x18c08] sm:$0xff] }
 0x2ea   : > { %1667 = vst [vmem:[%s5001_s7 + $0x16d0] sm:$0xff] %v1666_v26  ;;  %v1794_v26 = vld [vmem:[%s4996_s6 + $0x18c10] sm:$0xff] }
 0x2eb   : > { %1669 = vst [vmem:[%s5001_s7 + $0x16d8] sm:$0xff] %v1668_v27  ;;  %v1796_v27 = vld [vmem:[%s4996_s6 + $0x18c18] sm:$0xff] }
 0x2ec   : > { %1671 = vst [vmem:[%s5001_s7 + $0x16e0] sm:$0xff] %v1670_v28  ;;  %v1798_v28 = vld [vmem:[%s4996_s6 + $0x18c20] sm:$0xff] }
 0x2ed   : > { %1673 = vst [vmem:[%s5001_s7 + $0x16e8] sm:$0xff] %v1672_v29  ;;  %v1800_v29 = vld [vmem:[%s4996_s6 + $0x18c28] sm:$0xff] }
 0x2ee   : > { %1675 = vst [vmem:[%s5001_s7 + $0x16f0] sm:$0xff] %v1674_v30  ;;  %v1802_v30 = vld [vmem:[%s4996_s6 + $0x18c30] sm:$0xff] }
 0x2ef   : > { %1677 = vst [vmem:[%s5001_s7 + $0x16f8] sm:$0xff] %v1676_v31  ;;  %v1804_v31 = vld [vmem:[%s4996_s6 + $0x18c38] sm:$0xff] }
 0x2f0   : > { %1679 = vst [vmem:[%s5001_s7 + $0x1700] sm:$0xff] %v1678_v32  ;;  %v1806_v32 = vld [vmem:[%s4996_s6 + $0x19000] sm:$0xff] }
 0x2f1   : > { %1681 = vst [vmem:[%s5001_s7 + $0x1708] sm:$0xff] %v1680_v33  ;;  %v1808_v33 = vld [vmem:[%s4996_s6 + $0x19008] sm:$0xff] }
 0x2f2   : > { %1683 = vst [vmem:[%s5001_s7 + $0x1710] sm:$0xff] %v1682_v34  ;;  %v1810_v34 = vld [vmem:[%s4996_s6 + $0x19010] sm:$0xff] }
 0x2f3   : > { %1685 = vst [vmem:[%s5001_s7 + $0x1718] sm:$0xff] %v1684_v35  ;;  %v1812_v35 = vld [vmem:[%s4996_s6 + $0x19018] sm:$0xff] }
 0x2f4   : > { %1687 = vst [vmem:[%s5001_s7 + $0x1720] sm:$0xff] %v1686_v36  ;;  %v1814_v36 = vld [vmem:[%s4996_s6 + $0x19020] sm:$0xff] }
 0x2f5   : > { %1689 = vst [vmem:[%s5001_s7 + $0x1728] sm:$0xff] %v1688_v37  ;;  %v1816_v37 = vld [vmem:[%s4996_s6 + $0x19028] sm:$0xff] }
 0x2f6   : > { %1691 = vst [vmem:[%s5001_s7 + $0x1730] sm:$0xff] %v1690_v38  ;;  %v1818_v38 = vld [vmem:[%s4996_s6 + $0x19030] sm:$0xff] }
 0x2f7   : > { %1693 = vst [vmem:[%s5001_s7 + $0x1738] sm:$0xff] %v1692_v39  ;;  %v1820_v39 = vld [vmem:[%s4996_s6 + $0x19038] sm:$0xff] }
 0x2f8   : > { %1695 = vst [vmem:[%s5001_s7 + $0x1740] sm:$0xff] %v1694_v40  ;;  %v1822_v40 = vld [vmem:[%s4996_s6 + $0x19400] sm:$0xff] }
 0x2f9   : > { %1697 = vst [vmem:[%s5001_s7 + $0x1748] sm:$0xff] %v1696_v41  ;;  %v1824_v41 = vld [vmem:[%s4996_s6 + $0x19408] sm:$0xff] }
 0x2fa   : > { %1699 = vst [vmem:[%s5001_s7 + $0x1750] sm:$0xff] %v1698_v42  ;;  %v1826_v42 = vld [vmem:[%s4996_s6 + $0x19410] sm:$0xff] }
 0x2fb   : > { %1701 = vst [vmem:[%s5001_s7 + $0x1758] sm:$0xff] %v1700_v43  ;;  %v1828_v43 = vld [vmem:[%s4996_s6 + $0x19418] sm:$0xff] }
 0x2fc   : > { %1703 = vst [vmem:[%s5001_s7 + $0x1760] sm:$0xff] %v1702_v44  ;;  %v1830_v44 = vld [vmem:[%s4996_s6 + $0x19420] sm:$0xff] }
 0x2fd   : > { %1705 = vst [vmem:[%s5001_s7 + $0x1768] sm:$0xff] %v1704_v45  ;;  %v1832_v45 = vld [vmem:[%s4996_s6 + $0x19428] sm:$0xff] }
 0x2fe   : > { %1707 = vst [vmem:[%s5001_s7 + $0x1770] sm:$0xff] %v1706_v46  ;;  %v1834_v46 = vld [vmem:[%s4996_s6 + $0x19430] sm:$0xff] }
 0x2ff   : > { %1709 = vst [vmem:[%s5001_s7 + $0x1778] sm:$0xff] %v1708_v47  ;;  %v1836_v47 = vld [vmem:[%s4996_s6 + $0x19438] sm:$0xff] }
 0x300   : > { %1711 = vst [vmem:[%s5001_s7 + $0x1780] sm:$0xff] %v1710_v48  ;;  %v1838_v48 = vld [vmem:[%s4996_s6 + $0x19800] sm:$0xff] }
 0x301   : > { %1713 = vst [vmem:[%s5001_s7 + $0x1788] sm:$0xff] %v1712_v49  ;;  %v1840_v49 = vld [vmem:[%s4996_s6 + $0x19808] sm:$0xff] }
 0x302   : > { %1715 = vst [vmem:[%s5001_s7 + $0x1790] sm:$0xff] %v1714_v50  ;;  %v1842_v50 = vld [vmem:[%s4996_s6 + $0x19810] sm:$0xff] }
 0x303   : > { %1717 = vst [vmem:[%s5001_s7 + $0x1798] sm:$0xff] %v1716_v51  ;;  %v1844_v51 = vld [vmem:[%s4996_s6 + $0x19818] sm:$0xff] }
 0x304   : > { %1719 = vst [vmem:[%s5001_s7 + $0x17a0] sm:$0xff] %v1718_v52  ;;  %v1846_v52 = vld [vmem:[%s4996_s6 + $0x19820] sm:$0xff] }
 0x305   : > { %1721 = vst [vmem:[%s5001_s7 + $0x17a8] sm:$0xff] %v1720_v53  ;;  %v1848_v53 = vld [vmem:[%s4996_s6 + $0x19828] sm:$0xff] }
 0x306   : > { %1723 = vst [vmem:[%s5001_s7 + $0x17b0] sm:$0xff] %v1722_v54  ;;  %v1850_v54 = vld [vmem:[%s4996_s6 + $0x19830] sm:$0xff] }
 0x307   : > { %1725 = vst [vmem:[%s5001_s7 + $0x17b8] sm:$0xff] %v1724_v55  ;;  %v1852_v55 = vld [vmem:[%s4996_s6 + $0x19838] sm:$0xff] }
 0x308   : > { %1727 = vst [vmem:[%s5001_s7 + $0x17c0] sm:$0xff] %v1726_v56  ;;  %v1854_v56 = vld [vmem:[%s4996_s6 + $0x19c00] sm:$0xff] }
 0x309   : > { %1729 = vst [vmem:[%s5001_s7 + $0x17c8] sm:$0xff] %v1728_v57  ;;  %v1856_v57 = vld [vmem:[%s4996_s6 + $0x19c08] sm:$0xff] }
 0x30a   : > { %1731 = vst [vmem:[%s5001_s7 + $0x17d0] sm:$0xff] %v1730_v58  ;;  %v1858_v58 = vld [vmem:[%s4996_s6 + $0x19c10] sm:$0xff] }
 0x30b   : > { %1733 = vst [vmem:[%s5001_s7 + $0x17d8] sm:$0xff] %v1732_v59  ;;  %v1860_v59 = vld [vmem:[%s4996_s6 + $0x19c18] sm:$0xff] }
 0x30c   : > { %1735 = vst [vmem:[%s5001_s7 + $0x17e0] sm:$0xff] %v1734_v60  ;;  %v1862_v60 = vld [vmem:[%s4996_s6 + $0x19c20] sm:$0xff] }
 0x30d   : > { %1737 = vst [vmem:[%s5001_s7 + $0x17e8] sm:$0xff] %v1736_v61  ;;  %v1864_v61 = vld [vmem:[%s4996_s6 + $0x19c28] sm:$0xff] }
 0x30e   : > { %1739 = vst [vmem:[%s5001_s7 + $0x17f0] sm:$0xff] %v1738_v62  ;;  %v1866_v62 = vld [vmem:[%s4996_s6 + $0x19c30] sm:$0xff] }
 0x30f   : > { %1741 = vst [vmem:[%s5001_s7 + $0x17f8] sm:$0xff] %v1740_v63  ;;  %v1868_v63 = vld [vmem:[%s4996_s6 + $0x19c38] sm:$0xff] }
 0x310   : > { %1743 = vst [vmem:[%s5001_s7 + $0x1800] sm:$0xff] %v1742_v0  ;;  %v1870_v0 = vld [vmem:[%s4996_s6 + $0x1a000] sm:$0xff] }
 0x311   : > { %1745 = vst [vmem:[%s5001_s7 + $0x1808] sm:$0xff] %v1744_v1  ;;  %v1872_v1 = vld [vmem:[%s4996_s6 + $0x1a008] sm:$0xff] }
 0x312   : > { %1747 = vst [vmem:[%s5001_s7 + $0x1810] sm:$0xff] %v1746_v2  ;;  %v1874_v2 = vld [vmem:[%s4996_s6 + $0x1a010] sm:$0xff] }
 0x313   : > { %1749 = vst [vmem:[%s5001_s7 + $0x1818] sm:$0xff] %v1748_v3  ;;  %v1876_v3 = vld [vmem:[%s4996_s6 + $0x1a018] sm:$0xff] }
 0x314   : > { %1751 = vst [vmem:[%s5001_s7 + $0x1820] sm:$0xff] %v1750_v4  ;;  %v1878_v4 = vld [vmem:[%s4996_s6 + $0x1a020] sm:$0xff] }
 0x315   : > { %1753 = vst [vmem:[%s5001_s7 + $0x1828] sm:$0xff] %v1752_v5  ;;  %v1880_v5 = vld [vmem:[%s4996_s6 + $0x1a028] sm:$0xff] }
 0x316   : > { %1755 = vst [vmem:[%s5001_s7 + $0x1830] sm:$0xff] %v1754_v6  ;;  %v1882_v6 = vld [vmem:[%s4996_s6 + $0x1a030] sm:$0xff] }
 0x317   : > { %1757 = vst [vmem:[%s5001_s7 + $0x1838] sm:$0xff] %v1756_v7  ;;  %v1884_v7 = vld [vmem:[%s4996_s6 + $0x1a038] sm:$0xff] }
 0x318   : > { %1759 = vst [vmem:[%s5001_s7 + $0x1840] sm:$0xff] %v1758_v8  ;;  %v1886_v8 = vld [vmem:[%s4996_s6 + $0x1a400] sm:$0xff] }
 0x319   : > { %1761 = vst [vmem:[%s5001_s7 + $0x1848] sm:$0xff] %v1760_v9  ;;  %v1888_v9 = vld [vmem:[%s4996_s6 + $0x1a408] sm:$0xff] }
 0x31a   : > { %1763 = vst [vmem:[%s5001_s7 + $0x1850] sm:$0xff] %v1762_v10  ;;  %v1890_v10 = vld [vmem:[%s4996_s6 + $0x1a410] sm:$0xff] }
 0x31b   : > { %1765 = vst [vmem:[%s5001_s7 + $0x1858] sm:$0xff] %v1764_v11  ;;  %v1892_v11 = vld [vmem:[%s4996_s6 + $0x1a418] sm:$0xff] }
 0x31c   : > { %1767 = vst [vmem:[%s5001_s7 + $0x1860] sm:$0xff] %v1766_v12  ;;  %v1894_v12 = vld [vmem:[%s4996_s6 + $0x1a420] sm:$0xff] }
 0x31d   : > { %1769 = vst [vmem:[%s5001_s7 + $0x1868] sm:$0xff] %v1768_v13  ;;  %v1896_v13 = vld [vmem:[%s4996_s6 + $0x1a428] sm:$0xff] }
 0x31e   : > { %1771 = vst [vmem:[%s5001_s7 + $0x1870] sm:$0xff] %v1770_v14  ;;  %v1898_v14 = vld [vmem:[%s4996_s6 + $0x1a430] sm:$0xff] }
 0x31f   : > { %1773 = vst [vmem:[%s5001_s7 + $0x1878] sm:$0xff] %v1772_v15  ;;  %v1900_v15 = vld [vmem:[%s4996_s6 + $0x1a438] sm:$0xff] }
 0x320   : > { %1775 = vst [vmem:[%s5001_s7 + $0x1880] sm:$0xff] %v1774_v16  ;;  %v1902_v16 = vld [vmem:[%s4996_s6 + $0x1a800] sm:$0xff] }
 0x321   : > { %1777 = vst [vmem:[%s5001_s7 + $0x1888] sm:$0xff] %v1776_v17  ;;  %v1904_v17 = vld [vmem:[%s4996_s6 + $0x1a808] sm:$0xff] }
 0x322   : > { %1779 = vst [vmem:[%s5001_s7 + $0x1890] sm:$0xff] %v1778_v18  ;;  %v1906_v18 = vld [vmem:[%s4996_s6 + $0x1a810] sm:$0xff] }
 0x323   : > { %1781 = vst [vmem:[%s5001_s7 + $0x1898] sm:$0xff] %v1780_v19  ;;  %v1908_v19 = vld [vmem:[%s4996_s6 + $0x1a818] sm:$0xff] }
 0x324   : > { %1783 = vst [vmem:[%s5001_s7 + $0x18a0] sm:$0xff] %v1782_v20  ;;  %v1910_v20 = vld [vmem:[%s4996_s6 + $0x1a820] sm:$0xff] }
 0x325   : > { %1785 = vst [vmem:[%s5001_s7 + $0x18a8] sm:$0xff] %v1784_v21  ;;  %v1912_v21 = vld [vmem:[%s4996_s6 + $0x1a828] sm:$0xff] }
 0x326   : > { %1787 = vst [vmem:[%s5001_s7 + $0x18b0] sm:$0xff] %v1786_v22  ;;  %v1914_v22 = vld [vmem:[%s4996_s6 + $0x1a830] sm:$0xff] }
 0x327   : > { %1789 = vst [vmem:[%s5001_s7 + $0x18b8] sm:$0xff] %v1788_v23  ;;  %v1916_v23 = vld [vmem:[%s4996_s6 + $0x1a838] sm:$0xff] }
 0x328   : > { %1791 = vst [vmem:[%s5001_s7 + $0x18c0] sm:$0xff] %v1790_v24  ;;  %v1918_v24 = vld [vmem:[%s4996_s6 + $0x1ac00] sm:$0xff] }
 0x329   : > { %1793 = vst [vmem:[%s5001_s7 + $0x18c8] sm:$0xff] %v1792_v25  ;;  %v1920_v25 = vld [vmem:[%s4996_s6 + $0x1ac08] sm:$0xff] }
 0x32a   : > { %1795 = vst [vmem:[%s5001_s7 + $0x18d0] sm:$0xff] %v1794_v26  ;;  %v1922_v26 = vld [vmem:[%s4996_s6 + $0x1ac10] sm:$0xff] }
 0x32b   : > { %1797 = vst [vmem:[%s5001_s7 + $0x18d8] sm:$0xff] %v1796_v27  ;;  %v1924_v27 = vld [vmem:[%s4996_s6 + $0x1ac18] sm:$0xff] }
 0x32c   : > { %1799 = vst [vmem:[%s5001_s7 + $0x18e0] sm:$0xff] %v1798_v28  ;;  %v1926_v28 = vld [vmem:[%s4996_s6 + $0x1ac20] sm:$0xff] }
 0x32d   : > { %1801 = vst [vmem:[%s5001_s7 + $0x18e8] sm:$0xff] %v1800_v29  ;;  %v1928_v29 = vld [vmem:[%s4996_s6 + $0x1ac28] sm:$0xff] }
 0x32e   : > { %1803 = vst [vmem:[%s5001_s7 + $0x18f0] sm:$0xff] %v1802_v30  ;;  %v1930_v30 = vld [vmem:[%s4996_s6 + $0x1ac30] sm:$0xff] }
 0x32f   : > { %1805 = vst [vmem:[%s5001_s7 + $0x18f8] sm:$0xff] %v1804_v31  ;;  %v1932_v31 = vld [vmem:[%s4996_s6 + $0x1ac38] sm:$0xff] }
 0x330   : > { %1807 = vst [vmem:[%s5001_s7 + $0x1900] sm:$0xff] %v1806_v32  ;;  %v1934_v32 = vld [vmem:[%s4996_s6 + $0x1b000] sm:$0xff] }
 0x331   : > { %1809 = vst [vmem:[%s5001_s7 + $0x1908] sm:$0xff] %v1808_v33  ;;  %v1936_v33 = vld [vmem:[%s4996_s6 + $0x1b008] sm:$0xff] }
 0x332   : > { %1811 = vst [vmem:[%s5001_s7 + $0x1910] sm:$0xff] %v1810_v34  ;;  %v1938_v34 = vld [vmem:[%s4996_s6 + $0x1b010] sm:$0xff] }
 0x333   : > { %1813 = vst [vmem:[%s5001_s7 + $0x1918] sm:$0xff] %v1812_v35  ;;  %v1940_v35 = vld [vmem:[%s4996_s6 + $0x1b018] sm:$0xff] }
 0x334   : > { %1815 = vst [vmem:[%s5001_s7 + $0x1920] sm:$0xff] %v1814_v36  ;;  %v1942_v36 = vld [vmem:[%s4996_s6 + $0x1b020] sm:$0xff] }
 0x335   : > { %1817 = vst [vmem:[%s5001_s7 + $0x1928] sm:$0xff] %v1816_v37  ;;  %v1944_v37 = vld [vmem:[%s4996_s6 + $0x1b028] sm:$0xff] }
 0x336   : > { %1819 = vst [vmem:[%s5001_s7 + $0x1930] sm:$0xff] %v1818_v38  ;;  %v1946_v38 = vld [vmem:[%s4996_s6 + $0x1b030] sm:$0xff] }
 0x337   : > { %1821 = vst [vmem:[%s5001_s7 + $0x1938] sm:$0xff] %v1820_v39  ;;  %v1948_v39 = vld [vmem:[%s4996_s6 + $0x1b038] sm:$0xff] }
 0x338   : > { %1823 = vst [vmem:[%s5001_s7 + $0x1940] sm:$0xff] %v1822_v40  ;;  %v1950_v40 = vld [vmem:[%s4996_s6 + $0x1b400] sm:$0xff] }
 0x339   : > { %1825 = vst [vmem:[%s5001_s7 + $0x1948] sm:$0xff] %v1824_v41  ;;  %v1952_v41 = vld [vmem:[%s4996_s6 + $0x1b408] sm:$0xff] }
 0x33a   : > { %1827 = vst [vmem:[%s5001_s7 + $0x1950] sm:$0xff] %v1826_v42  ;;  %v1954_v42 = vld [vmem:[%s4996_s6 + $0x1b410] sm:$0xff] }
 0x33b   : > { %1829 = vst [vmem:[%s5001_s7 + $0x1958] sm:$0xff] %v1828_v43  ;;  %v1956_v43 = vld [vmem:[%s4996_s6 + $0x1b418] sm:$0xff] }
 0x33c   : > { %1831 = vst [vmem:[%s5001_s7 + $0x1960] sm:$0xff] %v1830_v44  ;;  %v1958_v44 = vld [vmem:[%s4996_s6 + $0x1b420] sm:$0xff] }
 0x33d   : > { %1833 = vst [vmem:[%s5001_s7 + $0x1968] sm:$0xff] %v1832_v45  ;;  %v1960_v45 = vld [vmem:[%s4996_s6 + $0x1b428] sm:$0xff] }
 0x33e   : > { %1835 = vst [vmem:[%s5001_s7 + $0x1970] sm:$0xff] %v1834_v46  ;;  %v1962_v46 = vld [vmem:[%s4996_s6 + $0x1b430] sm:$0xff] }
 0x33f   : > { %1837 = vst [vmem:[%s5001_s7 + $0x1978] sm:$0xff] %v1836_v47  ;;  %v1964_v47 = vld [vmem:[%s4996_s6 + $0x1b438] sm:$0xff] }
 0x340   : > { %1839 = vst [vmem:[%s5001_s7 + $0x1980] sm:$0xff] %v1838_v48  ;;  %v1966_v48 = vld [vmem:[%s4996_s6 + $0x1b800] sm:$0xff] }
 0x341   : > { %1841 = vst [vmem:[%s5001_s7 + $0x1988] sm:$0xff] %v1840_v49  ;;  %v1968_v49 = vld [vmem:[%s4996_s6 + $0x1b808] sm:$0xff] }
 0x342   : > { %1843 = vst [vmem:[%s5001_s7 + $0x1990] sm:$0xff] %v1842_v50  ;;  %v1970_v50 = vld [vmem:[%s4996_s6 + $0x1b810] sm:$0xff] }
 0x343   : > { %1845 = vst [vmem:[%s5001_s7 + $0x1998] sm:$0xff] %v1844_v51  ;;  %v1972_v51 = vld [vmem:[%s4996_s6 + $0x1b818] sm:$0xff] }
 0x344   : > { %1847 = vst [vmem:[%s5001_s7 + $0x19a0] sm:$0xff] %v1846_v52  ;;  %v1974_v52 = vld [vmem:[%s4996_s6 + $0x1b820] sm:$0xff] }
 0x345   : > { %1849 = vst [vmem:[%s5001_s7 + $0x19a8] sm:$0xff] %v1848_v53  ;;  %v1976_v53 = vld [vmem:[%s4996_s6 + $0x1b828] sm:$0xff] }
 0x346   : > { %1851 = vst [vmem:[%s5001_s7 + $0x19b0] sm:$0xff] %v1850_v54  ;;  %v1978_v54 = vld [vmem:[%s4996_s6 + $0x1b830] sm:$0xff] }
 0x347   : > { %1853 = vst [vmem:[%s5001_s7 + $0x19b8] sm:$0xff] %v1852_v55  ;;  %v1980_v55 = vld [vmem:[%s4996_s6 + $0x1b838] sm:$0xff] }
 0x348   : > { %1855 = vst [vmem:[%s5001_s7 + $0x19c0] sm:$0xff] %v1854_v56  ;;  %v1982_v56 = vld [vmem:[%s4996_s6 + $0x1bc00] sm:$0xff] }
 0x349   : > { %1857 = vst [vmem:[%s5001_s7 + $0x19c8] sm:$0xff] %v1856_v57  ;;  %v1984_v57 = vld [vmem:[%s4996_s6 + $0x1bc08] sm:$0xff] }
 0x34a   : > { %1859 = vst [vmem:[%s5001_s7 + $0x19d0] sm:$0xff] %v1858_v58  ;;  %v1986_v58 = vld [vmem:[%s4996_s6 + $0x1bc10] sm:$0xff] }
 0x34b   : > { %1861 = vst [vmem:[%s5001_s7 + $0x19d8] sm:$0xff] %v1860_v59  ;;  %v1988_v59 = vld [vmem:[%s4996_s6 + $0x1bc18] sm:$0xff] }
 0x34c   : > { %1863 = vst [vmem:[%s5001_s7 + $0x19e0] sm:$0xff] %v1862_v60  ;;  %v1990_v60 = vld [vmem:[%s4996_s6 + $0x1bc20] sm:$0xff] }
 0x34d   : > { %1865 = vst [vmem:[%s5001_s7 + $0x19e8] sm:$0xff] %v1864_v61  ;;  %v1992_v61 = vld [vmem:[%s4996_s6 + $0x1bc28] sm:$0xff] }
 0x34e   : > { %1867 = vst [vmem:[%s5001_s7 + $0x19f0] sm:$0xff] %v1866_v62  ;;  %v1994_v62 = vld [vmem:[%s4996_s6 + $0x1bc30] sm:$0xff] }
 0x34f   : > { %1869 = vst [vmem:[%s5001_s7 + $0x19f8] sm:$0xff] %v1868_v63  ;;  %v1996_v63 = vld [vmem:[%s4996_s6 + $0x1bc38] sm:$0xff] }
 0x350   : > { %1871 = vst [vmem:[%s5001_s7 + $0x1a00] sm:$0xff] %v1870_v0  ;;  %v1998_v0 = vld [vmem:[%s4996_s6 + $0x1c000] sm:$0xff] }
 0x351   : > { %1873 = vst [vmem:[%s5001_s7 + $0x1a08] sm:$0xff] %v1872_v1  ;;  %v2000_v1 = vld [vmem:[%s4996_s6 + $0x1c008] sm:$0xff] }
 0x352   : > { %1875 = vst [vmem:[%s5001_s7 + $0x1a10] sm:$0xff] %v1874_v2  ;;  %v2002_v2 = vld [vmem:[%s4996_s6 + $0x1c010] sm:$0xff] }
 0x353   : > { %1877 = vst [vmem:[%s5001_s7 + $0x1a18] sm:$0xff] %v1876_v3  ;;  %v2004_v3 = vld [vmem:[%s4996_s6 + $0x1c018] sm:$0xff] }
 0x354   : > { %1879 = vst [vmem:[%s5001_s7 + $0x1a20] sm:$0xff] %v1878_v4  ;;  %v2006_v4 = vld [vmem:[%s4996_s6 + $0x1c020] sm:$0xff] }
 0x355   : > { %1881 = vst [vmem:[%s5001_s7 + $0x1a28] sm:$0xff] %v1880_v5  ;;  %v2008_v5 = vld [vmem:[%s4996_s6 + $0x1c028] sm:$0xff] }
 0x356   : > { %1883 = vst [vmem:[%s5001_s7 + $0x1a30] sm:$0xff] %v1882_v6  ;;  %v2010_v6 = vld [vmem:[%s4996_s6 + $0x1c030] sm:$0xff] }
 0x357   : > { %1885 = vst [vmem:[%s5001_s7 + $0x1a38] sm:$0xff] %v1884_v7  ;;  %v2012_v7 = vld [vmem:[%s4996_s6 + $0x1c038] sm:$0xff] }
 0x358   : > { %1887 = vst [vmem:[%s5001_s7 + $0x1a40] sm:$0xff] %v1886_v8  ;;  %v2014_v8 = vld [vmem:[%s4996_s6 + $0x1c400] sm:$0xff] }
 0x359   : > { %1889 = vst [vmem:[%s5001_s7 + $0x1a48] sm:$0xff] %v1888_v9  ;;  %v2016_v9 = vld [vmem:[%s4996_s6 + $0x1c408] sm:$0xff] }
 0x35a   : > { %1891 = vst [vmem:[%s5001_s7 + $0x1a50] sm:$0xff] %v1890_v10  ;;  %v2018_v10 = vld [vmem:[%s4996_s6 + $0x1c410] sm:$0xff] }
 0x35b   : > { %1893 = vst [vmem:[%s5001_s7 + $0x1a58] sm:$0xff] %v1892_v11  ;;  %v2020_v11 = vld [vmem:[%s4996_s6 + $0x1c418] sm:$0xff] }
 0x35c   : > { %1895 = vst [vmem:[%s5001_s7 + $0x1a60] sm:$0xff] %v1894_v12  ;;  %v2022_v12 = vld [vmem:[%s4996_s6 + $0x1c420] sm:$0xff] }
 0x35d   : > { %1897 = vst [vmem:[%s5001_s7 + $0x1a68] sm:$0xff] %v1896_v13  ;;  %v2024_v13 = vld [vmem:[%s4996_s6 + $0x1c428] sm:$0xff] }
 0x35e   : > { %1899 = vst [vmem:[%s5001_s7 + $0x1a70] sm:$0xff] %v1898_v14  ;;  %v2026_v14 = vld [vmem:[%s4996_s6 + $0x1c430] sm:$0xff] }
 0x35f   : > { %1901 = vst [vmem:[%s5001_s7 + $0x1a78] sm:$0xff] %v1900_v15  ;;  %v2028_v15 = vld [vmem:[%s4996_s6 + $0x1c438] sm:$0xff] }
 0x360   : > { %1903 = vst [vmem:[%s5001_s7 + $0x1a80] sm:$0xff] %v1902_v16  ;;  %v2030_v16 = vld [vmem:[%s4996_s6 + $0x1c800] sm:$0xff] }
 0x361   : > { %1905 = vst [vmem:[%s5001_s7 + $0x1a88] sm:$0xff] %v1904_v17  ;;  %v2032_v17 = vld [vmem:[%s4996_s6 + $0x1c808] sm:$0xff] }
 0x362   : > { %1907 = vst [vmem:[%s5001_s7 + $0x1a90] sm:$0xff] %v1906_v18  ;;  %v2034_v18 = vld [vmem:[%s4996_s6 + $0x1c810] sm:$0xff] }
 0x363   : > { %1909 = vst [vmem:[%s5001_s7 + $0x1a98] sm:$0xff] %v1908_v19  ;;  %v2036_v19 = vld [vmem:[%s4996_s6 + $0x1c818] sm:$0xff] }
 0x364   : > { %1911 = vst [vmem:[%s5001_s7 + $0x1aa0] sm:$0xff] %v1910_v20  ;;  %v2038_v20 = vld [vmem:[%s4996_s6 + $0x1c820] sm:$0xff] }
 0x365   : > { %1913 = vst [vmem:[%s5001_s7 + $0x1aa8] sm:$0xff] %v1912_v21  ;;  %v2040_v21 = vld [vmem:[%s4996_s6 + $0x1c828] sm:$0xff] }
 0x366   : > { %1915 = vst [vmem:[%s5001_s7 + $0x1ab0] sm:$0xff] %v1914_v22  ;;  %v2042_v22 = vld [vmem:[%s4996_s6 + $0x1c830] sm:$0xff] }
 0x367   : > { %1917 = vst [vmem:[%s5001_s7 + $0x1ab8] sm:$0xff] %v1916_v23  ;;  %v2044_v23 = vld [vmem:[%s4996_s6 + $0x1c838] sm:$0xff] }
 0x368   : > { %1919 = vst [vmem:[%s5001_s7 + $0x1ac0] sm:$0xff] %v1918_v24  ;;  %v2046_v24 = vld [vmem:[%s4996_s6 + $0x1cc00] sm:$0xff] }
 0x369   : > { %1921 = vst [vmem:[%s5001_s7 + $0x1ac8] sm:$0xff] %v1920_v25  ;;  %v2048_v25 = vld [vmem:[%s4996_s6 + $0x1cc08] sm:$0xff] }
 0x36a   : > { %1923 = vst [vmem:[%s5001_s7 + $0x1ad0] sm:$0xff] %v1922_v26  ;;  %v2050_v26 = vld [vmem:[%s4996_s6 + $0x1cc10] sm:$0xff] }
 0x36b   : > { %1925 = vst [vmem:[%s5001_s7 + $0x1ad8] sm:$0xff] %v1924_v27  ;;  %v2052_v27 = vld [vmem:[%s4996_s6 + $0x1cc18] sm:$0xff] }
 0x36c   : > { %1927 = vst [vmem:[%s5001_s7 + $0x1ae0] sm:$0xff] %v1926_v28  ;;  %v2054_v28 = vld [vmem:[%s4996_s6 + $0x1cc20] sm:$0xff] }
 0x36d   : > { %1929 = vst [vmem:[%s5001_s7 + $0x1ae8] sm:$0xff] %v1928_v29  ;;  %v2056_v29 = vld [vmem:[%s4996_s6 + $0x1cc28] sm:$0xff] }
 0x36e   : > { %1931 = vst [vmem:[%s5001_s7 + $0x1af0] sm:$0xff] %v1930_v30  ;;  %v2058_v30 = vld [vmem:[%s4996_s6 + $0x1cc30] sm:$0xff] }
 0x36f   : > { %1933 = vst [vmem:[%s5001_s7 + $0x1af8] sm:$0xff] %v1932_v31  ;;  %v2060_v31 = vld [vmem:[%s4996_s6 + $0x1cc38] sm:$0xff] }
 0x370   : > { %1935 = vst [vmem:[%s5001_s7 + $0x1b00] sm:$0xff] %v1934_v32  ;;  %v2062_v32 = vld [vmem:[%s4996_s6 + $0x1d000] sm:$0xff] }
 0x371   : > { %1937 = vst [vmem:[%s5001_s7 + $0x1b08] sm:$0xff] %v1936_v33  ;;  %v2064_v33 = vld [vmem:[%s4996_s6 + $0x1d008] sm:$0xff] }
 0x372   : > { %1939 = vst [vmem:[%s5001_s7 + $0x1b10] sm:$0xff] %v1938_v34  ;;  %v2066_v34 = vld [vmem:[%s4996_s6 + $0x1d010] sm:$0xff] }
 0x373   : > { %1941 = vst [vmem:[%s5001_s7 + $0x1b18] sm:$0xff] %v1940_v35  ;;  %v2068_v35 = vld [vmem:[%s4996_s6 + $0x1d018] sm:$0xff] }
 0x374   : > { %1943 = vst [vmem:[%s5001_s7 + $0x1b20] sm:$0xff] %v1942_v36  ;;  %v2070_v36 = vld [vmem:[%s4996_s6 + $0x1d020] sm:$0xff] }
 0x375   : > { %1945 = vst [vmem:[%s5001_s7 + $0x1b28] sm:$0xff] %v1944_v37  ;;  %v2072_v37 = vld [vmem:[%s4996_s6 + $0x1d028] sm:$0xff] }
 0x376   : > { %1947 = vst [vmem:[%s5001_s7 + $0x1b30] sm:$0xff] %v1946_v38  ;;  %v2074_v38 = vld [vmem:[%s4996_s6 + $0x1d030] sm:$0xff] }
 0x377   : > { %1949 = vst [vmem:[%s5001_s7 + $0x1b38] sm:$0xff] %v1948_v39  ;;  %v2076_v39 = vld [vmem:[%s4996_s6 + $0x1d038] sm:$0xff] }
 0x378   : > { %1951 = vst [vmem:[%s5001_s7 + $0x1b40] sm:$0xff] %v1950_v40  ;;  %v2078_v40 = vld [vmem:[%s4996_s6 + $0x1d400] sm:$0xff] }
 0x379   : > { %1953 = vst [vmem:[%s5001_s7 + $0x1b48] sm:$0xff] %v1952_v41  ;;  %v2080_v41 = vld [vmem:[%s4996_s6 + $0x1d408] sm:$0xff] }
 0x37a   : > { %1955 = vst [vmem:[%s5001_s7 + $0x1b50] sm:$0xff] %v1954_v42  ;;  %v2082_v42 = vld [vmem:[%s4996_s6 + $0x1d410] sm:$0xff] }
 0x37b   : > { %1957 = vst [vmem:[%s5001_s7 + $0x1b58] sm:$0xff] %v1956_v43  ;;  %v2084_v43 = vld [vmem:[%s4996_s6 + $0x1d418] sm:$0xff] }
 0x37c   : > { %1959 = vst [vmem:[%s5001_s7 + $0x1b60] sm:$0xff] %v1958_v44  ;;  %v2086_v44 = vld [vmem:[%s4996_s6 + $0x1d420] sm:$0xff] }
 0x37d   : > { %1961 = vst [vmem:[%s5001_s7 + $0x1b68] sm:$0xff] %v1960_v45  ;;  %v2088_v45 = vld [vmem:[%s4996_s6 + $0x1d428] sm:$0xff] }
 0x37e   : > { %1963 = vst [vmem:[%s5001_s7 + $0x1b70] sm:$0xff] %v1962_v46  ;;  %v2090_v46 = vld [vmem:[%s4996_s6 + $0x1d430] sm:$0xff] }
 0x37f   : > { %1965 = vst [vmem:[%s5001_s7 + $0x1b78] sm:$0xff] %v1964_v47  ;;  %v2092_v47 = vld [vmem:[%s4996_s6 + $0x1d438] sm:$0xff] }
 0x380   : > { %1967 = vst [vmem:[%s5001_s7 + $0x1b80] sm:$0xff] %v1966_v48  ;;  %v2094_v48 = vld [vmem:[%s4996_s6 + $0x1d800] sm:$0xff] }
 0x381   : > { %1969 = vst [vmem:[%s5001_s7 + $0x1b88] sm:$0xff] %v1968_v49  ;;  %v2096_v49 = vld [vmem:[%s4996_s6 + $0x1d808] sm:$0xff] }
 0x382   : > { %1971 = vst [vmem:[%s5001_s7 + $0x1b90] sm:$0xff] %v1970_v50  ;;  %v2098_v50 = vld [vmem:[%s4996_s6 + $0x1d810] sm:$0xff] }
 0x383   : > { %1973 = vst [vmem:[%s5001_s7 + $0x1b98] sm:$0xff] %v1972_v51  ;;  %v2100_v51 = vld [vmem:[%s4996_s6 + $0x1d818] sm:$0xff] }
 0x384   : > { %1975 = vst [vmem:[%s5001_s7 + $0x1ba0] sm:$0xff] %v1974_v52  ;;  %v2102_v52 = vld [vmem:[%s4996_s6 + $0x1d820] sm:$0xff] }
 0x385   : > { %1977 = vst [vmem:[%s5001_s7 + $0x1ba8] sm:$0xff] %v1976_v53  ;;  %v2104_v53 = vld [vmem:[%s4996_s6 + $0x1d828] sm:$0xff] }
 0x386   : > { %1979 = vst [vmem:[%s5001_s7 + $0x1bb0] sm:$0xff] %v1978_v54  ;;  %v2106_v54 = vld [vmem:[%s4996_s6 + $0x1d830] sm:$0xff] }
 0x387   : > { %1981 = vst [vmem:[%s5001_s7 + $0x1bb8] sm:$0xff] %v1980_v55  ;;  %v2108_v55 = vld [vmem:[%s4996_s6 + $0x1d838] sm:$0xff] }
 0x388   : > { %1983 = vst [vmem:[%s5001_s7 + $0x1bc0] sm:$0xff] %v1982_v56  ;;  %v2110_v56 = vld [vmem:[%s4996_s6 + $0x1dc00] sm:$0xff] }
 0x389   : > { %1985 = vst [vmem:[%s5001_s7 + $0x1bc8] sm:$0xff] %v1984_v57  ;;  %v2112_v57 = vld [vmem:[%s4996_s6 + $0x1dc08] sm:$0xff] }
 0x38a   : > { %1987 = vst [vmem:[%s5001_s7 + $0x1bd0] sm:$0xff] %v1986_v58  ;;  %v2114_v58 = vld [vmem:[%s4996_s6 + $0x1dc10] sm:$0xff] }
 0x38b   : > { %1989 = vst [vmem:[%s5001_s7 + $0x1bd8] sm:$0xff] %v1988_v59  ;;  %v2116_v59 = vld [vmem:[%s4996_s6 + $0x1dc18] sm:$0xff] }
 0x38c   : > { %1991 = vst [vmem:[%s5001_s7 + $0x1be0] sm:$0xff] %v1990_v60  ;;  %v2118_v60 = vld [vmem:[%s4996_s6 + $0x1dc20] sm:$0xff] }
 0x38d   : > { %1993 = vst [vmem:[%s5001_s7 + $0x1be8] sm:$0xff] %v1992_v61  ;;  %v2120_v61 = vld [vmem:[%s4996_s6 + $0x1dc28] sm:$0xff] }
 0x38e   : > { %1995 = vst [vmem:[%s5001_s7 + $0x1bf0] sm:$0xff] %v1994_v62  ;;  %v2122_v62 = vld [vmem:[%s4996_s6 + $0x1dc30] sm:$0xff] }
 0x38f   : > { %1997 = vst [vmem:[%s5001_s7 + $0x1bf8] sm:$0xff] %v1996_v63  ;;  %v2124_v63 = vld [vmem:[%s4996_s6 + $0x1dc38] sm:$0xff] }
 0x390   : > { %1999 = vst [vmem:[%s5001_s7 + $0x1c00] sm:$0xff] %v1998_v0  ;;  %v2126_v0 = vld [vmem:[%s4996_s6 + $0x1e000] sm:$0xff] }
 0x391   : > { %2001 = vst [vmem:[%s5001_s7 + $0x1c08] sm:$0xff] %v2000_v1  ;;  %v2128_v1 = vld [vmem:[%s4996_s6 + $0x1e008] sm:$0xff] }
 0x392   : > { %2003 = vst [vmem:[%s5001_s7 + $0x1c10] sm:$0xff] %v2002_v2  ;;  %v2130_v2 = vld [vmem:[%s4996_s6 + $0x1e010] sm:$0xff] }
 0x393   : > { %2005 = vst [vmem:[%s5001_s7 + $0x1c18] sm:$0xff] %v2004_v3  ;;  %v2132_v3 = vld [vmem:[%s4996_s6 + $0x1e018] sm:$0xff] }
 0x394   : > { %2007 = vst [vmem:[%s5001_s7 + $0x1c20] sm:$0xff] %v2006_v4  ;;  %v2134_v4 = vld [vmem:[%s4996_s6 + $0x1e020] sm:$0xff] }
 0x395   : > { %2009 = vst [vmem:[%s5001_s7 + $0x1c28] sm:$0xff] %v2008_v5  ;;  %v2136_v5 = vld [vmem:[%s4996_s6 + $0x1e028] sm:$0xff] }
 0x396   : > { %2011 = vst [vmem:[%s5001_s7 + $0x1c30] sm:$0xff] %v2010_v6  ;;  %v2138_v6 = vld [vmem:[%s4996_s6 + $0x1e030] sm:$0xff] }
 0x397   : > { %2013 = vst [vmem:[%s5001_s7 + $0x1c38] sm:$0xff] %v2012_v7  ;;  %v2140_v7 = vld [vmem:[%s4996_s6 + $0x1e038] sm:$0xff] }
 0x398   : > { %2015 = vst [vmem:[%s5001_s7 + $0x1c40] sm:$0xff] %v2014_v8  ;;  %v2142_v8 = vld [vmem:[%s4996_s6 + $0x1e400] sm:$0xff] }
 0x399   : > { %2017 = vst [vmem:[%s5001_s7 + $0x1c48] sm:$0xff] %v2016_v9  ;;  %v2144_v9 = vld [vmem:[%s4996_s6 + $0x1e408] sm:$0xff] }
 0x39a   : > { %2019 = vst [vmem:[%s5001_s7 + $0x1c50] sm:$0xff] %v2018_v10  ;;  %v2146_v10 = vld [vmem:[%s4996_s6 + $0x1e410] sm:$0xff] }
 0x39b   : > { %2021 = vst [vmem:[%s5001_s7 + $0x1c58] sm:$0xff] %v2020_v11  ;;  %v2148_v11 = vld [vmem:[%s4996_s6 + $0x1e418] sm:$0xff] }
 0x39c   : > { %2023 = vst [vmem:[%s5001_s7 + $0x1c60] sm:$0xff] %v2022_v12  ;;  %v2150_v12 = vld [vmem:[%s4996_s6 + $0x1e420] sm:$0xff] }
 0x39d   : > { %2025 = vst [vmem:[%s5001_s7 + $0x1c68] sm:$0xff] %v2024_v13  ;;  %v2152_v13 = vld [vmem:[%s4996_s6 + $0x1e428] sm:$0xff] }
 0x39e   : > { %2027 = vst [vmem:[%s5001_s7 + $0x1c70] sm:$0xff] %v2026_v14  ;;  %v2154_v14 = vld [vmem:[%s4996_s6 + $0x1e430] sm:$0xff] }
 0x39f   : > { %2029 = vst [vmem:[%s5001_s7 + $0x1c78] sm:$0xff] %v2028_v15  ;;  %v2156_v15 = vld [vmem:[%s4996_s6 + $0x1e438] sm:$0xff] }
 0x3a0   : > { %2031 = vst [vmem:[%s5001_s7 + $0x1c80] sm:$0xff] %v2030_v16  ;;  %v2158_v16 = vld [vmem:[%s4996_s6 + $0x1e800] sm:$0xff] }
 0x3a1   : > { %2033 = vst [vmem:[%s5001_s7 + $0x1c88] sm:$0xff] %v2032_v17  ;;  %v2160_v17 = vld [vmem:[%s4996_s6 + $0x1e808] sm:$0xff] }
 0x3a2   : > { %2035 = vst [vmem:[%s5001_s7 + $0x1c90] sm:$0xff] %v2034_v18  ;;  %v2162_v18 = vld [vmem:[%s4996_s6 + $0x1e810] sm:$0xff] }
 0x3a3   : > { %2037 = vst [vmem:[%s5001_s7 + $0x1c98] sm:$0xff] %v2036_v19  ;;  %v2164_v19 = vld [vmem:[%s4996_s6 + $0x1e818] sm:$0xff] }
 0x3a4   : > { %2039 = vst [vmem:[%s5001_s7 + $0x1ca0] sm:$0xff] %v2038_v20  ;;  %v2166_v20 = vld [vmem:[%s4996_s6 + $0x1e820] sm:$0xff] }
 0x3a5   : > { %2041 = vst [vmem:[%s5001_s7 + $0x1ca8] sm:$0xff] %v2040_v21  ;;  %v2168_v21 = vld [vmem:[%s4996_s6 + $0x1e828] sm:$0xff] }
 0x3a6   : > { %2043 = vst [vmem:[%s5001_s7 + $0x1cb0] sm:$0xff] %v2042_v22  ;;  %v2170_v22 = vld [vmem:[%s4996_s6 + $0x1e830] sm:$0xff] }
 0x3a7   : > { %2045 = vst [vmem:[%s5001_s7 + $0x1cb8] sm:$0xff] %v2044_v23  ;;  %v2172_v23 = vld [vmem:[%s4996_s6 + $0x1e838] sm:$0xff] }
 0x3a8   : > { %2047 = vst [vmem:[%s5001_s7 + $0x1cc0] sm:$0xff] %v2046_v24  ;;  %v2174_v24 = vld [vmem:[%s4996_s6 + $0x1ec00] sm:$0xff] }
 0x3a9   : > { %2049 = vst [vmem:[%s5001_s7 + $0x1cc8] sm:$0xff] %v2048_v25  ;;  %v2176_v25 = vld [vmem:[%s4996_s6 + $0x1ec08] sm:$0xff] }
 0x3aa   : > { %2051 = vst [vmem:[%s5001_s7 + $0x1cd0] sm:$0xff] %v2050_v26  ;;  %v2178_v26 = vld [vmem:[%s4996_s6 + $0x1ec10] sm:$0xff] }
 0x3ab   : > { %2053 = vst [vmem:[%s5001_s7 + $0x1cd8] sm:$0xff] %v2052_v27  ;;  %v2180_v27 = vld [vmem:[%s4996_s6 + $0x1ec18] sm:$0xff] }
 0x3ac   : > { %2055 = vst [vmem:[%s5001_s7 + $0x1ce0] sm:$0xff] %v2054_v28  ;;  %v2182_v28 = vld [vmem:[%s4996_s6 + $0x1ec20] sm:$0xff] }
 0x3ad   : > { %2057 = vst [vmem:[%s5001_s7 + $0x1ce8] sm:$0xff] %v2056_v29  ;;  %v2184_v29 = vld [vmem:[%s4996_s6 + $0x1ec28] sm:$0xff] }
 0x3ae   : > { %2059 = vst [vmem:[%s5001_s7 + $0x1cf0] sm:$0xff] %v2058_v30  ;;  %v2186_v30 = vld [vmem:[%s4996_s6 + $0x1ec30] sm:$0xff] }
 0x3af   : > { %2061 = vst [vmem:[%s5001_s7 + $0x1cf8] sm:$0xff] %v2060_v31  ;;  %v2188_v31 = vld [vmem:[%s4996_s6 + $0x1ec38] sm:$0xff] }
 0x3b0   : > { %2063 = vst [vmem:[%s5001_s7 + $0x1d00] sm:$0xff] %v2062_v32  ;;  %v2190_v32 = vld [vmem:[%s4996_s6 + $0x1f000] sm:$0xff] }
 0x3b1   : > { %2065 = vst [vmem:[%s5001_s7 + $0x1d08] sm:$0xff] %v2064_v33  ;;  %v2192_v33 = vld [vmem:[%s4996_s6 + $0x1f008] sm:$0xff] }
 0x3b2   : > { %2067 = vst [vmem:[%s5001_s7 + $0x1d10] sm:$0xff] %v2066_v34  ;;  %v2194_v34 = vld [vmem:[%s4996_s6 + $0x1f010] sm:$0xff] }
 0x3b3   : > { %2069 = vst [vmem:[%s5001_s7 + $0x1d18] sm:$0xff] %v2068_v35  ;;  %v2196_v35 = vld [vmem:[%s4996_s6 + $0x1f018] sm:$0xff] }
 0x3b4   : > { %2071 = vst [vmem:[%s5001_s7 + $0x1d20] sm:$0xff] %v2070_v36  ;;  %v2198_v36 = vld [vmem:[%s4996_s6 + $0x1f020] sm:$0xff] }
 0x3b5   : > { %2073 = vst [vmem:[%s5001_s7 + $0x1d28] sm:$0xff] %v2072_v37  ;;  %v2200_v37 = vld [vmem:[%s4996_s6 + $0x1f028] sm:$0xff] }
 0x3b6   : > { %2075 = vst [vmem:[%s5001_s7 + $0x1d30] sm:$0xff] %v2074_v38  ;;  %v2202_v38 = vld [vmem:[%s4996_s6 + $0x1f030] sm:$0xff] }
 0x3b7   : > { %2077 = vst [vmem:[%s5001_s7 + $0x1d38] sm:$0xff] %v2076_v39  ;;  %v2204_v39 = vld [vmem:[%s4996_s6 + $0x1f038] sm:$0xff] }
 0x3b8   : > { %2079 = vst [vmem:[%s5001_s7 + $0x1d40] sm:$0xff] %v2078_v40  ;;  %v2206_v40 = vld [vmem:[%s4996_s6 + $0x1f400] sm:$0xff] }
 0x3b9   : > { %2081 = vst [vmem:[%s5001_s7 + $0x1d48] sm:$0xff] %v2080_v41  ;;  %v2208_v41 = vld [vmem:[%s4996_s6 + $0x1f408] sm:$0xff] }
 0x3ba   : > { %2083 = vst [vmem:[%s5001_s7 + $0x1d50] sm:$0xff] %v2082_v42  ;;  %v2210_v42 = vld [vmem:[%s4996_s6 + $0x1f410] sm:$0xff] }
 0x3bb   : > { %2085 = vst [vmem:[%s5001_s7 + $0x1d58] sm:$0xff] %v2084_v43  ;;  %v2212_v43 = vld [vmem:[%s4996_s6 + $0x1f418] sm:$0xff] }
 0x3bc   : > { %2087 = vst [vmem:[%s5001_s7 + $0x1d60] sm:$0xff] %v2086_v44  ;;  %v2214_v44 = vld [vmem:[%s4996_s6 + $0x1f420] sm:$0xff] }
 0x3bd   : > { %2089 = vst [vmem:[%s5001_s7 + $0x1d68] sm:$0xff] %v2088_v45  ;;  %v2216_v45 = vld [vmem:[%s4996_s6 + $0x1f428] sm:$0xff] }
 0x3be   : > { %2091 = vst [vmem:[%s5001_s7 + $0x1d70] sm:$0xff] %v2090_v46  ;;  %v2218_v46 = vld [vmem:[%s4996_s6 + $0x1f430] sm:$0xff] }
 0x3bf   : > { %2093 = vst [vmem:[%s5001_s7 + $0x1d78] sm:$0xff] %v2092_v47  ;;  %v2220_v47 = vld [vmem:[%s4996_s6 + $0x1f438] sm:$0xff] }
 0x3c0   : > { %2095 = vst [vmem:[%s5001_s7 + $0x1d80] sm:$0xff] %v2094_v48  ;;  %v2222_v48 = vld [vmem:[%s4996_s6 + $0x1f800] sm:$0xff] }
 0x3c1   : > { %2097 = vst [vmem:[%s5001_s7 + $0x1d88] sm:$0xff] %v2096_v49  ;;  %v2224_v49 = vld [vmem:[%s4996_s6 + $0x1f808] sm:$0xff] }
 0x3c2   : > { %2099 = vst [vmem:[%s5001_s7 + $0x1d90] sm:$0xff] %v2098_v50  ;;  %v2226_v50 = vld [vmem:[%s4996_s6 + $0x1f810] sm:$0xff] }
 0x3c3   : > { %2101 = vst [vmem:[%s5001_s7 + $0x1d98] sm:$0xff] %v2100_v51  ;;  %v2228_v51 = vld [vmem:[%s4996_s6 + $0x1f818] sm:$0xff] }
 0x3c4   : > { %2103 = vst [vmem:[%s5001_s7 + $0x1da0] sm:$0xff] %v2102_v52  ;;  %v2230_v52 = vld [vmem:[%s4996_s6 + $0x1f820] sm:$0xff] }
 0x3c5   : > { %2105 = vst [vmem:[%s5001_s7 + $0x1da8] sm:$0xff] %v2104_v53  ;;  %v2232_v53 = vld [vmem:[%s4996_s6 + $0x1f828] sm:$0xff] }
 0x3c6   : > { %2107 = vst [vmem:[%s5001_s7 + $0x1db0] sm:$0xff] %v2106_v54  ;;  %v2234_v54 = vld [vmem:[%s4996_s6 + $0x1f830] sm:$0xff] }
 0x3c7   : > { %2109 = vst [vmem:[%s5001_s7 + $0x1db8] sm:$0xff] %v2108_v55  ;;  %v2236_v55 = vld [vmem:[%s4996_s6 + $0x1f838] sm:$0xff] }
 0x3c8   : > { %2111 = vst [vmem:[%s5001_s7 + $0x1dc0] sm:$0xff] %v2110_v56  ;;  %v2238_v56 = vld [vmem:[%s4996_s6 + $0x1fc00] sm:$0xff] }
 0x3c9   : > { %2113 = vst [vmem:[%s5001_s7 + $0x1dc8] sm:$0xff] %v2112_v57  ;;  %v2240_v57 = vld [vmem:[%s4996_s6 + $0x1fc08] sm:$0xff] }
 0x3ca   : > { %2115 = vst [vmem:[%s5001_s7 + $0x1dd0] sm:$0xff] %v2114_v58  ;;  %v2242_v58 = vld [vmem:[%s4996_s6 + $0x1fc10] sm:$0xff] }
 0x3cb   : > { %2117 = vst [vmem:[%s5001_s7 + $0x1dd8] sm:$0xff] %v2116_v59  ;;  %v2244_v59 = vld [vmem:[%s4996_s6 + $0x1fc18] sm:$0xff] }
 0x3cc   : > { %2119 = vst [vmem:[%s5001_s7 + $0x1de0] sm:$0xff] %v2118_v60  ;;  %v2246_v60 = vld [vmem:[%s4996_s6 + $0x1fc20] sm:$0xff] }
 0x3cd   : > { %2121 = vst [vmem:[%s5001_s7 + $0x1de8] sm:$0xff] %v2120_v61  ;;  %v2248_v61 = vld [vmem:[%s4996_s6 + $0x1fc28] sm:$0xff] }
 0x3ce   : > { %2123 = vst [vmem:[%s5001_s7 + $0x1df0] sm:$0xff] %v2122_v62  ;;  %v2250_v62 = vld [vmem:[%s4996_s6 + $0x1fc30] sm:$0xff] }
 0x3cf   : > { %2125 = vst [vmem:[%s5001_s7 + $0x1df8] sm:$0xff] %v2124_v63  ;;  %v2252_v63 = vld [vmem:[%s4996_s6 + $0x1fc38] sm:$0xff] }
 0x3d0   : > { %2127 = vst [vmem:[%s5001_s7 + $0x1e00] sm:$0xff] %v2126_v0 }
 0x3d1   : > { %2129 = vst [vmem:[%s5001_s7 + $0x1e08] sm:$0xff] %v2128_v1 }
 0x3d2   : > { %2131 = vst [vmem:[%s5001_s7 + $0x1e10] sm:$0xff] %v2130_v2 }
 0x3d3   : > { %2133 = vst [vmem:[%s5001_s7 + $0x1e18] sm:$0xff] %v2132_v3 }
 0x3d4   : > { %2135 = vst [vmem:[%s5001_s7 + $0x1e20] sm:$0xff] %v2134_v4 }
 0x3d5   : > { %2137 = vst [vmem:[%s5001_s7 + $0x1e28] sm:$0xff] %v2136_v5 }
 0x3d6   : > { %2139 = vst [vmem:[%s5001_s7 + $0x1e30] sm:$0xff] %v2138_v6 }
 0x3d7   : > { %2141 = vst [vmem:[%s5001_s7 + $0x1e38] sm:$0xff] %v2140_v7 }
 0x3d8   : > { %2143 = vst [vmem:[%s5001_s7 + $0x1e40] sm:$0xff] %v2142_v8 }
 0x3d9   : > { %2145 = vst [vmem:[%s5001_s7 + $0x1e48] sm:$0xff] %v2144_v9 }
 0x3da   : > { %2147 = vst [vmem:[%s5001_s7 + $0x1e50] sm:$0xff] %v2146_v10 }
 0x3db   : > { %2149 = vst [vmem:[%s5001_s7 + $0x1e58] sm:$0xff] %v2148_v11 }
 0x3dc   : > { %2151 = vst [vmem:[%s5001_s7 + $0x1e60] sm:$0xff] %v2150_v12 }
 0x3dd   : > { %2153 = vst [vmem:[%s5001_s7 + $0x1e68] sm:$0xff] %v2152_v13 }
 0x3de   : > { %2155 = vst [vmem:[%s5001_s7 + $0x1e70] sm:$0xff] %v2154_v14 }
 0x3df   : > { %2157 = vst [vmem:[%s5001_s7 + $0x1e78] sm:$0xff] %v2156_v15 }
 0x3e0   : > { %2159 = vst [vmem:[%s5001_s7 + $0x1e80] sm:$0xff] %v2158_v16 }
 0x3e1   : > { %2161 = vst [vmem:[%s5001_s7 + $0x1e88] sm:$0xff] %v2160_v17 }
 0x3e2   : > { %2163 = vst [vmem:[%s5001_s7 + $0x1e90] sm:$0xff] %v2162_v18 }
 0x3e3   : > { %2165 = vst [vmem:[%s5001_s7 + $0x1e98] sm:$0xff] %v2164_v19 }
 0x3e4   : > { %2167 = vst [vmem:[%s5001_s7 + $0x1ea0] sm:$0xff] %v2166_v20 }
 0x3e5   : > { %2169 = vst [vmem:[%s5001_s7 + $0x1ea8] sm:$0xff] %v2168_v21 }
 0x3e6   : > { %2171 = vst [vmem:[%s5001_s7 + $0x1eb0] sm:$0xff] %v2170_v22 }
 0x3e7   : > { %2173 = vst [vmem:[%s5001_s7 + $0x1eb8] sm:$0xff] %v2172_v23 }
 0x3e8   : > { %2175 = vst [vmem:[%s5001_s7 + $0x1ec0] sm:$0xff] %v2174_v24 }
 0x3e9   : > { %2177 = vst [vmem:[%s5001_s7 + $0x1ec8] sm:$0xff] %v2176_v25 }
 0x3ea   : > { %2179 = vst [vmem:[%s5001_s7 + $0x1ed0] sm:$0xff] %v2178_v26 }
 0x3eb   : > { %2181 = vst [vmem:[%s5001_s7 + $0x1ed8] sm:$0xff] %v2180_v27 }
 0x3ec   : > { %2183 = vst [vmem:[%s5001_s7 + $0x1ee0] sm:$0xff] %v2182_v28 }
 0x3ed   : > { %2185 = vst [vmem:[%s5001_s7 + $0x1ee8] sm:$0xff] %v2184_v29 }
 0x3ee   : > { %2187 = vst [vmem:[%s5001_s7 + $0x1ef0] sm:$0xff] %v2186_v30 }
 0x3ef   : > { %2189 = vst [vmem:[%s5001_s7 + $0x1ef8] sm:$0xff] %v2188_v31 }
 0x3f0   : > { %2191 = vst [vmem:[%s5001_s7 + $0x1f00] sm:$0xff] %v2190_v32 }
 0x3f1   : > { %2193 = vst [vmem:[%s5001_s7 + $0x1f08] sm:$0xff] %v2192_v33 }
 0x3f2   : > { %2195 = vst [vmem:[%s5001_s7 + $0x1f10] sm:$0xff] %v2194_v34 }
 0x3f3   : > { %2197 = vst [vmem:[%s5001_s7 + $0x1f18] sm:$0xff] %v2196_v35 }
 0x3f4   : > { %2199 = vst [vmem:[%s5001_s7 + $0x1f20] sm:$0xff] %v2198_v36 }
 0x3f5   : > { %2201 = vst [vmem:[%s5001_s7 + $0x1f28] sm:$0xff] %v2200_v37 }
 0x3f6   : > { %2203 = vst [vmem:[%s5001_s7 + $0x1f30] sm:$0xff] %v2202_v38 }
 0x3f7   : > { %2205 = vst [vmem:[%s5001_s7 + $0x1f38] sm:$0xff] %v2204_v39 }
 0x3f8   : > { %2207 = vst [vmem:[%s5001_s7 + $0x1f40] sm:$0xff] %v2206_v40 }
 0x3f9   : > { %2209 = vst [vmem:[%s5001_s7 + $0x1f48] sm:$0xff] %v2208_v41 }
 0x3fa   : > { %2211 = vst [vmem:[%s5001_s7 + $0x1f50] sm:$0xff] %v2210_v42 }
 0x3fb   : > { %2213 = vst [vmem:[%s5001_s7 + $0x1f58] sm:$0xff] %v2212_v43 }
 0x3fc   : > { %2215 = vst [vmem:[%s5001_s7 + $0x1f60] sm:$0xff] %v2214_v44 }
 0x3fd   : > { %2217 = vst [vmem:[%s5001_s7 + $0x1f68] sm:$0xff] %v2216_v45 }
 0x3fe   : > { %2219 = vst [vmem:[%s5001_s7 + $0x1f70] sm:$0xff] %v2218_v46 }
 0x3ff   : > { %2221 = vst [vmem:[%s5001_s7 + $0x1f78] sm:$0xff] %v2220_v47 }
 0x400   : > { %2223 = vst [vmem:[%s5001_s7 + $0x1f80] sm:$0xff] %v2222_v48 }
 0x401   : > { %2225 = vst [vmem:[%s5001_s7 + $0x1f88] sm:$0xff] %v2224_v49 }
 0x402   : > { %2227 = vst [vmem:[%s5001_s7 + $0x1f90] sm:$0xff] %v2226_v50 }
 0x403   : > { %2229 = vst [vmem:[%s5001_s7 + $0x1f98] sm:$0xff] %v2228_v51 }
 0x404   : > { %2231 = vst [vmem:[%s5001_s7 + $0x1fa0] sm:$0xff] %v2230_v52 }
 0x405   : > { %2233 = vst [vmem:[%s5001_s7 + $0x1fa8] sm:$0xff] %v2232_v53 }
 0x406   : > { %2235 = vst [vmem:[%s5001_s7 + $0x1fb0] sm:$0xff] %v2234_v54 }
 0x407   : > { %2237 = vst [vmem:[%s5001_s7 + $0x1fb8] sm:$0xff] %v2236_v55 }
 0x408   : > { %2239 = vst [vmem:[%s5001_s7 + $0x1fc0] sm:$0xff] %v2238_v56 }
 0x409   : > { %2241 = vst [vmem:[%s5001_s7 + $0x1fc8] sm:$0xff] %v2240_v57 }
 0x40a   : > { %2243 = vst [vmem:[%s5001_s7 + $0x1fd0] sm:$0xff] %v2242_v58 }
 0x40b   : > { %2245 = vst [vmem:[%s5001_s7 + $0x1fd8] sm:$0xff] %v2244_v59 }
 0x40c   : > { %2247 = vst [vmem:[%s5001_s7 + $0x1fe0] sm:$0xff] %v2246_v60 }
 0x40d   : > { %2249 = vst [vmem:[%s5001_s7 + $0x1fe8] sm:$0xff] %v2248_v61 }
 0x40e   : > { %2251 = vst [vmem:[%s5001_s7 + $0x1ff0] sm:$0xff] %v2250_v62 }
 0x40f   : > { %2253 = vst [vmem:[%s5001_s7 + $0x1ff8] sm:$0xff] %v2252_v63 }
 0x410 PF: > { %p4844_p5 = scmp.ge.s32.totalorder %s4930_s20, 1  ;;  %p2282_p6 = scmp.lt.s32.totalorder %s4930_s20, 17 }
 0x412   : > { %p2283_p7 = pnand %p4844_p5, %p2282_p6 }
 0x413   : > { %s2289_s8 = sand.u32 (!%p2283_p7), 1, %s4922_s18   ;;  %s7441_s7 = sshll.u32 (!%p2283_p7), %s4837_s21, 3 }
 0x414   : > { %2286 = sbr.rel (%p2283_p7) target bundleno = 1904 (0x770), region = 59  ;;  %s4845_s9 = sshll.u32 (!%p2283_p7), %s2289_s8, 13 }
 0x415   : > { %s7051_s10 = scalar_lea.vmem (!%p2283_p7), [#allocation2], %s4845_s9  ;;  %p2330_p8 = scmp.lt.s32.totalorder (!%p2283_p7), %s7441_s7, 127 }
 0x419   : > { %v2734_v0 = vld [vmem:[%s7051_s10 + $0xbc0] sm:$0xff]  ;;  %s8414_s7 = smov (!%p2330_p8, %s7441_s7), 127 }
 0x41a   : > { %v2478_v1 = vld [vmem:[%s7051_s10 + $0x3c0] sm:$0xff]  ;;  %3440 = vmatpush.msra.mxu2 %v2734_v0  ;;  %s7475_s8 = scalar_lea.vmem %s8406_s2, %s8414_s7  ;;  %s7526_s14 = scalar_lea.vmem %s8407_s3, %s8414_s7 }
 0x41b   : > { %v2726_v2 = vld [vmem:[%s7051_s10 + $0xb80] sm:$0xff]  ;;  %3400 = vmatpush.msra.mxu0 %v2478_v1  ;;  %s7547_s26 = scalar_lea.vmem %s8408_s4, %s8414_s7  ;;  %s4850_s6 = sshll.u32 %s8414_s7, 3 }
 0x41c   : > { %v2862_v3 = vld [vmem:[%s7051_s10 + $0xfc0] sm:$0xff]  ;;  %3441 = vmatpush.msra.mxu2 %v2726_v2  ;;  %s7603_s13 = scalar_lea.vmem %s8409_s5, %s4850_s6 }
 0x41d   : > { %v2470_v4 = vld [vmem:[%s7051_s10 + $0x380] sm:$0xff]  ;;  %3460 = vmatpush.msra.mxu3 %v2862_v3 }
 0x41e   : > { %v2606_v5 = vld [vmem:[%s7051_s10 + $0x7c0] sm:$0xff]  ;;  %3401 = vmatpush.msra.mxu0 %v2470_v4 }
 0x41f   : > { %3420 = vmatpush.msra.mxu1 %v2606_v5  ;;  %v2718_v6 = vld [vmem:[%s7051_s10 + $0xb40] sm:$0xff] }
 0x420   : > { %v2854_v7 = vld [vmem:[%s7051_s10 + $0xf80] sm:$0xff]  ;;  %3442 = vmatpush.msra.mxu2 %v2718_v6 }
 0x421   : > { %v2462_v8 = vld [vmem:[%s7051_s10 + $0x340] sm:$0xff]  ;;  %3461 = vmatpush.msra.mxu3 %v2854_v7 }
 0x422   : > { %v2598_v9 = vld [vmem:[%s7051_s10 + $0x780] sm:$0xff]  ;;  %3402 = vmatpush.msra.mxu0 %v2462_v8 }
 0x423   : > { %v2846_v10 = vld [vmem:[%s7051_s10 + $0xf40] sm:$0xff]  ;;  %3421 = vmatpush.msra.mxu1 %v2598_v9 }
 0x424   : > { %v2710_v11 = vld [vmem:[%s7051_s10 + $0xb00] sm:$0xff]  ;;  %3462 = vmatpush.msra.mxu3 %v2846_v10 }
 0x425   : > { %v2454_v12 = vld [vmem:[%s7051_s10 + $0x300] sm:$0xff]  ;;  %3443 = vmatpush.msra.mxu2 %v2710_v11 }
 0x426   : > { %v2590_v13 = vld [vmem:[%s7051_s10 + $0x740] sm:$0xff]  ;;  %3403 = vmatpush.msra.mxu0 %v2454_v12 }
 0x427   : > { %v2838_v14 = vld [vmem:[%s7051_s10 + $0xf00] sm:$0xff]  ;;  %3422 = vmatpush.msra.mxu1 %v2590_v13 }
 0x428   : > { %v2582_v15 = vld [vmem:[%s7051_s10 + $0x700] sm:$0xff]  ;;  %3463 = vmatpush.msra.mxu3 %v2838_v14 }
 0x429   : > { %v2702_v16 = vld [vmem:[%s7051_s10 + $0xac0] sm:$0xff]  ;;  %3423 = vmatpush.msra.mxu1 %v2582_v15 }
 0x42a   : > { %v2446_v17 = vld [vmem:[%s7051_s10 + $0x2c0] sm:$0xff]  ;;  %3444 = vmatpush.msra.mxu2 %v2702_v16 }
 0x42b   : > { %v2830_v18 = vld [vmem:[%s7051_s10 + $0xec0] sm:$0xff]  ;;  %3404 = vmatpush.msra.mxu0 %v2446_v17 }
 0x42c   : > { %v2574_v19 = vld [vmem:[%s7051_s10 + $0x6c0] sm:$0xff]  ;;  %3464 = vmatpush.msra.mxu3 %v2830_v18 }
 0x42d   : > { %v2694_v20 = vld [vmem:[%s7051_s10 + $0xa80] sm:$0xff]  ;;  %3424 = vmatpush.msra.mxu1 %v2574_v19 }
 0x42e   : > { %v2438_v21 = vld [vmem:[%s7051_s10 + $0x280] sm:$0xff]  ;;  %3445 = vmatpush.msra.mxu2 %v2694_v20 }
 0x42f   : > { %v2822_v22 = vld [vmem:[%s7051_s10 + $0xe80] sm:$0xff]  ;;  %3405 = vmatpush.msra.mxu0 %v2438_v21 }
 0x430   : > { %v2566_v23 = vld [vmem:[%s7051_s10 + $0x680] sm:$0xff]  ;;  %3465 = vmatpush.msra.mxu3 %v2822_v22 }
 0x431   : > { %v2686_v24 = vld [vmem:[%s7051_s10 + $0xa40] sm:$0xff]  ;;  %3425 = vmatpush.msra.mxu1 %v2566_v23 }
 0x432   : > { %v2430_v25 = vld [vmem:[%s7051_s10 + $0x240] sm:$0xff]  ;;  %3446 = vmatpush.msra.mxu2 %v2686_v24 }
 0x433   : > { %v2814_v26 = vld [vmem:[%s7051_s10 + $0xe40] sm:$0xff]  ;;  %3406 = vmatpush.msra.mxu0 %v2430_v25 }
 0x434   : > { %v2558_v27 = vld [vmem:[%s7051_s10 + $0x640] sm:$0xff]  ;;  %3466 = vmatpush.msra.mxu3 %v2814_v26 }
 0x435   : > { %v2678_v28 = vld [vmem:[%s7051_s10 + $0xa00] sm:$0xff]  ;;  %3426 = vmatpush.msra.mxu1 %v2558_v27 }
 0x436   : > { %v2422_v29 = vld [vmem:[%s7051_s10 + $0x200] sm:$0xff]  ;;  %3447 = vmatpush.msra.mxu2 %v2678_v28 }
 0x437   : > { %v2806_v30 = vld [vmem:[%s7051_s10 + $0xe00] sm:$0xff]  ;;  %3407 = vmatpush.msra.mxu0 %v2422_v29 }
 0x438   : > { %v2550_v31 = vld [vmem:[%s7051_s10 + $0x600] sm:$0xff]  ;;  %3467 = vmatpush.msra.mxu3 %v2806_v30 }
 0x439   : > { %v2670_v32 = vld [vmem:[%s7051_s10 + $0x9c0] sm:$0xff]  ;;  %3427 = vmatpush.msra.mxu1 %v2550_v31 }
 0x43a   : > { %v2414_v33 = vld [vmem:[%s7051_s10 + $0x1c0] sm:$0xff]  ;;  %3448 = vmatpush.msra.mxu2 %v2670_v32 }
 0x43b   : > { %v2798_v34 = vld [vmem:[%s7051_s10 + $0xdc0] sm:$0xff]  ;;  %3408 = vmatpush.msra.mxu0 %v2414_v33 }
 0x43c   : > { %v2542_v35 = vld [vmem:[%s7051_s10 + $0x5c0] sm:$0xff]  ;;  %3468 = vmatpush.msra.mxu3 %v2798_v34 }
 0x43d   : > { %v2662_v36 = vld [vmem:[%s7051_s10 + $0x980] sm:$0xff]  ;;  %3428 = vmatpush.msra.mxu1 %v2542_v35 }
 0x43e   : > { %v2406_v37 = vld [vmem:[%s7051_s10 + $0x180] sm:$0xff]  ;;  %3449 = vmatpush.msra.mxu2 %v2662_v36 }
 0x43f   : > { %v2790_v38 = vld [vmem:[%s7051_s10 + $0xd80] sm:$0xff]  ;;  %3409 = vmatpush.msra.mxu0 %v2406_v37 }
 0x440   : > { %v2534_v39 = vld [vmem:[%s7051_s10 + $0x580] sm:$0xff]  ;;  %3469 = vmatpush.msra.mxu3 %v2790_v38 }
 0x441   : > { %v2654_v40 = vld [vmem:[%s7051_s10 + $0x940] sm:$0xff]  ;;  %3429 = vmatpush.msra.mxu1 %v2534_v39 }
 0x442   : > { %v2398_v41 = vld [vmem:[%s7051_s10 + $0x140] sm:$0xff]  ;;  %3450 = vmatpush.msra.mxu2 %v2654_v40 }
 0x443   : > { %v2782_v42 = vld [vmem:[%s7051_s10 + $0xd40] sm:$0xff]  ;;  %3410 = vmatpush.msra.mxu0 %v2398_v41 }
 0x444   : > { %v2526_v43 = vld [vmem:[%s7051_s10 + $0x540] sm:$0xff]  ;;  %3470 = vmatpush.msra.mxu3 %v2782_v42 }
 0x445   : > { %v2646_v44 = vld [vmem:[%s7051_s10 + $0x900] sm:$0xff]  ;;  %3430 = vmatpush.msra.mxu1 %v2526_v43 }
 0x446   : > { %v2390_v45 = vld [vmem:[%s7051_s10 + $0x100] sm:$0xff]  ;;  %3451 = vmatpush.msra.mxu2 %v2646_v44 }
 0x447   : > { %v2774_v46 = vld [vmem:[%s7051_s10 + $0xd00] sm:$0xff]  ;;  %3411 = vmatpush.msra.mxu0 %v2390_v45 }
 0x448   : > { %v2518_v47 = vld [vmem:[%s7051_s10 + $0x500] sm:$0xff]  ;;  %3471 = vmatpush.msra.mxu3 %v2774_v46 }
 0x449   : > { %v2638_v48 = vld [vmem:[%s7051_s10 + $0x8c0] sm:$0xff]  ;;  %3431 = vmatpush.msra.mxu1 %v2518_v47 }
 0x44a   : > { %v2382_v49 = vld [vmem:[%s7051_s10 + $0xc0] sm:$0xff]  ;;  %3452 = vmatpush.msra.mxu2 %v2638_v48 }
 0x44b   : > { %v2766_v50 = vld [vmem:[%s7051_s10 + $0xcc0] sm:$0xff]  ;;  %3412 = vmatpush.msra.mxu0 %v2382_v49 }
 0x44c   : > { %v2510_v51 = vld [vmem:[%s7051_s10 + $0x4c0] sm:$0xff]  ;;  %3472 = vmatpush.msra.mxu3 %v2766_v50 }
 0x44d   : > { %v2630_v52 = vld [vmem:[%s7051_s10 + $0x880] sm:$0xff]  ;;  %3432 = vmatpush.msra.mxu1 %v2510_v51 }
 0x44e   : > { %v2374_v53 = vld [vmem:[%s7051_s10 + $0x80] sm:$0xff]  ;;  %3453 = vmatpush.msra.mxu2 %v2630_v52 }
 0x44f   : > { %v2758_v54 = vld [vmem:[%s7051_s10 + $0xc80] sm:$0xff]  ;;  %3413 = vmatpush.msra.mxu0 %v2374_v53 }
 0x450   : > { %v2502_v55 = vld [vmem:[%s7051_s10 + $0x480] sm:$0xff]  ;;  %3473 = vmatpush.msra.mxu3 %v2758_v54 }
 0x451   : > { %v2622_v56 = vld [vmem:[%s7051_s10 + $0x840] sm:$0xff]  ;;  %3433 = vmatpush.msra.mxu1 %v2502_v55 }
 0x452   : > { %v2366_v57 = vld [vmem:[%s7051_s10 + $0x40] sm:$0xff]  ;;  %3454 = vmatpush.msra.mxu2 %v2622_v56 }
 0x453   : > { %v2750_v58 = vld [vmem:[%s7051_s10 + $0xc40] sm:$0xff]  ;;  %3414 = vmatpush.msra.mxu0 %v2366_v57 }
 0x454   : > { %v2494_v59 = vld [vmem:[%s7051_s10 + $0x440] sm:$0xff]  ;;  %3474 = vmatpush.msra.mxu3 %v2750_v58 }
 0x455   : > { %v2614_v60 = vld [vmem:[%s7051_s10 + $0x800] sm:$0xff]  ;;  %3434 = vmatpush.msra.mxu1 %v2494_v59 }
 0x456   : > { %v2358_v61 = vld [vmem:[%s7051_s10] sm:$0xff]  ;;  %3455 = vmatpush.msra.mxu2 %v2614_v60  ;;  %v7180_v60 = vld [vmem:[%s8404_s0 + $0x10] sm:$0xff] }
 0x457   : > { %v3246_v62 = vld [vmem:[%s7051_s10 + $0x1bc0] sm:$0xff]  ;;  %3415 = vmatpush.msra.mxu0 %v2358_v61  ;;  %3456 = vmatmul.f32.vlgmr.msra.gmra.mxu2 %v7180_v60 }
 0x458   : > { %v2742_v63 = vld [vmem:[%s7051_s10 + $0xc00] sm:$0xff]  ;;  %3520 = vmatpush.msrb.mxu2 %v3246_v62  ;;  %v2735_v62 = vld [vmem:[%s7051_s10 + $0xbc8] sm:$0xff] }
 0x459   : > { %v2990_v0 = vld [vmem:[%s7051_s10 + $0x13c0] sm:$0xff]  ;;  %3475 = vmatpush.msra.mxu3 %v2742_v63 }
 0x45a   : > { %v3374_v1 = vld [vmem:[%s7051_s10 + $0x1fc0] sm:$0xff]  ;;  %3480 = vmatpush.msrb.mxu0 %v2990_v0 }
 0x45b   : > { %v3238_v2 = vld [vmem:[%s7051_s10 + $0x1b80] sm:$0xff]  ;;  %3540 = vmatpush.msrb.mxu3 %v3374_v1 }
 0x45c   : > { %v2486_v3 = vld [vmem:[%s7051_s10 + $0x400] sm:$0xff]  ;;  %3521 = vmatpush.msrb.mxu2 %v3238_v2  ;;  %v7195_v2 = vld [vmem:[%s8404_s0 + $0x18] sm:$0xff] }
 0x45d   : > { %v2982_v4 = vld [vmem:[%s7051_s10 + $0x1380] sm:$0xff]  ;;  %3435 = vmatpush.msra.mxu1 %v2486_v3  ;;  %v2479_v3 = vld [vmem:[%s7051_s10 + $0x3c8] sm:$0xff]  ;;  %3476 = vmatmul.f32.vlgmr.msra.gmra.mxu3 %v7195_v2 }
 0x45e   : > { %v3118_v5 = vld [vmem:[%s7051_s10 + $0x17c0] sm:$0xff]  ;;  %3481 = vmatpush.msrb.mxu0 %v2982_v4  ;;  %v2727_v4 = vld [vmem:[%s7051_s10 + $0xb88] sm:$0xff] }
 0x45f   : > { %v3230_v6 = vld [vmem:[%s7051_s10 + $0x1b40] sm:$0xff]  ;;  %3500 = vmatpush.msrb.mxu1 %v3118_v5  ;;  %v2863_v5 = vld [vmem:[%s7051_s10 + $0xfc8] sm:$0xff] }
 0x460   : > { %v3366_v7 = vld [vmem:[%s7051_s10 + $0x1f80] sm:$0xff]  ;;  %3522 = vmatpush.msrb.mxu2 %v3230_v6 }
 0x461   : > { %v2974_v8 = vld [vmem:[%s7051_s10 + $0x1340] sm:$0xff]  ;;  %3541 = vmatpush.msrb.mxu3 %v3366_v7  ;;  %v2471_v7 = vld [vmem:[%s7051_s10 + $0x388] sm:$0xff] }
 0x462   : > { %v3110_v9 = vld [vmem:[%s7051_s10 + $0x1780] sm:$0xff]  ;;  %3482 = vmatpush.msrb.mxu0 %v2974_v8  ;;  %v7207_v8 = vld [vmem:[%s8404_s0 + $0x8] sm:$0xff] }
 0x463   : > { %v3222_v10 = vld [vmem:[%s7051_s10 + $0x1b00] sm:$0xff]  ;;  %3501 = vmatpush.msrb.mxu1 %v3110_v9  ;;  %v2719_v9 = vld [vmem:[%s7051_s10 + $0xb48] sm:$0xff] }
 0x464   : > { %v3358_v11 = vld [vmem:[%s7051_s10 + $0x1f40] sm:$0xff]  ;;  %3523 = vmatpush.msrb.mxu2 %v3222_v10  ;;  %v2607_v10 = vld [vmem:[%s7051_s10 + $0x7c8] sm:$0xff]  ;;  %3436 = vmatmul.f32.vlgmr.msra.gmra.mxu1 %v7207_v8 }
 0x465   : > { %v2966_v12 = vld [vmem:[%s7051_s10 + $0x1300] sm:$0xff]  ;;  %3542 = vmatpush.msrb.mxu3 %v3358_v11  ;;  %v2855_v11 = vld [vmem:[%s7051_s10 + $0xf88] sm:$0xff] }
 0x466   : > { %v3102_v13 = vld [vmem:[%s7051_s10 + $0x1740] sm:$0xff]  ;;  %3483 = vmatpush.msrb.mxu0 %v2966_v12  ;;  %v2463_v12 = vld [vmem:[%s7051_s10 + $0x348] sm:$0xff] }
 0x467   : > { %v3214_v14 = vld [vmem:[%s7051_s10 + $0x1ac0] sm:$0xff]  ;;  %3502 = vmatpush.msrb.mxu1 %v3102_v13  ;;  %v2711_v13 = vld [vmem:[%s7051_s10 + $0xb08] sm:$0xff] }
 0x468   : > { %v3350_v15 = vld [vmem:[%s7051_s10 + $0x1f00] sm:$0xff]  ;;  %3524 = vmatpush.msrb.mxu2 %v3214_v14  ;;  %v2599_v14 = vld [vmem:[%s7051_s10 + $0x788] sm:$0xff] }
 0x469   : > { %v2958_v16 = vld [vmem:[%s7051_s10 + $0x12c0] sm:$0xff]  ;;  %3543 = vmatpush.msrb.mxu3 %v3350_v15  ;;  %v2847_v15 = vld [vmem:[%s7051_s10 + $0xf48] sm:$0xff] }
 0x46a   : > { %v3094_v17 = vld [vmem:[%s7051_s10 + $0x1700] sm:$0xff]  ;;  %3484 = vmatpush.msrb.mxu0 %v2958_v16  ;;  %v7220_v16 = vld [vmem:[%s8404_s0 + $0x30] sm:$0xff] }
 0x46b   : > { %v3206_v18 = vld [vmem:[%s7051_s10 + $0x1a80] sm:$0xff]  ;;  %3503 = vmatpush.msrb.mxu1 %v3094_v17  ;;  %v2455_v17 = vld [vmem:[%s7051_s10 + $0x308] sm:$0xff] }
 0x46c   : > { %v3342_v19 = vld [vmem:[%s7051_s10 + $0x1ec0] sm:$0xff]  ;;  %3525 = vmatpush.msrb.mxu2 %v3206_v18  ;;  %v2591_v18 = vld [vmem:[%s7051_s10 + $0x748] sm:$0xff] }
 0x46d   : > { %v2950_v20 = vld [vmem:[%s7051_s10 + $0x1280] sm:$0xff]  ;;  %3544 = vmatpush.msrb.mxu3 %v3342_v19  ;;  %v2703_v19 = vld [vmem:[%s7051_s10 + $0xac8] sm:$0xff] }
 0x46e   : > { %v3086_v21 = vld [vmem:[%s7051_s10 + $0x16c0] sm:$0xff]  ;;  %3485 = vmatpush.msrb.mxu0 %v2950_v20  ;;  %v2839_v20 = vld [vmem:[%s7051_s10 + $0xf08] sm:$0xff] }
 0x46f   : > { %v3198_v22 = vld [vmem:[%s7051_s10 + $0x1a40] sm:$0xff]  ;;  %3504 = vmatpush.msrb.mxu1 %v3086_v21 }
 0x470   : > { %v3334_v23 = vld [vmem:[%s7051_s10 + $0x1e80] sm:$0xff]  ;;  %3526 = vmatpush.msrb.mxu2 %v3198_v22  ;;  %v7235_v22 = vld [vmem:[%s8404_s0 + $0x38] sm:$0xff] }
 0x471   : > { %v2942_v24 = vld [vmem:[%s7051_s10 + $0x1240] sm:$0xff]  ;;  %3545 = vmatpush.msrb.mxu3 %v3334_v23  ;;  %v2447_v23 = vld [vmem:[%s7051_s10 + $0x2c8] sm:$0xff] }
 0x472   : > { %v3078_v25 = vld [vmem:[%s7051_s10 + $0x1680] sm:$0xff]  ;;  %3486 = vmatpush.msrb.mxu0 %v2942_v24  ;;  %v2583_v24 = vld [vmem:[%s7051_s10 + $0x708] sm:$0xff] }
 0x473   : > { %v3190_v26 = vld [vmem:[%s7051_s10 + $0x1a00] sm:$0xff]  ;;  %3505 = vmatpush.msrb.mxu1 %v3078_v25  ;;  %v2695_v25 = vld [vmem:[%s7051_s10 + $0xa88] sm:$0xff] }
 0x474   : > { %v3326_v27 = vld [vmem:[%s7051_s10 + $0x1e40] sm:$0xff]  ;;  %3527 = vmatpush.msrb.mxu2 %v3190_v26  ;;  %v2831_v26 = vld [vmem:[%s7051_s10 + $0xec8] sm:$0xff] }
 0x475   : > { %v2934_v28 = vld [vmem:[%s7051_s10 + $0x1200] sm:$0xff]  ;;  %3546 = vmatpush.msrb.mxu3 %v3326_v27  ;;  %v7245_v27 = vld [vmem:[%s8404_s0 + $0x28] sm:$0xff] }
 0x476   : > { %v3070_v29 = vld [vmem:[%s7051_s10 + $0x1640] sm:$0xff]  ;;  %3487 = vmatpush.msrb.mxu0 %v2934_v28  ;;  %v2439_v28 = vld [vmem:[%s7051_s10 + $0x288] sm:$0xff] }
 0x477   : > { %v3182_v30 = vld [vmem:[%s7051_s10 + $0x19c0] sm:$0xff]  ;;  %3506 = vmatpush.msrb.mxu1 %v3070_v29  ;;  %v2575_v29 = vld [vmem:[%s7051_s10 + $0x6c8] sm:$0xff] }
 0x478   : > { %v3318_v31 = vld [vmem:[%s7051_s10 + $0x1e00] sm:$0xff]  ;;  %3528 = vmatpush.msrb.mxu2 %v3182_v30  ;;  %v2687_v30 = vld [vmem:[%s7051_s10 + $0xa48] sm:$0xff] }
 0x479   : > { %v2926_v32 = vld [vmem:[%s7051_s10 + $0x11c0] sm:$0xff]  ;;  %3547 = vmatpush.msrb.mxu3 %v3318_v31  ;;  %v2823_v31 = vld [vmem:[%s7051_s10 + $0xe88] sm:$0xff] }
 0x47a   : > { %v3062_v33 = vld [vmem:[%s7051_s10 + $0x1600] sm:$0xff]  ;;  %3488 = vmatpush.msrb.mxu0 %v2926_v32  ;;  %v2431_v32 = vld [vmem:[%s7051_s10 + $0x248] sm:$0xff] }
 0x47b   : > { %v3174_v34 = vld [vmem:[%s7051_s10 + $0x1980] sm:$0xff]  ;;  %3507 = vmatpush.msrb.mxu1 %v3062_v33  ;;  %v2567_v33 = vld [vmem:[%s7051_s10 + $0x688] sm:$0xff] }
 0x47c   : > { %v3310_v35 = vld [vmem:[%s7051_s10 + $0x1dc0] sm:$0xff]  ;;  %3529 = vmatpush.msrb.mxu2 %v3174_v34  ;;  %v2679_v34 = vld [vmem:[%s7051_s10 + $0xa08] sm:$0xff] }
 0x47d   : > { %v2918_v36 = vld [vmem:[%s7051_s10 + $0x1180] sm:$0xff]  ;;  %3548 = vmatpush.msrb.mxu3 %v3310_v35  ;;  %v2815_v35 = vld [vmem:[%s7051_s10 + $0xe48] sm:$0xff] }
 0x47e   : > { %v3054_v37 = vld [vmem:[%s7051_s10 + $0x15c0] sm:$0xff]  ;;  %3489 = vmatpush.msrb.mxu0 %v2918_v36  ;;  %v2423_v36 = vld [vmem:[%s7051_s10 + $0x208] sm:$0xff] }
 0x47f   : > { %v3166_v38 = vld [vmem:[%s7051_s10 + $0x1940] sm:$0xff]  ;;  %3508 = vmatpush.msrb.mxu1 %v3054_v37  ;;  %v2559_v37 = vld [vmem:[%s7051_s10 + $0x648] sm:$0xff] }
 0x480   : > { %v3302_v39 = vld [vmem:[%s7051_s10 + $0x1d80] sm:$0xff]  ;;  %3530 = vmatpush.msrb.mxu2 %v3166_v38  ;;  %v2671_v38 = vld [vmem:[%s7051_s10 + $0x9c8] sm:$0xff] }
 0x481   : > { %v2910_v40 = vld [vmem:[%s7051_s10 + $0x1140] sm:$0xff]  ;;  %3549 = vmatpush.msrb.mxu3 %v3302_v39  ;;  %v2807_v39 = vld [vmem:[%s7051_s10 + $0xe08] sm:$0xff] }
 0x482   : > { %v3046_v41 = vld [vmem:[%s7051_s10 + $0x1580] sm:$0xff]  ;;  %3490 = vmatpush.msrb.mxu0 %v2910_v40  ;;  %v2415_v40 = vld [vmem:[%s7051_s10 + $0x1c8] sm:$0xff] }
 0x483   : > { %v3158_v42 = vld [vmem:[%s7051_s10 + $0x1900] sm:$0xff]  ;;  %3509 = vmatpush.msrb.mxu1 %v3046_v41  ;;  %v2551_v41 = vld [vmem:[%s7051_s10 + $0x608] sm:$0xff] }
 0x484   : > { %v3294_v43 = vld [vmem:[%s7051_s10 + $0x1d40] sm:$0xff]  ;;  %3531 = vmatpush.msrb.mxu2 %v3158_v42  ;;  %v2663_v42 = vld [vmem:[%s7051_s10 + $0x988] sm:$0xff] }
 0x485   : > { %v2902_v44 = vld [vmem:[%s7051_s10 + $0x1100] sm:$0xff]  ;;  %3550 = vmatpush.msrb.mxu3 %v3294_v43  ;;  %v2799_v43 = vld [vmem:[%s7051_s10 + $0xdc8] sm:$0xff] }
 0x486   : > { %v3038_v45 = vld [vmem:[%s7051_s10 + $0x1540] sm:$0xff]  ;;  %3491 = vmatpush.msrb.mxu0 %v2902_v44  ;;  %v2407_v44 = vld [vmem:[%s7051_s10 + $0x188] sm:$0xff] }
 0x487   : > { %v3150_v46 = vld [vmem:[%s7051_s10 + $0x18c0] sm:$0xff]  ;;  %3510 = vmatpush.msrb.mxu1 %v3038_v45  ;;  %v2543_v45 = vld [vmem:[%s7051_s10 + $0x5c8] sm:$0xff] }
 0x488   : > { %v3286_v47 = vld [vmem:[%s7051_s10 + $0x1d00] sm:$0xff]  ;;  %3532 = vmatpush.msrb.mxu2 %v3150_v46  ;;  %v2655_v46 = vld [vmem:[%s7051_s10 + $0x948] sm:$0xff] }
 0x489   : > { %v2894_v48 = vld [vmem:[%s7051_s10 + $0x10c0] sm:$0xff]  ;;  %3551 = vmatpush.msrb.mxu3 %v3286_v47  ;;  %v2791_v47 = vld [vmem:[%s7051_s10 + $0xd88] sm:$0xff] }
 0x48a   : > { %v3030_v49 = vld [vmem:[%s7051_s10 + $0x1500] sm:$0xff]  ;;  %3492 = vmatpush.msrb.mxu0 %v2894_v48  ;;  %v2399_v48 = vld [vmem:[%s7051_s10 + $0x148] sm:$0xff] }
 0x48b   : > { %v3142_v50 = vld [vmem:[%s7051_s10 + $0x1880] sm:$0xff]  ;;  %3511 = vmatpush.msrb.mxu1 %v3030_v49  ;;  %v2535_v49 = vld [vmem:[%s7051_s10 + $0x588] sm:$0xff] }
 0x48c   : > { %v3278_v51 = vld [vmem:[%s7051_s10 + $0x1cc0] sm:$0xff]  ;;  %3533 = vmatpush.msrb.mxu2 %v3142_v50  ;;  %v2647_v50 = vld [vmem:[%s7051_s10 + $0x908] sm:$0xff] }
 0x48d   : > { %v2886_v52 = vld [vmem:[%s7051_s10 + $0x1080] sm:$0xff]  ;;  %3552 = vmatpush.msrb.mxu3 %v3278_v51  ;;  %v2783_v51 = vld [vmem:[%s7051_s10 + $0xd48] sm:$0xff] }
 0x48e   : > { %v3022_v53 = vld [vmem:[%s7051_s10 + $0x14c0] sm:$0xff]  ;;  %3493 = vmatpush.msrb.mxu0 %v2886_v52  ;;  %v2391_v52 = vld [vmem:[%s7051_s10 + $0x108] sm:$0xff] }
 0x48f   : > { %v3134_v54 = vld [vmem:[%s7051_s10 + $0x1840] sm:$0xff]  ;;  %3512 = vmatpush.msrb.mxu1 %v3022_v53  ;;  %v2527_v53 = vld [vmem:[%s7051_s10 + $0x548] sm:$0xff] }
 0x490   : > { %v3270_v55 = vld [vmem:[%s7051_s10 + $0x1c80] sm:$0xff]  ;;  %3534 = vmatpush.msrb.mxu2 %v3134_v54  ;;  %v2639_v54 = vld [vmem:[%s7051_s10 + $0x8c8] sm:$0xff] }
 0x491   : > { %v2878_v56 = vld [vmem:[%s7051_s10 + $0x1040] sm:$0xff]  ;;  %3553 = vmatpush.msrb.mxu3 %v3270_v55  ;;  %v2775_v55 = vld [vmem:[%s7051_s10 + $0xd08] sm:$0xff] }
 0x492   : > { %v3014_v57 = vld [vmem:[%s7051_s10 + $0x1480] sm:$0xff]  ;;  %3494 = vmatpush.msrb.mxu0 %v2878_v56  ;;  %v2383_v56 = vld [vmem:[%s7051_s10 + $0xc8] sm:$0xff] }
 0x493   : > { %v3126_v58 = vld [vmem:[%s7051_s10 + $0x1800] sm:$0xff]  ;;  %3513 = vmatpush.msrb.mxu1 %v3014_v57  ;;  %v2519_v57 = vld [vmem:[%s7051_s10 + $0x508] sm:$0xff] }
 0x494   : > { %v3262_v59 = vld [vmem:[%s7051_s10 + $0x1c40] sm:$0xff]  ;;  %3535 = vmatpush.msrb.mxu2 %v3126_v58  ;;  %v2631_v58 = vld [vmem:[%s7051_s10 + $0x888] sm:$0xff] }
 0x495   : > { %v2870_v61 = vld [vmem:[%s7051_s10 + $0x1000] sm:$0xff]  ;;  %3554 = vmatpush.msrb.mxu3 %v3262_v59  ;;  %3536 = vmatmul.f32.vlgmr.msrb.gmra.mxu2 %v7220_v16  ;;  %v2767_v59 = vld [vmem:[%s7051_s10 + $0xcc8] sm:$0xff] }
 0x496   : > { %v3006_v63 = vld [vmem:[%s7051_s10 + $0x1440] sm:$0xff]  ;;  %3495 = vmatpush.msrb.mxu0 %v2870_v61  ;;  %3600 = vmatpush.msra.mxu2 %v2735_v62  ;;  %v2375_v61 = vld [vmem:[%s7051_s10 + $0x88] sm:$0xff] }
 0x497   : > { %v3254_v0 = vld [vmem:[%s7051_s10 + $0x1c00] sm:$0xff]  ;;  %3514 = vmatpush.msrb.mxu1 %v3006_v63  ;;  %v2511_v62 = vld [vmem:[%s7051_s10 + $0x4c8] sm:$0xff] }
 0x498   : > { %v7189_v1 = vld [vmem:[%s8404_s0] sm:$0xff]  ;;  %3555 = vmatpush.msrb.mxu3 %v3254_v0  ;;  %3601 = vmatpush.msra.mxu2 %v2727_v4  ;;  %v2623_v63 = vld [vmem:[%s7051_s10 + $0x848] sm:$0xff] }
 0x499   : > { %3416 = vmatmul.f32.vlgmr.msra.gmra.mxu0 %v7189_v1  ;;  %v2998_v6 = vld [vmem:[%s7051_s10 + $0x1400] sm:$0xff]  ;;  %3556 = vmatmul.f32.vlgmr.msrb.gmra.mxu3 %v7235_v22  ;;  %v2759_v0 = vld [vmem:[%s7051_s10 + $0xc88] sm:$0xff] }
 0x49a   : > { %3560 = vmatpush.msra.mxu0 %v2479_v3  ;;  %3620 = vmatpush.msra.mxu3 %v2863_v5  ;;  %v7229_v21 = vld [vmem:[%s8404_s0 + $0x20] sm:$0xff]  ;;  %v2367_v3 = vld [vmem:[%s7051_s10 + $0x48] sm:$0xff] }
 0x49b   : > { %3515 = vmatpush.msrb.mxu1 %v2998_v6  ;;  %3602 = vmatpush.msra.mxu2 %v2719_v9  ;;  %v2503_v4 = vld [vmem:[%s7051_s10 + $0x488] sm:$0xff] }
 0x49c   : > { %3561 = vmatpush.msra.mxu0 %v2471_v7  ;;  %3621 = vmatpush.msra.mxu3 %v2855_v11  ;;  %v2615_v5 = vld [vmem:[%s7051_s10 + $0x808] sm:$0xff] }
 0x49d   : > { %3580 = vmatpush.msra.mxu1 %v2607_v10  ;;  %3603 = vmatpush.msra.mxu2 %v2711_v13  ;;  %v2751_v6 = vld [vmem:[%s7051_s10 + $0xc48] sm:$0xff] }
 0x49e   : > { %3562 = vmatpush.msra.mxu0 %v2463_v12  ;;  %3622 = vmatpush.msra.mxu3 %v2847_v15  ;;  %v3247_v7 = vld [vmem:[%s7051_s10 + $0x1bc8] sm:$0xff] }
 0x49f   : > { %3581 = vmatpush.msra.mxu1 %v2599_v14  ;;  %3604 = vmatpush.msra.mxu2 %v2703_v19  ;;  %v2359_v9 = vld [vmem:[%s7051_s10 + $0x8] sm:$0xff] }
 0x4a0   : > { %3563 = vmatpush.msra.mxu0 %v2455_v17  ;;  %3623 = vmatpush.msra.mxu3 %v2839_v20  ;;  %v2495_v10 = vld [vmem:[%s7051_s10 + $0x448] sm:$0xff] }
 0x4a1   : > { %3582 = vmatpush.msra.mxu1 %v2591_v18  ;;  %3496 = vmatmul.f32.vlgmr.msrb.gmra.mxu0 %v7229_v21  ;;  %v2743_v11 = vld [vmem:[%s7051_s10 + $0xc08] sm:$0xff] }
 0x4a2   : > { %3564 = vmatpush.msra.mxu0 %v2447_v23  ;;  %3605 = vmatpush.msra.mxu2 %v2695_v25  ;;  %v2991_v12 = vld [vmem:[%s7051_s10 + $0x13c8] sm:$0xff] }
 0x4a3   : > { %3583 = vmatpush.msra.mxu1 %v2583_v24  ;;  %3624 = vmatpush.msra.mxu3 %v2831_v26  ;;  %v3239_v13 = vld [vmem:[%s7051_s10 + $0x1b88] sm:$0xff] }
 0x4a4   : > { %3516 = vmatmul.f32.vlgmr.msrb.gmra.mxu1 %v7245_v27  ;;  %3565 = vmatpush.msra.mxu0 %v2439_v28  ;;  %v3375_v14 = vld [vmem:[%s7051_s10 + $0x1fc8] sm:$0xff] }
 0x4a5   : > { %3584 = vmatpush.msra.mxu1 %v2575_v29  ;;  %3606 = vmatpush.msra.mxu2 %v2687_v30  ;;  %v2487_v15 = vld [vmem:[%s7051_s10 + $0x408] sm:$0xff] }
 0x4a6   : > { %3625 = vmatpush.msra.mxu3 %v2823_v31  ;;  %3566 = vmatpush.msra.mxu0 %v2431_v32  ;;  %v2983_v17 = vld [vmem:[%s7051_s10 + $0x1388] sm:$0xff] }
 0x4a7   : > { %3585 = vmatpush.msra.mxu1 %v2567_v33  ;;  %3607 = vmatpush.msra.mxu2 %v2679_v34  ;;  %v3119_v18 = vld [vmem:[%s7051_s10 + $0x17c8] sm:$0xff] }
 0x4a8   : > { %3626 = vmatpush.msra.mxu3 %v2815_v35  ;;  %3567 = vmatpush.msra.mxu0 %v2423_v36  ;;  %v3231_v19 = vld [vmem:[%s7051_s10 + $0x1b48] sm:$0xff] }
 0x4a9   : > { %3586 = vmatpush.msra.mxu1 %v2559_v37  ;;  %3608 = vmatpush.msra.mxu2 %v2671_v38  ;;  %v3367_v20 = vld [vmem:[%s7051_s10 + $0x1f88] sm:$0xff] }
 0x4aa   : > { %3627 = vmatpush.msra.mxu3 %v2807_v39  ;;  %3568 = vmatpush.msra.mxu0 %v2415_v40  ;;  %v2975_v23 = vld [vmem:[%s7051_s10 + $0x1348] sm:$0xff] }
 0x4ab   : > { %3587 = vmatpush.msra.mxu1 %v2551_v41  ;;  %3609 = vmatpush.msra.mxu2 %v2663_v42  ;;  %v3111_v24 = vld [vmem:[%s7051_s10 + $0x1788] sm:$0xff] }
 0x4ac   : > { %3628 = vmatpush.msra.mxu3 %v2799_v43  ;;  %3569 = vmatpush.msra.mxu0 %v2407_v44  ;;  %v3223_v25 = vld [vmem:[%s7051_s10 + $0x1b08] sm:$0xff] }
 0x4ad   : > { %3588 = vmatpush.msra.mxu1 %v2543_v45  ;;  %3610 = vmatpush.msra.mxu2 %v2655_v46  ;;  %v3359_v26 = vld [vmem:[%s7051_s10 + $0x1f48] sm:$0xff] }
 0x4ae   : > { %3629 = vmatpush.msra.mxu3 %v2791_v47  ;;  %3570 = vmatpush.msra.mxu0 %v2399_v48  ;;  %v2967_v28 = vld [vmem:[%s7051_s10 + $0x1308] sm:$0xff] }
 0x4af   : > { %3589 = vmatpush.msra.mxu1 %v2535_v49  ;;  %3611 = vmatpush.msra.mxu2 %v2647_v50  ;;  %v3103_v29 = vld [vmem:[%s7051_s10 + $0x1748] sm:$0xff] }
 0x4b0   : > { %3630 = vmatpush.msra.mxu3 %v2783_v51  ;;  %3571 = vmatpush.msra.mxu0 %v2391_v52  ;;  %v3215_v30 = vld [vmem:[%s7051_s10 + $0x1ac8] sm:$0xff] }
 0x4b1   : > { %3590 = vmatpush.msra.mxu1 %v2527_v53  ;;  %3612 = vmatpush.msra.mxu2 %v2639_v54  ;;  %v3351_v31 = vld [vmem:[%s7051_s10 + $0x1f08] sm:$0xff] }
 0x4b2   : > { %3631 = vmatpush.msra.mxu3 %v2775_v55  ;;  %3572 = vmatpush.msra.mxu0 %v2383_v56  ;;  %v2959_v32 = vld [vmem:[%s7051_s10 + $0x12c8] sm:$0xff] }
 0x4b3   : > { %3591 = vmatpush.msra.mxu1 %v2519_v57  ;;  %3613 = vmatpush.msra.mxu2 %v2631_v58  ;;  %v3095_v33 = vld [vmem:[%s7051_s10 + $0x1708] sm:$0xff] }
 0x4b4   : > { %3632 = vmatpush.msra.mxu3 %v2767_v59  ;;  %3573 = vmatpush.msra.mxu0 %v2375_v61  ;;  %v3207_v34 = vld [vmem:[%s7051_s10 + $0x1a88] sm:$0xff] }
 0x4b5   : > { %3592 = vmatpush.msra.mxu1 %v2511_v62  ;;  %3614 = vmatpush.msra.mxu2 %v2623_v63  ;;  %v3343_v35 = vld [vmem:[%s7051_s10 + $0x1ec8] sm:$0xff] }
 0x4b6   : > { %3633 = vmatpush.msra.mxu3 %v2759_v0  ;;  %3574 = vmatpush.msra.mxu0 %v2367_v3  ;;  %v2951_v36 = vld [vmem:[%s7051_s10 + $0x1288] sm:$0xff] }
 0x4b7   : > { %3593 = vmatpush.msra.mxu1 %v2503_v4  ;;  %3615 = vmatpush.msra.mxu2 %v2615_v5  ;;  %v3087_v37 = vld [vmem:[%s7051_s10 + $0x16c8] sm:$0xff] }
 0x4b8   : > { %3634 = vmatpush.msra.mxu3 %v2751_v6  ;;  %3575 = vmatpush.msra.mxu0 %v2359_v9  ;;  %v3199_v38 = vld [vmem:[%s7051_s10 + $0x1a48] sm:$0xff] }
 0x4b9   : > { %3680 = vmatpush.msrb.mxu2 %v3247_v7  ;;  %3594 = vmatpush.msra.mxu1 %v2495_v10  ;;  %v3335_v39 = vld [vmem:[%s7051_s10 + $0x1e88] sm:$0xff] }
 0x4ba   : > { %3635 = vmatpush.msra.mxu3 %v2743_v11  ;;  %3640 = vmatpush.msrb.mxu0 %v2991_v12  ;;  %v2943_v40 = vld [vmem:[%s7051_s10 + $0x1248] sm:$0xff] }
 0x4bb   : > { %3681 = vmatpush.msrb.mxu2 %v3239_v13  ;;  %3595 = vmatpush.msra.mxu1 %v2487_v15  ;;  %v3079_v41 = vld [vmem:[%s7051_s10 + $0x1688] sm:$0xff] }
 0x4bc   : > { %3700 = vmatpush.msrb.mxu3 %v3375_v14  ;;  %3641 = vmatpush.msrb.mxu0 %v2983_v17  ;;  %v3191_v42 = vld [vmem:[%s7051_s10 + $0x1a08] sm:$0xff] }
 0x4bd   : > { %3660 = vmatpush.msrb.mxu1 %v3119_v18  ;;  %3682 = vmatpush.msrb.mxu2 %v3231_v19  ;;  %v3327_v43 = vld [vmem:[%s7051_s10 + $0x1e48] sm:$0xff]  ;;  %v2736_v18 = vld [vmem:[%s7051_s10 + $0xbd0] sm:$0xff] }
 0x4be   : > { %3701 = vmatpush.msrb.mxu3 %v3367_v20  ;;  %3642 = vmatpush.msrb.mxu0 %v2975_v23  ;;  %v2935_v44 = vld [vmem:[%s7051_s10 + $0x1208] sm:$0xff]  ;;  %v2480_v23 = vld [vmem:[%s7051_s10 + $0x3d0] sm:$0xff] }
 0x4bf   : > { %3661 = vmatpush.msrb.mxu1 %v3111_v24  ;;  %3683 = vmatpush.msrb.mxu2 %v3223_v25  ;;  %v3071_v45 = vld [vmem:[%s7051_s10 + $0x1648] sm:$0xff]  ;;  %v2728_v24 = vld [vmem:[%s7051_s10 + $0xb90] sm:$0xff] }
 0x4c0   : > { %3702 = vmatpush.msrb.mxu3 %v3359_v26  ;;  %3643 = vmatpush.msrb.mxu0 %v2967_v28  ;;  %v3183_v46 = vld [vmem:[%s7051_s10 + $0x19c8] sm:$0xff]  ;;  %v2864_v25 = vld [vmem:[%s7051_s10 + $0xfd0] sm:$0xff] }
 0x4c1   : > { %3662 = vmatpush.msrb.mxu1 %v3103_v29  ;;  %3684 = vmatpush.msrb.mxu2 %v3215_v30  ;;  %v3319_v47 = vld [vmem:[%s7051_s10 + $0x1e08] sm:$0xff]  ;;  %v2472_v28 = vld [vmem:[%s7051_s10 + $0x390] sm:$0xff] }
 0x4c2   : > { %3703 = vmatpush.msrb.mxu3 %v3351_v31  ;;  %3644 = vmatpush.msrb.mxu0 %v2959_v32  ;;  %v2927_v48 = vld [vmem:[%s7051_s10 + $0x11c8] sm:$0xff]  ;;  %v2608_v29 = vld [vmem:[%s7051_s10 + $0x7d0] sm:$0xff] }
 0x4c3   : > { %3663 = vmatpush.msrb.mxu1 %v3095_v33  ;;  %3685 = vmatpush.msrb.mxu2 %v3207_v34  ;;  %v3063_v49 = vld [vmem:[%s7051_s10 + $0x1608] sm:$0xff]  ;;  %v2856_v30 = vld [vmem:[%s7051_s10 + $0xf90] sm:$0xff] }
 0x4c4   : > { %3704 = vmatpush.msrb.mxu3 %v3343_v35  ;;  %3645 = vmatpush.msrb.mxu0 %v2951_v36  ;;  %v3175_v50 = vld [vmem:[%s7051_s10 + $0x1988] sm:$0xff]  ;;  %v2464_v31 = vld [vmem:[%s7051_s10 + $0x350] sm:$0xff] }
 0x4c5   : > { %3664 = vmatpush.msrb.mxu1 %v3087_v37  ;;  %3686 = vmatpush.msrb.mxu2 %v3199_v38  ;;  %v3311_v51 = vld [vmem:[%s7051_s10 + $0x1dc8] sm:$0xff]  ;;  %v2600_v32 = vld [vmem:[%s7051_s10 + $0x790] sm:$0xff] }
 0x4c6   : > { %3705 = vmatpush.msrb.mxu3 %v3335_v39  ;;  %3646 = vmatpush.msrb.mxu0 %v2943_v40  ;;  %v2919_v52 = vld [vmem:[%s7051_s10 + $0x1188] sm:$0xff]  ;;  %v2456_v33 = vld [vmem:[%s7051_s10 + $0x310] sm:$0xff] }
 0x4c7   : > { %3665 = vmatpush.msrb.mxu1 %v3079_v41  ;;  %3687 = vmatpush.msrb.mxu2 %v3191_v42  ;;  %v3055_v53 = vld [vmem:[%s7051_s10 + $0x15c8] sm:$0xff]  ;;  %v2592_v34 = vld [vmem:[%s7051_s10 + $0x750] sm:$0xff] }
 0x4c8   : > { %3706 = vmatpush.msrb.mxu3 %v3327_v43  ;;  %3647 = vmatpush.msrb.mxu0 %v2935_v44  ;;  %v3167_v54 = vld [vmem:[%s7051_s10 + $0x1948] sm:$0xff]  ;;  %v2704_v35 = vld [vmem:[%s7051_s10 + $0xad0] sm:$0xff] }
 0x4c9   : > { %3666 = vmatpush.msrb.mxu1 %v3071_v45  ;;  %3688 = vmatpush.msrb.mxu2 %v3183_v46  ;;  %v3303_v55 = vld [vmem:[%s7051_s10 + $0x1d88] sm:$0xff]  ;;  %v2840_v36 = vld [vmem:[%s7051_s10 + $0xf10] sm:$0xff] }
 0x4ca   : > { %3707 = vmatpush.msrb.mxu3 %v3319_v47  ;;  %3648 = vmatpush.msrb.mxu0 %v2927_v48  ;;  %v2911_v56 = vld [vmem:[%s7051_s10 + $0x1148] sm:$0xff]  ;;  %v2584_v37 = vld [vmem:[%s7051_s10 + $0x710] sm:$0xff] }
 0x4cb   : > { %3667 = vmatpush.msrb.mxu1 %v3063_v49  ;;  %3689 = vmatpush.msrb.mxu2 %v3175_v50  ;;  %v3047_v57 = vld [vmem:[%s7051_s10 + $0x1588] sm:$0xff]  ;;  %v2696_v38 = vld [vmem:[%s7051_s10 + $0xa90] sm:$0xff] }
 0x4cc   : > { %3708 = vmatpush.msrb.mxu3 %v3311_v51  ;;  %3649 = vmatpush.msrb.mxu0 %v2919_v52  ;;  %v3159_v58 = vld [vmem:[%s7051_s10 + $0x1908] sm:$0xff]  ;;  %v2832_v39 = vld [vmem:[%s7051_s10 + $0xed0] sm:$0xff] }
 0x4cd   : > { %3668 = vmatpush.msrb.mxu1 %v3055_v53  ;;  %v3295_v59 = vld [vmem:[%s7051_s10 + $0x1d48] sm:$0xff]  ;;  %3690 = vmatpush.msrb.mxu2 %v3167_v54  ;;  %v2576_v40 = vld [vmem:[%s7051_s10 + $0x6d0] sm:$0xff] }
 0x4ce   : > { %3709 = vmatpush.msrb.mxu3 %v3303_v55  ;;  %v2903_v61 = vld [vmem:[%s7051_s10 + $0x1108] sm:$0xff]  ;;  %3650 = vmatpush.msrb.mxu0 %v2911_v56  ;;  %v2688_v41 = vld [vmem:[%s7051_s10 + $0xa50] sm:$0xff] }
 0x4cf   : > { %v3039_v62 = vld [vmem:[%s7051_s10 + $0x1548] sm:$0xff]  ;;  %3669 = vmatpush.msrb.mxu1 %v3047_v57  ;;  %3691 = vmatpush.msrb.mxu2 %v3159_v58  ;;  %v2824_v42 = vld [vmem:[%s7051_s10 + $0xe90] sm:$0xff] }
 0x4d0   : > { %v3151_v63 = vld [vmem:[%s7051_s10 + $0x18c8] sm:$0xff]  ;;  %3710 = vmatpush.msrb.mxu3 %v3295_v59  ;;  %3651 = vmatpush.msrb.mxu0 %v2903_v61  ;;  %v2568_v43 = vld [vmem:[%s7051_s10 + $0x690] sm:$0xff] }
 0x4d1   : > { %v3287_v0 = vld [vmem:[%s7051_s10 + $0x1d08] sm:$0xff]  ;;  %3670 = vmatpush.msrb.mxu1 %v3039_v62  ;;  %3692 = vmatpush.msrb.mxu2 %v3151_v63  ;;  %v2816_v44 = vld [vmem:[%s7051_s10 + $0xe50] sm:$0xff] }
 0x4d2   : > { %v2895_v3 = vld [vmem:[%s7051_s10 + $0x10c8] sm:$0xff]  ;;  %3711 = vmatpush.msrb.mxu3 %v3287_v0  ;;  %3616 = vmatmul.f32.vlgmr.msra.gmra.mxu2 %v7180_v60  ;;  %v2720_v60 = vld [vmem:[%s7051_s10 + $0xb50] sm:$0xff] }
 0x4d3   : > { %v3031_v4 = vld [vmem:[%s7051_s10 + $0x1508] sm:$0xff]  ;;  %3652 = vmatpush.msrb.mxu0 %v2895_v3  ;;  %3636 = vmatmul.f32.vlgmr.msra.gmra.mxu3 %v7195_v2  ;;  %v2848_v2 = vld [vmem:[%s7051_s10 + $0xf50] sm:$0xff] }
 0x4d4   : > { %v3143_v5 = vld [vmem:[%s7051_s10 + $0x1888] sm:$0xff]  ;;  %3671 = vmatpush.msrb.mxu1 %v3031_v4  ;;  %3576 = vmatmul.f32.vlgmr.msra.gmra.mxu0 %v7189_v1  ;;  %v2712_v1 = vld [vmem:[%s7051_s10 + $0xb10] sm:$0xff] }
 0x4d5   : > { %v3279_v6 = vld [vmem:[%s7051_s10 + $0x1cc8] sm:$0xff]  ;;  %3693 = vmatpush.msrb.mxu2 %v3143_v5  ;;  %3596 = vmatmul.f32.vlgmr.msra.gmra.mxu1 %v7207_v8  ;;  %v2448_v8 = vld [vmem:[%s7051_s10 + $0x2d0] sm:$0xff] }
 0x4d6   : > { %v2887_v7 = vld [vmem:[%s7051_s10 + $0x1088] sm:$0xff]  ;;  %3712 = vmatpush.msrb.mxu3 %v3279_v6  ;;  %v2424_v45 = vld [vmem:[%s7051_s10 + $0x210] sm:$0xff] }
 0x4d7   : > { %v3023_v9 = vld [vmem:[%s7051_s10 + $0x14c8] sm:$0xff]  ;;  %3653 = vmatpush.msrb.mxu0 %v2887_v7  ;;  %v2560_v46 = vld [vmem:[%s7051_s10 + $0x650] sm:$0xff] }
 0x4d8   : > { %v3135_v10 = vld [vmem:[%s7051_s10 + $0x1848] sm:$0xff]  ;;  %3672 = vmatpush.msrb.mxu1 %v3023_v9  ;;  %v2672_v47 = vld [vmem:[%s7051_s10 + $0x9d0] sm:$0xff] }
 0x4d9   : > { %v3271_v11 = vld [vmem:[%s7051_s10 + $0x1c88] sm:$0xff]  ;;  %3694 = vmatpush.msrb.mxu2 %v3135_v10  ;;  %v2416_v48 = vld [vmem:[%s7051_s10 + $0x1d0] sm:$0xff] }
 0x4da   : > { %v2879_v12 = vld [vmem:[%s7051_s10 + $0x1048] sm:$0xff]  ;;  %3713 = vmatpush.msrb.mxu3 %v3271_v11  ;;  %v2552_v49 = vld [vmem:[%s7051_s10 + $0x610] sm:$0xff] }
 0x4db   : > { %v3015_v13 = vld [vmem:[%s7051_s10 + $0x1488] sm:$0xff]  ;;  %3654 = vmatpush.msrb.mxu0 %v2879_v12  ;;  %v2664_v50 = vld [vmem:[%s7051_s10 + $0x990] sm:$0xff] }
 0x4dc   : > { %v3127_v14 = vld [vmem:[%s7051_s10 + $0x1808] sm:$0xff]  ;;  %3673 = vmatpush.msrb.mxu1 %v3015_v13  ;;  %v2800_v51 = vld [vmem:[%s7051_s10 + $0xdd0] sm:$0xff] }
 0x4dd   : > { %v3263_v15 = vld [vmem:[%s7051_s10 + $0x1c48] sm:$0xff]  ;;  %3695 = vmatpush.msrb.mxu2 %v3127_v14  ;;  %v2408_v52 = vld [vmem:[%s7051_s10 + $0x190] sm:$0xff] }
 0x4de   : > { %v2871_v17 = vld [vmem:[%s7051_s10 + $0x1008] sm:$0xff]  ;;  %3714 = vmatpush.msrb.mxu3 %v3263_v15  ;;  %3696 = vmatmul.f32.vlgmr.msrb.gmra.mxu2 %v7220_v16  ;;  %v2440_v16 = vld [vmem:[%s7051_s10 + $0x290] sm:$0xff] }
 0x4df   : > { %v3007_v19 = vld [vmem:[%s7051_s10 + $0x1448] sm:$0xff]  ;;  %3655 = vmatpush.msrb.mxu0 %v2871_v17  ;;  %3760 = vmatpush.msra.mxu2 %v2736_v18  ;;  %v2544_v53 = vld [vmem:[%s7051_s10 + $0x5d0] sm:$0xff] }
 0x4e0   : > { %v3255_v20 = vld [vmem:[%s7051_s10 + $0x1c08] sm:$0xff]  ;;  %3674 = vmatpush.msrb.mxu1 %v3007_v19  ;;  %3656 = vmatmul.f32.vlgmr.msrb.gmra.mxu0 %v7229_v21  ;;  %v2432_v21 = vld [vmem:[%s7051_s10 + $0x250] sm:$0xff] }
 0x4e1   : > { %3715 = vmatpush.msrb.mxu3 %v3255_v20  ;;  %v2999_v26 = vld [vmem:[%s7051_s10 + $0x1408] sm:$0xff]  ;;  %3720 = vmatpush.msra.mxu0 %v2480_v23  ;;  %v2656_v54 = vld [vmem:[%s7051_s10 + $0x950] sm:$0xff] }
 0x4e2   : > { %3761 = vmatpush.msra.mxu2 %v2728_v24  ;;  %3675 = vmatpush.msrb.mxu1 %v2999_v26  ;;  %v2792_v55 = vld [vmem:[%s7051_s10 + $0xd90] sm:$0xff] }
 0x4e3   : > { %3780 = vmatpush.msra.mxu3 %v2864_v25  ;;  %3721 = vmatpush.msra.mxu0 %v2472_v28  ;;  %v2400_v56 = vld [vmem:[%s7051_s10 + $0x150] sm:$0xff] }
 0x4e4   : > { %3762 = vmatpush.msra.mxu2 %v2720_v60  ;;  %3740 = vmatpush.msra.mxu1 %v2608_v29  ;;  %v2536_v57 = vld [vmem:[%s7051_s10 + $0x590] sm:$0xff] }
 0x4e5   : > { %3781 = vmatpush.msra.mxu3 %v2856_v30  ;;  %3722 = vmatpush.msra.mxu0 %v2464_v31  ;;  %v2648_v58 = vld [vmem:[%s7051_s10 + $0x910] sm:$0xff] }
 0x4e6   : > { %3763 = vmatpush.msra.mxu2 %v2712_v1  ;;  %3741 = vmatpush.msra.mxu1 %v2600_v32  ;;  %v2784_v59 = vld [vmem:[%s7051_s10 + $0xd50] sm:$0xff] }
 0x4e7   : > { %3782 = vmatpush.msra.mxu3 %v2848_v2  ;;  %3723 = vmatpush.msra.mxu0 %v2456_v33  ;;  %v2392_v61 = vld [vmem:[%s7051_s10 + $0x110] sm:$0xff] }
 0x4e8   : > { %3742 = vmatpush.msra.mxu1 %v2592_v34  ;;  %3764 = vmatpush.msra.mxu2 %v2704_v35  ;;  %v2528_v62 = vld [vmem:[%s7051_s10 + $0x550] sm:$0xff] }
 0x4e9   : > { %3783 = vmatpush.msra.mxu3 %v2840_v36  ;;  %3724 = vmatpush.msra.mxu0 %v2448_v8  ;;  %v2640_v63 = vld [vmem:[%s7051_s10 + $0x8d0] sm:$0xff] }
 0x4ea   : > { %3716 = vmatmul.f32.vlgmr.msrb.gmra.mxu3 %v7235_v22  ;;  %3743 = vmatpush.msra.mxu1 %v2584_v37  ;;  %v2680_v22 = vld [vmem:[%s7051_s10 + $0xa10] sm:$0xff] }
 0x4eb   : > { %3765 = vmatpush.msra.mxu2 %v2696_v38  ;;  %3784 = vmatpush.msra.mxu3 %v2832_v39  ;;  %v2776_v0 = vld [vmem:[%s7051_s10 + $0xd10] sm:$0xff] }
 0x4ec   : > { %3676 = vmatmul.f32.vlgmr.msrb.gmra.mxu1 %v7245_v27  ;;  %3725 = vmatpush.msra.mxu0 %v2440_v16  ;;  %v2808_v27 = vld [vmem:[%s7051_s10 + $0xe10] sm:$0xff] }
 0x4ed   : > { %3744 = vmatpush.msra.mxu1 %v2576_v40  ;;  %3766 = vmatpush.msra.mxu2 %v2688_v41  ;;  %v2384_v3 = vld [vmem:[%s7051_s10 + $0xd0] sm:$0xff] }
 0x4ee   : > { %3785 = vmatpush.msra.mxu3 %v2824_v42  ;;  %3726 = vmatpush.msra.mxu0 %v2432_v21  ;;  %v2520_v4 = vld [vmem:[%s7051_s10 + $0x510] sm:$0xff] }
 0x4ef   : > { %3745 = vmatpush.msra.mxu1 %v2568_v43  ;;  %3767 = vmatpush.msra.mxu2 %v2680_v22  ;;  %v2632_v5 = vld [vmem:[%s7051_s10 + $0x890] sm:$0xff] }
 0x4f0   : > { %3786 = vmatpush.msra.mxu3 %v2816_v44  ;;  %3727 = vmatpush.msra.mxu0 %v2424_v45  ;;  %v2768_v6 = vld [vmem:[%s7051_s10 + $0xcd0] sm:$0xff] }
 0x4f1   : > { %3746 = vmatpush.msra.mxu1 %v2560_v46  ;;  %3768 = vmatpush.msra.mxu2 %v2672_v47  ;;  %v2376_v7 = vld [vmem:[%s7051_s10 + $0x90] sm:$0xff] }
 0x4f2   : > { %3787 = vmatpush.msra.mxu3 %v2808_v27  ;;  %3728 = vmatpush.msra.mxu0 %v2416_v48  ;;  %v2512_v9 = vld [vmem:[%s7051_s10 + $0x4d0] sm:$0xff] }
 0x4f3   : > { %3747 = vmatpush.msra.mxu1 %v2552_v49  ;;  %3769 = vmatpush.msra.mxu2 %v2664_v50  ;;  %v2624_v10 = vld [vmem:[%s7051_s10 + $0x850] sm:$0xff] }
 0x4f4   : > { %3788 = vmatpush.msra.mxu3 %v2800_v51  ;;  %3729 = vmatpush.msra.mxu0 %v2408_v52  ;;  %v2760_v11 = vld [vmem:[%s7051_s10 + $0xc90] sm:$0xff] }
 0x4f5   : > { %3748 = vmatpush.msra.mxu1 %v2544_v53  ;;  %3770 = vmatpush.msra.mxu2 %v2656_v54  ;;  %v2368_v12 = vld [vmem:[%s7051_s10 + $0x50] sm:$0xff]  ;;  %v7484_v54 = vld [vmem:[%s7475_s8] sm:$0xff] }
 0x4f6   : > { %3789 = vmatpush.msra.mxu3 %v2792_v55  ;;  %3730 = vmatpush.msra.mxu0 %v2400_v56  ;;  %v2504_v13 = vld [vmem:[%s7051_s10 + $0x490] sm:$0xff] }
 0x4f7   : > { %3749 = vmatpush.msra.mxu1 %v2536_v57  ;;  %3771 = vmatpush.msra.mxu2 %v2648_v58  ;;  %v2616_v14 = vld [vmem:[%s7051_s10 + $0x810] sm:$0xff] }
 0x4f8   : > { %3790 = vmatpush.msra.mxu3 %v2784_v59  ;;  %3731 = vmatpush.msra.mxu0 %v2392_v61  ;;  %v2752_v15 = vld [vmem:[%s7051_s10 + $0xc50] sm:$0xff] }
 0x4f9   : > { %3750 = vmatpush.msra.mxu1 %v2528_v62  ;;  %3772 = vmatpush.msra.mxu2 %v2640_v63  ;;  %v3248_v17 = vld [vmem:[%s7051_s10 + $0x1bd0] sm:$0xff]  ;;  %v3384_v62 = vperm.slane %v7484_v54, 0 }
 0x4fa   : > { %3791 = vmatpush.msra.mxu3 %v2776_v0  ;;  %3732 = vmatpush.msra.mxu0 %v2384_v3  ;;  %v2360_v18 = vld [vmem:[%s7051_s10 + $0x10] sm:$0xff] }
 0x4fb   : > { %3751 = vmatpush.msra.mxu1 %v2520_v4  ;;  %3773 = vmatpush.msra.mxu2 %v2632_v5  ;;  %v2496_v19 = vld [vmem:[%s7051_s10 + $0x450] sm:$0xff] }
 0x4fc   : > { %3792 = vmatpush.msra.mxu3 %v2768_v6  ;;  %3733 = vmatpush.msra.mxu0 %v2376_v7  ;;  %v2744_v20 = vld [vmem:[%s7051_s10 + $0xc10] sm:$0xff] }
 0x4fd   : > { %3752 = vmatpush.msra.mxu1 %v2512_v9  ;;  %3774 = vmatpush.msra.mxu2 %v2624_v10  ;;  %v2992_v23 = vld [vmem:[%s7051_s10 + $0x13d0] sm:$0xff] }
 0x4fe   : > { %3793 = vmatpush.msra.mxu3 %v2760_v11  ;;  %3734 = vmatpush.msra.mxu0 %v2368_v12  ;;  %v3240_v24 = vld [vmem:[%s7051_s10 + $0x1b90] sm:$0xff] }
 0x4ff   : > { %3753 = vmatpush.msra.mxu1 %v2504_v13  ;;  %3775 = vmatpush.msra.mxu2 %v2616_v14  ;;  %v3376_v25 = vld [vmem:[%s7051_s10 + $0x1fd0] sm:$0xff] }
 0x500   : > { %3794 = vmatpush.msra.mxu3 %v2752_v15  ;;  %3735 = vmatpush.msra.mxu0 %v2360_v18  ;;  %v2488_v26 = vld [vmem:[%s7051_s10 + $0x410] sm:$0xff] }
 0x501   : > { %3840 = vmatpush.msrb.mxu2 %v3248_v17  ;;  %3754 = vmatpush.msra.mxu1 %v2496_v19  ;;  %v2984_v28 = vld [vmem:[%s7051_s10 + $0x1390] sm:$0xff]  ;;  %v3437_v19 = vpop.f32.mrf.mxu1 }
 0x502   : > { %3795 = vmatpush.msra.mxu3 %v2744_v20  ;;  %v3120_v60 = vld [vmem:[%s7051_s10 + $0x17d0] sm:$0xff]  ;;  %3800 = vmatpush.msrb.mxu0 %v2992_v23  ;;  %v3457_v20 = vpop.f32.mrf.mxu2 }
 0x503   : > { %3841 = vmatpush.msrb.mxu2 %v3240_v24  ;;  %v3232_v29 = vld [vmem:[%s7051_s10 + $0x1b50] sm:$0xff]  ;;  %3755 = vmatpush.msra.mxu1 %v2488_v26 }
 0x504   : > { %v3368_v30 = vld [vmem:[%s7051_s10 + $0x1f90] sm:$0xff]  ;;  %3860 = vmatpush.msrb.mxu3 %v3376_v25  ;;  %3801 = vmatpush.msrb.mxu0 %v2984_v28  ;;  %v2737_v28 = vld [vmem:[%s7051_s10 + $0xbd8] sm:$0xff] }
 0x505   : > { %v2976_v31 = vld [vmem:[%s7051_s10 + $0x1350] sm:$0xff]  ;;  %3820 = vmatpush.msrb.mxu1 %v3120_v60  ;;  %3842 = vmatpush.msrb.mxu2 %v3232_v29 }
 0x506   : > { %v3112_v1 = vld [vmem:[%s7051_s10 + $0x1790] sm:$0xff]  ;;  %3861 = vmatpush.msrb.mxu3 %v3368_v30  ;;  %3802 = vmatpush.msrb.mxu0 %v2976_v31  ;;  %v3477_v30 = vpop.f32.mrf.mxu3 }
 0x507   : > { %v3224_v32 = vld [vmem:[%s7051_s10 + $0x1b10] sm:$0xff]  ;;  %3821 = vmatpush.msrb.mxu1 %v3112_v1 }
 0x508   : > { %v3360_v2 = vld [vmem:[%s7051_s10 + $0x1f50] sm:$0xff]  ;;  %3843 = vmatpush.msrb.mxu2 %v3224_v32  ;;  %v2481_v32 = vld [vmem:[%s7051_s10 + $0x3d8] sm:$0xff] }
 0x509   : > { %v2968_v33 = vld [vmem:[%s7051_s10 + $0x1310] sm:$0xff]  ;;  %3862 = vmatpush.msrb.mxu3 %v3360_v2 }
 0x50a   : > { %v3104_v34 = vld [vmem:[%s7051_s10 + $0x1750] sm:$0xff]  ;;  %3803 = vmatpush.msrb.mxu0 %v2968_v33  ;;  %v2729_v33 = vld [vmem:[%s7051_s10 + $0xb98] sm:$0xff] }
 0x50b   : > { %v3216_v35 = vld [vmem:[%s7051_s10 + $0x1ad0] sm:$0xff]  ;;  %3822 = vmatpush.msrb.mxu1 %v3104_v34  ;;  %v2865_v34 = vld [vmem:[%s7051_s10 + $0xfd8] sm:$0xff] }
 0x50c   : > { %v3352_v36 = vld [vmem:[%s7051_s10 + $0x1f10] sm:$0xff]  ;;  %3844 = vmatpush.msrb.mxu2 %v3216_v35 }
 0x50d   : > { %v2960_v8 = vld [vmem:[%s7051_s10 + $0x12d0] sm:$0xff]  ;;  %3863 = vmatpush.msrb.mxu3 %v3352_v36  ;;  %v7531_v36 = vld [vmem:[%s8404_s0] sm:$0xff] }
 0x50e   : > { %v3096_v37 = vld [vmem:[%s7051_s10 + $0x1710] sm:$0xff]  ;;  %3804 = vmatpush.msrb.mxu0 %v2960_v8 }
 0x50f   : > { %v3208_v38 = vld [vmem:[%s7051_s10 + $0x1a90] sm:$0xff]  ;;  %3823 = vmatpush.msrb.mxu1 %v3096_v37  ;;  %3736 = vmatmul.f32.vlgmr.msra.gmra.mxu0 %v7531_v36  ;;  %v2473_v37 = vld [vmem:[%s7051_s10 + $0x398] sm:$0xff] }
 0x510   : > { %v3344_v39 = vld [vmem:[%s7051_s10 + $0x1ed0] sm:$0xff]  ;;  %3845 = vmatpush.msrb.mxu2 %v3208_v38 }
 0x511   : > { %v2952_v16 = vld [vmem:[%s7051_s10 + $0x1290] sm:$0xff]  ;;  %3864 = vmatpush.msrb.mxu3 %v3344_v39  ;;  %v7539_v39 = vld [vmem:[%s8404_s0 + $0x18] sm:$0xff] }
 0x512   : > { %v3088_v40 = vld [vmem:[%s7051_s10 + $0x16d0] sm:$0xff]  ;;  %3805 = vmatpush.msrb.mxu0 %v2952_v16  ;;  %3796 = vmatmul.f32.vlgmr.msra.gmra.mxu3 %v7539_v39  ;;  %v2721_v16 = vld [vmem:[%s7051_s10 + $0xb58] sm:$0xff] }
 0x513   : > { %v3200_v41 = vld [vmem:[%s7051_s10 + $0x1a50] sm:$0xff]  ;;  %3824 = vmatpush.msrb.mxu1 %v3088_v40  ;;  %v2609_v40 = vld [vmem:[%s7051_s10 + $0x7d8] sm:$0xff] }
 0x514   : > { %v3336_v42 = vld [vmem:[%s7051_s10 + $0x1e90] sm:$0xff]  ;;  %3846 = vmatpush.msrb.mxu2 %v3200_v41  ;;  %v2857_v41 = vld [vmem:[%s7051_s10 + $0xf98] sm:$0xff] }
 0x515   : > { %v2944_v21 = vld [vmem:[%s7051_s10 + $0x1250] sm:$0xff]  ;;  %3865 = vmatpush.msrb.mxu3 %v3336_v42 }
 0x516   : > { %v3080_v43 = vld [vmem:[%s7051_s10 + $0x1690] sm:$0xff]  ;;  %3806 = vmatpush.msrb.mxu0 %v2944_v21  ;;  %v3417_v7 = vpop.f32.mrf.mxu0  ;;  %v7552_v21 = vld [vmem:[%s7526_s14] sm:$0xff] }
 0x517   : > { %v3192_v22 = vld [vmem:[%s7051_s10 + $0x1a10] sm:$0xff]  ;;  %3825 = vmatpush.msrb.mxu1 %v3080_v43  ;;  %v3418_v11 = vadd.f32 %v3417_v7, %v3384_v62  ;;  %v2465_v43 = vld [vmem:[%s7051_s10 + $0x358] sm:$0xff] }
 0x518   : > { %v3328_v44 = vld [vmem:[%s7051_s10 + $0x1e50] sm:$0xff]  ;;  %3847 = vmatpush.msrb.mxu2 %v3192_v22  ;;  %v2713_v22 = vld [vmem:[%s7051_s10 + $0xb18] sm:$0xff] }
 0x519   : > { %v2936_v45 = vld [vmem:[%s7051_s10 + $0x1210] sm:$0xff]  ;;  %3866 = vmatpush.msrb.mxu3 %v3328_v44  ;;  %v3438_v25 = vadd.f32 %v3437_v19, %v3418_v11  ;;  %v2585_v62 = vld [vmem:[%s7051_s10 + $0x718] sm:$0xff] }
 0x51a   : > { %v3072_v46 = vld [vmem:[%s7051_s10 + $0x1650] sm:$0xff]  ;;  %3807 = vmatpush.msrb.mxu0 %v2936_v45  ;;  %v3537_v45 = vpop.f32.mrf.mxu2  ;;  %v2577_v7 = vld [vmem:[%s7051_s10 + $0x6d8] sm:$0xff] }
 0x51b   : > { %v3184_v47 = vld [vmem:[%s7051_s10 + $0x19d0] sm:$0xff]  ;;  %3826 = vmatpush.msrb.mxu1 %v3072_v46  ;;  %v3458_v29 = vadd.f32 %v3457_v20, %v3438_v25  ;;  %v7559_v46 = vld [vmem:[%s8404_s0 + $0x8] sm:$0xff]  ;;  %v2825_v11 = vld [vmem:[%s7051_s10 + $0xe98] sm:$0xff] }
 0x51c   : > { %v3320_v27 = vld [vmem:[%s7051_s10 + $0x1e10] sm:$0xff]  ;;  %3848 = vmatpush.msrb.mxu2 %v3184_v47  ;;  %3756 = vmatmul.f32.vlgmr.msra.gmra.mxu1 %v7559_v46  ;;  %v2601_v47 = vld [vmem:[%s7051_s10 + $0x798] sm:$0xff] }
 0x51d   : > { %v2928_v48 = vld [vmem:[%s7051_s10 + $0x11d0] sm:$0xff]  ;;  %3867 = vmatpush.msrb.mxu3 %v3320_v27  ;;  %v3478_v2 = vadd.f32 %v3477_v30, %v3458_v29  ;;  %v2849_v27 = vld [vmem:[%s7051_s10 + $0xf58] sm:$0xff] }
 0x51e   : > { %v3064_v49 = vld [vmem:[%s7051_s10 + $0x1610] sm:$0xff]  ;;  %3808 = vmatpush.msrb.mxu0 %v2928_v48  ;;  %v3497_v35 = vpop.f32.mrf.mxu0  ;;  %v7565_v48 = vld [vmem:[%s7547_s26] sm:$0xff]  ;;  %v2425_v19 = vld [vmem:[%s7051_s10 + $0x218] sm:$0xff] }
 0x51f   : > { %v3176_v50 = vld [vmem:[%s7051_s10 + $0x1990] sm:$0xff]  ;;  %3827 = vmatpush.msrb.mxu1 %v3064_v49  ;;  %v3498_v38 = vadd.f32 %v3497_v35, %v3478_v2  ;;  %v2457_v49 = vld [vmem:[%s7051_s10 + $0x318] sm:$0xff] }
 0x520   : > { %v3312_v51 = vld [vmem:[%s7051_s10 + $0x1dd0] sm:$0xff]  ;;  %3849 = vmatpush.msrb.mxu2 %v3176_v50  ;;  %v2561_v20 = vld [vmem:[%s7051_s10 + $0x658] sm:$0xff] }
 0x521   : > { %v2920_v52 = vld [vmem:[%s7051_s10 + $0x1190] sm:$0xff]  ;;  %3868 = vmatpush.msrb.mxu3 %v3312_v51  ;;  %v3517_v42 = vpop.f32.mrf.mxu1  ;;  %v4682_v51 = vperm.slane %v7552_v21, 0  ;;  %v2417_v25 = vld [vmem:[%s7051_s10 + $0x1d8] sm:$0xff] }
 0x522   : > { %v3056_v53 = vld [vmem:[%s7051_s10 + $0x15d0] sm:$0xff]  ;;  %3809 = vmatpush.msrb.mxu0 %v2920_v52  ;;  %v3518_v44 = vadd.f32 %v3517_v42, %v3498_v38  ;;  %v2593_v52 = vld [vmem:[%s7051_s10 + $0x758] sm:$0xff] }
 0x523   : > { %v3168_v55 = vld [vmem:[%s7051_s10 + $0x1950] sm:$0xff]  ;;  %3828 = vmatpush.msrb.mxu1 %v3056_v53  ;;  %v2705_v53 = vld [vmem:[%s7051_s10 + $0xad8] sm:$0xff] }
 0x524   : > { %v3304_v56 = vld [vmem:[%s7051_s10 + $0x1d90] sm:$0xff]  ;;  %3850 = vmatpush.msrb.mxu2 %v3168_v55  ;;  %v3538_v50 = vadd.f32 %v3537_v45, %v3518_v44  ;;  %v3557_v55 = vpop.f32.mrf.mxu3  ;;  %v2409_v29 = vld [vmem:[%s7051_s10 + $0x198] sm:$0xff] }
 0x525   : > { %v2912_v57 = vld [vmem:[%s7051_s10 + $0x1150] sm:$0xff]  ;;  %3869 = vmatpush.msrb.mxu3 %v3304_v56  ;;  %v2841_v56 = vld [vmem:[%s7051_s10 + $0xf18] sm:$0xff] }
 0x526   : > { %v3048_v58 = vld [vmem:[%s7051_s10 + $0x1590] sm:$0xff]  ;;  %3810 = vmatpush.msrb.mxu0 %v2912_v57  ;;  %v3558_v57 = vadd.f32 %v3557_v55, %v3538_v50  ;;  %v2545_v30 = vld [vmem:[%s7051_s10 + $0x5d8] sm:$0xff] }
 0x527   : > { %v3160_v59 = vld [vmem:[%s7051_s10 + $0x1910] sm:$0xff]  ;;  %3829 = vmatpush.msrb.mxu1 %v3048_v58  ;;  %v4708_v58 = vperm.slane %v7565_v48, 0  ;;  %v2401_v2 = vld [vmem:[%s7051_s10 + $0x158] sm:$0xff] }
 0x528   : > { %v3296_v61 = vld [vmem:[%s7051_s10 + $0x1d50] sm:$0xff]  ;;  %3851 = vmatpush.msrb.mxu2 %v3160_v59  ;;  %v2785_v35 = vld [vmem:[%s7051_s10 + $0xd58] sm:$0xff] }
 0x529   : > { %v2904_v63 = vld [vmem:[%s7051_s10 + $0x1110] sm:$0xff]  ;;  %3870 = vmatpush.msrb.mxu3 %v3296_v61  ;;  %v2449_v61 = vld [vmem:[%s7051_s10 + $0x2d8] sm:$0xff] }
 0x52a   : > { %v3040_v0 = vld [vmem:[%s7051_s10 + $0x1550] sm:$0xff]  ;;  %3811 = vmatpush.msrb.mxu0 %v2904_v63  ;;  %v2697_v63 = vld [vmem:[%s7051_s10 + $0xa98] sm:$0xff] }
 0x52b   : > { %v3152_v3 = vld [vmem:[%s7051_s10 + $0x18d0] sm:$0xff]  ;;  %3830 = vmatpush.msrb.mxu1 %v3040_v0  ;;  %v4698_v0 = vmul.f32 %v4682_v51, %v3558_v57  ;;  %v2641_v38 = vld [vmem:[%s7051_s10 + $0x8d8] sm:$0xff] }
 0x52c   : > { %v3288_v4 = vld [vmem:[%s7051_s10 + $0x1d10] sm:$0xff]  ;;  %3852 = vmatpush.msrb.mxu2 %v3152_v3  ;;  %v7586_v3 = vld [vmem:[%s8404_s0 + $0x20] sm:$0xff]  ;;  %v2633_v42 = vld [vmem:[%s7051_s10 + $0x898] sm:$0xff] }
 0x52d   : > { %v2896_v5 = vld [vmem:[%s7051_s10 + $0x10d0] sm:$0xff]  ;;  %3871 = vmatpush.msrb.mxu3 %v3288_v4  ;;  %v2833_v4 = vld [vmem:[%s7051_s10 + $0xed8] sm:$0xff] }
 0x52e   : > { %v3032_v6 = vld [vmem:[%s7051_s10 + $0x1510] sm:$0xff]  ;;  %3812 = vmatpush.msrb.mxu0 %v2896_v5  ;;  %v7593_v5 = vld [vmem:[%s8404_s0 + $0x38] sm:$0xff] }
 0x52f   : > { %v3144_v9 = vld [vmem:[%s7051_s10 + $0x1890] sm:$0xff]  ;;  %3831 = vmatpush.msrb.mxu1 %v3032_v6  ;;  %v2441_v6 = vld [vmem:[%s7051_s10 + $0x298] sm:$0xff] }
 0x530   : > { %v3280_v10 = vld [vmem:[%s7051_s10 + $0x1cd0] sm:$0xff]  ;;  %3853 = vmatpush.msrb.mxu2 %v3144_v9  ;;  %v4724_v9 = vadd.f32 %v4708_v58, %v4698_v0  ;;  %v2513_v44 = vld [vmem:[%s7051_s10 + $0x4d8] sm:$0xff] }
 0x531   : > { %v2888_v12 = vld [vmem:[%s7051_s10 + $0x1090] sm:$0xff]  ;;  %3872 = vmatpush.msrb.mxu3 %v3280_v10  ;;  %v2689_v10 = vld [vmem:[%s7051_s10 + $0xa58] sm:$0xff] }
 0x532   : > { %v3024_v13 = vld [vmem:[%s7051_s10 + $0x14d0] sm:$0xff]  ;;  %3813 = vmatpush.msrb.mxu0 %v2888_v12  ;;  %v7608_v12 = vld [vmem:[%s8404_s0 + $0x28] sm:$0xff]  ;;  %v2625_v45 = vld [vmem:[%s7051_s10 + $0x858] sm:$0xff] }
 0x533   : > { %v3136_v14 = vld [vmem:[%s7051_s10 + $0x1850] sm:$0xff]  ;;  %3832 = vmatpush.msrb.mxu1 %v3024_v13  ;;  %v2433_v13 = vld [vmem:[%s7051_s10 + $0x258] sm:$0xff] }
 0x534   : > { %v3272_v15 = vld [vmem:[%s7051_s10 + $0x1c90] sm:$0xff]  ;;  %3854 = vmatpush.msrb.mxu2 %v3136_v14  ;;  %v2569_v14 = vld [vmem:[%s7051_s10 + $0x698] sm:$0xff] }
 0x535   : > { %v2880_v17 = vld [vmem:[%s7051_s10 + $0x1050] sm:$0xff]  ;;  %3873 = vmatpush.msrb.mxu3 %v3272_v15  ;;  %v4732_v15 = vmax.f32 %v4724_v9, 0.0  ;;  %v2617_v50 = vld [vmem:[%s7051_s10 + $0x818] sm:$0xff] }
 0x536   : > { %v3016_v18 = vld [vmem:[%s7051_s10 + $0x1490] sm:$0xff]  ;;  %3814 = vmatpush.msrb.mxu0 %v2880_v17  ;;  %v2681_v17 = vld [vmem:[%s7051_s10 + $0xa18] sm:$0xff] }
 0x537   : > { %v3128_v23 = vld [vmem:[%s7051_s10 + $0x1810] sm:$0xff]  ;;  %3833 = vmatpush.msrb.mxu1 %v3016_v18  ;;  %v2817_v18 = vld [vmem:[%s7051_s10 + $0xe58] sm:$0xff]  ;;  %4740 = vst [vmem:[%s7603_s13] sm:$0xff] %v4732_v15 }
 0x538   : > { %v3264_v24 = vld [vmem:[%s7051_s10 + $0x1c50] sm:$0xff]  ;;  %3855 = vmatpush.msrb.mxu2 %v3128_v23  ;;  %v2673_v23 = vld [vmem:[%s7051_s10 + $0x9d8] sm:$0xff] }
 0x539   : > { %v2872_v26 = vld [vmem:[%s7051_s10 + $0x1010] sm:$0xff]  ;;  %3874 = vmatpush.msrb.mxu3 %v3264_v24  ;;  %v2809_v24 = vld [vmem:[%s7051_s10 + $0xe18] sm:$0xff] }
 0x53a   : > { %v3008_v60 = vld [vmem:[%s7051_s10 + $0x1450] sm:$0xff]  ;;  %3815 = vmatpush.msrb.mxu0 %v2872_v26  ;;  %v2553_v26 = vld [vmem:[%s7051_s10 + $0x618] sm:$0xff] }
 0x53b   : > { %v3256_v31 = vld [vmem:[%s7051_s10 + $0x1c10] sm:$0xff]  ;;  %3834 = vmatpush.msrb.mxu1 %v3008_v60  ;;  %3816 = vmatmul.f32.vlgmr.msrb.gmra.mxu0 %v7586_v3  ;;  %v2801_v60 = vld [vmem:[%s7051_s10 + $0xdd8] sm:$0xff] }
 0x53c   : > { %v7516_v1 = vld [vmem:[%s8404_s0 + $0x10] sm:$0xff]  ;;  %3875 = vmatpush.msrb.mxu3 %v3256_v31  ;;  %3880 = vmatpush.msra.mxu0 %v2481_v32  ;;  %v2657_v31 = vld [vmem:[%s7051_s10 + $0x958] sm:$0xff] }
 0x53d   : > { %3776 = vmatmul.f32.vlgmr.msra.gmra.mxu2 %v7516_v1  ;;  %v3000_v8 = vld [vmem:[%s7051_s10 + $0x1410] sm:$0xff]  ;;  %3876 = vmatmul.f32.vlgmr.msrb.gmra.mxu3 %v7593_v5  ;;  %v2793_v32 = vld [vmem:[%s7051_s10 + $0xd98] sm:$0xff] }
 0x53e   : > { %3920 = vmatpush.msra.mxu2 %v2737_v28  ;;  %3940 = vmatpush.msra.mxu3 %v2865_v34  ;;  %v7576_v59 = vld [vmem:[%s8404_s0 + $0x30] sm:$0xff]  ;;  %v2665_v28 = vld [vmem:[%s7051_s10 + $0x998] sm:$0xff] }
 0x53f   : > { %3835 = vmatpush.msrb.mxu1 %v3000_v8  ;;  %3881 = vmatpush.msra.mxu0 %v2473_v37  ;;  %v2649_v34 = vld [vmem:[%s7051_s10 + $0x918] sm:$0xff] }
 0x540   : > { %3921 = vmatpush.msra.mxu2 %v2729_v33  ;;  %3941 = vmatpush.msra.mxu3 %v2857_v41  ;;  %v2537_v33 = vld [vmem:[%s7051_s10 + $0x598] sm:$0xff] }
 0x541   : > { %3900 = vmatpush.msra.mxu1 %v2609_v40  ;;  %3882 = vmatpush.msra.mxu0 %v2465_v43  ;;  %v2393_v8 = vld [vmem:[%s7051_s10 + $0x118] sm:$0xff] }
 0x542   : > { %3922 = vmatpush.msra.mxu2 %v2721_v16  ;;  %3942 = vmatpush.msra.mxu3 %v2849_v27  ;;  %v2529_v37 = vld [vmem:[%s7051_s10 + $0x558] sm:$0xff] }
 0x543   : > { %3901 = vmatpush.msra.mxu1 %v2601_v47  ;;  %3883 = vmatpush.msra.mxu0 %v2457_v49  ;;  %v2777_v16 = vld [vmem:[%s7051_s10 + $0xd18] sm:$0xff] }
 0x544   : > { %3923 = vmatpush.msra.mxu2 %v2713_v22  ;;  %3943 = vmatpush.msra.mxu3 %v2841_v56  ;;  %v2385_v40 = vld [vmem:[%s7051_s10 + $0xd8] sm:$0xff] }
 0x545   : > { %3856 = vmatmul.f32.vlgmr.msrb.gmra.mxu2 %v7576_v59  ;;  %3902 = vmatpush.msra.mxu1 %v2593_v52  ;;  %v2521_v41 = vld [vmem:[%s7051_s10 + $0x518] sm:$0xff] }
 0x546   : > { %3924 = vmatpush.msra.mxu2 %v2705_v53  ;;  %3884 = vmatpush.msra.mxu0 %v2449_v61  ;;  %v2769_v43 = vld [vmem:[%s7051_s10 + $0xcd8] sm:$0xff] }
 0x547   : > { %3903 = vmatpush.msra.mxu1 %v2585_v62  ;;  %3944 = vmatpush.msra.mxu3 %v2833_v4  ;;  %v2377_v22 = vld [vmem:[%s7051_s10 + $0x98] sm:$0xff] }
 0x548   : > { %3925 = vmatpush.msra.mxu2 %v2697_v63  ;;  %3836 = vmatmul.f32.vlgmr.msrb.gmra.mxu1 %v7608_v12  ;;  %v2761_v47 = vld [vmem:[%s7051_s10 + $0xc98] sm:$0xff] }
 0x549   : > { %3885 = vmatpush.msra.mxu0 %v2441_v6  ;;  %3904 = vmatpush.msra.mxu1 %v2577_v7  ;;  %v2369_v27 = vld [vmem:[%s7051_s10 + $0x58] sm:$0xff] }
 0x54a   : > { %3926 = vmatpush.msra.mxu2 %v2689_v10  ;;  %3945 = vmatpush.msra.mxu3 %v2825_v11  ;;  %v2505_v49 = vld [vmem:[%s7051_s10 + $0x498] sm:$0xff] }
 0x54b   : > { %3886 = vmatpush.msra.mxu0 %v2433_v13  ;;  %3905 = vmatpush.msra.mxu1 %v2569_v14  ;;  %v2753_v51 = vld [vmem:[%s7051_s10 + $0xc58] sm:$0xff] }
 0x54c   : > { %3927 = vmatpush.msra.mxu2 %v2681_v17  ;;  %3946 = vmatpush.msra.mxu3 %v2817_v18  ;;  %v3249_v52 = vld [vmem:[%s7051_s10 + $0x1bd8] sm:$0xff] }
 0x54d   : > { %3887 = vmatpush.msra.mxu0 %v2425_v19  ;;  %3906 = vmatpush.msra.mxu1 %v2561_v20  ;;  %v2361_v53 = vld [vmem:[%s7051_s10 + $0x18] sm:$0xff] }
 0x54e   : > { %3928 = vmatpush.msra.mxu2 %v2673_v23  ;;  %3947 = vmatpush.msra.mxu3 %v2809_v24  ;;  %v2497_v55 = vld [vmem:[%s7051_s10 + $0x458] sm:$0xff] }
 0x54f   : > { %3888 = vmatpush.msra.mxu0 %v2417_v25  ;;  %3907 = vmatpush.msra.mxu1 %v2553_v26  ;;  %v2745_v56 = vld [vmem:[%s7051_s10 + $0xc18] sm:$0xff] }
 0x550   : > { %3929 = vmatpush.msra.mxu2 %v2665_v28  ;;  %3948 = vmatpush.msra.mxu3 %v2801_v60  ;;  %v2993_v57 = vld [vmem:[%s7051_s10 + $0x13d8] sm:$0xff] }
 0x551   : > { %3889 = vmatpush.msra.mxu0 %v2409_v29  ;;  %3908 = vmatpush.msra.mxu1 %v2545_v30  ;;  %v3241_v58 = vld [vmem:[%s7051_s10 + $0x1b98] sm:$0xff] }
 0x552   : > { %3930 = vmatpush.msra.mxu2 %v2657_v31  ;;  %3949 = vmatpush.msra.mxu3 %v2793_v32  ;;  %v3377_v61 = vld [vmem:[%s7051_s10 + $0x1fd8] sm:$0xff] }
 0x553   : > { %3890 = vmatpush.msra.mxu0 %v2401_v2  ;;  %3909 = vmatpush.msra.mxu1 %v2537_v33  ;;  %v2489_v62 = vld [vmem:[%s7051_s10 + $0x418] sm:$0xff] }
 0x554   : > { %3931 = vmatpush.msra.mxu2 %v2649_v34  ;;  %3950 = vmatpush.msra.mxu3 %v2785_v35  ;;  %v2985_v63 = vld [vmem:[%s7051_s10 + $0x1398] sm:$0xff] }
 0x555   : > { %3891 = vmatpush.msra.mxu0 %v2393_v8  ;;  %3910 = vmatpush.msra.mxu1 %v2529_v37  ;;  %v3121_v0 = vld [vmem:[%s7051_s10 + $0x17d8] sm:$0xff] }
 0x556   : > { %3932 = vmatpush.msra.mxu2 %v2641_v38  ;;  %3951 = vmatpush.msra.mxu3 %v2777_v16  ;;  %v3233_v4 = vld [vmem:[%s7051_s10 + $0x1b58] sm:$0xff] }
 0x557   : > { %3892 = vmatpush.msra.mxu0 %v2385_v40  ;;  %3911 = vmatpush.msra.mxu1 %v2521_v41  ;;  %v3369_v6 = vld [vmem:[%s7051_s10 + $0x1f98] sm:$0xff] }
 0x558   : > { %3933 = vmatpush.msra.mxu2 %v2633_v42  ;;  %3952 = vmatpush.msra.mxu3 %v2769_v43  ;;  %v2977_v7 = vld [vmem:[%s7051_s10 + $0x1358] sm:$0xff] }
 0x559   : > { %3893 = vmatpush.msra.mxu0 %v2377_v22  ;;  %3912 = vmatpush.msra.mxu1 %v2513_v44  ;;  %v3113_v9 = vld [vmem:[%s7051_s10 + $0x1798] sm:$0xff] }
 0x55a   : > { %3934 = vmatpush.msra.mxu2 %v2625_v45  ;;  %3953 = vmatpush.msra.mxu3 %v2761_v47  ;;  %v3225_v10 = vld [vmem:[%s7051_s10 + $0x1b18] sm:$0xff]  ;;  %v3385_v47 = vperm.slane %v7484_v54, 1 }
 0x55b   : > { %3894 = vmatpush.msra.mxu0 %v2369_v27  ;;  %3913 = vmatpush.msra.mxu1 %v2505_v49  ;;  %v3361_v11 = vld [vmem:[%s7051_s10 + $0x1f58] sm:$0xff] }
 0x55c   : > { %3935 = vmatpush.msra.mxu2 %v2617_v50  ;;  %3954 = vmatpush.msra.mxu3 %v2753_v51  ;;  %v2969_v13 = vld [vmem:[%s7051_s10 + $0x1318] sm:$0xff] }
 0x55d   : > { %3895 = vmatpush.msra.mxu0 %v2361_v53  ;;  %3914 = vmatpush.msra.mxu1 %v2497_v55  ;;  %v3105_v14 = vld [vmem:[%s7051_s10 + $0x1758] sm:$0xff]  ;;  %v3577_v55 = vpop.f32.mrf.mxu0 }
 0x55e   : > { %4000 = vmatpush.msrb.mxu2 %v3249_v52  ;;  %3955 = vmatpush.msra.mxu3 %v2745_v56  ;;  %v3217_v15 = vld [vmem:[%s7051_s10 + $0x1ad8] sm:$0xff] }
 0x55f   : > { %3960 = vmatpush.msrb.mxu0 %v2993_v57  ;;  %3915 = vmatpush.msra.mxu1 %v2489_v62  ;;  %v3353_v17 = vld [vmem:[%s7051_s10 + $0x1f18] sm:$0xff]  ;;  %v3578_v57 = vadd.f32 %v3577_v55, %v3385_v47  ;;  %v2834_v47 = vld [vmem:[%s7051_s10 + $0xee0] sm:$0xff] }
 0x560   : > { %4001 = vmatpush.msrb.mxu2 %v3241_v58  ;;  %4020 = vmatpush.msrb.mxu3 %v3377_v61  ;;  %v2961_v18 = vld [vmem:[%s7051_s10 + $0x12d8] sm:$0xff]  ;;  %v2426_v55 = vld [vmem:[%s7051_s10 + $0x220] sm:$0xff] }
 0x561   : > { %3961 = vmatpush.msrb.mxu0 %v2985_v63  ;;  %3980 = vmatpush.msrb.mxu1 %v3121_v0  ;;  %v3097_v19 = vld [vmem:[%s7051_s10 + $0x1718] sm:$0xff] }
 0x562   : > { %4002 = vmatpush.msrb.mxu2 %v3233_v4  ;;  %4021 = vmatpush.msrb.mxu3 %v3369_v6  ;;  %v3209_v20 = vld [vmem:[%s7051_s10 + $0x1a98] sm:$0xff]  ;;  %v3597_v6 = vpop.f32.mrf.mxu1 }
 0x563   : > { %3962 = vmatpush.msrb.mxu0 %v2977_v7  ;;  %3981 = vmatpush.msrb.mxu1 %v3113_v9  ;;  %v3345_v23 = vld [vmem:[%s7051_s10 + $0x1ed8] sm:$0xff]  ;;  %v3617_v7 = vpop.f32.mrf.mxu2 }
 0x564   : > { %4003 = vmatpush.msrb.mxu2 %v3225_v10  ;;  %4022 = vmatpush.msrb.mxu3 %v3361_v11  ;;  %v2953_v24 = vld [vmem:[%s7051_s10 + $0x1298] sm:$0xff]  ;;  %v3598_v11 = vadd.f32 %v3597_v6, %v3578_v57  ;;  %v2418_v57 = vld [vmem:[%s7051_s10 + $0x1e0] sm:$0xff] }
 0x565   : > { %3963 = vmatpush.msrb.mxu0 %v2969_v13  ;;  %3982 = vmatpush.msrb.mxu1 %v3105_v14  ;;  %v3089_v25 = vld [vmem:[%s7051_s10 + $0x16d8] sm:$0xff]  ;;  %v2738_v14 = vld [vmem:[%s7051_s10 + $0xbe0] sm:$0xff] }
 0x566   : > { %4004 = vmatpush.msrb.mxu2 %v3217_v15  ;;  %4023 = vmatpush.msrb.mxu3 %v3353_v17  ;;  %v3201_v26 = vld [vmem:[%s7051_s10 + $0x1a58] sm:$0xff]  ;;  %v3618_v17 = vadd.f32 %v3617_v7, %v3598_v11  ;;  %v2794_v6 = vld [vmem:[%s7051_s10 + $0xda0] sm:$0xff] }
 0x567   : > { %3964 = vmatpush.msrb.mxu0 %v2961_v18  ;;  %3983 = vmatpush.msrb.mxu1 %v3097_v19  ;;  %v3337_v28 = vld [vmem:[%s7051_s10 + $0x1e98] sm:$0xff]  ;;  %v3637_v18 = vpop.f32.mrf.mxu3  ;;  %v2402_v7 = vld [vmem:[%s7051_s10 + $0x160] sm:$0xff] }
 0x568   : > { %4005 = vmatpush.msrb.mxu2 %v3209_v20  ;;  %4024 = vmatpush.msrb.mxu3 %v3345_v23  ;;  %v2945_v60 = vld [vmem:[%s7051_s10 + $0x1258] sm:$0xff]  ;;  %v2482_v20 = vld [vmem:[%s7051_s10 + $0x3e0] sm:$0xff]  ;;  %v3638_v23 = vadd.f32 %v3637_v18, %v3618_v17 }
 0x569   : > { %v3081_v29 = vld [vmem:[%s7051_s10 + $0x1698] sm:$0xff]  ;;  %3965 = vmatpush.msrb.mxu0 %v2953_v24  ;;  %3984 = vmatpush.msrb.mxu1 %v3089_v25  ;;  %v2730_v24 = vld [vmem:[%s7051_s10 + $0xba0] sm:$0xff] }
 0x56a   : > { %v3193_v30 = vld [vmem:[%s7051_s10 + $0x1a18] sm:$0xff]  ;;  %4006 = vmatpush.msrb.mxu2 %v3201_v26  ;;  %4025 = vmatpush.msrb.mxu3 %v3337_v28  ;;  %v2866_v25 = vld [vmem:[%s7051_s10 + $0xfe0] sm:$0xff]  ;;  %v3657_v26 = vpop.f32.mrf.mxu0 }
 0x56b   : > { %v3329_v31 = vld [vmem:[%s7051_s10 + $0x1e58] sm:$0xff]  ;;  %3966 = vmatpush.msrb.mxu0 %v2945_v60  ;;  %3985 = vmatpush.msrb.mxu1 %v3081_v29  ;;  %v2474_v60 = vld [vmem:[%s7051_s10 + $0x3a0] sm:$0xff]  ;;  %v3658_v29 = vadd.f32 %v3657_v26, %v3638_v23 }
 0x56c   : > { %v2937_v32 = vld [vmem:[%s7051_s10 + $0x1218] sm:$0xff]  ;;  %4007 = vmatpush.msrb.mxu2 %v3193_v30  ;;  %4026 = vmatpush.msrb.mxu3 %v3329_v31  ;;  %v2610_v30 = vld [vmem:[%s7051_s10 + $0x7e0] sm:$0xff] }
 0x56d   : > { %v3073_v2 = vld [vmem:[%s7051_s10 + $0x1658] sm:$0xff]  ;;  %3967 = vmatpush.msrb.mxu0 %v2937_v32  ;;  %3936 = vmatmul.f32.vlgmr.msra.gmra.mxu2 %v7516_v1  ;;  %v2722_v1 = vld [vmem:[%s7051_s10 + $0xb60] sm:$0xff]  ;;  %v3677_v32 = vpop.f32.mrf.mxu1 }
 0x56e   : > { %v3185_v33 = vld [vmem:[%s7051_s10 + $0x19d8] sm:$0xff]  ;;  %3986 = vmatpush.msrb.mxu1 %v3073_v2  ;;  %3896 = vmatmul.f32.vlgmr.msra.gmra.mxu0 %v7531_v36  ;;  %v2858_v31 = vld [vmem:[%s7051_s10 + $0xfa0] sm:$0xff] }
 0x56f   : > { %v3321_v34 = vld [vmem:[%s7051_s10 + $0x1e18] sm:$0xff]  ;;  %4008 = vmatpush.msrb.mxu2 %v3185_v33  ;;  %3956 = vmatmul.f32.vlgmr.msra.gmra.mxu3 %v7539_v39  ;;  %v2466_v2 = vld [vmem:[%s7051_s10 + $0x360] sm:$0xff]  ;;  %v3678_v33 = vadd.f32 %v3677_v32, %v3658_v29 }
 0x570   : > { %v2929_v35 = vld [vmem:[%s7051_s10 + $0x11d8] sm:$0xff]  ;;  %4027 = vmatpush.msrb.mxu3 %v3321_v34  ;;  %v2714_v36 = vld [vmem:[%s7051_s10 + $0xb20] sm:$0xff]  ;;  %v3697_v34 = vpop.f32.mrf.mxu2  ;;  %3916 = vmatmul.f32.vlgmr.msra.gmra.mxu1 %v7559_v46 }
 0x571   : > { %v3065_v8 = vld [vmem:[%s7051_s10 + $0x1618] sm:$0xff]  ;;  %3968 = vmatpush.msrb.mxu0 %v2929_v35  ;;  %v2602_v39 = vld [vmem:[%s7051_s10 + $0x7a0] sm:$0xff] }
 0x572   : > { %v3177_v37 = vld [vmem:[%s7051_s10 + $0x1998] sm:$0xff]  ;;  %3987 = vmatpush.msrb.mxu1 %v3065_v8  ;;  %v2850_v35 = vld [vmem:[%s7051_s10 + $0xf60] sm:$0xff] }
 0x573   : > { %v3313_v38 = vld [vmem:[%s7051_s10 + $0x1dd8] sm:$0xff]  ;;  %4009 = vmatpush.msrb.mxu2 %v3177_v37  ;;  %v2458_v8 = vld [vmem:[%s7051_s10 + $0x320] sm:$0xff]  ;;  %v3698_v37 = vadd.f32 %v3697_v34, %v3678_v33 }
 0x574   : > { %v2921_v16 = vld [vmem:[%s7051_s10 + $0x1198] sm:$0xff]  ;;  %4028 = vmatpush.msrb.mxu3 %v3313_v38  ;;  %v4683_v38 = vperm.slane %v7552_v21, 1  ;;  %v2842_v46 = vld [vmem:[%s7051_s10 + $0xf20] sm:$0xff] }
 0x575   : > { %v3057_v40 = vld [vmem:[%s7051_s10 + $0x15d8] sm:$0xff]  ;;  %3969 = vmatpush.msrb.mxu0 %v2921_v16  ;;  %v2594_v16 = vld [vmem:[%s7051_s10 + $0x760] sm:$0xff] }
 0x576   : > { %v3169_v41 = vld [vmem:[%s7051_s10 + $0x1958] sm:$0xff]  ;;  %3988 = vmatpush.msrb.mxu1 %v3057_v40  ;;  %v2706_v40 = vld [vmem:[%s7051_s10 + $0xae0] sm:$0xff] }
 0x577   : > { %v3305_v42 = vld [vmem:[%s7051_s10 + $0x1d98] sm:$0xff]  ;;  %4010 = vmatpush.msrb.mxu2 %v3169_v41  ;;  %v3717_v41 = vpop.f32.mrf.mxu3  ;;  %v2450_v21 = vld [vmem:[%s7051_s10 + $0x2e0] sm:$0xff] }
 0x578   : > { %v2913_v43 = vld [vmem:[%s7051_s10 + $0x1158] sm:$0xff]  ;;  %4029 = vmatpush.msrb.mxu3 %v3305_v42  ;;  %v3718_v42 = vadd.f32 %v3717_v41, %v3698_v37  ;;  %v2786_v11 = vld [vmem:[%s7051_s10 + $0xd60] sm:$0xff] }
 0x579   : > { %v3049_v22 = vld [vmem:[%s7051_s10 + $0x1598] sm:$0xff]  ;;  %3970 = vmatpush.msrb.mxu0 %v2913_v43  ;;  %v4709_v43 = vperm.slane %v7565_v48, 1  ;;  %v2442_v48 = vld [vmem:[%s7051_s10 + $0x2a0] sm:$0xff] }
 0x57a   : > { %v3161_v44 = vld [vmem:[%s7051_s10 + $0x1918] sm:$0xff]  ;;  %3989 = vmatpush.msrb.mxu1 %v3049_v22  ;;  %v2586_v22 = vld [vmem:[%s7051_s10 + $0x720] sm:$0xff] }
 0x57b   : > { %v3297_v45 = vld [vmem:[%s7051_s10 + $0x1d58] sm:$0xff]  ;;  %4011 = vmatpush.msrb.mxu2 %v3161_v44  ;;  %v2698_v44 = vld [vmem:[%s7051_s10 + $0xaa0] sm:$0xff] }
 0x57c   : > { %v2905_v27 = vld [vmem:[%s7051_s10 + $0x1118] sm:$0xff]  ;;  %4030 = vmatpush.msrb.mxu3 %v3297_v45  ;;  %v4699_v45 = vmul.f32 %v4683_v38, %v3718_v42  ;;  %v2778_v17 = vld [vmem:[%s7051_s10 + $0xd20] sm:$0xff] }
 0x57d   : > { %v3041_v49 = vld [vmem:[%s7051_s10 + $0x1558] sm:$0xff]  ;;  %3971 = vmatpush.msrb.mxu0 %v2905_v27  ;;  %v2386_v18 = vld [vmem:[%s7051_s10 + $0xe0] sm:$0xff] }
 0x57e   : > { %v3153_v50 = vld [vmem:[%s7051_s10 + $0x18d8] sm:$0xff]  ;;  %3990 = vmatpush.msrb.mxu1 %v3041_v49  ;;  %v4725_v27 = vadd.f32 %v4709_v43, %v4699_v45  ;;  %v2690_v49 = vld [vmem:[%s7051_s10 + $0xa60] sm:$0xff] }
 0x57f   : > { %v3289_v51 = vld [vmem:[%s7051_s10 + $0x1d18] sm:$0xff]  ;;  %4012 = vmatpush.msrb.mxu2 %v3153_v50  ;;  %v2826_v50 = vld [vmem:[%s7051_s10 + $0xea0] sm:$0xff] }
 0x580   : > { %v2897_v52 = vld [vmem:[%s7051_s10 + $0x10d8] sm:$0xff]  ;;  %4031 = vmatpush.msrb.mxu3 %v3289_v51  ;;  %v4733_v51 = vmax.f32 %v4725_v27, 0.0  ;;  %v2770_v23 = vld [vmem:[%s7051_s10 + $0xce0] sm:$0xff] }
 0x581   : > { %v3033_v53 = vld [vmem:[%s7051_s10 + $0x1518] sm:$0xff]  ;;  %3972 = vmatpush.msrb.mxu0 %v2897_v52  ;;  %v2682_v52 = vld [vmem:[%s7051_s10 + $0xa20] sm:$0xff] }
 0x582   : > { %v3145_v54 = vld [vmem:[%s7051_s10 + $0x1898] sm:$0xff]  ;;  %3991 = vmatpush.msrb.mxu1 %v3033_v53  ;;  %v2818_v53 = vld [vmem:[%s7051_s10 + $0xe60] sm:$0xff]  ;;  %4741 = vst [vmem:[%s7603_s13 + $0x8] sm:$0xff] %v4733_v51 }
 0x583   : > { %v3281_v56 = vld [vmem:[%s7051_s10 + $0x1cd8] sm:$0xff]  ;;  %4013 = vmatpush.msrb.mxu2 %v3145_v54  ;;  %v2562_v54 = vld [vmem:[%s7051_s10 + $0x660] sm:$0xff] }
 0x584   : > { %v2889_v58 = vld [vmem:[%s7051_s10 + $0x1098] sm:$0xff]  ;;  %4032 = vmatpush.msrb.mxu3 %v3281_v56  ;;  %v2810_v56 = vld [vmem:[%s7051_s10 + $0xe20] sm:$0xff] }
 0x585   : > { %v3025_v61 = vld [vmem:[%s7051_s10 + $0x14d8] sm:$0xff]  ;;  %3973 = vmatpush.msrb.mxu0 %v2889_v58  ;;  %v2554_v58 = vld [vmem:[%s7051_s10 + $0x620] sm:$0xff] }
 0x586   : > { %v3137_v62 = vld [vmem:[%s7051_s10 + $0x1858] sm:$0xff]  ;;  %3992 = vmatpush.msrb.mxu1 %v3025_v61  ;;  %v2666_v61 = vld [vmem:[%s7051_s10 + $0x9a0] sm:$0xff] }
 0x587   : > { %v3273_v63 = vld [vmem:[%s7051_s10 + $0x1c98] sm:$0xff]  ;;  %4014 = vmatpush.msrb.mxu2 %v3137_v62  ;;  %v2802_v62 = vld [vmem:[%s7051_s10 + $0xde0] sm:$0xff] }
 0x588   : > { %v2881_v0 = vld [vmem:[%s7051_s10 + $0x1058] sm:$0xff]  ;;  %4033 = vmatpush.msrb.mxu3 %v3273_v63  ;;  %v2410_v63 = vld [vmem:[%s7051_s10 + $0x1a0] sm:$0xff] }
 0x589   : > { %v3017_v4 = vld [vmem:[%s7051_s10 + $0x1498] sm:$0xff]  ;;  %3974 = vmatpush.msrb.mxu0 %v2881_v0  ;;  %v2546_v0 = vld [vmem:[%s7051_s10 + $0x5e0] sm:$0xff] }
 0x58a   : > { %v3129_v9 = vld [vmem:[%s7051_s10 + $0x1818] sm:$0xff]  ;;  %3993 = vmatpush.msrb.mxu1 %v3017_v4  ;;  %v2658_v4 = vld [vmem:[%s7051_s10 + $0x960] sm:$0xff] }
 0x58b   : > { %v3265_v10 = vld [vmem:[%s7051_s10 + $0x1c58] sm:$0xff]  ;;  %4015 = vmatpush.msrb.mxu2 %v3129_v9  ;;  %v2538_v9 = vld [vmem:[%s7051_s10 + $0x5a0] sm:$0xff] }
 0x58c   : > { %v2873_v13 = vld [vmem:[%s7051_s10 + $0x1018] sm:$0xff]  ;;  %4034 = vmatpush.msrb.mxu3 %v3265_v10  ;;  %4016 = vmatmul.f32.vlgmr.msrb.gmra.mxu2 %v7576_v59  ;;  %v2578_v59 = vld [vmem:[%s7051_s10 + $0x6e0] sm:$0xff] }
 0x58d   : > { %v3009_v15 = vld [vmem:[%s7051_s10 + $0x1458] sm:$0xff]  ;;  %3975 = vmatpush.msrb.mxu0 %v2873_v13  ;;  %4080 = vmatpush.msra.mxu2 %v2738_v14  ;;  %v2650_v10 = vld [vmem:[%s7051_s10 + $0x920] sm:$0xff] }
 0x58e   : > { %v3257_v19 = vld [vmem:[%s7051_s10 + $0x1c18] sm:$0xff]  ;;  %3994 = vmatpush.msrb.mxu1 %v3009_v15  ;;  %3976 = vmatmul.f32.vlgmr.msrb.gmra.mxu0 %v7586_v3  ;;  %v2434_v3 = vld [vmem:[%s7051_s10 + $0x260] sm:$0xff] }
 0x58f   : > { %4035 = vmatpush.msrb.mxu3 %v3257_v19  ;;  %v3001_v28 = vld [vmem:[%s7051_s10 + $0x1418] sm:$0xff]  ;;  %4040 = vmatpush.msra.mxu0 %v2482_v20  ;;  %v2394_v13 = vld [vmem:[%s7051_s10 + $0x120] sm:$0xff] }
 0x590   : > { %4081 = vmatpush.msra.mxu2 %v2730_v24  ;;  %3995 = vmatpush.msrb.mxu1 %v3001_v28  ;;  %v2530_v14 = vld [vmem:[%s7051_s10 + $0x560] sm:$0xff] }
 0x591   : > { %4100 = vmatpush.msra.mxu3 %v2866_v25  ;;  %4041 = vmatpush.msra.mxu0 %v2474_v60  ;;  %v2642_v15 = vld [vmem:[%s7051_s10 + $0x8e0] sm:$0xff] }
 0x592   : > { %4082 = vmatpush.msra.mxu2 %v2722_v1  ;;  %4060 = vmatpush.msra.mxu1 %v2610_v30  ;;  %v2522_v19 = vld [vmem:[%s7051_s10 + $0x520] sm:$0xff] }
 0x593   : > { %4101 = vmatpush.msra.mxu3 %v2858_v31  ;;  %4042 = vmatpush.msra.mxu0 %v2466_v2  ;;  %v2634_v20 = vld [vmem:[%s7051_s10 + $0x8a0] sm:$0xff] }
 0x594   : > { %4083 = vmatpush.msra.mxu2 %v2714_v36  ;;  %4061 = vmatpush.msra.mxu1 %v2602_v39  ;;  %v2378_v24 = vld [vmem:[%s7051_s10 + $0xa0] sm:$0xff] }
 0x595   : > { %4102 = vmatpush.msra.mxu3 %v2850_v35  ;;  %4043 = vmatpush.msra.mxu0 %v2458_v8  ;;  %v2514_v25 = vld [vmem:[%s7051_s10 + $0x4e0] sm:$0xff] }
 0x596   : > { %4062 = vmatpush.msra.mxu1 %v2594_v16  ;;  %4084 = vmatpush.msra.mxu2 %v2706_v40  ;;  %v2626_v26 = vld [vmem:[%s7051_s10 + $0x860] sm:$0xff] }
 0x597   : > { %4103 = vmatpush.msra.mxu3 %v2842_v46  ;;  %4044 = vmatpush.msra.mxu0 %v2450_v21  ;;  %v2762_v28 = vld [vmem:[%s7051_s10 + $0xca0] sm:$0xff] }
 0x598   : > { %4036 = vmatmul.f32.vlgmr.msrb.gmra.mxu3 %v7593_v5  ;;  %4063 = vmatpush.msra.mxu1 %v2586_v22  ;;  %v2570_v5 = vld [vmem:[%s7051_s10 + $0x6a0] sm:$0xff] }
 0x599   : > { %4085 = vmatpush.msra.mxu2 %v2698_v44  ;;  %4104 = vmatpush.msra.mxu3 %v2834_v47  ;;  %v2370_v60 = vld [vmem:[%s7051_s10 + $0x60] sm:$0xff] }
 0x59a   : > { %3996 = vmatmul.f32.vlgmr.msrb.gmra.mxu1 %v7608_v12  ;;  %4045 = vmatpush.msra.mxu0 %v2442_v48  ;;  %v2674_v12 = vld [vmem:[%s7051_s10 + $0x9e0] sm:$0xff] }
 0x59b   : > { %4064 = vmatpush.msra.mxu1 %v2578_v59  ;;  %4086 = vmatpush.msra.mxu2 %v2690_v49  ;;  %v2506_v29 = vld [vmem:[%s7051_s10 + $0x4a0] sm:$0xff] }
 0x59c   : > { %4105 = vmatpush.msra.mxu3 %v2826_v50  ;;  %4046 = vmatpush.msra.mxu0 %v2434_v3  ;;  %v2618_v1 = vld [vmem:[%s7051_s10 + $0x820] sm:$0xff] }
 0x59d   : > { %4065 = vmatpush.msra.mxu1 %v2570_v5  ;;  %4087 = vmatpush.msra.mxu2 %v2682_v52  ;;  %v2754_v30 = vld [vmem:[%s7051_s10 + $0xc60] sm:$0xff] }
 0x59e   : > { %4106 = vmatpush.msra.mxu3 %v2818_v53  ;;  %4047 = vmatpush.msra.mxu0 %v2426_v55  ;;  %v3250_v31 = vld [vmem:[%s7051_s10 + $0x1be0] sm:$0xff] }
 0x59f   : > { %4066 = vmatpush.msra.mxu1 %v2562_v54  ;;  %4088 = vmatpush.msra.mxu2 %v2674_v12  ;;  %v2362_v32 = vld [vmem:[%s7051_s10 + $0x20] sm:$0xff] }
 0x5a0   : > { %4107 = vmatpush.msra.mxu3 %v2810_v56  ;;  %4048 = vmatpush.msra.mxu0 %v2418_v57  ;;  %v2498_v2 = vld [vmem:[%s7051_s10 + $0x460] sm:$0xff] }
 0x5a1   : > { %4067 = vmatpush.msra.mxu1 %v2554_v58  ;;  %4089 = vmatpush.msra.mxu2 %v2666_v61  ;;  %v2746_v36 = vld [vmem:[%s7051_s10 + $0xc20] sm:$0xff] }
 0x5a2   : > { %4108 = vmatpush.msra.mxu3 %v2802_v62  ;;  %4049 = vmatpush.msra.mxu0 %v2410_v63  ;;  %v2994_v33 = vld [vmem:[%s7051_s10 + $0x13e0] sm:$0xff] }
 0x5a3   : > { %4068 = vmatpush.msra.mxu1 %v2546_v0  ;;  %4090 = vmatpush.msra.mxu2 %v2658_v4  ;;  %v3242_v34 = vld [vmem:[%s7051_s10 + $0x1ba0] sm:$0xff] }
 0x5a4   : > { %4109 = vmatpush.msra.mxu3 %v2794_v6  ;;  %4050 = vmatpush.msra.mxu0 %v2402_v7  ;;  %v3378_v39 = vld [vmem:[%s7051_s10 + $0x1fe0] sm:$0xff] }
 0x5a5   : > { %4069 = vmatpush.msra.mxu1 %v2538_v9  ;;  %4091 = vmatpush.msra.mxu2 %v2650_v10  ;;  %v2490_v35 = vld [vmem:[%s7051_s10 + $0x420] sm:$0xff] }
 0x5a6   : > { %4110 = vmatpush.msra.mxu3 %v2786_v11  ;;  %4051 = vmatpush.msra.mxu0 %v2394_v13  ;;  %v2986_v8 = vld [vmem:[%s7051_s10 + $0x13a0] sm:$0xff] }
 0x5a7   : > { %4070 = vmatpush.msra.mxu1 %v2530_v14  ;;  %4092 = vmatpush.msra.mxu2 %v2642_v15  ;;  %v3122_v37 = vld [vmem:[%s7051_s10 + $0x17e0] sm:$0xff] }
 0x5a8   : > { %4111 = vmatpush.msra.mxu3 %v2778_v17  ;;  %4052 = vmatpush.msra.mxu0 %v2386_v18  ;;  %v3234_v38 = vld [vmem:[%s7051_s10 + $0x1b60] sm:$0xff] }
 0x5a9   : > { %4071 = vmatpush.msra.mxu1 %v2522_v19  ;;  %4093 = vmatpush.msra.mxu2 %v2634_v20  ;;  %v3370_v16 = vld [vmem:[%s7051_s10 + $0x1fa0] sm:$0xff] }
 0x5aa   : > { %4112 = vmatpush.msra.mxu3 %v2770_v23  ;;  %4053 = vmatpush.msra.mxu0 %v2378_v24  ;;  %v2978_v40 = vld [vmem:[%s7051_s10 + $0x1360] sm:$0xff]  ;;  %v3737_v24 = vpop.f32.mrf.mxu0 }
 0x5ab   : > { %4072 = vmatpush.msra.mxu1 %v2514_v25  ;;  %4094 = vmatpush.msra.mxu2 %v2626_v26  ;;  %v3114_v41 = vld [vmem:[%s7051_s10 + $0x17a0] sm:$0xff] }
 0x5ac   : > { %4113 = vmatpush.msra.mxu3 %v2762_v28  ;;  %4054 = vmatpush.msra.mxu0 %v2370_v60  ;;  %v3226_v46 = vld [vmem:[%s7051_s10 + $0x1b20] sm:$0xff] }
 0x5ad   : > { %4073 = vmatpush.msra.mxu1 %v2506_v29  ;;  %4095 = vmatpush.msra.mxu2 %v2618_v1  ;;  %v3362_v42 = vld [vmem:[%s7051_s10 + $0x1f60] sm:$0xff] }
 0x5ae   : > { %4114 = vmatpush.msra.mxu3 %v2754_v30  ;;  %4055 = vmatpush.msra.mxu0 %v2362_v32  ;;  %v2970_v43 = vld [vmem:[%s7051_s10 + $0x1320] sm:$0xff] }
 0x5af   : > { %4160 = vmatpush.msrb.mxu2 %v3250_v31  ;;  %4074 = vmatpush.msra.mxu1 %v2498_v2  ;;  %v3106_v21 = vld [vmem:[%s7051_s10 + $0x1760] sm:$0xff]  ;;  %v3757_v2 = vpop.f32.mrf.mxu1 }
 0x5b0   : > { %4115 = vmatpush.msra.mxu3 %v2746_v36  ;;  %4120 = vmatpush.msrb.mxu0 %v2994_v33  ;;  %v3218_v22 = vld [vmem:[%s7051_s10 + $0x1ae0] sm:$0xff] }
 0x5b1   : > { %4161 = vmatpush.msrb.mxu2 %v3242_v34  ;;  %4075 = vmatpush.msra.mxu1 %v2490_v35  ;;  %v3354_v44 = vld [vmem:[%s7051_s10 + $0x1f20] sm:$0xff] }
 0x5b2   : > { %4180 = vmatpush.msrb.mxu3 %v3378_v39  ;;  %4121 = vmatpush.msrb.mxu0 %v2986_v8  ;;  %v2962_v45 = vld [vmem:[%s7051_s10 + $0x12e0] sm:$0xff]  ;;  %v2739_v8 = vld [vmem:[%s7051_s10 + $0xbe8] sm:$0xff] }
 0x5b3   : > { %4140 = vmatpush.msrb.mxu1 %v3122_v37  ;;  %4162 = vmatpush.msrb.mxu2 %v3234_v38  ;;  %v3098_v47 = vld [vmem:[%s7051_s10 + $0x1720] sm:$0xff] }
 0x5b4   : > { %4181 = vmatpush.msrb.mxu3 %v3370_v16  ;;  %4122 = vmatpush.msrb.mxu0 %v2978_v40  ;;  %v3210_v48 = vld [vmem:[%s7051_s10 + $0x1aa0] sm:$0xff]  ;;  %v3797_v16 = vpop.f32.mrf.mxu3 }
 0x5b5   : > { %4141 = vmatpush.msrb.mxu1 %v3114_v41  ;;  %4163 = vmatpush.msrb.mxu2 %v3226_v46  ;;  %v3346_v59 = vld [vmem:[%s7051_s10 + $0x1ee0] sm:$0xff]  ;;  %v7863_v41 = vld [vmem:[%s8404_s0 + $0x10] sm:$0xff]  ;;  %v2483_v46 = vld [vmem:[%s7051_s10 + $0x3e8] sm:$0xff] }
 0x5b6   : > { %4182 = vmatpush.msrb.mxu3 %v3362_v42  ;;  %4123 = vmatpush.msrb.mxu0 %v2970_v43  ;;  %v2954_v27 = vld [vmem:[%s7051_s10 + $0x12a0] sm:$0xff]  ;;  %v2731_v43 = vld [vmem:[%s7051_s10 + $0xba8] sm:$0xff] }
 0x5b7   : > { %4142 = vmatpush.msrb.mxu1 %v3106_v21  ;;  %4164 = vmatpush.msrb.mxu2 %v3218_v22  ;;  %v3090_v49 = vld [vmem:[%s7051_s10 + $0x16e0] sm:$0xff]  ;;  %v2867_v21 = vld [vmem:[%s7051_s10 + $0xfe8] sm:$0xff] }
 0x5b8   : > { %4183 = vmatpush.msrb.mxu3 %v3354_v44  ;;  %4124 = vmatpush.msrb.mxu0 %v2962_v45  ;;  %v3202_v50 = vld [vmem:[%s7051_s10 + $0x1a60] sm:$0xff]  ;;  %v3817_v22 = vpop.f32.mrf.mxu0 }
 0x5b9   : > { %4143 = vmatpush.msrb.mxu1 %v3098_v47  ;;  %v3338_v3 = vld [vmem:[%s7051_s10 + $0x1ea0] sm:$0xff]  ;;  %4165 = vmatpush.msrb.mxu2 %v3210_v48  ;;  %v2475_v47 = vld [vmem:[%s7051_s10 + $0x3a8] sm:$0xff] }
 0x5ba   : > { %4184 = vmatpush.msrb.mxu3 %v3346_v59  ;;  %v2946_v5 = vld [vmem:[%s7051_s10 + $0x1260] sm:$0xff]  ;;  %4125 = vmatpush.msrb.mxu0 %v2954_v27  ;;  %v7880_v59 = vld [vmem:[%s8404_s0 + $0x18] sm:$0xff]  ;;  %v2723_v27 = vld [vmem:[%s7051_s10 + $0xb68] sm:$0xff] }
 0x5bb   : > { %v3082_v51 = vld [vmem:[%s7051_s10 + $0x16a0] sm:$0xff]  ;;  %4144 = vmatpush.msrb.mxu1 %v3090_v49  ;;  %4166 = vmatpush.msrb.mxu2 %v3202_v50  ;;  %v2611_v49 = vld [vmem:[%s7051_s10 + $0x7e8] sm:$0xff] }
 0x5bc   : > { %v3194_v52 = vld [vmem:[%s7051_s10 + $0x1a20] sm:$0xff]  ;;  %4185 = vmatpush.msrb.mxu3 %v3338_v3  ;;  %4126 = vmatpush.msrb.mxu0 %v2946_v5  ;;  %v2859_v50 = vld [vmem:[%s7051_s10 + $0xfa8] sm:$0xff] }
 0x5bd   : > { %v3330_v53 = vld [vmem:[%s7051_s10 + $0x1e60] sm:$0xff]  ;;  %4145 = vmatpush.msrb.mxu1 %v3082_v51  ;;  %4167 = vmatpush.msrb.mxu2 %v3194_v52  ;;  %v2467_v5 = vld [vmem:[%s7051_s10 + $0x368] sm:$0xff] }
 0x5be   : > { %v2938_v55 = vld [vmem:[%s7051_s10 + $0x1220] sm:$0xff]  ;;  %4186 = vmatpush.msrb.mxu3 %v3330_v53  ;;  %4096 = vmatmul.f32.vlgmr.msra.gmra.mxu2 %v7863_v41  ;;  %v2715_v51 = vld [vmem:[%s7051_s10 + $0xb28] sm:$0xff] }
 0x5bf   : > { %v3074_v54 = vld [vmem:[%s7051_s10 + $0x1660] sm:$0xff]  ;;  %4127 = vmatpush.msrb.mxu0 %v2938_v55  ;;  %4116 = vmatmul.f32.vlgmr.msra.gmra.mxu3 %v7880_v59  ;;  %v7891_v55 = vld [vmem:[%s8404_s0 + $0x8] sm:$0xff] }
 0x5c0   : > { %v3186_v12 = vld [vmem:[%s7051_s10 + $0x19e0] sm:$0xff]  ;;  %4146 = vmatpush.msrb.mxu1 %v3074_v54  ;;  %v3777_v36 = vpop.f32.mrf.mxu2  ;;  %v2603_v54 = vld [vmem:[%s7051_s10 + $0x7a8] sm:$0xff] }
 0x5c1   : > { %v3322_v56 = vld [vmem:[%s7051_s10 + $0x1e20] sm:$0xff]  ;;  %4168 = vmatpush.msrb.mxu2 %v3186_v12  ;;  %4076 = vmatmul.f32.vlgmr.msra.gmra.mxu1 %v7891_v55  ;;  %v2851_v12 = vld [vmem:[%s7051_s10 + $0xf68] sm:$0xff] }
 0x5c2   : > { %v2930_v57 = vld [vmem:[%s7051_s10 + $0x11e0] sm:$0xff]  ;;  %4187 = vmatpush.msrb.mxu3 %v3322_v56  ;;  %v2459_v56 = vld [vmem:[%s7051_s10 + $0x328] sm:$0xff] }
 0x5c3   : > { %v3066_v58 = vld [vmem:[%s7051_s10 + $0x1620] sm:$0xff]  ;;  %4128 = vmatpush.msrb.mxu0 %v2930_v57 }
 0x5c4   : > { %v3178_v61 = vld [vmem:[%s7051_s10 + $0x19a0] sm:$0xff]  ;;  %4147 = vmatpush.msrb.mxu1 %v3066_v58 }
 0x5c5   : > { %v3314_v62 = vld [vmem:[%s7051_s10 + $0x1de0] sm:$0xff]  ;;  %4169 = vmatpush.msrb.mxu2 %v3178_v61  ;;  %v3837_v3 = vpop.f32.mrf.mxu1 }
 0x5c6   : > { %v2922_v63 = vld [vmem:[%s7051_s10 + $0x11a0] sm:$0xff]  ;;  %4188 = vmatpush.msrb.mxu3 %v3314_v62  ;;  %v2595_v62 = vld [vmem:[%s7051_s10 + $0x768] sm:$0xff] }
 0x5c7   : > { %v3058_v0 = vld [vmem:[%s7051_s10 + $0x15e0] sm:$0xff]  ;;  %4129 = vmatpush.msrb.mxu0 %v2922_v63  ;;  %v2707_v63 = vld [vmem:[%s7051_s10 + $0xae8] sm:$0xff] }
 0x5c8   : > { %v3170_v4 = vld [vmem:[%s7051_s10 + $0x1960] sm:$0xff]  ;;  %4148 = vmatpush.msrb.mxu1 %v3058_v0  ;;  %v3857_v53 = vpop.f32.mrf.mxu2  ;;  %v3877_v0 = vpop.f32.mrf.mxu3 }
 0x5c9   : > { %v3306_v6 = vld [vmem:[%s7051_s10 + $0x1da0] sm:$0xff]  ;;  %4170 = vmatpush.msrb.mxu2 %v3170_v4  ;;  %v2843_v4 = vld [vmem:[%s7051_s10 + $0xf28] sm:$0xff] }
 0x5ca   : > { %v2914_v7 = vld [vmem:[%s7051_s10 + $0x1160] sm:$0xff]  ;;  %4189 = vmatpush.msrb.mxu3 %v3306_v6 }
 0x5cb   : > { %v3050_v9 = vld [vmem:[%s7051_s10 + $0x15a0] sm:$0xff]  ;;  %4130 = vmatpush.msrb.mxu0 %v2914_v7 }
 0x5cc   : > { %v3162_v10 = vld [vmem:[%s7051_s10 + $0x1920] sm:$0xff]  ;;  %4149 = vmatpush.msrb.mxu1 %v3050_v9 }
 0x5cd   : > { %v3298_v11 = vld [vmem:[%s7051_s10 + $0x1d60] sm:$0xff]  ;;  %4171 = vmatpush.msrb.mxu2 %v3162_v10  ;;  %v7911_v10 = vld [vmem:[%s8404_s0 + $0x30] sm:$0xff] }
 0x5ce   : > { %v7837_v13 = vld [vmem:[%s7475_s8] sm:$0xff]  ;;  %4190 = vmatpush.msrb.mxu3 %v3298_v11  ;;  %v2451_v11 = vld [vmem:[%s7051_s10 + $0x2e8] sm:$0xff] }
 0x5cf   : > { %v3386_v14 = vperm.slane %v7837_v13, 2  ;;  %v2906_v15 = vld [vmem:[%s7051_s10 + $0x1120] sm:$0xff] }
 0x5d0   : > { %v3042_v17 = vld [vmem:[%s7051_s10 + $0x1560] sm:$0xff]  ;;  %4131 = vmatpush.msrb.mxu0 %v2906_v15  ;;  %v2699_v15 = vld [vmem:[%s7051_s10 + $0xaa8] sm:$0xff] }
 0x5d1   : > { %v3154_v18 = vld [vmem:[%s7051_s10 + $0x18e0] sm:$0xff]  ;;  %4150 = vmatpush.msrb.mxu1 %v3042_v17  ;;  %v3738_v28 = vadd.f32 %v3737_v24, %v3386_v14  ;;  %v2587_v14 = vld [vmem:[%s7051_s10 + $0x728] sm:$0xff] }
 0x5d2   : > { %v3290_v19 = vld [vmem:[%s7051_s10 + $0x1d20] sm:$0xff]  ;;  %4172 = vmatpush.msrb.mxu2 %v3154_v18  ;;  %v2579_v24 = vld [vmem:[%s7051_s10 + $0x6e8] sm:$0xff] }
 0x5d3   : > { %v2898_v20 = vld [vmem:[%s7051_s10 + $0x10e0] sm:$0xff]  ;;  %4191 = vmatpush.msrb.mxu3 %v3290_v19  ;;  %v3758_v39 = vadd.f32 %v3757_v2, %v3738_v28  ;;  %v2835_v19 = vld [vmem:[%s7051_s10 + $0xee8] sm:$0xff] }
 0x5d4   : > { %v3034_v23 = vld [vmem:[%s7051_s10 + $0x1520] sm:$0xff]  ;;  %4132 = vmatpush.msrb.mxu0 %v2898_v20  ;;  %v7927_v20 = vld [vmem:[%s8404_s0 + $0x38] sm:$0xff]  ;;  %v2827_v28 = vld [vmem:[%s7051_s10 + $0xea8] sm:$0xff] }
 0x5d5   : > { %v3146_v25 = vld [vmem:[%s7051_s10 + $0x18a0] sm:$0xff]  ;;  %4151 = vmatpush.msrb.mxu1 %v3034_v23  ;;  %v3778_v38 = vadd.f32 %v3777_v36, %v3758_v39  ;;  %v2443_v23 = vld [vmem:[%s7051_s10 + $0x2a8] sm:$0xff] }
 0x5d6   : > { %v3282_v26 = vld [vmem:[%s7051_s10 + $0x1ce0] sm:$0xff]  ;;  %4173 = vmatpush.msrb.mxu2 %v3146_v25  ;;  %v2427_v2 = vld [vmem:[%s7051_s10 + $0x228] sm:$0xff] }
 0x5d7   : > { %v2890_v60 = vld [vmem:[%s7051_s10 + $0x10a0] sm:$0xff]  ;;  %4192 = vmatpush.msrb.mxu3 %v3282_v26  ;;  %v3798_v42 = vadd.f32 %v3797_v16, %v3778_v38  ;;  %v2691_v26 = vld [vmem:[%s7051_s10 + $0xa68] sm:$0xff] }
 0x5d8   : > { %v3026_v29 = vld [vmem:[%s7051_s10 + $0x14e0] sm:$0xff]  ;;  %4133 = vmatpush.msrb.mxu0 %v2890_v60  ;;  %v7937_v60 = vld [vmem:[%s8404_s0 + $0x28] sm:$0xff] }
 0x5d9   : > { %v3138_v1 = vld [vmem:[%s7051_s10 + $0x1860] sm:$0xff]  ;;  %4152 = vmatpush.msrb.mxu1 %v3026_v29  ;;  %v3818_v48 = vadd.f32 %v3817_v22, %v3798_v42  ;;  %v2435_v29 = vld [vmem:[%s7051_s10 + $0x268] sm:$0xff] }
 0x5da   : > { %v3274_v30 = vld [vmem:[%s7051_s10 + $0x1ca0] sm:$0xff]  ;;  %4174 = vmatpush.msrb.mxu2 %v3138_v1  ;;  %v2571_v1 = vld [vmem:[%s7051_s10 + $0x6a8] sm:$0xff] }
 0x5db   : > { %v2882_v31 = vld [vmem:[%s7051_s10 + $0x1060] sm:$0xff]  ;;  %4193 = vmatpush.msrb.mxu3 %v3274_v30  ;;  %v3838_v52 = vadd.f32 %v3837_v3, %v3818_v48  ;;  %v2563_v36 = vld [vmem:[%s7051_s10 + $0x668] sm:$0xff] }
 0x5dc   : > { %v3018_v32 = vld [vmem:[%s7051_s10 + $0x14a0] sm:$0xff]  ;;  %4134 = vmatpush.msrb.mxu0 %v2882_v31  ;;  %v2683_v31 = vld [vmem:[%s7051_s10 + $0xa28] sm:$0xff] }
 0x5dd   : > { %v3130_v33 = vld [vmem:[%s7051_s10 + $0x1820] sm:$0xff]  ;;  %4153 = vmatpush.msrb.mxu1 %v3018_v32  ;;  %v3858_v57 = vadd.f32 %v3857_v53, %v3838_v52  ;;  %v2819_v32 = vld [vmem:[%s7051_s10 + $0xe68] sm:$0xff] }
 0x5de   : > { %v3266_v34 = vld [vmem:[%s7051_s10 + $0x1c60] sm:$0xff]  ;;  %4175 = vmatpush.msrb.mxu2 %v3130_v33  ;;  %v2675_v33 = vld [vmem:[%s7051_s10 + $0x9e8] sm:$0xff] }
 0x5df   : > { %v2874_v35 = vld [vmem:[%s7051_s10 + $0x1020] sm:$0xff]  ;;  %4194 = vmatpush.msrb.mxu3 %v3266_v34  ;;  %v3878_v6 = vadd.f32 %v3877_v0, %v3858_v57  ;;  %4176 = vmatmul.f32.vlgmr.msrb.gmra.mxu2 %v7911_v10  ;;  %v2811_v34 = vld [vmem:[%s7051_s10 + $0xe28] sm:$0xff] }
 0x5e0   : > { %v3010_v37 = vld [vmem:[%s7051_s10 + $0x1460] sm:$0xff]  ;;  %4135 = vmatpush.msrb.mxu0 %v2874_v35  ;;  %4240 = vmatpush.msra.mxu2 %v2739_v8  ;;  %v2419_v39 = vld [vmem:[%s7051_s10 + $0x1e8] sm:$0xff] }
 0x5e1   : > { %v3258_v40 = vld [vmem:[%s7051_s10 + $0x1c20] sm:$0xff]  ;;  %4154 = vmatpush.msrb.mxu1 %v3010_v37  ;;  %v2555_v35 = vld [vmem:[%s7051_s10 + $0x628] sm:$0xff] }
 0x5e2   : > { %4195 = vmatpush.msrb.mxu3 %v3258_v40  ;;  %v7872_v44 = vld [vmem:[%s8404_s0] sm:$0xff]  ;;  %4241 = vmatpush.msra.mxu2 %v2731_v43  ;;  %v2667_v8 = vld [vmem:[%s7051_s10 + $0x9a8] sm:$0xff] }
 0x5e3   : > { %4056 = vmatmul.f32.vlgmr.msra.gmra.mxu0 %v7872_v44  ;;  %v3002_v45 = vld [vmem:[%s7051_s10 + $0x1420] sm:$0xff]  ;;  %4196 = vmatmul.f32.vlgmr.msrb.gmra.mxu3 %v7927_v20  ;;  %v2803_v37 = vld [vmem:[%s7051_s10 + $0xde8] sm:$0xff] }
 0x5e4   : > { %4200 = vmatpush.msra.mxu0 %v2483_v46  ;;  %4260 = vmatpush.msra.mxu3 %v2867_v21  ;;  %v7898_v58 = vld [vmem:[%s7526_s14] sm:$0xff]  ;;  %v2411_v38 = vld [vmem:[%s7051_s10 + $0x1a8] sm:$0xff] }
 0x5e5   : > { %4155 = vmatpush.msrb.mxu1 %v3002_v45  ;;  %4242 = vmatpush.msra.mxu2 %v2723_v27  ;;  %v4684_v61 = vperm.slane %v7898_v58, 2  ;;  %v7905_v7 = vld [vmem:[%s7547_s26] sm:$0xff]  ;;  %v2547_v16 = vld [vmem:[%s7051_s10 + $0x5e8] sm:$0xff] }
 0x5e6   : > { %4201 = vmatpush.msra.mxu0 %v2475_v47  ;;  %4261 = vmatpush.msra.mxu3 %v2859_v50  ;;  %v4710_v9 = vperm.slane %v7905_v7, 2  ;;  %v7920_v18 = vld [vmem:[%s8404_s0 + $0x20] sm:$0xff]  ;;  %v2659_v40 = vld [vmem:[%s7051_s10 + $0x968] sm:$0xff] }
 0x5e7   : > { %4220 = vmatpush.msra.mxu1 %v2611_v49  ;;  %4243 = vmatpush.msra.mxu2 %v2715_v51  ;;  %v4700_v17 = vmul.f32 %v4684_v61, %v3878_v6  ;;  %v2795_v46 = vld [vmem:[%s7051_s10 + $0xda8] sm:$0xff] }
 0x5e8   : > { %4202 = vmatpush.msra.mxu0 %v2467_v5  ;;  %4262 = vmatpush.msra.mxu3 %v2851_v12  ;;  %v2403_v42 = vld [vmem:[%s7051_s10 + $0x168] sm:$0xff] }
 0x5e9   : > { %4221 = vmatpush.msra.mxu1 %v2603_v54  ;;  %4244 = vmatpush.msra.mxu2 %v2707_v63  ;;  %v4726_v25 = vadd.f32 %v4710_v9, %v4700_v17  ;;  %v2539_v43 = vld [vmem:[%s7051_s10 + $0x5a8] sm:$0xff] }
 0x5ea   : > { %4203 = vmatpush.msra.mxu0 %v2459_v56  ;;  %4263 = vmatpush.msra.mxu3 %v2843_v4  ;;  %v2651_v21 = vld [vmem:[%s7051_s10 + $0x928] sm:$0xff] }
 0x5eb   : > { %4222 = vmatpush.msra.mxu1 %v2595_v62  ;;  %4136 = vmatmul.f32.vlgmr.msrb.gmra.mxu0 %v7920_v18  ;;  %v4734_v30 = vmax.f32 %v4726_v25, 0.0  ;;  %v2787_v22 = vld [vmem:[%s7051_s10 + $0xd68] sm:$0xff] }
 0x5ec   : > { %4204 = vmatpush.msra.mxu0 %v2451_v11  ;;  %4245 = vmatpush.msra.mxu2 %v2699_v15  ;;  %v2395_v45 = vld [vmem:[%s7051_s10 + $0x128] sm:$0xff] }
 0x5ed   : > { %4223 = vmatpush.msra.mxu1 %v2587_v14  ;;  %4264 = vmatpush.msra.mxu3 %v2835_v19  ;;  %4742 = vst [vmem:[%s7603_s13 + $0x10] sm:$0xff] %v4734_v30  ;;  %v2531_v47 = vld [vmem:[%s7051_s10 + $0x568] sm:$0xff] }
 0x5ee   : > { %4156 = vmatmul.f32.vlgmr.msrb.gmra.mxu1 %v7937_v60  ;;  %4205 = vmatpush.msra.mxu0 %v2443_v23  ;;  %v2643_v48 = vld [vmem:[%s7051_s10 + $0x8e8] sm:$0xff] }
 0x5ef   : > { %4224 = vmatpush.msra.mxu1 %v2579_v24  ;;  %4246 = vmatpush.msra.mxu2 %v2691_v26  ;;  %v2779_v27 = vld [vmem:[%s7051_s10 + $0xd28] sm:$0xff] }
 0x5f0   : > { %4265 = vmatpush.msra.mxu3 %v2827_v28  ;;  %4206 = vmatpush.msra.mxu0 %v2435_v29  ;;  %v2387_v49 = vld [vmem:[%s7051_s10 + $0xe8] sm:$0xff] }
 0x5f1   : > { %4225 = vmatpush.msra.mxu1 %v2571_v1  ;;  %4247 = vmatpush.msra.mxu2 %v2683_v31  ;;  %v2523_v50 = vld [vmem:[%s7051_s10 + $0x528] sm:$0xff] }
 0x5f2   : > { %4266 = vmatpush.msra.mxu3 %v2819_v32  ;;  %4207 = vmatpush.msra.mxu0 %v2427_v2  ;;  %v2635_v3 = vld [vmem:[%s7051_s10 + $0x8a8] sm:$0xff] }
 0x5f3   : > { %4226 = vmatpush.msra.mxu1 %v2563_v36  ;;  %4248 = vmatpush.msra.mxu2 %v2675_v33  ;;  %v2771_v5 = vld [vmem:[%s7051_s10 + $0xce8] sm:$0xff] }
 0x5f4   : > { %4267 = vmatpush.msra.mxu3 %v2811_v34  ;;  %4208 = vmatpush.msra.mxu0 %v2419_v39  ;;  %v2379_v51 = vld [vmem:[%s7051_s10 + $0xa8] sm:$0xff] }
 0x5f5   : > { %4227 = vmatpush.msra.mxu1 %v2555_v35  ;;  %4249 = vmatpush.msra.mxu2 %v2667_v8  ;;  %v2515_v52 = vld [vmem:[%s7051_s10 + $0x4e8] sm:$0xff] }
 0x5f6   : > { %4268 = vmatpush.msra.mxu3 %v2803_v37  ;;  %4209 = vmatpush.msra.mxu0 %v2411_v38  ;;  %v2627_v53 = vld [vmem:[%s7051_s10 + $0x868] sm:$0xff] }
 0x5f7   : > { %4228 = vmatpush.msra.mxu1 %v2547_v16  ;;  %4250 = vmatpush.msra.mxu2 %v2659_v40  ;;  %v2763_v54 = vld [vmem:[%s7051_s10 + $0xca8] sm:$0xff] }
 0x5f8   : > { %4269 = vmatpush.msra.mxu3 %v2795_v46  ;;  %4210 = vmatpush.msra.mxu0 %v2403_v42  ;;  %v2371_v12 = vld [vmem:[%s7051_s10 + $0x68] sm:$0xff] }
 0x5f9   : > { %4229 = vmatpush.msra.mxu1 %v2539_v43  ;;  %4251 = vmatpush.msra.mxu2 %v2651_v21  ;;  %v2507_v56 = vld [vmem:[%s7051_s10 + $0x4a8] sm:$0xff] }
 0x5fa   : > { %4270 = vmatpush.msra.mxu3 %v2787_v22  ;;  %4211 = vmatpush.msra.mxu0 %v2395_v45  ;;  %v2619_v57 = vld [vmem:[%s7051_s10 + $0x828] sm:$0xff] }
 0x5fb   : > { %4230 = vmatpush.msra.mxu1 %v2531_v47  ;;  %4252 = vmatpush.msra.mxu2 %v2643_v48  ;;  %v2755_v61 = vld [vmem:[%s7051_s10 + $0xc68] sm:$0xff] }
 0x5fc   : > { %4271 = vmatpush.msra.mxu3 %v2779_v27  ;;  %4212 = vmatpush.msra.mxu0 %v2387_v49  ;;  %v3251_v62 = vld [vmem:[%s7051_s10 + $0x1be8] sm:$0xff] }
 0x5fd   : > { %4231 = vmatpush.msra.mxu1 %v2523_v50  ;;  %4253 = vmatpush.msra.mxu2 %v2635_v3  ;;  %v2363_v63 = vld [vmem:[%s7051_s10 + $0x28] sm:$0xff] }
 0x5fe   : > { %4272 = vmatpush.msra.mxu3 %v2771_v5  ;;  %4213 = vmatpush.msra.mxu0 %v2379_v51  ;;  %v2499_v0 = vld [vmem:[%s7051_s10 + $0x468] sm:$0xff] }
 0x5ff   : > { %4232 = vmatpush.msra.mxu1 %v2515_v52  ;;  %4254 = vmatpush.msra.mxu2 %v2627_v53  ;;  %v2747_v4 = vld [vmem:[%s7051_s10 + $0xc28] sm:$0xff] }
 0x600   : > { %4273 = vmatpush.msra.mxu3 %v2763_v54  ;;  %4214 = vmatpush.msra.mxu0 %v2371_v12  ;;  %v2995_v6 = vld [vmem:[%s7051_s10 + $0x13e8] sm:$0xff]  ;;  %v3387_v54 = vperm.slane %v7837_v13, 3 }
 0x601   : > { %4233 = vmatpush.msra.mxu1 %v2507_v56  ;;  %4255 = vmatpush.msra.mxu2 %v2619_v57  ;;  %v3243_v9 = vld [vmem:[%s7051_s10 + $0x1ba8] sm:$0xff] }
 0x602   : > { %4274 = vmatpush.msra.mxu3 %v2755_v61  ;;  %4215 = vmatpush.msra.mxu0 %v2363_v63  ;;  %v3379_v11 = vld [vmem:[%s7051_s10 + $0x1fe8] sm:$0xff] }
 0x603   : > { %4320 = vmatpush.msrb.mxu2 %v3251_v62  ;;  %v2491_v14 = vld [vmem:[%s7051_s10 + $0x428] sm:$0xff]  ;;  %4234 = vmatpush.msra.mxu1 %v2499_v0  ;;  %v3897_v0 = vpop.f32.mrf.mxu0 }
 0x604   : > { %4275 = vmatpush.msra.mxu3 %v2747_v4  ;;  %v2987_v15 = vld [vmem:[%s7051_s10 + $0x13a8] sm:$0xff]  ;;  %4280 = vmatpush.msrb.mxu0 %v2995_v6  ;;  %v3898_v6 = vadd.f32 %v3897_v0, %v3387_v54  ;;  %v2836_v54 = vld [vmem:[%s7051_s10 + $0xef0] sm:$0xff] }
 0x605   : > { %v3123_v17 = vld [vmem:[%s7051_s10 + $0x17e8] sm:$0xff]  ;;  %4321 = vmatpush.msrb.mxu2 %v3243_v9  ;;  %4235 = vmatpush.msra.mxu1 %v2491_v14  ;;  %v2428_v0 = vld [vmem:[%s7051_s10 + $0x230] sm:$0xff] }
 0x606   : > { %v3235_v19 = vld [vmem:[%s7051_s10 + $0x1b68] sm:$0xff]  ;;  %4340 = vmatpush.msrb.mxu3 %v3379_v11  ;;  %4281 = vmatpush.msrb.mxu0 %v2987_v15 }
 0x607   : > { %v3371_v23 = vld [vmem:[%s7051_s10 + $0x1fa8] sm:$0xff]  ;;  %4300 = vmatpush.msrb.mxu1 %v3123_v17  ;;  %4322 = vmatpush.msrb.mxu2 %v3235_v19 }
 0x608   : > { %v2979_v24 = vld [vmem:[%s7051_s10 + $0x1368] sm:$0xff]  ;;  %4341 = vmatpush.msrb.mxu3 %v3371_v23  ;;  %v3917_v23 = vpop.f32.mrf.mxu1  ;;  %4256 = vmatmul.f32.vlgmr.msra.gmra.mxu2 %v7863_v41  ;;  %v2724_v41 = vld [vmem:[%s7051_s10 + $0xb70] sm:$0xff] }
 0x609   : > { %v3115_v25 = vld [vmem:[%s7051_s10 + $0x17a8] sm:$0xff]  ;;  %4282 = vmatpush.msrb.mxu0 %v2979_v24  ;;  %v3937_v24 = vpop.f32.mrf.mxu2  ;;  %4276 = vmatmul.f32.vlgmr.msra.gmra.mxu3 %v7880_v59  ;;  %v2604_v59 = vld [vmem:[%s7051_s10 + $0x7b0] sm:$0xff] }
 0x60a   : > { %v3227_v26 = vld [vmem:[%s7051_s10 + $0x1b28] sm:$0xff]  ;;  %4301 = vmatpush.msrb.mxu1 %v3115_v25  ;;  %4216 = vmatmul.f32.vlgmr.msra.gmra.mxu0 %v7872_v44  ;;  %v2716_v44 = vld [vmem:[%s7051_s10 + $0xb30] sm:$0xff] }
 0x60b   : > { %v3363_v28 = vld [vmem:[%s7051_s10 + $0x1f68] sm:$0xff]  ;;  %4323 = vmatpush.msrb.mxu2 %v3227_v26  ;;  %4236 = vmatmul.f32.vlgmr.msra.gmra.mxu1 %v7891_v55  ;;  %v2844_v55 = vld [vmem:[%s7051_s10 + $0xf30] sm:$0xff] }
 0x60c   : > { %v2971_v29 = vld [vmem:[%s7051_s10 + $0x1328] sm:$0xff]  ;;  %4342 = vmatpush.msrb.mxu3 %v3363_v28  ;;  %v3918_v28 = vadd.f32 %v3917_v23, %v3898_v6  ;;  %v2420_v6 = vld [vmem:[%s7051_s10 + $0x1f0] sm:$0xff] }
 0x60d   : > { %v3107_v1 = vld [vmem:[%s7051_s10 + $0x1768] sm:$0xff]  ;;  %4283 = vmatpush.msrb.mxu0 %v2971_v29  ;;  %v2796_v23 = vld [vmem:[%s7051_s10 + $0xdb0] sm:$0xff] }
 0x60e   : > { %v3219_v30 = vld [vmem:[%s7051_s10 + $0x1ae8] sm:$0xff]  ;;  %4302 = vmatpush.msrb.mxu1 %v3107_v1  ;;  %v2740_v1 = vld [vmem:[%s7051_s10 + $0xbf0] sm:$0xff] }
 0x60f   : > { %v3355_v31 = vld [vmem:[%s7051_s10 + $0x1f28] sm:$0xff]  ;;  %4324 = vmatpush.msrb.mxu2 %v3219_v30 }
 0x610   : > { %v2963_v32 = vld [vmem:[%s7051_s10 + $0x12e8] sm:$0xff]  ;;  %4343 = vmatpush.msrb.mxu3 %v3355_v31  ;;  %v3938_v31 = vadd.f32 %v3937_v24, %v3918_v28  ;;  %v2404_v24 = vld [vmem:[%s7051_s10 + $0x170] sm:$0xff] }
 0x611   : > { %v3099_v2 = vld [vmem:[%s7051_s10 + $0x1728] sm:$0xff]  ;;  %4284 = vmatpush.msrb.mxu0 %v2963_v32  ;;  %v3957_v32 = vpop.f32.mrf.mxu3  ;;  %v2788_v28 = vld [vmem:[%s7051_s10 + $0xd70] sm:$0xff] }
 0x612   : > { %v3211_v36 = vld [vmem:[%s7051_s10 + $0x1aa8] sm:$0xff]  ;;  %4303 = vmatpush.msrb.mxu1 %v3099_v2 }
 0x613   : > { %v3347_v33 = vld [vmem:[%s7051_s10 + $0x1ee8] sm:$0xff]  ;;  %4325 = vmatpush.msrb.mxu2 %v3211_v36  ;;  %v2484_v36 = vld [vmem:[%s7051_s10 + $0x3f0] sm:$0xff] }
 0x614   : > { %v2955_v34 = vld [vmem:[%s7051_s10 + $0x12a8] sm:$0xff]  ;;  %4344 = vmatpush.msrb.mxu3 %v3347_v33  ;;  %v3958_v33 = vadd.f32 %v3957_v32, %v3938_v31  ;;  %v2780_v31 = vld [vmem:[%s7051_s10 + $0xd30] sm:$0xff] }
 0x615   : > { %v3091_v39 = vld [vmem:[%s7051_s10 + $0x16e8] sm:$0xff]  ;;  %4285 = vmatpush.msrb.mxu0 %v2955_v34  ;;  %v2732_v34 = vld [vmem:[%s7051_s10 + $0xbb0] sm:$0xff] }
 0x616   : > { %v3203_v35 = vld [vmem:[%s7051_s10 + $0x1a68] sm:$0xff]  ;;  %4304 = vmatpush.msrb.mxu1 %v3091_v39  ;;  %v2868_v39 = vld [vmem:[%s7051_s10 + $0xff0] sm:$0xff] }
 0x617   : > { %v3339_v8 = vld [vmem:[%s7051_s10 + $0x1ea8] sm:$0xff]  ;;  %4326 = vmatpush.msrb.mxu2 %v3203_v35  ;;  %v3977_v35 = vpop.f32.mrf.mxu0  ;;  %v2388_v32 = vld [vmem:[%s7051_s10 + $0xf0] sm:$0xff] }
 0x618   : > { %v2947_v37 = vld [vmem:[%s7051_s10 + $0x1268] sm:$0xff]  ;;  %4345 = vmatpush.msrb.mxu3 %v3339_v8 }
 0x619   : > { %v3083_v38 = vld [vmem:[%s7051_s10 + $0x16a8] sm:$0xff]  ;;  %4286 = vmatpush.msrb.mxu0 %v2947_v37  ;;  %v2476_v37 = vld [vmem:[%s7051_s10 + $0x3b0] sm:$0xff] }
 0x61a   : > { %v3195_v16 = vld [vmem:[%s7051_s10 + $0x1a28] sm:$0xff]  ;;  %4305 = vmatpush.msrb.mxu1 %v3083_v38  ;;  %v3978_v38 = vadd.f32 %v3977_v35, %v3958_v33  ;;  %v2772_v33 = vld [vmem:[%s7051_s10 + $0xcf0] sm:$0xff] }
 0x61b   : > { %v3331_v40 = vld [vmem:[%s7051_s10 + $0x1e68] sm:$0xff]  ;;  %4327 = vmatpush.msrb.mxu2 %v3195_v16  ;;  %v2612_v16 = vld [vmem:[%s7051_s10 + $0x7f0] sm:$0xff] }
 0x61c   : > { %v2939_v46 = vld [vmem:[%s7051_s10 + $0x1228] sm:$0xff]  ;;  %4346 = vmatpush.msrb.mxu3 %v3331_v40  ;;  %v2860_v40 = vld [vmem:[%s7051_s10 + $0xfb0] sm:$0xff] }
 0x61d   : > { %v3075_v42 = vld [vmem:[%s7051_s10 + $0x1668] sm:$0xff]  ;;  %4287 = vmatpush.msrb.mxu0 %v2939_v46  ;;  %v3997_v46 = vpop.f32.mrf.mxu1  ;;  %v2628_v35 = vld [vmem:[%s7051_s10 + $0x870] sm:$0xff] }
 0x61e   : > { %v3187_v43 = vld [vmem:[%s7051_s10 + $0x19e8] sm:$0xff]  ;;  %4306 = vmatpush.msrb.mxu1 %v3075_v42  ;;  %v2468_v42 = vld [vmem:[%s7051_s10 + $0x370] sm:$0xff] }
 0x61f   : > { %v3323_v21 = vld [vmem:[%s7051_s10 + $0x1e28] sm:$0xff]  ;;  %4328 = vmatpush.msrb.mxu2 %v3187_v43  ;;  %v3998_v43 = vadd.f32 %v3997_v46, %v3978_v38  ;;  %v2508_v38 = vld [vmem:[%s7051_s10 + $0x4b0] sm:$0xff] }
 0x620   : > { %v2931_v22 = vld [vmem:[%s7051_s10 + $0x11e8] sm:$0xff]  ;;  %4347 = vmatpush.msrb.mxu3 %v3323_v21  ;;  %v4017_v21 = vpop.f32.mrf.mxu2  ;;  %v2364_v46 = vld [vmem:[%s7051_s10 + $0x30] sm:$0xff] }
 0x621   : > { %v3067_v45 = vld [vmem:[%s7051_s10 + $0x1628] sm:$0xff]  ;;  %4288 = vmatpush.msrb.mxu0 %v2931_v22  ;;  %v2852_v22 = vld [vmem:[%s7051_s10 + $0xf70] sm:$0xff] }
 0x622   : > { %v3179_v47 = vld [vmem:[%s7051_s10 + $0x19a8] sm:$0xff]  ;;  %4307 = vmatpush.msrb.mxu1 %v3067_v45  ;;  %v2460_v45 = vld [vmem:[%s7051_s10 + $0x330] sm:$0xff] }
 0x623   : > { %v3315_v48 = vld [vmem:[%s7051_s10 + $0x1de8] sm:$0xff]  ;;  %4329 = vmatpush.msrb.mxu2 %v3179_v47  ;;  %v4018_v47 = vadd.f32 %v4017_v21, %v3998_v43  ;;  %v2996_v43 = vld [vmem:[%s7051_s10 + $0x13f0] sm:$0xff] }
 0x624   : > { %v2923_v27 = vld [vmem:[%s7051_s10 + $0x11a8] sm:$0xff]  ;;  %4348 = vmatpush.msrb.mxu3 %v3315_v48  ;;  %v4685_v48 = vperm.slane %v7898_v58, 3  ;;  %v2452_v58 = vld [vmem:[%s7051_s10 + $0x2f0] sm:$0xff] }
 0x625   : > { %v3059_v49 = vld [vmem:[%s7051_s10 + $0x15e8] sm:$0xff]  ;;  %4289 = vmatpush.msrb.mxu0 %v2923_v27  ;;  %v2596_v27 = vld [vmem:[%s7051_s10 + $0x770] sm:$0xff] }
 0x626   : > { %v3171_v50 = vld [vmem:[%s7051_s10 + $0x1968] sm:$0xff]  ;;  %4308 = vmatpush.msrb.mxu1 %v3059_v49  ;;  %v2708_v49 = vld [vmem:[%s7051_s10 + $0xaf0] sm:$0xff] }
 0x627   : > { %v3307_v3 = vld [vmem:[%s7051_s10 + $0x1da8] sm:$0xff]  ;;  %4330 = vmatpush.msrb.mxu2 %v3171_v50  ;;  %v4037_v50 = vpop.f32.mrf.mxu3  ;;  %v3244_v21 = vld [vmem:[%s7051_s10 + $0x1bb0] sm:$0xff] }
 0x628   : > { %v2915_v5 = vld [vmem:[%s7051_s10 + $0x1168] sm:$0xff]  ;;  %4349 = vmatpush.msrb.mxu3 %v3307_v3  ;;  %v4038_v3 = vadd.f32 %v4037_v50, %v4018_v47  ;;  %v3124_v47 = vld [vmem:[%s7051_s10 + $0x17f0] sm:$0xff] }
 0x629   : > { %v3051_v51 = vld [vmem:[%s7051_s10 + $0x15a8] sm:$0xff]  ;;  %4290 = vmatpush.msrb.mxu0 %v2915_v5  ;;  %v4711_v5 = vperm.slane %v7905_v7, 3  ;;  %v2444_v7 = vld [vmem:[%s7051_s10 + $0x2b0] sm:$0xff] }
 0x62a   : > { %v3163_v52 = vld [vmem:[%s7051_s10 + $0x1928] sm:$0xff]  ;;  %4309 = vmatpush.msrb.mxu1 %v3051_v51  ;;  %v2588_v51 = vld [vmem:[%s7051_s10 + $0x730] sm:$0xff] }
 0x62b   : > { %v3299_v53 = vld [vmem:[%s7051_s10 + $0x1d68] sm:$0xff]  ;;  %4331 = vmatpush.msrb.mxu2 %v3163_v52  ;;  %v2700_v52 = vld [vmem:[%s7051_s10 + $0xab0] sm:$0xff] }
 0x62c   : > { %v2907_v12 = vld [vmem:[%s7051_s10 + $0x1128] sm:$0xff]  ;;  %4350 = vmatpush.msrb.mxu3 %v3299_v53  ;;  %v4701_v53 = vmul.f32 %v4685_v48, %v4038_v3  ;;  %v3236_v48 = vld [vmem:[%s7051_s10 + $0x1b70] sm:$0xff] }
 0x62d   : > { %v3043_v56 = vld [vmem:[%s7051_s10 + $0x1568] sm:$0xff]  ;;  %4291 = vmatpush.msrb.mxu0 %v2907_v12  ;;  %v3116_v50 = vld [vmem:[%s7051_s10 + $0x17b0] sm:$0xff] }
 0x62e   : > { %v3155_v57 = vld [vmem:[%s7051_s10 + $0x18e8] sm:$0xff]  ;;  %4310 = vmatpush.msrb.mxu1 %v3043_v56  ;;  %v4727_v12 = vadd.f32 %v4711_v5, %v4701_v53  ;;  %v2692_v56 = vld [vmem:[%s7051_s10 + $0xa70] sm:$0xff] }
 0x62f   : > { %v3291_v61 = vld [vmem:[%s7051_s10 + $0x1d28] sm:$0xff]  ;;  %4332 = vmatpush.msrb.mxu2 %v3155_v57  ;;  %v2828_v57 = vld [vmem:[%s7051_s10 + $0xeb0] sm:$0xff] }
 0x630   : > { %v2899_v62 = vld [vmem:[%s7051_s10 + $0x10e8] sm:$0xff]  ;;  %4351 = vmatpush.msrb.mxu3 %v3291_v61  ;;  %v4735_v61 = vmax.f32 %v4727_v12, 0.0  ;;  %v3364_v3 = vld [vmem:[%s7051_s10 + $0x1f70] sm:$0xff] }
 0x631   : > { %v3035_v63 = vld [vmem:[%s7051_s10 + $0x1528] sm:$0xff]  ;;  %4292 = vmatpush.msrb.mxu0 %v2899_v62  ;;  %v2684_v62 = vld [vmem:[%s7051_s10 + $0xa30] sm:$0xff] }
 0x632   : > { %v3147_v13 = vld [vmem:[%s7051_s10 + $0x18a8] sm:$0xff]  ;;  %4311 = vmatpush.msrb.mxu1 %v3035_v63  ;;  %v2820_v63 = vld [vmem:[%s7051_s10 + $0xe70] sm:$0xff]  ;;  %4743 = vst [vmem:[%s7603_s13 + $0x18] sm:$0xff] %v4735_v61 }
 0x633   : > { %v3283_v4 = vld [vmem:[%s7051_s10 + $0x1ce8] sm:$0xff]  ;;  %4333 = vmatpush.msrb.mxu2 %v3147_v13  ;;  %v2564_v13 = vld [vmem:[%s7051_s10 + $0x670] sm:$0xff] }
 0x634   : > { %v2891_v9 = vld [vmem:[%s7051_s10 + $0x10a8] sm:$0xff]  ;;  %4352 = vmatpush.msrb.mxu3 %v3283_v4  ;;  %v2812_v4 = vld [vmem:[%s7051_s10 + $0xe30] sm:$0xff] }
 0x635   : > { %v3027_v11 = vld [vmem:[%s7051_s10 + $0x14e8] sm:$0xff]  ;;  %4293 = vmatpush.msrb.mxu0 %v2891_v9  ;;  %v2556_v9 = vld [vmem:[%s7051_s10 + $0x630] sm:$0xff] }
 0x636   : > { %v3139_v14 = vld [vmem:[%s7051_s10 + $0x1868] sm:$0xff]  ;;  %4312 = vmatpush.msrb.mxu1 %v3027_v11  ;;  %v2668_v11 = vld [vmem:[%s7051_s10 + $0x9b0] sm:$0xff] }
 0x637   : > { %v3275_v15 = vld [vmem:[%s7051_s10 + $0x1ca8] sm:$0xff]  ;;  %4334 = vmatpush.msrb.mxu2 %v3139_v14  ;;  %v2804_v14 = vld [vmem:[%s7051_s10 + $0xdf0] sm:$0xff] }
 0x638   : > { %v2883_v17 = vld [vmem:[%s7051_s10 + $0x1068] sm:$0xff]  ;;  %4353 = vmatpush.msrb.mxu3 %v3275_v15  ;;  %v2412_v15 = vld [vmem:[%s7051_s10 + $0x1b0] sm:$0xff] }
 0x639   : > { %v3019_v19 = vld [vmem:[%s7051_s10 + $0x14a8] sm:$0xff]  ;;  %4294 = vmatpush.msrb.mxu0 %v2883_v17  ;;  %v2548_v17 = vld [vmem:[%s7051_s10 + $0x5f0] sm:$0xff] }
 0x63a   : > { %v3131_v25 = vld [vmem:[%s7051_s10 + $0x1828] sm:$0xff]  ;;  %4313 = vmatpush.msrb.mxu1 %v3019_v19  ;;  %v2660_v19 = vld [vmem:[%s7051_s10 + $0x970] sm:$0xff] }
 0x63b   : > { %v3267_v26 = vld [vmem:[%s7051_s10 + $0x1c68] sm:$0xff]  ;;  %4335 = vmatpush.msrb.mxu2 %v3131_v25  ;;  %v2540_v25 = vld [vmem:[%s7051_s10 + $0x5b0] sm:$0xff] }
 0x63c   : > { %v2875_v29 = vld [vmem:[%s7051_s10 + $0x1028] sm:$0xff]  ;;  %4354 = vmatpush.msrb.mxu3 %v3267_v26  ;;  %4336 = vmatmul.f32.vlgmr.msrb.gmra.mxu2 %v7911_v10  ;;  %v2580_v10 = vld [vmem:[%s7051_s10 + $0x6f0] sm:$0xff] }
 0x63d   : > { %v3011_v30 = vld [vmem:[%s7051_s10 + $0x1468] sm:$0xff]  ;;  %4295 = vmatpush.msrb.mxu0 %v2875_v29  ;;  %4400 = vmatpush.msra.mxu2 %v2740_v1  ;;  %v2652_v26 = vld [vmem:[%s7051_s10 + $0x930] sm:$0xff] }
 0x63e   : > { %v3259_v2 = vld [vmem:[%s7051_s10 + $0x1c28] sm:$0xff]  ;;  %4314 = vmatpush.msrb.mxu1 %v3011_v30  ;;  %4296 = vmatmul.f32.vlgmr.msrb.gmra.mxu0 %v7920_v18  ;;  %v2436_v18 = vld [vmem:[%s7051_s10 + $0x270] sm:$0xff] }
 0x63f   : > { %4355 = vmatpush.msrb.mxu3 %v3259_v2  ;;  %v3003_v8 = vld [vmem:[%s7051_s10 + $0x1428] sm:$0xff]  ;;  %4360 = vmatpush.msra.mxu0 %v2484_v36  ;;  %v2396_v29 = vld [vmem:[%s7051_s10 + $0x130] sm:$0xff] }
 0x640   : > { %4401 = vmatpush.msra.mxu2 %v2732_v34  ;;  %4315 = vmatpush.msrb.mxu1 %v3003_v8  ;;  %v2532_v1 = vld [vmem:[%s7051_s10 + $0x570] sm:$0xff] }
 0x641   : > { %4420 = vmatpush.msra.mxu3 %v2868_v39  ;;  %4361 = vmatpush.msra.mxu0 %v2476_v37  ;;  %v2644_v30 = vld [vmem:[%s7051_s10 + $0x8f0] sm:$0xff] }
 0x642   : > { %4402 = vmatpush.msra.mxu2 %v2724_v41  ;;  %4380 = vmatpush.msra.mxu1 %v2612_v16  ;;  %v2524_v2 = vld [vmem:[%s7051_s10 + $0x530] sm:$0xff] }
 0x643   : > { %4421 = vmatpush.msra.mxu3 %v2860_v40  ;;  %4362 = vmatpush.msra.mxu0 %v2468_v42  ;;  %v2636_v36 = vld [vmem:[%s7051_s10 + $0x8b0] sm:$0xff] }
 0x644   : > { %4403 = vmatpush.msra.mxu2 %v2716_v44  ;;  %4381 = vmatpush.msra.mxu1 %v2604_v59  ;;  %v2380_v34 = vld [vmem:[%s7051_s10 + $0xb0] sm:$0xff] }
 0x645   : > { %4422 = vmatpush.msra.mxu3 %v2852_v22  ;;  %4363 = vmatpush.msra.mxu0 %v2460_v45  ;;  %v2516_v39 = vld [vmem:[%s7051_s10 + $0x4f0] sm:$0xff] }
 0x646   : > { %4382 = vmatpush.msra.mxu1 %v2596_v27  ;;  %4404 = vmatpush.msra.mxu2 %v2708_v49  ;;  %v2764_v8 = vld [vmem:[%s7051_s10 + $0xcb0] sm:$0xff] }
 0x647   : > { %4423 = vmatpush.msra.mxu3 %v2844_v55  ;;  %4364 = vmatpush.msra.mxu0 %v2452_v58  ;;  %v2372_v37 = vld [vmem:[%s7051_s10 + $0x70] sm:$0xff] }
 0x648   : > { %4356 = vmatmul.f32.vlgmr.msrb.gmra.mxu3 %v7927_v20  ;;  %4383 = vmatpush.msra.mxu1 %v2588_v51  ;;  %v2572_v20 = vld [vmem:[%s7051_s10 + $0x6b0] sm:$0xff] }
 0x649   : > { %4405 = vmatpush.msra.mxu2 %v2700_v52  ;;  %4424 = vmatpush.msra.mxu3 %v2836_v54  ;;  %v2620_v41 = vld [vmem:[%s7051_s10 + $0x830] sm:$0xff] }
 0x64a   : > { %4316 = vmatmul.f32.vlgmr.msrb.gmra.mxu1 %v7937_v60  ;;  %4365 = vmatpush.msra.mxu0 %v2444_v7  ;;  %v2676_v60 = vld [vmem:[%s7051_s10 + $0x9f0] sm:$0xff] }
 0x64b   : > { %4384 = vmatpush.msra.mxu1 %v2580_v10  ;;  %4406 = vmatpush.msra.mxu2 %v2692_v56  ;;  %v2756_v16 = vld [vmem:[%s7051_s10 + $0xc70] sm:$0xff] }
 0x64c   : > { %4425 = vmatpush.msra.mxu3 %v2828_v57  ;;  %4366 = vmatpush.msra.mxu0 %v2436_v18  ;;  %v3252_v40 = vld [vmem:[%s7051_s10 + $0x1bf0] sm:$0xff] }
 0x64d   : > { %4385 = vmatpush.msra.mxu1 %v2572_v20  ;;  %4407 = vmatpush.msra.mxu2 %v2684_v62  ;;  %v2500_v42 = vld [vmem:[%s7051_s10 + $0x470] sm:$0xff] }
 0x64e   : > { %4426 = vmatpush.msra.mxu3 %v2820_v63  ;;  %4367 = vmatpush.msra.mxu0 %v2428_v0  ;;  %v2748_v44 = vld [vmem:[%s7051_s10 + $0xc30] sm:$0xff] }
 0x64f   : > { %4386 = vmatpush.msra.mxu1 %v2564_v13  ;;  %4408 = vmatpush.msra.mxu2 %v2676_v60  ;;  %v3380_v59 = vld [vmem:[%s7051_s10 + $0x1ff0] sm:$0xff] }
 0x650   : > { %4427 = vmatpush.msra.mxu3 %v2812_v4  ;;  %4368 = vmatpush.msra.mxu0 %v2420_v6  ;;  %v2492_v22 = vld [vmem:[%s7051_s10 + $0x430] sm:$0xff] }
 0x651   : > { %4387 = vmatpush.msra.mxu1 %v2556_v9  ;;  %4409 = vmatpush.msra.mxu2 %v2668_v11  ;;  %v2988_v45 = vld [vmem:[%s7051_s10 + $0x13b0] sm:$0xff] }
 0x652   : > { %4428 = vmatpush.msra.mxu3 %v2804_v14  ;;  %4369 = vmatpush.msra.mxu0 %v2412_v15  ;;  %v3372_v27 = vld [vmem:[%s7051_s10 + $0x1fb0] sm:$0xff] }
 0x653   : > { %4388 = vmatpush.msra.mxu1 %v2548_v17  ;;  %4410 = vmatpush.msra.mxu2 %v2660_v19  ;;  %v2980_v49 = vld [vmem:[%s7051_s10 + $0x1370] sm:$0xff] }
 0x654   : > { %4429 = vmatpush.msra.mxu3 %v2796_v23  ;;  %4370 = vmatpush.msra.mxu0 %v2404_v24  ;;  %v3228_v55 = vld [vmem:[%s7051_s10 + $0x1b30] sm:$0xff] }
 0x655   : > { %4389 = vmatpush.msra.mxu1 %v2540_v25  ;;  %4411 = vmatpush.msra.mxu2 %v2652_v26  ;;  %v2972_v5 = vld [vmem:[%s7051_s10 + $0x1330] sm:$0xff] }
 0x656   : > { %4430 = vmatpush.msra.mxu3 %v2788_v28  ;;  %4371 = vmatpush.msra.mxu0 %v2396_v29  ;;  %v3108_v58 = vld [vmem:[%s7051_s10 + $0x1770] sm:$0xff]  ;;  %v8166_v29 = vld [vmem:[%s7475_s8] sm:$0xff] }
 0x657   : > { %4390 = vmatpush.msra.mxu1 %v2532_v1  ;;  %4412 = vmatpush.msra.mxu2 %v2644_v30  ;;  %v3220_v51 = vld [vmem:[%s7051_s10 + $0x1af0] sm:$0xff]  ;;  %v3388_v1 = vperm.slane %v8166_v29, 4 }
 0x658   : > { %4431 = vmatpush.msra.mxu3 %v2780_v31  ;;  %4372 = vmatpush.msra.mxu0 %v2388_v32  ;;  %v3356_v52 = vld [vmem:[%s7051_s10 + $0x1f30] sm:$0xff] }
 0x659   : > { %4391 = vmatpush.msra.mxu1 %v2524_v2  ;;  %4413 = vmatpush.msra.mxu2 %v2636_v36  ;;  %v2964_v53 = vld [vmem:[%s7051_s10 + $0x12f0] sm:$0xff] }
 0x65a   : > { %4432 = vmatpush.msra.mxu3 %v2772_v33  ;;  %4373 = vmatpush.msra.mxu0 %v2380_v34  ;;  %v3100_v54 = vld [vmem:[%s7051_s10 + $0x1730] sm:$0xff] }
 0x65b   : > { %4392 = vmatpush.msra.mxu1 %v2516_v39  ;;  %4414 = vmatpush.msra.mxu2 %v2628_v35  ;;  %v3212_v7 = vld [vmem:[%s7051_s10 + $0x1ab0] sm:$0xff] }
 0x65c   : > { %4433 = vmatpush.msra.mxu3 %v2764_v8  ;;  %4374 = vmatpush.msra.mxu0 %v2372_v37  ;;  %v3348_v10 = vld [vmem:[%s7051_s10 + $0x1ef0] sm:$0xff] }
 0x65d   : > { %4393 = vmatpush.msra.mxu1 %v2508_v38  ;;  %4415 = vmatpush.msra.mxu2 %v2620_v41  ;;  %v2956_v12 = vld [vmem:[%s7051_s10 + $0x12b0] sm:$0xff] }
 0x65e   : > { %4434 = vmatpush.msra.mxu3 %v2756_v16  ;;  %4375 = vmatpush.msra.mxu0 %v2364_v46  ;;  %v3092_v56 = vld [vmem:[%s7051_s10 + $0x16f0] sm:$0xff] }
 0x65f   : > { %4480 = vmatpush.msrb.mxu2 %v3252_v40  ;;  %4394 = vmatpush.msra.mxu1 %v2500_v42  ;;  %v3204_v57 = vld [vmem:[%s7051_s10 + $0x1a70] sm:$0xff]  ;;  %v4077_v42 = vpop.f32.mrf.mxu1 }
 0x660   : > { %4435 = vmatpush.msra.mxu3 %v2748_v44  ;;  %4440 = vmatpush.msrb.mxu0 %v2996_v43  ;;  %v3340_v18 = vld [vmem:[%s7051_s10 + $0x1eb0] sm:$0xff]  ;;  %v4057_v34 = vpop.f32.mrf.mxu0  ;;  %v4097_v44 = vpop.f32.mrf.mxu2 }
 0x661   : > { %4481 = vmatpush.msrb.mxu2 %v3244_v21  ;;  %4395 = vmatpush.msra.mxu1 %v2492_v22  ;;  %v2948_v20 = vld [vmem:[%s7051_s10 + $0x1270] sm:$0xff]  ;;  %v4058_v8 = vadd.f32 %v4057_v34, %v3388_v1  ;;  %v2589_v1 = vld [vmem:[%s7051_s10 + $0x738] sm:$0xff] }
 0x662   : > { %4500 = vmatpush.msrb.mxu3 %v3380_v59  ;;  %4441 = vmatpush.msrb.mxu0 %v2988_v45  ;;  %v3084_v61 = vld [vmem:[%s7051_s10 + $0x16b0] sm:$0xff]  ;;  %v2741_v45 = vld [vmem:[%s7051_s10 + $0xbf8] sm:$0xff] }
 0x663   : > { %4460 = vmatpush.msrb.mxu1 %v3124_v47  ;;  %4482 = vmatpush.msrb.mxu2 %v3236_v48  ;;  %v3196_v62 = vld [vmem:[%s7051_s10 + $0x1a30] sm:$0xff]  ;;  %v4078_v59 = vadd.f32 %v4077_v42, %v4058_v8  ;;  %v2581_v34 = vld [vmem:[%s7051_s10 + $0x6f8] sm:$0xff] }
 0x664   : > { %4501 = vmatpush.msrb.mxu3 %v3372_v27  ;;  %4442 = vmatpush.msrb.mxu0 %v2980_v49  ;;  %v3332_v63 = vld [vmem:[%s7051_s10 + $0x1e70] sm:$0xff]  ;;  %v4117_v27 = vpop.f32.mrf.mxu3  ;;  %v2829_v8 = vld [vmem:[%s7051_s10 + $0xeb8] sm:$0xff] }
 0x665   : > { %4461 = vmatpush.msrb.mxu1 %v3116_v50  ;;  %4483 = vmatpush.msrb.mxu2 %v3228_v55  ;;  %v2940_v0 = vld [vmem:[%s7051_s10 + $0x1230] sm:$0xff]  ;;  %v4098_v48 = vadd.f32 %v4097_v44, %v4078_v59  ;;  %v2485_v55 = vld [vmem:[%s7051_s10 + $0x3f8] sm:$0xff] }
 0x666   : > { %4502 = vmatpush.msrb.mxu3 %v3364_v3  ;;  %4443 = vmatpush.msrb.mxu0 %v2972_v5  ;;  %v3076_v13 = vld [vmem:[%s7051_s10 + $0x1670] sm:$0xff]  ;;  %v2733_v5 = vld [vmem:[%s7051_s10 + $0xbb8] sm:$0xff] }
 0x667   : > { %4462 = vmatpush.msrb.mxu1 %v3108_v58  ;;  %4484 = vmatpush.msrb.mxu2 %v3220_v51  ;;  %v3188_v60 = vld [vmem:[%s7051_s10 + $0x19f0] sm:$0xff]  ;;  %v4118_v3 = vadd.f32 %v4117_v27, %v4098_v48  ;;  %v2869_v58 = vld [vmem:[%s7051_s10 + $0xff8] sm:$0xff] }
 0x668   : > { %4503 = vmatpush.msrb.mxu3 %v3356_v52  ;;  %4444 = vmatpush.msrb.mxu0 %v2964_v53  ;;  %v3324_v4 = vld [vmem:[%s7051_s10 + $0x1e30] sm:$0xff]  ;;  %v4137_v51 = vpop.f32.mrf.mxu0  ;;  %v8201_v52 = vld [vmem:[%s8404_s0] sm:$0xff]  ;;  %v2429_v42 = vld [vmem:[%s7051_s10 + $0x238] sm:$0xff] }
 0x669   : > { %4463 = vmatpush.msrb.mxu1 %v3100_v54  ;;  %4485 = vmatpush.msrb.mxu2 %v3212_v7  ;;  %v2932_v6 = vld [vmem:[%s7051_s10 + $0x11f0] sm:$0xff]  ;;  %v2477_v54 = vld [vmem:[%s7051_s10 + $0x3b8] sm:$0xff]  ;;  %v4138_v7 = vadd.f32 %v4137_v51, %v4118_v3 }
 0x66a   : > { %4504 = vmatpush.msrb.mxu3 %v3348_v10  ;;  %4445 = vmatpush.msrb.mxu0 %v2956_v12  ;;  %v3068_v9 = vld [vmem:[%s7051_s10 + $0x1630] sm:$0xff]  ;;  %v8209_v10 = vld [vmem:[%s8404_s0 + $0x18] sm:$0xff] }
 0x66b   : > { %4464 = vmatpush.msrb.mxu1 %v3092_v56  ;;  %4486 = vmatpush.msrb.mxu2 %v3204_v57  ;;  %v3180_v11 = vld [vmem:[%s7051_s10 + $0x19b0] sm:$0xff]  ;;  %v2725_v12 = vld [vmem:[%s7051_s10 + $0xb78] sm:$0xff] }
 0x66c   : > { %4505 = vmatpush.msrb.mxu3 %v3340_v18  ;;  %4446 = vmatpush.msrb.mxu0 %v2948_v20  ;;  %v3316_v14 = vld [vmem:[%s7051_s10 + $0x1df0] sm:$0xff]  ;;  %v2613_v56 = vld [vmem:[%s7051_s10 + $0x7f8] sm:$0xff]  ;;  %v4157_v18 = vpop.f32.mrf.mxu1 }
 0x66d   : > { %4465 = vmatpush.msrb.mxu1 %v3084_v61  ;;  %4487 = vmatpush.msrb.mxu2 %v3196_v62  ;;  %v2924_v15 = vld [vmem:[%s7051_s10 + $0x11b0] sm:$0xff]  ;;  %v2861_v57 = vld [vmem:[%s7051_s10 + $0xfb8] sm:$0xff]  ;;  %v4158_v62 = vadd.f32 %v4157_v18, %v4138_v7 }
 0x66e   : > { %4506 = vmatpush.msrb.mxu3 %v3332_v63  ;;  %4447 = vmatpush.msrb.mxu0 %v2940_v0  ;;  %v3060_v17 = vld [vmem:[%s7051_s10 + $0x15f0] sm:$0xff]  ;;  %v2469_v20 = vld [vmem:[%s7051_s10 + $0x378] sm:$0xff]  ;;  %v4177_v63 = vpop.f32.mrf.mxu2  ;;  %v8220_v0 = vld [vmem:[%s8404_s0 + $0x8] sm:$0xff] }
 0x66f   : > { %4466 = vmatpush.msrb.mxu1 %v3076_v13  ;;  %4488 = vmatpush.msrb.mxu2 %v3188_v60  ;;  %v3172_v19 = vld [vmem:[%s7051_s10 + $0x1970] sm:$0xff]  ;;  %v2717_v61 = vld [vmem:[%s7051_s10 + $0xb38] sm:$0xff] }
 0x670   : > { %4507 = vmatpush.msrb.mxu3 %v3324_v4  ;;  %4448 = vmatpush.msrb.mxu0 %v2932_v6  ;;  %v3308_v23 = vld [vmem:[%s7051_s10 + $0x1db0] sm:$0xff]  ;;  %v2605_v13 = vld [vmem:[%s7051_s10 + $0x7b8] sm:$0xff]  ;;  %v4178_v6 = vadd.f32 %v4177_v63, %v4158_v62 }
 0x671   : > { %4467 = vmatpush.msrb.mxu1 %v3068_v9  ;;  %4489 = vmatpush.msrb.mxu2 %v3180_v11  ;;  %v2916_v24 = vld [vmem:[%s7051_s10 + $0x1170] sm:$0xff]  ;;  %v2853_v60 = vld [vmem:[%s7051_s10 + $0xf78] sm:$0xff]  ;;  %v8227_v9 = vld [vmem:[%s7526_s14] sm:$0xff] }
 0x672   : > { %4508 = vmatpush.msrb.mxu3 %v3316_v14  ;;  %v3052_v25 = vld [vmem:[%s7051_s10 + $0x15b0] sm:$0xff]  ;;  %4449 = vmatpush.msrb.mxu0 %v2924_v15  ;;  %v2461_v4 = vld [vmem:[%s7051_s10 + $0x338] sm:$0xff]  ;;  %v4686_v11 = vperm.slane %v8227_v9, 4 }
 0x673   : > { %4468 = vmatpush.msrb.mxu1 %v3060_v17  ;;  %v3164_v26 = vld [vmem:[%s7051_s10 + $0x1930] sm:$0xff]  ;;  %4490 = vmatpush.msrb.mxu2 %v3172_v19  ;;  %v2597_v14 = vld [vmem:[%s7051_s10 + $0x778] sm:$0xff]  ;;  %v4197_v17 = vpop.f32.mrf.mxu3 }
 0x674   : > { %v3300_v28 = vld [vmem:[%s7051_s10 + $0x1d70] sm:$0xff]  ;;  %4509 = vmatpush.msrb.mxu3 %v3308_v23  ;;  %4450 = vmatpush.msrb.mxu0 %v2916_v24  ;;  %v2709_v15 = vld [vmem:[%s7051_s10 + $0xaf8] sm:$0xff]  ;;  %v4198_v23 = vadd.f32 %v4197_v17, %v4178_v6  ;;  %v8234_v24 = vld [vmem:[%s7547_s26] sm:$0xff] }
 0x675   : > { %v2908_v30 = vld [vmem:[%s7051_s10 + $0x1130] sm:$0xff]  ;;  %4469 = vmatpush.msrb.mxu1 %v3052_v25  ;;  %4491 = vmatpush.msrb.mxu2 %v3164_v26  ;;  %v2845_v19 = vld [vmem:[%s7051_s10 + $0xf38] sm:$0xff]  ;;  %v4712_v25 = vperm.slane %v8234_v24, 4 }
 0x676   : > { %v3044_v31 = vld [vmem:[%s7051_s10 + $0x1570] sm:$0xff]  ;;  %4510 = vmatpush.msrb.mxu3 %v3300_v28  ;;  %4451 = vmatpush.msrb.mxu0 %v2908_v30  ;;  %v2453_v28 = vld [vmem:[%s7051_s10 + $0x2f8] sm:$0xff] }
 0x677   : > { %v3156_v32 = vld [vmem:[%s7051_s10 + $0x18f0] sm:$0xff]  ;;  %4470 = vmatpush.msrb.mxu1 %v3044_v31  ;;  %4376 = vmatmul.f32.vlgmr.msra.gmra.mxu0 %v8201_v52  ;;  %v2701_v30 = vld [vmem:[%s7051_s10 + $0xab8] sm:$0xff]  ;;  %v4702_v31 = vmul.f32 %v4686_v11, %v4198_v23 }
 0x678   : > { %v3292_v2 = vld [vmem:[%s7051_s10 + $0x1d30] sm:$0xff]  ;;  %4492 = vmatpush.msrb.mxu2 %v3156_v32  ;;  %4436 = vmatmul.f32.vlgmr.msra.gmra.mxu3 %v8209_v10  ;;  %v8249_v32 = vld [vmem:[%s8404_s0 + $0x20] sm:$0xff]  ;;  %v2565_v44 = vld [vmem:[%s7051_s10 + $0x678] sm:$0xff] }
 0x679   : > { %v2900_v36 = vld [vmem:[%s7051_s10 + $0x10f0] sm:$0xff]  ;;  %4511 = vmatpush.msrb.mxu3 %v3292_v2  ;;  %4396 = vmatmul.f32.vlgmr.msra.gmra.mxu1 %v8220_v0  ;;  %v2837_v2 = vld [vmem:[%s7051_s10 + $0xef8] sm:$0xff] }
 0x67a   : > { %v3036_v33 = vld [vmem:[%s7051_s10 + $0x1530] sm:$0xff]  ;;  %4452 = vmatpush.msrb.mxu0 %v2900_v36  ;;  %v8256_v36 = vld [vmem:[%s8404_s0 + $0x38] sm:$0xff] }
 0x67b   : > { %v3148_v39 = vld [vmem:[%s7051_s10 + $0x18b0] sm:$0xff]  ;;  %4471 = vmatpush.msrb.mxu1 %v3036_v33  ;;  %v2445_v33 = vld [vmem:[%s7051_s10 + $0x2b8] sm:$0xff] }
 0x67c   : > { %v3284_v35 = vld [vmem:[%s7051_s10 + $0x1cf0] sm:$0xff]  ;;  %4493 = vmatpush.msrb.mxu2 %v3148_v39  ;;  %v4728_v39 = vadd.f32 %v4712_v25, %v4702_v31  ;;  %v2421_v59 = vld [vmem:[%s7051_s10 + $0x1f8] sm:$0xff] }
 0x67d   : > { %v2892_v37 = vld [vmem:[%s7051_s10 + $0x10b0] sm:$0xff]  ;;  %4512 = vmatpush.msrb.mxu3 %v3284_v35  ;;  %v2693_v35 = vld [vmem:[%s7051_s10 + $0xa78] sm:$0xff] }
 0x67e   : > { %v3028_v38 = vld [vmem:[%s7051_s10 + $0x14f0] sm:$0xff]  ;;  %4453 = vmatpush.msrb.mxu0 %v2892_v37  ;;  %v8266_v37 = vld [vmem:[%s8404_s0 + $0x28] sm:$0xff]  ;;  %v2413_v48 = vld [vmem:[%s7051_s10 + $0x1b8] sm:$0xff] }
 0x67f   : > { %v3140_v41 = vld [vmem:[%s7051_s10 + $0x1870] sm:$0xff]  ;;  %4472 = vmatpush.msrb.mxu1 %v3028_v38  ;;  %v2437_v38 = vld [vmem:[%s7051_s10 + $0x278] sm:$0xff] }
 0x680   : > { %v3276_v16 = vld [vmem:[%s7051_s10 + $0x1cb0] sm:$0xff]  ;;  %4494 = vmatpush.msrb.mxu2 %v3140_v41  ;;  %v2573_v41 = vld [vmem:[%s7051_s10 + $0x6b8] sm:$0xff] }
 0x681   : > { %v2884_v40 = vld [vmem:[%s7051_s10 + $0x1070] sm:$0xff]  ;;  %4513 = vmatpush.msrb.mxu3 %v3276_v16  ;;  %v4736_v16 = vmax.f32 %v4728_v39, 0.0  ;;  %v2549_v27 = vld [vmem:[%s7051_s10 + $0x5f8] sm:$0xff] }
 0x682   : > { %v3020_v46 = vld [vmem:[%s7051_s10 + $0x14b0] sm:$0xff]  ;;  %4454 = vmatpush.msrb.mxu0 %v2884_v40  ;;  %v2685_v40 = vld [vmem:[%s7051_s10 + $0xa38] sm:$0xff] }
 0x683   : > { %v3132_v43 = vld [vmem:[%s7051_s10 + $0x1830] sm:$0xff]  ;;  %4473 = vmatpush.msrb.mxu1 %v3020_v46  ;;  %v2821_v46 = vld [vmem:[%s7051_s10 + $0xe78] sm:$0xff]  ;;  %4744 = vst [vmem:[%s7603_s13 + $0x20] sm:$0xff] %v4736_v16 }
 0x684   : > { %v3268_v21 = vld [vmem:[%s7051_s10 + $0x1c70] sm:$0xff]  ;;  %4495 = vmatpush.msrb.mxu2 %v3132_v43  ;;  %v2677_v43 = vld [vmem:[%s7051_s10 + $0x9f8] sm:$0xff] }
 0x685   : > { %v2876_v22 = vld [vmem:[%s7051_s10 + $0x1030] sm:$0xff]  ;;  %4514 = vmatpush.msrb.mxu3 %v3268_v21  ;;  %v2813_v21 = vld [vmem:[%s7051_s10 + $0xe38] sm:$0xff] }
 0x686   : > { %v3012_v47 = vld [vmem:[%s7051_s10 + $0x1470] sm:$0xff]  ;;  %4455 = vmatpush.msrb.mxu0 %v2876_v22  ;;  %v2557_v22 = vld [vmem:[%s7051_s10 + $0x638] sm:$0xff] }
 0x687   : > { %v3260_v49 = vld [vmem:[%s7051_s10 + $0x1c30] sm:$0xff]  ;;  %4474 = vmatpush.msrb.mxu1 %v3012_v47  ;;  %4456 = vmatmul.f32.vlgmr.msrb.gmra.mxu0 %v8249_v32  ;;  %v2805_v47 = vld [vmem:[%s7051_s10 + $0xdf8] sm:$0xff] }
 0x688   : > { %v8192_v50 = vld [vmem:[%s8404_s0 + $0x10] sm:$0xff]  ;;  %4515 = vmatpush.msrb.mxu3 %v3260_v49  ;;  %4520 = vmatpush.msra.mxu0 %v2485_v55  ;;  %v2661_v49 = vld [vmem:[%s7051_s10 + $0x978] sm:$0xff] }
 0x689   : > { %4416 = vmatmul.f32.vlgmr.msra.gmra.mxu2 %v8192_v50  ;;  %v3004_v53 = vld [vmem:[%s7051_s10 + $0x1430] sm:$0xff]  ;;  %4516 = vmatmul.f32.vlgmr.msrb.gmra.mxu3 %v8256_v36  ;;  %v2797_v55 = vld [vmem:[%s7051_s10 + $0xdb8] sm:$0xff] }
 0x68a   : > { %4560 = vmatpush.msra.mxu2 %v2741_v45  ;;  %4580 = vmatpush.msra.mxu3 %v2869_v58  ;;  %v8240_v26 = vld [vmem:[%s8404_s0 + $0x30] sm:$0xff]  ;;  %v2669_v45 = vld [vmem:[%s7051_s10 + $0x9b8] sm:$0xff] }
 0x68b   : > { %4475 = vmatpush.msrb.mxu1 %v3004_v53  ;;  %4521 = vmatpush.msra.mxu0 %v2477_v54  ;;  %v2405_v3 = vld [vmem:[%s7051_s10 + $0x178] sm:$0xff] }
 0x68c   : > { %4561 = vmatpush.msra.mxu2 %v2733_v5  ;;  %4581 = vmatpush.msra.mxu3 %v2861_v57  ;;  %v2541_v5 = vld [vmem:[%s7051_s10 + $0x5b8] sm:$0xff] }
 0x68d   : > { %4540 = vmatpush.msra.mxu1 %v2613_v56  ;;  %4522 = vmatpush.msra.mxu0 %v2469_v20  ;;  %v2653_v58 = vld [vmem:[%s7051_s10 + $0x938] sm:$0xff] }
 0x68e   : > { %4562 = vmatpush.msra.mxu2 %v2725_v12  ;;  %4582 = vmatpush.msra.mxu3 %v2853_v60  ;;  %v2789_v51 = vld [vmem:[%s7051_s10 + $0xd78] sm:$0xff] }
 0x68f   : > { %4541 = vmatpush.msra.mxu1 %v2605_v13  ;;  %4523 = vmatpush.msra.mxu0 %v2461_v4  ;;  %v2397_v53 = vld [vmem:[%s7051_s10 + $0x138] sm:$0xff] }
 0x690   : > { %4563 = vmatpush.msra.mxu2 %v2717_v61  ;;  %4583 = vmatpush.msra.mxu3 %v2845_v19  ;;  %v2533_v54 = vld [vmem:[%s7051_s10 + $0x578] sm:$0xff] }
 0x691   : > { %4496 = vmatmul.f32.vlgmr.msrb.gmra.mxu2 %v8240_v26  ;;  %4542 = vmatpush.msra.mxu1 %v2597_v14  ;;  %v2645_v7 = vld [vmem:[%s7051_s10 + $0x8f8] sm:$0xff] }
 0x692   : > { %4564 = vmatpush.msra.mxu2 %v2709_v15  ;;  %4524 = vmatpush.msra.mxu0 %v2453_v28  ;;  %v2781_v12 = vld [vmem:[%s7051_s10 + $0xd38] sm:$0xff] }
 0x693   : > { %4543 = vmatpush.msra.mxu1 %v2589_v1  ;;  %4584 = vmatpush.msra.mxu3 %v2837_v2  ;;  %v2389_v56 = vld [vmem:[%s7051_s10 + $0xf8] sm:$0xff] }
 0x694   : > { %4565 = vmatpush.msra.mxu2 %v2701_v30  ;;  %4476 = vmatmul.f32.vlgmr.msrb.gmra.mxu1 %v8266_v37  ;;  %v2525_v57 = vld [vmem:[%s7051_s10 + $0x538] sm:$0xff] }
 0x695   : > { %4525 = vmatpush.msra.mxu0 %v2445_v33  ;;  %4544 = vmatpush.msra.mxu1 %v2581_v34  ;;  %v2637_v18 = vld [vmem:[%s7051_s10 + $0x8b8] sm:$0xff] }
 0x696   : > { %4566 = vmatpush.msra.mxu2 %v2693_v35  ;;  %4585 = vmatpush.msra.mxu3 %v2829_v8  ;;  %v2773_v20 = vld [vmem:[%s7051_s10 + $0xcf8] sm:$0xff] }
 0x697   : > { %4526 = vmatpush.msra.mxu0 %v2437_v38  ;;  %4545 = vmatpush.msra.mxu1 %v2573_v41  ;;  %v2381_v61 = vld [vmem:[%s7051_s10 + $0xb8] sm:$0xff] }
 0x698   : > { %4567 = vmatpush.msra.mxu2 %v2685_v40  ;;  %4586 = vmatpush.msra.mxu3 %v2821_v46  ;;  %v2517_v62 = vld [vmem:[%s7051_s10 + $0x4f8] sm:$0xff] }
 0x699   : > { %4527 = vmatpush.msra.mxu0 %v2429_v42  ;;  %4546 = vmatpush.msra.mxu1 %v2565_v44  ;;  %v2629_v63 = vld [vmem:[%s7051_s10 + $0x878] sm:$0xff] }
 0x69a   : > { %4568 = vmatpush.msra.mxu2 %v2677_v43  ;;  %4587 = vmatpush.msra.mxu3 %v2813_v21  ;;  %v2765_v13 = vld [vmem:[%s7051_s10 + $0xcb8] sm:$0xff] }
 0x69b   : > { %4528 = vmatpush.msra.mxu0 %v2421_v59  ;;  %4547 = vmatpush.msra.mxu1 %v2557_v22  ;;  %v2373_v60 = vld [vmem:[%s7051_s10 + $0x78] sm:$0xff] }
 0x69c   : > { %4569 = vmatpush.msra.mxu2 %v2669_v45  ;;  %4588 = vmatpush.msra.mxu3 %v2805_v47  ;;  %v2509_v4 = vld [vmem:[%s7051_s10 + $0x4b8] sm:$0xff] }
 0x69d   : > { %4529 = vmatpush.msra.mxu0 %v2413_v48  ;;  %4548 = vmatpush.msra.mxu1 %v2549_v27  ;;  %v2621_v6 = vld [vmem:[%s7051_s10 + $0x838] sm:$0xff] }
 0x69e   : > { %4570 = vmatpush.msra.mxu2 %v2661_v49  ;;  %4589 = vmatpush.msra.mxu3 %v2797_v55  ;;  %v2757_v11 = vld [vmem:[%s7051_s10 + $0xc78] sm:$0xff] }
 0x69f   : > { %4530 = vmatpush.msra.mxu0 %v2405_v3  ;;  %4549 = vmatpush.msra.mxu1 %v2541_v5  ;;  %v3253_v14 = vld [vmem:[%s7051_s10 + $0x1bf8] sm:$0xff] }
 0x6a0   : > { %4571 = vmatpush.msra.mxu2 %v2653_v58  ;;  %4590 = vmatpush.msra.mxu3 %v2789_v51  ;;  %v2365_v15 = vld [vmem:[%s7051_s10 + $0x38] sm:$0xff] }
 0x6a1   : > { %4531 = vmatpush.msra.mxu0 %v2397_v53  ;;  %4550 = vmatpush.msra.mxu1 %v2533_v54  ;;  %v2501_v17 = vld [vmem:[%s7051_s10 + $0x478] sm:$0xff] }
 0x6a2   : > { %4572 = vmatpush.msra.mxu2 %v2645_v7  ;;  %4591 = vmatpush.msra.mxu3 %v2781_v12  ;;  %v2749_v19 = vld [vmem:[%s7051_s10 + $0xc38] sm:$0xff] }
 0x6a3   : > { %4532 = vmatpush.msra.mxu0 %v2389_v56  ;;  %4551 = vmatpush.msra.mxu1 %v2525_v57  ;;  %v2997_v23 = vld [vmem:[%s7051_s10 + $0x13f8] sm:$0xff] }
 0x6a4   : > { %4573 = vmatpush.msra.mxu2 %v2637_v18  ;;  %4592 = vmatpush.msra.mxu3 %v2773_v20  ;;  %v3245_v25 = vld [vmem:[%s7051_s10 + $0x1bb8] sm:$0xff] }
 0x6a5   : > { %4533 = vmatpush.msra.mxu0 %v2381_v61  ;;  %4552 = vmatpush.msra.mxu1 %v2517_v62  ;;  %v3381_v28 = vld [vmem:[%s7051_s10 + $0x1ff8] sm:$0xff] }
 0x6a6   : > { %4574 = vmatpush.msra.mxu2 %v2629_v63  ;;  %4593 = vmatpush.msra.mxu3 %v2765_v13  ;;  %v2493_v1 = vld [vmem:[%s7051_s10 + $0x438] sm:$0xff]  ;;  %v3389_v13 = vperm.slane %v8166_v29, 5 }
 0x6a7   : > { %4534 = vmatpush.msra.mxu0 %v2373_v60  ;;  %4553 = vmatpush.msra.mxu1 %v2509_v4  ;;  %v2989_v30 = vld [vmem:[%s7051_s10 + $0x13b8] sm:$0xff] }
 0x6a8   : > { %4575 = vmatpush.msra.mxu2 %v2621_v6  ;;  %4594 = vmatpush.msra.mxu3 %v2757_v11  ;;  %v3125_v31 = vld [vmem:[%s7051_s10 + $0x17f8] sm:$0xff] }
 0x6a9   : > { %4535 = vmatpush.msra.mxu0 %v2365_v15  ;;  %4554 = vmatpush.msra.mxu1 %v2501_v17  ;;  %v3237_v2 = vld [vmem:[%s7051_s10 + $0x1b78] sm:$0xff] }
 0x6aa   : > { %4640 = vmatpush.msrb.mxu2 %v3253_v14  ;;  %4595 = vmatpush.msra.mxu3 %v2749_v19  ;;  %v3373_v33 = vld [vmem:[%s7051_s10 + $0x1fb8] sm:$0xff]  ;;  %v4217_v14 = vpop.f32.mrf.mxu0 }
 0x6ab   : > { %4600 = vmatpush.msrb.mxu0 %v2997_v23  ;;  %4555 = vmatpush.msra.mxu1 %v2493_v1  ;;  %v2981_v34 = vld [vmem:[%s7051_s10 + $0x1378] sm:$0xff]  ;;  %v4218_v17 = vadd.f32 %v4217_v14, %v3389_v13  ;;  %v4237_v1 = vpop.f32.mrf.mxu1 }
 0x6ac   : > { %4641 = vmatpush.msrb.mxu2 %v3245_v25  ;;  %4660 = vmatpush.msrb.mxu3 %v3381_v28  ;;  %v3117_v39 = vld [vmem:[%s7051_s10 + $0x17b8] sm:$0xff] }
 0x6ad   : > { %4601 = vmatpush.msrb.mxu0 %v2989_v30  ;;  %4620 = vmatpush.msrb.mxu1 %v3125_v31  ;;  %v3229_v35 = vld [vmem:[%s7051_s10 + $0x1b38] sm:$0xff]  ;;  %v4257_v30 = vpop.f32.mrf.mxu2 }
 0x6ae   : > { %v3365_v8 = vld [vmem:[%s7051_s10 + $0x1f78] sm:$0xff]  ;;  %4642 = vmatpush.msrb.mxu2 %v3237_v2  ;;  %4661 = vmatpush.msrb.mxu3 %v3373_v33  ;;  %v4238_v33 = vadd.f32 %v4237_v1, %v4218_v17 }
 0x6af   : > { %v2973_v38 = vld [vmem:[%s7051_s10 + $0x1338] sm:$0xff]  ;;  %4602 = vmatpush.msrb.mxu0 %v2981_v34  ;;  %4621 = vmatpush.msrb.mxu1 %v3117_v39 }
 0x6b0   : > { %v3109_v41 = vld [vmem:[%s7051_s10 + $0x1778] sm:$0xff]  ;;  %4643 = vmatpush.msrb.mxu2 %v3229_v35  ;;  %4662 = vmatpush.msrb.mxu3 %v3365_v8  ;;  %v4258_v35 = vadd.f32 %v4257_v30, %v4238_v33  ;;  %v4277_v8 = vpop.f32.mrf.mxu3 }
 0x6b1   : > { %v3221_v16 = vld [vmem:[%s7051_s10 + $0x1af8] sm:$0xff]  ;;  %4603 = vmatpush.msrb.mxu0 %v2973_v38  ;;  %4622 = vmatpush.msrb.mxu1 %v3109_v41 }
 0x6b2   : > { %v3357_v40 = vld [vmem:[%s7051_s10 + $0x1f38] sm:$0xff]  ;;  %4644 = vmatpush.msrb.mxu2 %v3221_v16  ;;  %4536 = vmatmul.f32.vlgmr.msra.gmra.mxu0 %v8201_v52 }
 0x6b3   : > { %v2965_v46 = vld [vmem:[%s7051_s10 + $0x12f8] sm:$0xff]  ;;  %4663 = vmatpush.msrb.mxu3 %v3357_v40  ;;  %4576 = vmatmul.f32.vlgmr.msra.gmra.mxu2 %v8192_v50  ;;  %v4278_v40 = vadd.f32 %v4277_v8, %v4258_v35 }
 0x6b4   : > { %v3101_v42 = vld [vmem:[%s7051_s10 + $0x1738] sm:$0xff]  ;;  %4604 = vmatpush.msrb.mxu0 %v2965_v46  ;;  %4596 = vmatmul.f32.vlgmr.msra.gmra.mxu3 %v8209_v10 }
 0x6b5   : > { %v3213_v44 = vld [vmem:[%s7051_s10 + $0x1ab8] sm:$0xff]  ;;  %4623 = vmatpush.msrb.mxu1 %v3101_v42 }
 0x6b6   : > { %v3349_v43 = vld [vmem:[%s7051_s10 + $0x1ef8] sm:$0xff]  ;;  %4645 = vmatpush.msrb.mxu2 %v3213_v44  ;;  %4556 = vmatmul.f32.vlgmr.msra.gmra.mxu1 %v8220_v0 }
 0x6b7   : > { %v2957_v21 = vld [vmem:[%s7051_s10 + $0x12b8] sm:$0xff]  ;;  %4664 = vmatpush.msrb.mxu3 %v3349_v43 }
 0x6b8   : > { %v3093_v59 = vld [vmem:[%s7051_s10 + $0x16f8] sm:$0xff]  ;;  %4605 = vmatpush.msrb.mxu0 %v2957_v21 }
 0x6b9   : > { %v3205_v22 = vld [vmem:[%s7051_s10 + $0x1a78] sm:$0xff]  ;;  %4624 = vmatpush.msrb.mxu1 %v3093_v59 }
 0x6ba   : > { %v3341_v45 = vld [vmem:[%s7051_s10 + $0x1eb8] sm:$0xff]  ;;  %4646 = vmatpush.msrb.mxu2 %v3205_v22  ;;  %v4687_v22 = vperm.slane %v8227_v9, 5 }
 0x6bb   : > { %v2949_v47 = vld [vmem:[%s7051_s10 + $0x1278] sm:$0xff]  ;;  %4665 = vmatpush.msrb.mxu3 %v3341_v45  ;;  %v4297_v0 = vpop.f32.mrf.mxu0 }
 0x6bc   : > { %v3085_v48 = vld [vmem:[%s7051_s10 + $0x16b8] sm:$0xff]  ;;  %4606 = vmatpush.msrb.mxu0 %v2949_v47  ;;  %v4298_v42 = vadd.f32 %v4297_v0, %v4278_v40  ;;  %v4713_v47 = vperm.slane %v8234_v24, 5 }
 0x6bd   : > { %v3197_v27 = vld [vmem:[%s7051_s10 + $0x1a38] sm:$0xff]  ;;  %4625 = vmatpush.msrb.mxu1 %v3085_v48 }
 0x6be   : > { %v3333_v49 = vld [vmem:[%s7051_s10 + $0x1e78] sm:$0xff]  ;;  %4647 = vmatpush.msrb.mxu2 %v3197_v27 }
 0x6bf   : > { %v2941_v55 = vld [vmem:[%s7051_s10 + $0x1238] sm:$0xff]  ;;  %4666 = vmatpush.msrb.mxu3 %v3333_v49  ;;  %v4337_v21 = vpop.f32.mrf.mxu2 }
 0x6c0   : > { %v3077_v3 = vld [vmem:[%s7051_s10 + $0x1678] sm:$0xff]  ;;  %4607 = vmatpush.msrb.mxu0 %v2941_v55 }
 0x6c1   : > { %v3189_v5 = vld [vmem:[%s7051_s10 + $0x19f8] sm:$0xff]  ;;  %4626 = vmatpush.msrb.mxu1 %v3077_v3 }
 0x6c2   : > { %v3325_v58 = vld [vmem:[%s7051_s10 + $0x1e38] sm:$0xff]  ;;  %4648 = vmatpush.msrb.mxu2 %v3189_v5 }
 0x6c3   : > { %v2933_v51 = vld [vmem:[%s7051_s10 + $0x11f8] sm:$0xff]  ;;  %4667 = vmatpush.msrb.mxu3 %v3325_v58 }
 0x6c4   : > { %v3069_v53 = vld [vmem:[%s7051_s10 + $0x1638] sm:$0xff]  ;;  %4608 = vmatpush.msrb.mxu0 %v2933_v51 }
 0x6c5   : > { %v3181_v54 = vld [vmem:[%s7051_s10 + $0x19b8] sm:$0xff]  ;;  %4627 = vmatpush.msrb.mxu1 %v3069_v53 }
 0x6c6   : > { %v3317_v7 = vld [vmem:[%s7051_s10 + $0x1df8] sm:$0xff]  ;;  %4649 = vmatpush.msrb.mxu2 %v3181_v54 }
 0x6c7   : > { %v2925_v12 = vld [vmem:[%s7051_s10 + $0x11b8] sm:$0xff]  ;;  %4668 = vmatpush.msrb.mxu3 %v3317_v7  ;;  %v4317_v44 = vpop.f32.mrf.mxu1 }
 0x6c8   : > { %v3061_v56 = vld [vmem:[%s7051_s10 + $0x15f8] sm:$0xff]  ;;  %4609 = vmatpush.msrb.mxu0 %v2925_v12  ;;  %v4318_v43 = vadd.f32 %v4317_v44, %v4298_v42 }
 0x6c9   : > { %v3173_v57 = vld [vmem:[%s7051_s10 + $0x1978] sm:$0xff]  ;;  %4628 = vmatpush.msrb.mxu1 %v3061_v56 }
 0x6ca   : > { %v3309_v18 = vld [vmem:[%s7051_s10 + $0x1db8] sm:$0xff]  ;;  %4650 = vmatpush.msrb.mxu2 %v3173_v57  ;;  %v4338_v59 = vadd.f32 %v4337_v21, %v4318_v43 }
 0x6cb   : > { %v2917_v20 = vld [vmem:[%s7051_s10 + $0x1178] sm:$0xff]  ;;  %4669 = vmatpush.msrb.mxu3 %v3309_v18 }
 0x6cc   : > { %v3053_v61 = vld [vmem:[%s7051_s10 + $0x15b8] sm:$0xff]  ;;  %4610 = vmatpush.msrb.mxu0 %v2917_v20  ;;  %v4688_v20 = vperm.slane %v8227_v9, 6 }
 0x6cd   : > { %v3165_v62 = vld [vmem:[%s7051_s10 + $0x1938] sm:$0xff]  ;;  %4629 = vmatpush.msrb.mxu1 %v3053_v61 }
 0x6ce   : > { %v3301_v63 = vld [vmem:[%s7051_s10 + $0x1d78] sm:$0xff]  ;;  %4651 = vmatpush.msrb.mxu2 %v3165_v62 }
 0x6cf   : > { %v2909_v60 = vld [vmem:[%s7051_s10 + $0x1138] sm:$0xff]  ;;  %4670 = vmatpush.msrb.mxu3 %v3301_v63  ;;  %v4714_v63 = vperm.slane %v8234_v24, 6 }
 0x6d0   : > { %v3045_v4 = vld [vmem:[%s7051_s10 + $0x1578] sm:$0xff]  ;;  %4611 = vmatpush.msrb.mxu0 %v2909_v60 }
 0x6d1   : > { %v3157_v6 = vld [vmem:[%s7051_s10 + $0x18f8] sm:$0xff]  ;;  %4630 = vmatpush.msrb.mxu1 %v3045_v4 }
 0x6d2   : > { %v3293_v11 = vld [vmem:[%s7051_s10 + $0x1d38] sm:$0xff]  ;;  %4652 = vmatpush.msrb.mxu2 %v3157_v6  ;;  %v3391_v6 = vperm.slane %v8166_v29, 7 }
 0x6d3   : > { %v2901_v15 = vld [vmem:[%s7051_s10 + $0x10f8] sm:$0xff]  ;;  %4671 = vmatpush.msrb.mxu3 %v3293_v11 }
 0x6d4   : > { %v3037_v19 = vld [vmem:[%s7051_s10 + $0x1538] sm:$0xff]  ;;  %4612 = vmatpush.msrb.mxu0 %v2901_v15 }
 0x6d5   : > { %v3149_v23 = vld [vmem:[%s7051_s10 + $0x18b8] sm:$0xff]  ;;  %4631 = vmatpush.msrb.mxu1 %v3037_v19 }
 0x6d6   : > { %v3285_v25 = vld [vmem:[%s7051_s10 + $0x1cf8] sm:$0xff]  ;;  %4653 = vmatpush.msrb.mxu2 %v3149_v23 }
 0x6d7   : > { %v2893_v50 = vld [vmem:[%s7051_s10 + $0x10b8] sm:$0xff]  ;;  %4672 = vmatpush.msrb.mxu3 %v3285_v25 }
 0x6d8   : > { %v3029_v28 = vld [vmem:[%s7051_s10 + $0x14f8] sm:$0xff]  ;;  %4613 = vmatpush.msrb.mxu0 %v2893_v50 }
 0x6d9   : > { %v3141_v31 = vld [vmem:[%s7051_s10 + $0x1878] sm:$0xff]  ;;  %4632 = vmatpush.msrb.mxu1 %v3029_v28 }
 0x6da   : > { %v3277_v2 = vld [vmem:[%s7051_s10 + $0x1cb8] sm:$0xff]  ;;  %4654 = vmatpush.msrb.mxu2 %v3141_v31 }
 0x6db   : > { %v2885_v52 = vld [vmem:[%s7051_s10 + $0x1078] sm:$0xff]  ;;  %4673 = vmatpush.msrb.mxu3 %v3277_v2 }
 0x6dc   : > { %v3021_v10 = vld [vmem:[%s7051_s10 + $0x14b8] sm:$0xff]  ;;  %4614 = vmatpush.msrb.mxu0 %v2885_v52  ;;  %v4689_v52 = vperm.slane %v8227_v9, 7 }
 0x6dd   : > { %v3133_v34 = vld [vmem:[%s7051_s10 + $0x1838] sm:$0xff]  ;;  %4633 = vmatpush.msrb.mxu1 %v3021_v10 }
 0x6de   : > { %v3269_v39 = vld [vmem:[%s7051_s10 + $0x1c78] sm:$0xff]  ;;  %4655 = vmatpush.msrb.mxu2 %v3133_v34 }
 0x6df   : > { %v2877_v38 = vld [vmem:[%s7051_s10 + $0x1038] sm:$0xff]  ;;  %4674 = vmatpush.msrb.mxu3 %v3269_v39  ;;  %4656 = vmatmul.f32.vlgmr.msrb.gmra.mxu2 %v8240_v26  ;;  %v4357_v26 = vpop.f32.mrf.mxu3 }
 0x6e0   : > { %v3013_v41 = vld [vmem:[%s7051_s10 + $0x1478] sm:$0xff]  ;;  %4615 = vmatpush.msrb.mxu0 %v2877_v38  ;;  %v4358_v45 = vadd.f32 %v4357_v26, %v4338_v59 }
 0x6e1   : > { %v3261_v16 = vld [vmem:[%s7051_s10 + $0x1c38] sm:$0xff]  ;;  %4634 = vmatpush.msrb.mxu1 %v3013_v41  ;;  %4616 = vmatmul.f32.vlgmr.msrb.gmra.mxu0 %v8249_v32  ;;  %v3390_v32 = vperm.slane %v8166_v29, 6  ;;  %v4715_v29 = vperm.slane %v8234_v24, 7 }
 0x6e2   : > { %v3005_v46 = vld [vmem:[%s7051_s10 + $0x1438] sm:$0xff]  ;;  %4675 = vmatpush.msrb.mxu3 %v3261_v16  ;;  %v4703_v48 = vmul.f32 %v4687_v22, %v4358_v45 }
 0x6e3   : > { %4676 = vmatmul.f32.vlgmr.msrb.gmra.mxu3 %v8256_v36  ;;  %4635 = vmatpush.msrb.mxu1 %v3005_v46 }
 0x6e4   : > { %4636 = vmatmul.f32.vlgmr.msrb.gmra.mxu1 %v8266_v37  ;;  %v4729_v27 = vadd.f32 %v4713_v47, %v4703_v48 }
 0x6e6   : > { %v4737_v49 = vmax.f32 %v4729_v27, 0.0 }
 0x6e8   : > { %4745 = vst [vmem:[%s7603_s13 + $0x28] sm:$0xff] %v4737_v49 }
 0x6f4   : > { %v4377_v36 = vpop.f32.mrf.mxu0 }
 0x6f5   : > { %v4378_v55 = vadd.f32 %v4377_v36, %v3390_v32 }
 0x6f6   : > { %v4397_v3 = vpop.f32.mrf.mxu1 }
 0x6f7   : > { %v4398_v58 = vadd.f32 %v4397_v3, %v4378_v55 }
 0x6fb   : > { %v4437_v37 = vpop.f32.mrf.mxu3 }
 0x704   : > { %v4457_v54 = vpop.f32.mrf.mxu0 }
 0x70c   : > { %v4417_v5 = vpop.f32.mrf.mxu2  ;;  %v4517_v61 = vpop.f32.mrf.mxu3 }
 0x70d   : > { %v4418_v51 = vadd.f32 %v4417_v5, %v4398_v58 }
 0x70f   : > { %v4438_v53 = vadd.f32 %v4437_v37, %v4418_v51 }
 0x711   : > { %v4458_v7 = vadd.f32 %v4457_v54, %v4438_v53  ;;  %v4477_v12 = vpop.f32.mrf.mxu1 }
 0x713   : > { %v4478_v56 = vadd.f32 %v4477_v12, %v4458_v7 }
 0x714   : > { %v4497_v57 = vpop.f32.mrf.mxu2 }
 0x715   : > { %v4498_v18 = vadd.f32 %v4497_v57, %v4478_v56 }
 0x717   : > { %v4518_v62 = vadd.f32 %v4517_v61, %v4498_v18 }
 0x719   : > { %v4704_v13 = vmul.f32 %v4688_v20, %v4518_v62 }
 0x71b   : > { %v4730_v60 = vadd.f32 %v4714_v63, %v4704_v13 }
 0x71d   : > { %v4738_v4 = vmax.f32 %v4730_v60, 0.0 }
 0x71f   : > { %4746 = vst [vmem:[%s7603_s13 + $0x30] sm:$0xff] %v4738_v4 }
 0x72f   : > { %v4537_v11 = vpop.f32.mrf.mxu0 }
 0x730   : > { %v4538_v14 = vadd.f32 %v4537_v11, %v3391_v6 }
 0x733   : > { %v4557_v15 = vpop.f32.mrf.mxu1 }
 0x734   : > { %v4558_v17 = vadd.f32 %v4557_v15, %v4538_v14 }
 0x736   : > { %v4577_v19 = vpop.f32.mrf.mxu2 }
 0x737   : > { %v4578_v23 = vadd.f32 %v4577_v19, %v4558_v17  ;;  %v4597_v25 = vpop.f32.mrf.mxu3 }
 0x739   : > { %v4598_v50 = vadd.f32 %v4597_v25, %v4578_v23 }
 0x75e   : > { %v4617_v28 = vpop.f32.mrf.mxu0 }
 0x75f   : > { %v4618_v1 = vadd.f32 %v4617_v28, %v4598_v50 }
 0x761   : > { %v4637_v30 = vpop.f32.mrf.mxu1 }
 0x762   : > { %v4638_v31 = vadd.f32 %v4637_v30, %v4618_v1  ;;  %v4657_v2 = vpop.f32.mrf.mxu2 }
 0x764   : > { %v4658_v33 = vadd.f32 %v4657_v2, %v4638_v31 }
 0x766   : > { %v4677_v10 = vpop.f32.mrf.mxu3 }
 0x767   : > { %v4678_v34 = vadd.f32 %v4677_v10, %v4658_v33 }
 0x769   : > { %v4705_v39 = vmul.f32 %v4689_v52, %v4678_v34 }
 0x76b   : > { %v4731_v35 = vadd.f32 %v4715_v29, %v4705_v39 }
 0x76d   : > { %v4739_v8 = vmax.f32 %v4731_v35, 0.0 }
 0x76f   : > { %4747 = vst [vmem:[%s7603_s13 + $0x38] sm:$0xff] %v4739_v8 }
 0x770 PF: > { %p12_p9 = scmp.ge.s32.totalorder %s4979_s22, 18   ;;  %s8410_s18 = smov %s4926_s19 }
 0x771   : > { %s8411_s19 = smov %s4988_s25  ;;  %s8412_s20 = smov %s4979_s22 }
 0x772   :  { %14 = sbr.rel (!%p12_p9) target bundleno = 2 (0x2), region = 107 }

// kernel: generator_forward.7
= control target key start
LH: loop header
LB: loop body
LE: loop exit
PB: predicated region body
PF: predicated region fallthrough
CT: control target
= control target key end

     0   :  { %s1571_s9 = smov 0   ;;  %s2596_s0 = inlined_call_operand.vmem [shape: f32[1024,128], index: 0, kind: input, shape index: {}]   ;;  %s2597_s1 = inlined_call_operand.vmem [shape: f32[128,1024], index: 1, kind: input, shape index: {}]   ;;  %s2598_s2 = inlined_call_operand.vmem [shape: f32[1024,1024], index: 2, kind: output, shape index: {}]  }
   0x1 LB: > { %s1527_s10 = sadd.s32 4294967295, %s1554_s9   ;;  %p1531_p0 = scmp.ge.s32.totalorder %s1554_s9, 1  ;;  %s1554_s9 = sphi %s1571_s9, %s12_s9  }
   0x2   : > { %p113_p1 = scmp.lt.s32.totalorder %s1554_s9, 5 }
   0x4   : > { %p114_p2 = pnand %p1531_p0, %p113_p1 }
   0x5   : > { %s1665_s15 = sshll.u32 (!%p114_p2), %s1527_s10, 5 }
   0x6   : > { %117 = sbr.rel (%p114_p2) target bundleno = 681 (0x2a9), region = 28  ;;  %p137_p3 = scmp.lt.s32.totalorder (!%p114_p2), %s1665_s15, 127 }
   0xb   : > { %v303_v0 = vld [vmem:[%s2597_s1 + $0x3d0] sm:$0xff]  ;;  %v304_v1 = vld [vmem:[%s2597_s1 + $0x3d8] sm:$0xff]  ;;  %v301_v6 = vld [vmem:[%s2597_s1 + $0x3c0] sm:$0xff]  ;;  %s2600_s15 = smov (!%p137_p3, %s1665_s15), 127 }
   0xc   : > { %v295_v2 = vld [vmem:[%s2597_s1 + $0x390] sm:$0xff]  ;;  %535 = vmatpush.msra.mxu2 %v303_v0  ;;  %648 = vmatpush.msra.mxu3 %v304_v1  ;;  %v296_v3 = vld [vmem:[%s2597_s1 + $0x398] sm:$0xff]  ;;  %v302_v7 = vld [vmem:[%s2597_s1 + $0x3c8] sm:$0xff]  ;;  %s1533_s5 = sshll.u32 %s2600_s15, 3  ;;  %s1539_s19 = sshll.u32 %s2600_s15, 6 }
   0xd   : > { %v287_v4 = vld [vmem:[%s2597_s1 + $0x350] sm:$0xff]  ;;  %v288_v5 = vld [vmem:[%s2597_s1 + $0x358] sm:$0xff]  ;;  %v293_v8 = vld [vmem:[%s2597_s1 + $0x380] sm:$0xff]  ;;  %309 = vmatpush.msra.mxu0 %v301_v6  ;;  %422 = vmatpush.msra.mxu1 %v302_v7  ;;  %s1761_s10 = scalar_lea.vmem %s2596_s0, %s1533_s5  ;;  %s2028_s22 = scalar_lea.vmem %s2598_s2, %s1539_s19 }
   0xe   : > { %536 = vmatpush.msra.mxu2 %v295_v2  ;;  %649 = vmatpush.msra.mxu3 %v296_v3  ;;  %v294_v9 = vld [vmem:[%s2597_s1 + $0x388] sm:$0xff]  ;;  %v279_v10 = vld [vmem:[%s2597_s1 + $0x310] sm:$0xff]  ;;  %v280_v11 = vld [vmem:[%s2597_s1 + $0x318] sm:$0xff] }
   0xf   : > { %v285_v12 = vld [vmem:[%s2597_s1 + $0x340] sm:$0xff]  ;;  %v286_v13 = vld [vmem:[%s2597_s1 + $0x348] sm:$0xff]  ;;  %310 = vmatpush.msra.mxu0 %v293_v8  ;;  %423 = vmatpush.msra.mxu1 %v294_v9  ;;  %v271_v14 = vld [vmem:[%s2597_s1 + $0x2d0] sm:$0xff] }
  0x10   : > { %537 = vmatpush.msra.mxu2 %v287_v4  ;;  %650 = vmatpush.msra.mxu3 %v288_v5  ;;  %v272_v15 = vld [vmem:[%s2597_s1 + $0x2d8] sm:$0xff]  ;;  %v277_v16 = vld [vmem:[%s2597_s1 + $0x300] sm:$0xff]  ;;  %v278_v17 = vld [vmem:[%s2597_s1 + $0x308] sm:$0xff] }
  0x11   : > { %311 = vmatpush.msra.mxu0 %v285_v12  ;;  %424 = vmatpush.msra.mxu1 %v286_v13  ;;  %v263_v18 = vld [vmem:[%s2597_s1 + $0x290] sm:$0xff]  ;;  %v264_v19 = vld [vmem:[%s2597_s1 + $0x298] sm:$0xff]  ;;  %v269_v20 = vld [vmem:[%s2597_s1 + $0x2c0] sm:$0xff] }
  0x12   : > { %538 = vmatpush.msra.mxu2 %v279_v10  ;;  %651 = vmatpush.msra.mxu3 %v280_v11  ;;  %v270_v21 = vld [vmem:[%s2597_s1 + $0x2c8] sm:$0xff]  ;;  %v255_v22 = vld [vmem:[%s2597_s1 + $0x250] sm:$0xff]  ;;  %v256_v23 = vld [vmem:[%s2597_s1 + $0x258] sm:$0xff] }
  0x13   : > { %312 = vmatpush.msra.mxu0 %v277_v16  ;;  %425 = vmatpush.msra.mxu1 %v278_v17  ;;  %v261_v24 = vld [vmem:[%s2597_s1 + $0x280] sm:$0xff]  ;;  %v262_v25 = vld [vmem:[%s2597_s1 + $0x288] sm:$0xff]  ;;  %v247_v26 = vld [vmem:[%s2597_s1 + $0x210] sm:$0xff] }
  0x14   : > { %539 = vmatpush.msra.mxu2 %v271_v14  ;;  %652 = vmatpush.msra.mxu3 %v272_v15  ;;  %v248_v27 = vld [vmem:[%s2597_s1 + $0x218] sm:$0xff]  ;;  %v253_v28 = vld [vmem:[%s2597_s1 + $0x240] sm:$0xff]  ;;  %v254_v29 = vld [vmem:[%s2597_s1 + $0x248] sm:$0xff] }
  0x15   : > { %313 = vmatpush.msra.mxu0 %v269_v20  ;;  %426 = vmatpush.msra.mxu1 %v270_v21  ;;  %v239_v30 = vld [vmem:[%s2597_s1 + $0x1d0] sm:$0xff]  ;;  %v240_v31 = vld [vmem:[%s2597_s1 + $0x1d8] sm:$0xff]  ;;  %v245_v32 = vld [vmem:[%s2597_s1 + $0x200] sm:$0xff] }
  0x16   : > { %540 = vmatpush.msra.mxu2 %v263_v18  ;;  %653 = vmatpush.msra.mxu3 %v264_v19  ;;  %v246_v33 = vld [vmem:[%s2597_s1 + $0x208] sm:$0xff]  ;;  %v231_v34 = vld [vmem:[%s2597_s1 + $0x190] sm:$0xff]  ;;  %v232_v35 = vld [vmem:[%s2597_s1 + $0x198] sm:$0xff] }
  0x17   : > { %314 = vmatpush.msra.mxu0 %v261_v24  ;;  %427 = vmatpush.msra.mxu1 %v262_v25  ;;  %v237_v36 = vld [vmem:[%s2597_s1 + $0x1c0] sm:$0xff]  ;;  %v238_v37 = vld [vmem:[%s2597_s1 + $0x1c8] sm:$0xff]  ;;  %v223_v38 = vld [vmem:[%s2597_s1 + $0x150] sm:$0xff] }
  0x18   : > { %541 = vmatpush.msra.mxu2 %v255_v22  ;;  %654 = vmatpush.msra.mxu3 %v256_v23  ;;  %v224_v39 = vld [vmem:[%s2597_s1 + $0x158] sm:$0xff]  ;;  %v229_v40 = vld [vmem:[%s2597_s1 + $0x180] sm:$0xff]  ;;  %v230_v41 = vld [vmem:[%s2597_s1 + $0x188] sm:$0xff] }
  0x19   : > { %315 = vmatpush.msra.mxu0 %v253_v28  ;;  %428 = vmatpush.msra.mxu1 %v254_v29  ;;  %v215_v42 = vld [vmem:[%s2597_s1 + $0x110] sm:$0xff]  ;;  %v216_v43 = vld [vmem:[%s2597_s1 + $0x118] sm:$0xff]  ;;  %v221_v44 = vld [vmem:[%s2597_s1 + $0x140] sm:$0xff] }
  0x1a   : > { %542 = vmatpush.msra.mxu2 %v247_v26  ;;  %655 = vmatpush.msra.mxu3 %v248_v27  ;;  %v222_v45 = vld [vmem:[%s2597_s1 + $0x148] sm:$0xff]  ;;  %v207_v46 = vld [vmem:[%s2597_s1 + $0xd0] sm:$0xff]  ;;  %v208_v47 = vld [vmem:[%s2597_s1 + $0xd8] sm:$0xff] }
  0x1b   : > { %316 = vmatpush.msra.mxu0 %v245_v32  ;;  %429 = vmatpush.msra.mxu1 %v246_v33  ;;  %v213_v48 = vld [vmem:[%s2597_s1 + $0x100] sm:$0xff]  ;;  %v214_v49 = vld [vmem:[%s2597_s1 + $0x108] sm:$0xff]  ;;  %v199_v50 = vld [vmem:[%s2597_s1 + $0x90] sm:$0xff] }
  0x1c   : > { %543 = vmatpush.msra.mxu2 %v239_v30  ;;  %656 = vmatpush.msra.mxu3 %v240_v31  ;;  %v200_v51 = vld [vmem:[%s2597_s1 + $0x98] sm:$0xff]  ;;  %v205_v52 = vld [vmem:[%s2597_s1 + $0xc0] sm:$0xff]  ;;  %v206_v53 = vld [vmem:[%s2597_s1 + $0xc8] sm:$0xff] }
  0x1d   : > { %317 = vmatpush.msra.mxu0 %v237_v36  ;;  %430 = vmatpush.msra.mxu1 %v238_v37  ;;  %v191_v54 = vld [vmem:[%s2597_s1 + $0x50] sm:$0xff]  ;;  %v192_v55 = vld [vmem:[%s2597_s1 + $0x58] sm:$0xff]  ;;  %v197_v56 = vld [vmem:[%s2597_s1 + $0x80] sm:$0xff] }
  0x1e   : > { %544 = vmatpush.msra.mxu2 %v231_v34  ;;  %657 = vmatpush.msra.mxu3 %v232_v35  ;;  %v198_v57 = vld [vmem:[%s2597_s1 + $0x88] sm:$0xff]  ;;  %v183_v58 = vld [vmem:[%s2597_s1 + $0x10] sm:$0xff]  ;;  %v184_v59 = vld [vmem:[%s2597_s1 + $0x18] sm:$0xff] }
  0x1f   : > { %318 = vmatpush.msra.mxu0 %v229_v40  ;;  %431 = vmatpush.msra.mxu1 %v230_v41  ;;  %v1776_v60 = vld [vmem:[%s1761_s10] sm:$0xff]  ;;  %v307_v61 = vld [vmem:[%s2597_s1 + $0x3f0] sm:$0xff]  ;;  %v308_v62 = vld [vmem:[%s2597_s1 + $0x3f8] sm:$0xff] }
  0x20   : > { %545 = vmatpush.msra.mxu2 %v223_v38  ;;  %658 = vmatpush.msra.mxu3 %v224_v39  ;;  %v189_v63 = vld [vmem:[%s2597_s1 + $0x40] sm:$0xff]  ;;  %v190_v0 = vld [vmem:[%s2597_s1 + $0x48] sm:$0xff]  ;;  %v299_v1 = vld [vmem:[%s2597_s1 + $0x3b0] sm:$0xff] }
  0x21   : > { %319 = vmatpush.msra.mxu0 %v221_v44  ;;  %432 = vmatpush.msra.mxu1 %v222_v45  ;;  %v300_v2 = vld [vmem:[%s2597_s1 + $0x3b8] sm:$0xff]  ;;  %v181_v3 = vld [vmem:[%s2597_s1] sm:$0xff]  ;;  %v182_v4 = vld [vmem:[%s2597_s1 + $0x8] sm:$0xff] }
  0x22   : > { %546 = vmatpush.msra.mxu2 %v215_v42  ;;  %659 = vmatpush.msra.mxu3 %v216_v43  ;;  %v305_v5 = vld [vmem:[%s2597_s1 + $0x3e0] sm:$0xff]  ;;  %v306_v6 = vld [vmem:[%s2597_s1 + $0x3e8] sm:$0xff]  ;;  %v291_v7 = vld [vmem:[%s2597_s1 + $0x370] sm:$0xff] }
  0x23   : > { %320 = vmatpush.msra.mxu0 %v213_v48  ;;  %433 = vmatpush.msra.mxu1 %v214_v49  ;;  %v292_v8 = vld [vmem:[%s2597_s1 + $0x378] sm:$0xff]  ;;  %v1819_v9 = vld [vmem:[%s1761_s10 + $0x8] sm:$0xff]  ;;  %v297_v10 = vld [vmem:[%s2597_s1 + $0x3a0] sm:$0xff] }
  0x24   : > { %547 = vmatpush.msra.mxu2 %v207_v46  ;;  %660 = vmatpush.msra.mxu3 %v208_v47  ;;  %v298_v11 = vld [vmem:[%s2597_s1 + $0x3a8] sm:$0xff]  ;;  %v289_v12 = vld [vmem:[%s2597_s1 + $0x360] sm:$0xff]  ;;  %v1838_v14 = vld [vmem:[%s1761_s10 + $0x10] sm:$0xff] }
  0x25   : > { %321 = vmatpush.msra.mxu0 %v205_v52  ;;  %434 = vmatpush.msra.mxu1 %v206_v53  ;;  %v290_v13 = vld [vmem:[%s2597_s1 + $0x368] sm:$0xff]  ;;  %v283_v15 = vld [vmem:[%s2597_s1 + $0x330] sm:$0xff]  ;;  %v284_v16 = vld [vmem:[%s2597_s1 + $0x338] sm:$0xff] }
  0x26   : > { %548 = vmatpush.msra.mxu2 %v199_v50  ;;  %661 = vmatpush.msra.mxu3 %v200_v51  ;;  %v1851_v17 = vld [vmem:[%s1761_s10 + $0x18] sm:$0xff]  ;;  %v281_v18 = vld [vmem:[%s2597_s1 + $0x320] sm:$0xff]  ;;  %v282_v19 = vld [vmem:[%s2597_s1 + $0x328] sm:$0xff] }
  0x27   : > { %322 = vmatpush.msra.mxu0 %v197_v56  ;;  %435 = vmatpush.msra.mxu1 %v198_v57  ;;  %v1864_v20 = vld [vmem:[%s1761_s10 + $0x20] sm:$0xff]  ;;  %v275_v21 = vld [vmem:[%s2597_s1 + $0x2f0] sm:$0xff]  ;;  %v276_v22 = vld [vmem:[%s2597_s1 + $0x2f8] sm:$0xff] }
  0x28   : > { %549 = vmatpush.msra.mxu2 %v191_v54  ;;  %662 = vmatpush.msra.mxu3 %v192_v55  ;;  %v1877_v23 = vld [vmem:[%s1761_s10 + $0x28] sm:$0xff]  ;;  %v273_v24 = vld [vmem:[%s2597_s1 + $0x2e0] sm:$0xff]  ;;  %v1890_v26 = vld [vmem:[%s1761_s10 + $0x30] sm:$0xff] }
  0x29   : > { %323 = vmatpush.msra.mxu0 %v189_v63  ;;  %436 = vmatpush.msra.mxu1 %v190_v0  ;;  %v274_v25 = vld [vmem:[%s2597_s1 + $0x2e8] sm:$0xff]  ;;  %v267_v27 = vld [vmem:[%s2597_s1 + $0x2b0] sm:$0xff]  ;;  %v268_v28 = vld [vmem:[%s2597_s1 + $0x2b8] sm:$0xff] }
  0x2a   : > { %550 = vmatpush.msra.mxu2 %v183_v58  ;;  %663 = vmatpush.msra.mxu3 %v184_v59  ;;  %v1903_v29 = vld [vmem:[%s1761_s10 + $0x38] sm:$0xff]  ;;  %v265_v30 = vld [vmem:[%s2597_s1 + $0x2a0] sm:$0xff]  ;;  %v266_v31 = vld [vmem:[%s2597_s1 + $0x2a8] sm:$0xff] }
  0x2b   : > { %551 = vmatmul.f32.vlgmr.msra.gmra.mxu2 %v1776_v60  ;;  %664 = vmatmul.f32.vlgmr.msra.gmra.mxu3 %v1776_v60  ;;  %v1916_v32 = vld [vmem:[%s1761_s10 + $0x40] sm:$0xff]  ;;  %v259_v33 = vld [vmem:[%s2597_s1 + $0x270] sm:$0xff]  ;;  %v260_v34 = vld [vmem:[%s2597_s1 + $0x278] sm:$0xff] }
  0x2c   : > { %987 = vmatpush.msrb.mxu2 %v307_v61  ;;  %1100 = vmatpush.msrb.mxu3 %v308_v62  ;;  %v1929_v35 = vld [vmem:[%s1761_s10 + $0x48] sm:$0xff]  ;;  %v257_v36 = vld [vmem:[%s2597_s1 + $0x260] sm:$0xff]  ;;  %v1942_v38 = vld [vmem:[%s1761_s10 + $0x50] sm:$0xff] }
  0x2d   : > { %324 = vmatpush.msra.mxu0 %v181_v3  ;;  %437 = vmatpush.msra.mxu1 %v182_v4  ;;  %v258_v37 = vld [vmem:[%s2597_s1 + $0x268] sm:$0xff]  ;;  %v251_v39 = vld [vmem:[%s2597_s1 + $0x230] sm:$0xff]  ;;  %v252_v40 = vld [vmem:[%s2597_s1 + $0x238] sm:$0xff] }
  0x2e   : > { %988 = vmatpush.msrb.mxu2 %v299_v1  ;;  %1101 = vmatpush.msrb.mxu3 %v300_v2  ;;  %v1955_v41 = vld [vmem:[%s1761_s10 + $0x58] sm:$0xff]  ;;  %v249_v42 = vld [vmem:[%s2597_s1 + $0x220] sm:$0xff]  ;;  %v250_v43 = vld [vmem:[%s2597_s1 + $0x228] sm:$0xff] }
  0x2f   : > { %325 = vmatmul.f32.vlgmr.msra.gmra.mxu0 %v1776_v60  ;;  %438 = vmatmul.f32.vlgmr.msra.gmra.mxu1 %v1776_v60  ;;  %v1968_v44 = vld [vmem:[%s1761_s10 + $0x60] sm:$0xff]  ;;  %v243_v45 = vld [vmem:[%s2597_s1 + $0x1f0] sm:$0xff]  ;;  %v244_v46 = vld [vmem:[%s2597_s1 + $0x1f8] sm:$0xff] }
  0x30   : > { %761 = vmatpush.msrb.mxu0 %v305_v5  ;;  %874 = vmatpush.msrb.mxu1 %v306_v6  ;;  %v1981_v47 = vld [vmem:[%s1761_s10 + $0x68] sm:$0xff]  ;;  %v241_v48 = vld [vmem:[%s2597_s1 + $0x1e0] sm:$0xff]  ;;  %v1994_v50 = vld [vmem:[%s1761_s10 + $0x70] sm:$0xff] }
  0x31   : > { %989 = vmatpush.msrb.mxu2 %v291_v7  ;;  %1102 = vmatpush.msrb.mxu3 %v292_v8  ;;  %v242_v49 = vld [vmem:[%s2597_s1 + $0x1e8] sm:$0xff]  ;;  %v235_v51 = vld [vmem:[%s2597_s1 + $0x1b0] sm:$0xff]  ;;  %v236_v52 = vld [vmem:[%s2597_s1 + $0x1b8] sm:$0xff] }
  0x32   : > { %762 = vmatpush.msrb.mxu0 %v297_v10  ;;  %875 = vmatpush.msrb.mxu1 %v298_v11  ;;  %v2007_v53 = vld [vmem:[%s1761_s10 + $0x78] sm:$0xff]  ;;  %v233_v54 = vld [vmem:[%s2597_s1 + $0x1a0] sm:$0xff]  ;;  %v234_v55 = vld [vmem:[%s2597_s1 + $0x1a8] sm:$0xff] }
  0x33   : > { %554 = vmatmul.f32.gmra.mxu2 %v1819_v9  ;;  %667 = vmatmul.f32.gmra.mxu3 %v1819_v9  ;;  %v2020_v56 = vld [vmem:[%s1761_s10 + $0x80] sm:$0xff]  ;;  %v227_v57 = vld [vmem:[%s2597_s1 + $0x170] sm:$0xff]  ;;  %v228_v58 = vld [vmem:[%s2597_s1 + $0x178] sm:$0xff] }
  0x34   : > { %763 = vmatpush.msrb.mxu0 %v289_v12  ;;  %876 = vmatpush.msrb.mxu1 %v290_v13  ;;  %v2042_v0 = vld [vmem:[%s1761_s10 + $0x88] sm:$0xff]  ;;  %v225_v1 = vld [vmem:[%s2597_s1 + $0x160] sm:$0xff]  ;;  %v2059_v7 = vld [vmem:[%s1761_s10 + $0x90] sm:$0xff] }
  0x35   : > { %990 = vmatpush.msrb.mxu2 %v283_v15  ;;  %1103 = vmatpush.msrb.mxu3 %v284_v16  ;;  %v226_v2 = vld [vmem:[%s2597_s1 + $0x168] sm:$0xff]  ;;  %v219_v8 = vld [vmem:[%s2597_s1 + $0x130] sm:$0xff]  ;;  %v220_v10 = vld [vmem:[%s2597_s1 + $0x138] sm:$0xff] }
  0x36   : > { %764 = vmatpush.msrb.mxu0 %v281_v18  ;;  %877 = vmatpush.msrb.mxu1 %v282_v19  ;;  %v2076_v16 = vld [vmem:[%s1761_s10 + $0x98] sm:$0xff]  ;;  %v217_v18 = vld [vmem:[%s2597_s1 + $0x120] sm:$0xff]  ;;  %v218_v19 = vld [vmem:[%s2597_s1 + $0x128] sm:$0xff] }
  0x37   : > { %328 = vmatmul.f32.gmra.mxu0 %v1819_v9  ;;  %441 = vmatmul.f32.gmra.mxu1 %v1819_v9 }
  0x38   : > { %991 = vmatpush.msrb.mxu2 %v275_v21  ;;  %1104 = vmatpush.msrb.mxu3 %v276_v22 }
  0x39   : > { %765 = vmatpush.msrb.mxu0 %v273_v24  ;;  %878 = vmatpush.msrb.mxu1 %v274_v25 }
  0x3a   : > { %992 = vmatpush.msrb.mxu2 %v267_v27  ;;  %1105 = vmatpush.msrb.mxu3 %v268_v28  ;;  %v2093_v27 = vld [vmem:[%s1761_s10 + $0xa0] sm:$0xff]  ;;  %v211_v28 = vld [vmem:[%s2597_s1 + $0xf0] sm:$0xff] }
  0x3b   : > { %557 = vmatmul.f32.gmra.mxu2 %v1838_v14  ;;  %670 = vmatmul.f32.gmra.mxu3 %v1838_v14 }
  0x3c   : > { %766 = vmatpush.msrb.mxu0 %v265_v30  ;;  %879 = vmatpush.msrb.mxu1 %v266_v31  ;;  %v212_v30 = vld [vmem:[%s2597_s1 + $0xf8] sm:$0xff] }
  0x3d   : > { %993 = vmatpush.msrb.mxu2 %v259_v33  ;;  %1106 = vmatpush.msrb.mxu3 %v260_v34 }
  0x3e   : > { %767 = vmatpush.msrb.mxu0 %v257_v36  ;;  %880 = vmatpush.msrb.mxu1 %v258_v37  ;;  %v2110_v37 = vld [vmem:[%s1761_s10 + $0xa8] sm:$0xff] }
  0x3f   : > { %331 = vmatmul.f32.gmra.mxu0 %v1838_v14  ;;  %444 = vmatmul.f32.gmra.mxu1 %v1838_v14 }
  0x40   : > { %994 = vmatpush.msrb.mxu2 %v251_v39  ;;  %1107 = vmatpush.msrb.mxu3 %v252_v40  ;;  %v209_v39 = vld [vmem:[%s2597_s1 + $0xe0] sm:$0xff]  ;;  %v210_v40 = vld [vmem:[%s2597_s1 + $0xe8] sm:$0xff] }
  0x41   : > { %768 = vmatpush.msrb.mxu0 %v249_v42  ;;  %881 = vmatpush.msrb.mxu1 %v250_v43 }
  0x42   : > { %995 = vmatpush.msrb.mxu2 %v243_v45  ;;  %1108 = vmatpush.msrb.mxu3 %v244_v46 }
  0x43   : > { %560 = vmatmul.f32.gmra.mxu2 %v1851_v17  ;;  %673 = vmatmul.f32.gmra.mxu3 %v1851_v17 }
  0x44   : > { %769 = vmatpush.msrb.mxu0 %v241_v48  ;;  %882 = vmatpush.msrb.mxu1 %v242_v49  ;;  %v2127_v48 = vld [vmem:[%s1761_s10 + $0xb0] sm:$0xff] }
  0x45   : > { %996 = vmatpush.msrb.mxu2 %v235_v51  ;;  %1109 = vmatpush.msrb.mxu3 %v236_v52  ;;  %v203_v49 = vld [vmem:[%s2597_s1 + $0xb0] sm:$0xff]  ;;  %v204_v51 = vld [vmem:[%s2597_s1 + $0xb8] sm:$0xff] }
  0x46   : > { %770 = vmatpush.msrb.mxu0 %v233_v54  ;;  %883 = vmatpush.msrb.mxu1 %v234_v55 }
  0x47   : > { %334 = vmatmul.f32.gmra.mxu0 %v1851_v17  ;;  %447 = vmatmul.f32.gmra.mxu1 %v1851_v17 }
  0x48   : > { %997 = vmatpush.msrb.mxu2 %v227_v57  ;;  %1110 = vmatpush.msrb.mxu3 %v228_v58  ;;  %v2144_v58 = vld [vmem:[%s1761_s10 + $0xb8] sm:$0xff] }
  0x49   : > { %771 = vmatpush.msrb.mxu0 %v225_v1  ;;  %884 = vmatpush.msrb.mxu1 %v226_v2 }
  0x4a   : > { %998 = vmatpush.msrb.mxu2 %v219_v8  ;;  %1111 = vmatpush.msrb.mxu3 %v220_v10 }
  0x4b   : > { %563 = vmatmul.f32.gmra.mxu2 %v1864_v20  ;;  %676 = vmatmul.f32.gmra.mxu3 %v1864_v20 }
  0x4c   : > { %772 = vmatpush.msrb.mxu0 %v217_v18  ;;  %885 = vmatpush.msrb.mxu1 %v218_v19 }
  0x4d   : > { %999 = vmatpush.msrb.mxu2 %v211_v28  ;;  %1112 = vmatpush.msrb.mxu3 %v212_v30  ;;  %v188_v28 = vld [vmem:[%s2597_s1 + $0x38] sm:$0xff] }
  0x4e   : > { %773 = vmatpush.msrb.mxu0 %v209_v39  ;;  %886 = vmatpush.msrb.mxu1 %v210_v40  ;;  %v185_v39 = vld [vmem:[%s2597_s1 + $0x20] sm:$0xff]  ;;  %v186_v40 = vld [vmem:[%s2597_s1 + $0x28] sm:$0xff] }
  0x4f   : > { %337 = vmatmul.f32.gmra.mxu0 %v1864_v20  ;;  %450 = vmatmul.f32.gmra.mxu1 %v1864_v20 }
  0x50   : > { %1000 = vmatpush.msrb.mxu2 %v203_v49  ;;  %1113 = vmatpush.msrb.mxu3 %v204_v51  ;;  %v2229_v49 = vld [vmem:[%s1761_s10 + $0xe0] sm:$0xff] }
  0x53   : > { %566 = vmatmul.f32.gmra.mxu2 %v1877_v23  ;;  %679 = vmatmul.f32.gmra.mxu3 %v1877_v23 }
  0x57   : > { %340 = vmatmul.f32.gmra.mxu0 %v1877_v23  ;;  %453 = vmatmul.f32.gmra.mxu1 %v1877_v23 }
  0x5b   : > { %569 = vmatmul.f32.gmra.mxu2 %v1890_v26  ;;  %682 = vmatmul.f32.gmra.mxu3 %v1890_v26 }
  0x5f   : > { %343 = vmatmul.f32.gmra.mxu0 %v1890_v26  ;;  %456 = vmatmul.f32.gmra.mxu1 %v1890_v26 }
  0x63   : > { %572 = vmatmul.f32.gmra.mxu2 %v1903_v29  ;;  %685 = vmatmul.f32.gmra.mxu3 %v1903_v29 }
  0x67   : > { %346 = vmatmul.f32.gmra.mxu0 %v1903_v29  ;;  %459 = vmatmul.f32.gmra.mxu1 %v1903_v29 }
  0x6b   : > { %575 = vmatmul.f32.gmra.mxu2 %v1916_v32  ;;  %688 = vmatmul.f32.gmra.mxu3 %v1916_v32 }
  0x6f   : > { %349 = vmatmul.f32.gmra.mxu0 %v1916_v32  ;;  %462 = vmatmul.f32.gmra.mxu1 %v1916_v32 }
  0x73   : > { %578 = vmatmul.f32.gmra.mxu2 %v1929_v35  ;;  %691 = vmatmul.f32.gmra.mxu3 %v1929_v35 }
  0x77   : > { %352 = vmatmul.f32.gmra.mxu0 %v1929_v35  ;;  %465 = vmatmul.f32.gmra.mxu1 %v1929_v35 }
  0x7b   : > { %581 = vmatmul.f32.gmra.mxu2 %v1942_v38  ;;  %694 = vmatmul.f32.gmra.mxu3 %v1942_v38 }
  0x7f   : > { %355 = vmatmul.f32.gmra.mxu0 %v1942_v38  ;;  %468 = vmatmul.f32.gmra.mxu1 %v1942_v38 }
  0x83   : > { %584 = vmatmul.f32.gmra.mxu2 %v1955_v41  ;;  %697 = vmatmul.f32.gmra.mxu3 %v1955_v41 }
  0x87   : > { %358 = vmatmul.f32.gmra.mxu0 %v1955_v41  ;;  %471 = vmatmul.f32.gmra.mxu1 %v1955_v41 }
  0x8b   : > { %587 = vmatmul.f32.gmra.mxu2 %v1968_v44  ;;  %700 = vmatmul.f32.gmra.mxu3 %v1968_v44 }
  0x8f   : > { %361 = vmatmul.f32.gmra.mxu0 %v1968_v44  ;;  %474 = vmatmul.f32.gmra.mxu1 %v1968_v44 }
  0x93   : > { %590 = vmatmul.f32.gmra.mxu2 %v1981_v47  ;;  %703 = vmatmul.f32.gmra.mxu3 %v1981_v47 }
  0x97   : > { %364 = vmatmul.f32.gmra.mxu0 %v1981_v47  ;;  %477 = vmatmul.f32.gmra.mxu1 %v1981_v47 }
  0x9b   : > { %593 = vmatmul.f32.gmra.mxu2 %v1994_v50  ;;  %706 = vmatmul.f32.gmra.mxu3 %v1994_v50 }
  0x9f   : > { %367 = vmatmul.f32.gmra.mxu0 %v1994_v50  ;;  %480 = vmatmul.f32.gmra.mxu1 %v1994_v50 }
  0xa3   : > { %596 = vmatmul.f32.gmra.mxu2 %v2007_v53  ;;  %709 = vmatmul.f32.gmra.mxu3 %v2007_v53 }
  0xa7   : > { %370 = vmatmul.f32.gmra.mxu0 %v2007_v53  ;;  %483 = vmatmul.f32.gmra.mxu1 %v2007_v53 }
  0xab   : > { %599 = vmatmul.f32.gmra.mxu2 %v2020_v56  ;;  %712 = vmatmul.f32.gmra.mxu3 %v2020_v56 }
  0xac   : > { %v326_v59 = vpop.f32.mrf.mxu0  ;;  %v439_v61 = vpop.f32.mrf.mxu1 }
  0xad   : > { %1213 = vst [vmem:[%s2028_s22] sm:$0xff] %v326_v59  ;;  %v201_v59 = vld [vmem:[%s2597_s1 + $0xa0] sm:$0xff] }
  0xae   : > { %v552_v62 = vpop.f32.mrf.mxu2  ;;  %v665_v63 = vpop.f32.mrf.mxu3  ;;  %1214 = vst [vmem:[%s2028_s22 + $0x8] sm:$0xff] %v439_v61  ;;  %v202_v61 = vld [vmem:[%s2597_s1 + $0xa8] sm:$0xff]  ;;  %774 = vmatpush.msrb.mxu0 %v201_v59 }
  0xaf   : > { %1215 = vst [vmem:[%s2028_s22 + $0x10] sm:$0xff] %v552_v62  ;;  %373 = vmatmul.f32.gmra.mxu0 %v2020_v56  ;;  %486 = vmatmul.f32.gmra.mxu1 %v2020_v56 }
  0xb0   : > { %1216 = vst [vmem:[%s2028_s22 + $0x18] sm:$0xff] %v665_v63  ;;  %887 = vmatpush.msrb.mxu1 %v202_v61 }
  0xb3   : > { %602 = vmatmul.f32.gmra.mxu2 %v2042_v0  ;;  %715 = vmatmul.f32.gmra.mxu3 %v2042_v0 }
  0xb4   : > { %v329_v3 = vpop.f32.mrf.mxu0  ;;  %v442_v4 = vpop.f32.mrf.mxu1 }
  0xb5   : > { %1221 = vst [vmem:[%s2028_s22 + $0x40] sm:$0xff] %v329_v3  ;;  %v2161_v3 = vld [vmem:[%s1761_s10 + $0xc0] sm:$0xff] }
  0xb6   : > { %v555_v5 = vpop.f32.mrf.mxu2  ;;  %v668_v6 = vpop.f32.mrf.mxu3  ;;  %1222 = vst [vmem:[%s2028_s22 + $0x48] sm:$0xff] %v442_v4  ;;  %v195_v4 = vld [vmem:[%s2597_s1 + $0x70] sm:$0xff] }
  0xb7   : > { %1223 = vst [vmem:[%s2028_s22 + $0x50] sm:$0xff] %v555_v5  ;;  %376 = vmatmul.f32.gmra.mxu0 %v2042_v0  ;;  %489 = vmatmul.f32.gmra.mxu1 %v2042_v0  ;;  %v196_v5 = vld [vmem:[%s2597_s1 + $0x78] sm:$0xff] }
  0xb8   : > { %1224 = vst [vmem:[%s2028_s22 + $0x58] sm:$0xff] %v668_v6  ;;  %1001 = vmatpush.msrb.mxu2 %v195_v4  ;;  %1114 = vmatpush.msrb.mxu3 %v196_v5 }
  0xba   : > { %1115 = vmatpush.msrb.mxu3 %v188_v28 }
  0xbb   : > { %605 = vmatmul.f32.gmra.mxu2 %v2059_v7  ;;  %718 = vmatmul.f32.gmra.mxu3 %v2059_v7 }
  0xbc   : > { %v332_v11 = vpop.f32.mrf.mxu0  ;;  %v445_v12 = vpop.f32.mrf.mxu1 }
  0xbd   : > { %1229 = vst [vmem:[%s2028_s22 + $0x80] sm:$0xff] %v332_v11 }
  0xbe   : > { %v558_v13 = vpop.f32.mrf.mxu2  ;;  %v671_v15 = vpop.f32.mrf.mxu3  ;;  %1230 = vst [vmem:[%s2028_s22 + $0x88] sm:$0xff] %v445_v12  ;;  %v2178_v12 = vld [vmem:[%s1761_s10 + $0xc8] sm:$0xff] }
  0xbf   : > { %1231 = vst [vmem:[%s2028_s22 + $0x90] sm:$0xff] %v558_v13  ;;  %379 = vmatmul.f32.gmra.mxu0 %v2059_v7  ;;  %492 = vmatmul.f32.gmra.mxu1 %v2059_v7  ;;  %v193_v13 = vld [vmem:[%s2597_s1 + $0x60] sm:$0xff] }
  0xc0   : > { %1232 = vst [vmem:[%s2028_s22 + $0x98] sm:$0xff] %v671_v15  ;;  %v194_v15 = vld [vmem:[%s2597_s1 + $0x68] sm:$0xff]  ;;  %775 = vmatpush.msrb.mxu0 %v193_v13 }
  0xc1   : > { %888 = vmatpush.msrb.mxu1 %v194_v15 }
  0xc2   : > { %776 = vmatpush.msrb.mxu0 %v185_v39 }
  0xc3   : > { %608 = vmatmul.f32.gmra.mxu2 %v2076_v16  ;;  %721 = vmatmul.f32.gmra.mxu3 %v2076_v16 }
  0xc4   : > { %v335_v21 = vpop.f32.mrf.mxu0  ;;  %v448_v22 = vpop.f32.mrf.mxu1  ;;  %889 = vmatpush.msrb.mxu1 %v186_v40 }
  0xc5   : > { %1237 = vst [vmem:[%s2028_s22 + $0xc0] sm:$0xff] %v335_v21 }
  0xc6   : > { %v561_v24 = vpop.f32.mrf.mxu2  ;;  %v674_v25 = vpop.f32.mrf.mxu3  ;;  %1238 = vst [vmem:[%s2028_s22 + $0xc8] sm:$0xff] %v448_v22 }
  0xc7   : > { %1239 = vst [vmem:[%s2028_s22 + $0xd0] sm:$0xff] %v561_v24  ;;  %382 = vmatmul.f32.gmra.mxu0 %v2076_v16  ;;  %495 = vmatmul.f32.gmra.mxu1 %v2076_v16  ;;  %v2195_v24 = vld [vmem:[%s1761_s10 + $0xd0] sm:$0xff] }
  0xc8   : > { %1240 = vst [vmem:[%s2028_s22 + $0xd8] sm:$0xff] %v674_v25  ;;  %v187_v25 = vld [vmem:[%s2597_s1 + $0x30] sm:$0xff] }
  0xc9   : > { %1002 = vmatpush.msrb.mxu2 %v187_v25 }
  0xcb   : > { %611 = vmatmul.f32.gmra.mxu2 %v2093_v27  ;;  %724 = vmatmul.f32.gmra.mxu3 %v2093_v27 }
  0xcc   : > { %v338_v31 = vpop.f32.mrf.mxu0  ;;  %v451_v33 = vpop.f32.mrf.mxu1 }
  0xcd   : > { %1245 = vst [vmem:[%s2028_s22 + $0x100] sm:$0xff] %v338_v31 }
  0xce   : > { %v564_v34 = vpop.f32.mrf.mxu2  ;;  %v677_v36 = vpop.f32.mrf.mxu3  ;;  %1246 = vst [vmem:[%s2028_s22 + $0x108] sm:$0xff] %v451_v33 }
  0xcf   : > { %1247 = vst [vmem:[%s2028_s22 + $0x110] sm:$0xff] %v564_v34  ;;  %385 = vmatmul.f32.gmra.mxu0 %v2093_v27  ;;  %498 = vmatmul.f32.gmra.mxu1 %v2093_v27 }
  0xd0   : > { %1248 = vst [vmem:[%s2028_s22 + $0x118] sm:$0xff] %v677_v36  ;;  %v2212_v36 = vld [vmem:[%s1761_s10 + $0xd8] sm:$0xff] }
  0xd3   : > { %614 = vmatmul.f32.gmra.mxu2 %v2110_v37  ;;  %727 = vmatmul.f32.gmra.mxu3 %v2110_v37 }
  0xd4   : > { %v341_v42 = vpop.f32.mrf.mxu0  ;;  %v454_v43 = vpop.f32.mrf.mxu1 }
  0xd5   : > { %1253 = vst [vmem:[%s2028_s22 + $0x140] sm:$0xff] %v341_v42 }
  0xd6   : > { %v567_v45 = vpop.f32.mrf.mxu2  ;;  %v680_v46 = vpop.f32.mrf.mxu3  ;;  %1254 = vst [vmem:[%s2028_s22 + $0x148] sm:$0xff] %v454_v43 }
  0xd7   : > { %1255 = vst [vmem:[%s2028_s22 + $0x150] sm:$0xff] %v567_v45  ;;  %388 = vmatmul.f32.gmra.mxu0 %v2110_v37  ;;  %501 = vmatmul.f32.gmra.mxu1 %v2110_v37 }
  0xd8   : > { %1256 = vst [vmem:[%s2028_s22 + $0x158] sm:$0xff] %v680_v46 }
  0xdb   : > { %617 = vmatmul.f32.gmra.mxu2 %v2127_v48  ;;  %730 = vmatmul.f32.gmra.mxu3 %v2127_v48 }
  0xdc   : > { %v344_v52 = vpop.f32.mrf.mxu0  ;;  %v457_v54 = vpop.f32.mrf.mxu1 }
  0xdd   : > { %1261 = vst [vmem:[%s2028_s22 + $0x180] sm:$0xff] %v344_v52 }
  0xde   : > { %v570_v55 = vpop.f32.mrf.mxu2  ;;  %v683_v57 = vpop.f32.mrf.mxu3  ;;  %1262 = vst [vmem:[%s2028_s22 + $0x188] sm:$0xff] %v457_v54 }
  0xdf   : > { %1263 = vst [vmem:[%s2028_s22 + $0x190] sm:$0xff] %v570_v55  ;;  %391 = vmatmul.f32.gmra.mxu0 %v2127_v48  ;;  %504 = vmatmul.f32.gmra.mxu1 %v2127_v48 }
  0xe0   : > { %1264 = vst [vmem:[%s2028_s22 + $0x198] sm:$0xff] %v683_v57  ;;  %v2240_v57 = vld [vmem:[%s1761_s10 + $0xe8] sm:$0xff] }
  0xe3   : > { %620 = vmatmul.f32.gmra.mxu2 %v2144_v58  ;;  %733 = vmatmul.f32.gmra.mxu3 %v2144_v58 }
  0xe4   : > { %v347_v62 = vpop.f32.mrf.mxu0  ;;  %v460_v63 = vpop.f32.mrf.mxu1 }
  0xe5   : > { %1269 = vst [vmem:[%s2028_s22 + $0x1c0] sm:$0xff] %v347_v62 }
  0xe6   : > { %v573_v1 = vpop.f32.mrf.mxu2  ;;  %v686_v2 = vpop.f32.mrf.mxu3  ;;  %1270 = vst [vmem:[%s2028_s22 + $0x1c8] sm:$0xff] %v460_v63 }
  0xe7   : > { %1271 = vst [vmem:[%s2028_s22 + $0x1d0] sm:$0xff] %v573_v1  ;;  %394 = vmatmul.f32.gmra.mxu0 %v2144_v58  ;;  %507 = vmatmul.f32.gmra.mxu1 %v2144_v58  ;;  %v2251_v1 = vld [vmem:[%s1761_s10 + $0xf0] sm:$0xff] }
  0xe8   : > { %1272 = vst [vmem:[%s2028_s22 + $0x1d8] sm:$0xff] %v686_v2 }
  0xeb   : > { %623 = vmatmul.f32.gmra.mxu2 %v2161_v3  ;;  %736 = vmatmul.f32.gmra.mxu3 %v2161_v3 }
  0xec   : > { %v350_v6 = vpop.f32.mrf.mxu0  ;;  %v463_v8 = vpop.f32.mrf.mxu1 }
  0xed   : > { %1277 = vst [vmem:[%s2028_s22 + $0x200] sm:$0xff] %v350_v6 }
  0xee   : > { %v576_v10 = vpop.f32.mrf.mxu2  ;;  %v689_v11 = vpop.f32.mrf.mxu3  ;;  %1278 = vst [vmem:[%s2028_s22 + $0x208] sm:$0xff] %v463_v8  ;;  %v2262_v8 = vld [vmem:[%s1761_s10 + $0xf8] sm:$0xff] }
  0xef   : > { %1279 = vst [vmem:[%s2028_s22 + $0x210] sm:$0xff] %v576_v10  ;;  %397 = vmatmul.f32.gmra.mxu0 %v2161_v3  ;;  %510 = vmatmul.f32.gmra.mxu1 %v2161_v3 }
  0xf0   : > { %1280 = vst [vmem:[%s2028_s22 + $0x218] sm:$0xff] %v689_v11 }
  0xf3   : > { %626 = vmatmul.f32.gmra.mxu2 %v2178_v12  ;;  %739 = vmatmul.f32.gmra.mxu3 %v2178_v12 }
  0xf4   : > { %v353_v18 = vpop.f32.mrf.mxu0  ;;  %v466_v19 = vpop.f32.mrf.mxu1 }
  0xf5   : > { %1285 = vst [vmem:[%s2028_s22 + $0x240] sm:$0xff] %v353_v18 }
  0xf6   : > { %v579_v21 = vpop.f32.mrf.mxu2  ;;  %v692_v22 = vpop.f32.mrf.mxu3  ;;  %1286 = vst [vmem:[%s2028_s22 + $0x248] sm:$0xff] %v466_v19 }
  0xf7   : > { %1287 = vst [vmem:[%s2028_s22 + $0x250] sm:$0xff] %v579_v21  ;;  %400 = vmatmul.f32.gmra.mxu0 %v2178_v12  ;;  %513 = vmatmul.f32.gmra.mxu1 %v2178_v12 }
  0xf8   : > { %1288 = vst [vmem:[%s2028_s22 + $0x258] sm:$0xff] %v692_v22 }
  0xfb   : > { %629 = vmatmul.f32.gmra.mxu2 %v2195_v24  ;;  %742 = vmatmul.f32.gmra.mxu3 %v2195_v24 }
  0xfc   : > { %v356_v30 = vpop.f32.mrf.mxu0  ;;  %v469_v31 = vpop.f32.mrf.mxu1 }
  0xfd   : > { %1293 = vst [vmem:[%s2028_s22 + $0x280] sm:$0xff] %v356_v30 }
  0xfe   : > { %v582_v33 = vpop.f32.mrf.mxu2  ;;  %v695_v34 = vpop.f32.mrf.mxu3  ;;  %1294 = vst [vmem:[%s2028_s22 + $0x288] sm:$0xff] %v469_v31 }
  0xff   : > { %1295 = vst [vmem:[%s2028_s22 + $0x290] sm:$0xff] %v582_v33  ;;  %403 = vmatmul.f32.gmra.mxu0 %v2195_v24  ;;  %516 = vmatmul.f32.gmra.mxu1 %v2195_v24 }
 0x100   : > { %1296 = vst [vmem:[%s2028_s22 + $0x298] sm:$0xff] %v695_v34 }
 0x103   : > { %632 = vmatmul.f32.gmra.mxu2 %v2212_v36  ;;  %745 = vmatmul.f32.gmra.mxu3 %v2212_v36 }
 0x104   : > { %v359_v42 = vpop.f32.mrf.mxu0  ;;  %v472_v43 = vpop.f32.mrf.mxu1 }
 0x105   : > { %1301 = vst [vmem:[%s2028_s22 + $0x2c0] sm:$0xff] %v359_v42 }
 0x106   : > { %v585_v45 = vpop.f32.mrf.mxu2  ;;  %v698_v46 = vpop.f32.mrf.mxu3  ;;  %1302 = vst [vmem:[%s2028_s22 + $0x2c8] sm:$0xff] %v472_v43 }
 0x107   : > { %1303 = vst [vmem:[%s2028_s22 + $0x2d0] sm:$0xff] %v585_v45  ;;  %406 = vmatmul.f32.gmra.mxu0 %v2212_v36  ;;  %519 = vmatmul.f32.gmra.mxu1 %v2212_v36 }
 0x108   : > { %1304 = vst [vmem:[%s2028_s22 + $0x2d8] sm:$0xff] %v698_v46 }
 0x10b   : > { %635 = vmatmul.f32.gmra.mxu2 %v2229_v49  ;;  %748 = vmatmul.f32.gmra.mxu3 %v2229_v49 }
 0x10c   : > { %v362_v51 = vpop.f32.mrf.mxu0  ;;  %v475_v52 = vpop.f32.mrf.mxu1 }
 0x10d   : > { %1309 = vst [vmem:[%s2028_s22 + $0x300] sm:$0xff] %v362_v51 }
 0x10e   : > { %v588_v54 = vpop.f32.mrf.mxu2  ;;  %v701_v55 = vpop.f32.mrf.mxu3  ;;  %1310 = vst [vmem:[%s2028_s22 + $0x308] sm:$0xff] %v475_v52 }
 0x10f   : > { %1311 = vst [vmem:[%s2028_s22 + $0x310] sm:$0xff] %v588_v54  ;;  %409 = vmatmul.f32.gmra.mxu0 %v2229_v49  ;;  %522 = vmatmul.f32.gmra.mxu1 %v2229_v49 }
 0x110   : > { %1312 = vst [vmem:[%s2028_s22 + $0x318] sm:$0xff] %v701_v55 }
 0x113   : > { %638 = vmatmul.f32.gmra.mxu2 %v2240_v57  ;;  %751 = vmatmul.f32.gmra.mxu3 %v2240_v57 }
 0x114   : > { %v365_v59 = vpop.f32.mrf.mxu0  ;;  %v478_v61 = vpop.f32.mrf.mxu1 }
 0x115   : > { %1317 = vst [vmem:[%s2028_s22 + $0x340] sm:$0xff] %v365_v59 }
 0x116   : > { %v591_v62 = vpop.f32.mrf.mxu2  ;;  %v704_v63 = vpop.f32.mrf.mxu3  ;;  %1318 = vst [vmem:[%s2028_s22 + $0x348] sm:$0xff] %v478_v61 }
 0x117   : > { %1319 = vst [vmem:[%s2028_s22 + $0x350] sm:$0xff] %v591_v62  ;;  %412 = vmatmul.f32.gmra.mxu0 %v2240_v57  ;;  %525 = vmatmul.f32.gmra.mxu1 %v2240_v57 }
 0x118   : > { %1320 = vst [vmem:[%s2028_s22 + $0x358] sm:$0xff] %v704_v63 }
 0x11b   : > { %641 = vmatmul.f32.gmra.mxu2 %v2251_v1  ;;  %754 = vmatmul.f32.gmra.mxu3 %v2251_v1 }
 0x11c   : > { %v368_v2 = vpop.f32.mrf.mxu0  ;;  %v481_v4 = vpop.f32.mrf.mxu1 }
 0x11d   : > { %1325 = vst [vmem:[%s2028_s22 + $0x380] sm:$0xff] %v368_v2 }
 0x11e   : > { %v594_v5 = vpop.f32.mrf.mxu2  ;;  %v707_v6 = vpop.f32.mrf.mxu3  ;;  %1326 = vst [vmem:[%s2028_s22 + $0x388] sm:$0xff] %v481_v4 }
 0x11f   : > { %1327 = vst [vmem:[%s2028_s22 + $0x390] sm:$0xff] %v594_v5  ;;  %415 = vmatmul.f32.gmra.mxu0 %v2251_v1  ;;  %528 = vmatmul.f32.gmra.mxu1 %v2251_v1 }
 0x120   : > { %1328 = vst [vmem:[%s2028_s22 + $0x398] sm:$0xff] %v707_v6 }
 0x123   : > { %644 = vmatmul.f32.gmra.mxu2 %v2262_v8  ;;  %757 = vmatmul.f32.gmra.mxu3 %v2262_v8 }
 0x124   : > { %v371_v10 = vpop.f32.mrf.mxu0  ;;  %v484_v11 = vpop.f32.mrf.mxu1 }
 0x125   : > { %1333 = vst [vmem:[%s2028_s22 + $0x3c0] sm:$0xff] %v371_v10 }
 0x126   : > { %v597_v13 = vpop.f32.mrf.mxu2  ;;  %v710_v15 = vpop.f32.mrf.mxu3  ;;  %1334 = vst [vmem:[%s2028_s22 + $0x3c8] sm:$0xff] %v484_v11 }
 0x127   : > { %1335 = vst [vmem:[%s2028_s22 + $0x3d0] sm:$0xff] %v597_v13  ;;  %418 = vmatmul.f32.gmra.mxu0 %v2262_v8  ;;  %531 = vmatmul.f32.gmra.mxu1 %v2262_v8 }
 0x128   : > { %1336 = vst [vmem:[%s2028_s22 + $0x3d8] sm:$0xff] %v710_v15 }
 0x12b   : > { %1003 = vmatmul.f32.vlgmr.msrb.gmra.mxu2 %v1776_v60  ;;  %1116 = vmatmul.f32.vlgmr.msrb.gmra.mxu3 %v1776_v60 }
 0x12c   : > { %v374_v18 = vpop.f32.mrf.mxu0  ;;  %v487_v19 = vpop.f32.mrf.mxu1 }
 0x12d   : > { %1341 = vst [vmem:[%s2028_s22 + $0x400] sm:$0xff] %v374_v18 }
 0x12e   : > { %v600_v21 = vpop.f32.mrf.mxu2  ;;  %v713_v22 = vpop.f32.mrf.mxu3  ;;  %1342 = vst [vmem:[%s2028_s22 + $0x408] sm:$0xff] %v487_v19 }
 0x12f   : > { %1343 = vst [vmem:[%s2028_s22 + $0x410] sm:$0xff] %v600_v21  ;;  %777 = vmatmul.f32.vlgmr.msrb.gmra.mxu0 %v1776_v60  ;;  %890 = vmatmul.f32.vlgmr.msrb.gmra.mxu1 %v1776_v60 }
 0x130   : > { %1344 = vst [vmem:[%s2028_s22 + $0x418] sm:$0xff] %v713_v22 }
 0x133   : > { %1006 = vmatmul.f32.gmra.mxu2 %v1819_v9  ;;  %1119 = vmatmul.f32.gmra.mxu3 %v1819_v9 }
 0x134   : > { %v377_v25 = vpop.f32.mrf.mxu0  ;;  %v490_v28 = vpop.f32.mrf.mxu1 }
 0x135   : > { %1349 = vst [vmem:[%s2028_s22 + $0x440] sm:$0xff] %v377_v25 }
 0x136   : > { %v603_v30 = vpop.f32.mrf.mxu2  ;;  %v716_v31 = vpop.f32.mrf.mxu3  ;;  %1350 = vst [vmem:[%s2028_s22 + $0x448] sm:$0xff] %v490_v28 }
 0x137   : > { %1351 = vst [vmem:[%s2028_s22 + $0x450] sm:$0xff] %v603_v30  ;;  %780 = vmatmul.f32.gmra.mxu0 %v1819_v9  ;;  %893 = vmatmul.f32.gmra.mxu1 %v1819_v9 }
 0x138   : > { %1352 = vst [vmem:[%s2028_s22 + $0x458] sm:$0xff] %v716_v31 }
 0x13b   : > { %1009 = vmatmul.f32.gmra.mxu2 %v1838_v14  ;;  %1122 = vmatmul.f32.gmra.mxu3 %v1838_v14 }
 0x13c   : > { %v380_v60 = vpop.f32.mrf.mxu0  ;;  %v493_v33 = vpop.f32.mrf.mxu1 }
 0x13d   : > { %1357 = vst [vmem:[%s2028_s22 + $0x480] sm:$0xff] %v380_v60 }
 0x13e   : > { %v606_v34 = vpop.f32.mrf.mxu2  ;;  %v719_v39 = vpop.f32.mrf.mxu3  ;;  %1358 = vst [vmem:[%s2028_s22 + $0x488] sm:$0xff] %v493_v33 }
 0x13f   : > { %1359 = vst [vmem:[%s2028_s22 + $0x490] sm:$0xff] %v606_v34  ;;  %783 = vmatmul.f32.gmra.mxu0 %v1838_v14  ;;  %896 = vmatmul.f32.gmra.mxu1 %v1838_v14 }
 0x140   : > { %1360 = vst [vmem:[%s2028_s22 + $0x498] sm:$0xff] %v719_v39 }
 0x143   : > { %1012 = vmatmul.f32.gmra.mxu2 %v1851_v17  ;;  %1125 = vmatmul.f32.gmra.mxu3 %v1851_v17 }
 0x144   : > { %v383_v9 = vpop.f32.mrf.mxu0  ;;  %v496_v40 = vpop.f32.mrf.mxu1 }
 0x145   : > { %1365 = vst [vmem:[%s2028_s22 + $0x4c0] sm:$0xff] %v383_v9 }
 0x146   : > { %v609_v42 = vpop.f32.mrf.mxu2  ;;  %v722_v43 = vpop.f32.mrf.mxu3  ;;  %1366 = vst [vmem:[%s2028_s22 + $0x4c8] sm:$0xff] %v496_v40 }
 0x147   : > { %1367 = vst [vmem:[%s2028_s22 + $0x4d0] sm:$0xff] %v609_v42  ;;  %786 = vmatmul.f32.gmra.mxu0 %v1851_v17  ;;  %899 = vmatmul.f32.gmra.mxu1 %v1851_v17 }
 0x148   : > { %1368 = vst [vmem:[%s2028_s22 + $0x4d8] sm:$0xff] %v722_v43 }
 0x14b   : > { %1015 = vmatmul.f32.gmra.mxu2 %v1864_v20  ;;  %1128 = vmatmul.f32.gmra.mxu3 %v1864_v20 }
 0x14c   : > { %v386_v14 = vpop.f32.mrf.mxu0  ;;  %v499_v45 = vpop.f32.mrf.mxu1 }
 0x14d   : > { %1373 = vst [vmem:[%s2028_s22 + $0x500] sm:$0xff] %v386_v14 }
 0x14e   : > { %v612_v46 = vpop.f32.mrf.mxu2  ;;  %v725_v51 = vpop.f32.mrf.mxu3  ;;  %1374 = vst [vmem:[%s2028_s22 + $0x508] sm:$0xff] %v499_v45 }
 0x14f   : > { %1375 = vst [vmem:[%s2028_s22 + $0x510] sm:$0xff] %v612_v46  ;;  %789 = vmatmul.f32.gmra.mxu0 %v1864_v20  ;;  %902 = vmatmul.f32.gmra.mxu1 %v1864_v20 }
 0x150   : > { %1376 = vst [vmem:[%s2028_s22 + $0x518] sm:$0xff] %v725_v51 }
 0x153   : > { %1018 = vmatmul.f32.gmra.mxu2 %v1877_v23  ;;  %1131 = vmatmul.f32.gmra.mxu3 %v1877_v23 }
 0x154   : > { %v389_v17 = vpop.f32.mrf.mxu0  ;;  %v502_v52 = vpop.f32.mrf.mxu1 }
 0x155   : > { %1381 = vst [vmem:[%s2028_s22 + $0x540] sm:$0xff] %v389_v17 }
 0x156   : > { %v615_v54 = vpop.f32.mrf.mxu2  ;;  %v728_v55 = vpop.f32.mrf.mxu3  ;;  %1382 = vst [vmem:[%s2028_s22 + $0x548] sm:$0xff] %v502_v52 }
 0x157   : > { %1383 = vst [vmem:[%s2028_s22 + $0x550] sm:$0xff] %v615_v54  ;;  %792 = vmatmul.f32.gmra.mxu0 %v1877_v23  ;;  %905 = vmatmul.f32.gmra.mxu1 %v1877_v23 }
 0x158   : > { %1384 = vst [vmem:[%s2028_s22 + $0x558] sm:$0xff] %v728_v55 }
 0x15b   : > { %1021 = vmatmul.f32.gmra.mxu2 %v1890_v26  ;;  %1134 = vmatmul.f32.gmra.mxu3 %v1890_v26 }
 0x15c   : > { %v392_v20 = vpop.f32.mrf.mxu0  ;;  %v505_v59 = vpop.f32.mrf.mxu1 }
 0x15d   : > { %1389 = vst [vmem:[%s2028_s22 + $0x580] sm:$0xff] %v392_v20 }
 0x15e   : > { %v618_v61 = vpop.f32.mrf.mxu2  ;;  %v731_v62 = vpop.f32.mrf.mxu3  ;;  %1390 = vst [vmem:[%s2028_s22 + $0x588] sm:$0xff] %v505_v59 }
 0x15f   : > { %1391 = vst [vmem:[%s2028_s22 + $0x590] sm:$0xff] %v618_v61  ;;  %795 = vmatmul.f32.gmra.mxu0 %v1890_v26  ;;  %908 = vmatmul.f32.gmra.mxu1 %v1890_v26 }
 0x160   : > { %1392 = vst [vmem:[%s2028_s22 + $0x598] sm:$0xff] %v731_v62 }
 0x163   : > { %1024 = vmatmul.f32.gmra.mxu2 %v1903_v29  ;;  %1137 = vmatmul.f32.gmra.mxu3 %v1903_v29 }
 0x164   : > { %v395_v23 = vpop.f32.mrf.mxu0  ;;  %v508_v63 = vpop.f32.mrf.mxu1 }
 0x165   : > { %1397 = vst [vmem:[%s2028_s22 + $0x5c0] sm:$0xff] %v395_v23 }
 0x166   : > { %v621_v2 = vpop.f32.mrf.mxu2  ;;  %v734_v4 = vpop.f32.mrf.mxu3  ;;  %1398 = vst [vmem:[%s2028_s22 + $0x5c8] sm:$0xff] %v508_v63 }
 0x167   : > { %1399 = vst [vmem:[%s2028_s22 + $0x5d0] sm:$0xff] %v621_v2  ;;  %798 = vmatmul.f32.gmra.mxu0 %v1903_v29  ;;  %911 = vmatmul.f32.gmra.mxu1 %v1903_v29 }
 0x168   : > { %1400 = vst [vmem:[%s2028_s22 + $0x5d8] sm:$0xff] %v734_v4 }
 0x16b   : > { %1027 = vmatmul.f32.gmra.mxu2 %v1916_v32  ;;  %1140 = vmatmul.f32.gmra.mxu3 %v1916_v32 }
 0x16c   : > { %v398_v26 = vpop.f32.mrf.mxu0  ;;  %v511_v5 = vpop.f32.mrf.mxu1 }
 0x16d   : > { %1405 = vst [vmem:[%s2028_s22 + $0x600] sm:$0xff] %v398_v26 }
 0x16e   : > { %v624_v6 = vpop.f32.mrf.mxu2  ;;  %v737_v10 = vpop.f32.mrf.mxu3  ;;  %1406 = vst [vmem:[%s2028_s22 + $0x608] sm:$0xff] %v511_v5 }
 0x16f   : > { %1407 = vst [vmem:[%s2028_s22 + $0x610] sm:$0xff] %v624_v6  ;;  %801 = vmatmul.f32.gmra.mxu0 %v1916_v32  ;;  %914 = vmatmul.f32.gmra.mxu1 %v1916_v32 }
 0x170   : > { %1408 = vst [vmem:[%s2028_s22 + $0x618] sm:$0xff] %v737_v10 }
 0x173   : > { %1030 = vmatmul.f32.gmra.mxu2 %v1929_v35  ;;  %1143 = vmatmul.f32.gmra.mxu3 %v1929_v35 }
 0x174   : > { %v401_v29 = vpop.f32.mrf.mxu0  ;;  %v514_v11 = vpop.f32.mrf.mxu1 }
 0x175   : > { %1413 = vst [vmem:[%s2028_s22 + $0x640] sm:$0xff] %v401_v29 }
 0x176   : > { %v627_v13 = vpop.f32.mrf.mxu2  ;;  %v740_v15 = vpop.f32.mrf.mxu3  ;;  %1414 = vst [vmem:[%s2028_s22 + $0x648] sm:$0xff] %v514_v11 }
 0x177   : > { %1415 = vst [vmem:[%s2028_s22 + $0x650] sm:$0xff] %v627_v13  ;;  %804 = vmatmul.f32.gmra.mxu0 %v1929_v35  ;;  %917 = vmatmul.f32.gmra.mxu1 %v1929_v35 }
 0x178   : > { %1416 = vst [vmem:[%s2028_s22 + $0x658] sm:$0xff] %v740_v15 }
 0x17b   : > { %1033 = vmatmul.f32.gmra.mxu2 %v1942_v38  ;;  %1146 = vmatmul.f32.gmra.mxu3 %v1942_v38 }
 0x17c   : > { %v404_v32 = vpop.f32.mrf.mxu0  ;;  %v517_v18 = vpop.f32.mrf.mxu1 }
 0x17d   : > { %1421 = vst [vmem:[%s2028_s22 + $0x680] sm:$0xff] %v404_v32 }
 0x17e   : > { %v630_v19 = vpop.f32.mrf.mxu2  ;;  %v743_v21 = vpop.f32.mrf.mxu3  ;;  %1422 = vst [vmem:[%s2028_s22 + $0x688] sm:$0xff] %v517_v18 }
 0x17f   : > { %1423 = vst [vmem:[%s2028_s22 + $0x690] sm:$0xff] %v630_v19  ;;  %807 = vmatmul.f32.gmra.mxu0 %v1942_v38  ;;  %920 = vmatmul.f32.gmra.mxu1 %v1942_v38 }
 0x180   : > { %1424 = vst [vmem:[%s2028_s22 + $0x698] sm:$0xff] %v743_v21 }
 0x183   : > { %1036 = vmatmul.f32.gmra.mxu2 %v1955_v41  ;;  %1149 = vmatmul.f32.gmra.mxu3 %v1955_v41 }
 0x184   : > { %v407_v35 = vpop.f32.mrf.mxu0  ;;  %v520_v22 = vpop.f32.mrf.mxu1 }
 0x185   : > { %1429 = vst [vmem:[%s2028_s22 + $0x6c0] sm:$0xff] %v407_v35 }
 0x186   : > { %v633_v25 = vpop.f32.mrf.mxu2  ;;  %v746_v28 = vpop.f32.mrf.mxu3  ;;  %1430 = vst [vmem:[%s2028_s22 + $0x6c8] sm:$0xff] %v520_v22 }
 0x187   : > { %1431 = vst [vmem:[%s2028_s22 + $0x6d0] sm:$0xff] %v633_v25  ;;  %810 = vmatmul.f32.gmra.mxu0 %v1955_v41  ;;  %923 = vmatmul.f32.gmra.mxu1 %v1955_v41 }
 0x188   : > { %1432 = vst [vmem:[%s2028_s22 + $0x6d8] sm:$0xff] %v746_v28 }
 0x18b   : > { %1039 = vmatmul.f32.gmra.mxu2 %v1968_v44  ;;  %1152 = vmatmul.f32.gmra.mxu3 %v1968_v44 }
 0x18c   : > { %v410_v38 = vpop.f32.mrf.mxu0  ;;  %v523_v30 = vpop.f32.mrf.mxu1 }
 0x18d   : > { %1437 = vst [vmem:[%s2028_s22 + $0x700] sm:$0xff] %v410_v38 }
 0x18e   : > { %v636_v31 = vpop.f32.mrf.mxu2  ;;  %v749_v60 = vpop.f32.mrf.mxu3  ;;  %1438 = vst [vmem:[%s2028_s22 + $0x708] sm:$0xff] %v523_v30 }
 0x18f   : > { %1439 = vst [vmem:[%s2028_s22 + $0x710] sm:$0xff] %v636_v31  ;;  %813 = vmatmul.f32.gmra.mxu0 %v1968_v44  ;;  %926 = vmatmul.f32.gmra.mxu1 %v1968_v44 }
 0x190   : > { %1440 = vst [vmem:[%s2028_s22 + $0x718] sm:$0xff] %v749_v60 }
 0x193   : > { %1042 = vmatmul.f32.gmra.mxu2 %v1981_v47  ;;  %1155 = vmatmul.f32.gmra.mxu3 %v1981_v47 }
 0x194   : > { %v413_v41 = vpop.f32.mrf.mxu0  ;;  %v526_v33 = vpop.f32.mrf.mxu1 }
 0x195   : > { %1445 = vst [vmem:[%s2028_s22 + $0x740] sm:$0xff] %v413_v41 }
 0x196   : > { %v639_v34 = vpop.f32.mrf.mxu2  ;;  %v752_v39 = vpop.f32.mrf.mxu3  ;;  %1446 = vst [vmem:[%s2028_s22 + $0x748] sm:$0xff] %v526_v33 }
 0x197   : > { %1447 = vst [vmem:[%s2028_s22 + $0x750] sm:$0xff] %v639_v34  ;;  %816 = vmatmul.f32.gmra.mxu0 %v1981_v47  ;;  %929 = vmatmul.f32.gmra.mxu1 %v1981_v47 }
 0x198   : > { %1448 = vst [vmem:[%s2028_s22 + $0x758] sm:$0xff] %v752_v39 }
 0x19b   : > { %1045 = vmatmul.f32.gmra.mxu2 %v1994_v50  ;;  %1158 = vmatmul.f32.gmra.mxu3 %v1994_v50 }
 0x19c   : > { %v416_v44 = vpop.f32.mrf.mxu0  ;;  %v529_v9 = vpop.f32.mrf.mxu1 }
 0x19d   : > { %1453 = vst [vmem:[%s2028_s22 + $0x780] sm:$0xff] %v416_v44 }
 0x19e   : > { %v642_v40 = vpop.f32.mrf.mxu2  ;;  %v755_v42 = vpop.f32.mrf.mxu3  ;;  %1454 = vst [vmem:[%s2028_s22 + $0x788] sm:$0xff] %v529_v9 }
 0x19f   : > { %1455 = vst [vmem:[%s2028_s22 + $0x790] sm:$0xff] %v642_v40  ;;  %819 = vmatmul.f32.gmra.mxu0 %v1994_v50  ;;  %932 = vmatmul.f32.gmra.mxu1 %v1994_v50 }
 0x1a0   : > { %1456 = vst [vmem:[%s2028_s22 + $0x798] sm:$0xff] %v755_v42 }
 0x1a3   : > { %1048 = vmatmul.f32.gmra.mxu2 %v2007_v53  ;;  %1161 = vmatmul.f32.gmra.mxu3 %v2007_v53 }
 0x1a4   : > { %v419_v47 = vpop.f32.mrf.mxu0  ;;  %v532_v43 = vpop.f32.mrf.mxu1 }
 0x1a5   : > { %1461 = vst [vmem:[%s2028_s22 + $0x7c0] sm:$0xff] %v419_v47 }
 0x1a6   : > { %v645_v14 = vpop.f32.mrf.mxu2  ;;  %v758_v45 = vpop.f32.mrf.mxu3  ;;  %1462 = vst [vmem:[%s2028_s22 + $0x7c8] sm:$0xff] %v532_v43 }
 0x1a7   : > { %1463 = vst [vmem:[%s2028_s22 + $0x7d0] sm:$0xff] %v645_v14  ;;  %822 = vmatmul.f32.gmra.mxu0 %v2007_v53  ;;  %935 = vmatmul.f32.gmra.mxu1 %v2007_v53 }
 0x1a8   : > { %1464 = vst [vmem:[%s2028_s22 + $0x7d8] sm:$0xff] %v758_v45 }
 0x1ab   : > { %1051 = vmatmul.f32.gmra.mxu2 %v2020_v56  ;;  %1164 = vmatmul.f32.gmra.mxu3 %v2020_v56 }
 0x1ac   : > { %v778_v50 = vpop.f32.mrf.mxu0  ;;  %v891_v46 = vpop.f32.mrf.mxu1 }
 0x1ad   : > { %1217 = vst [vmem:[%s2028_s22 + $0x20] sm:$0xff] %v778_v50 }
 0x1ae   : > { %v1004_v51 = vpop.f32.mrf.mxu2  ;;  %v1117_v17 = vpop.f32.mrf.mxu3  ;;  %1218 = vst [vmem:[%s2028_s22 + $0x28] sm:$0xff] %v891_v46 }
 0x1af   : > { %1219 = vst [vmem:[%s2028_s22 + $0x30] sm:$0xff] %v1004_v51  ;;  %825 = vmatmul.f32.gmra.mxu0 %v2020_v56  ;;  %938 = vmatmul.f32.gmra.mxu1 %v2020_v56 }
 0x1b0   : > { %1220 = vst [vmem:[%s2028_s22 + $0x38] sm:$0xff] %v1117_v17 }
 0x1b3   : > { %1054 = vmatmul.f32.gmra.mxu2 %v2042_v0  ;;  %1167 = vmatmul.f32.gmra.mxu3 %v2042_v0 }
 0x1b4   : > { %v781_v53 = vpop.f32.mrf.mxu0  ;;  %v894_v52 = vpop.f32.mrf.mxu1 }
 0x1b5   : > { %1225 = vst [vmem:[%s2028_s22 + $0x60] sm:$0xff] %v781_v53 }
 0x1b6   : > { %v1007_v54 = vpop.f32.mrf.mxu2  ;;  %v1120_v55 = vpop.f32.mrf.mxu3  ;;  %1226 = vst [vmem:[%s2028_s22 + $0x68] sm:$0xff] %v894_v52 }
 0x1b7   : > { %1227 = vst [vmem:[%s2028_s22 + $0x70] sm:$0xff] %v1007_v54  ;;  %828 = vmatmul.f32.gmra.mxu0 %v2042_v0  ;;  %941 = vmatmul.f32.gmra.mxu1 %v2042_v0 }
 0x1b8   : > { %1228 = vst [vmem:[%s2028_s22 + $0x78] sm:$0xff] %v1120_v55 }
 0x1bb   : > { %1057 = vmatmul.f32.gmra.mxu2 %v2059_v7  ;;  %1170 = vmatmul.f32.gmra.mxu3 %v2059_v7 }
 0x1bc   : > { %v784_v56 = vpop.f32.mrf.mxu0  ;;  %v897_v20 = vpop.f32.mrf.mxu1 }
 0x1bd   : > { %1233 = vst [vmem:[%s2028_s22 + $0xa0] sm:$0xff] %v784_v56 }
 0x1be   : > { %v1010_v59 = vpop.f32.mrf.mxu2  ;;  %v1123_v61 = vpop.f32.mrf.mxu3  ;;  %1234 = vst [vmem:[%s2028_s22 + $0xa8] sm:$0xff] %v897_v20 }
 0x1bf   : > { %1235 = vst [vmem:[%s2028_s22 + $0xb0] sm:$0xff] %v1010_v59  ;;  %831 = vmatmul.f32.gmra.mxu0 %v2059_v7  ;;  %944 = vmatmul.f32.gmra.mxu1 %v2059_v7 }
 0x1c0   : > { %1236 = vst [vmem:[%s2028_s22 + $0xb8] sm:$0xff] %v1123_v61 }
 0x1c3   : > { %1060 = vmatmul.f32.gmra.mxu2 %v2076_v16  ;;  %1173 = vmatmul.f32.gmra.mxu3 %v2076_v16 }
 0x1c4   : > { %v787_v0 = vpop.f32.mrf.mxu0  ;;  %v900_v62 = vpop.f32.mrf.mxu1 }
 0x1c5   : > { %1241 = vst [vmem:[%s2028_s22 + $0xe0] sm:$0xff] %v787_v0 }
 0x1c6   : > { %v1013_v23 = vpop.f32.mrf.mxu2  ;;  %v1126_v63 = vpop.f32.mrf.mxu3  ;;  %1242 = vst [vmem:[%s2028_s22 + $0xe8] sm:$0xff] %v900_v62 }
 0x1c7   : > { %1243 = vst [vmem:[%s2028_s22 + $0xf0] sm:$0xff] %v1013_v23  ;;  %834 = vmatmul.f32.gmra.mxu0 %v2076_v16  ;;  %947 = vmatmul.f32.gmra.mxu1 %v2076_v16 }
 0x1c8   : > { %1244 = vst [vmem:[%s2028_s22 + $0xf8] sm:$0xff] %v1126_v63 }
 0x1cb   : > { %1063 = vmatmul.f32.gmra.mxu2 %v2093_v27  ;;  %1176 = vmatmul.f32.gmra.mxu3 %v2093_v27 }
 0x1cc   : > { %v790_v7 = vpop.f32.mrf.mxu0  ;;  %v903_v2 = vpop.f32.mrf.mxu1 }
 0x1cd   : > { %1249 = vst [vmem:[%s2028_s22 + $0x120] sm:$0xff] %v790_v7 }
 0x1ce   : > { %v1016_v4 = vpop.f32.mrf.mxu2  ;;  %v1129_v26 = vpop.f32.mrf.mxu3  ;;  %1250 = vst [vmem:[%s2028_s22 + $0x128] sm:$0xff] %v903_v2 }
 0x1cf   : > { %1251 = vst [vmem:[%s2028_s22 + $0x130] sm:$0xff] %v1016_v4  ;;  %837 = vmatmul.f32.gmra.mxu0 %v2093_v27  ;;  %950 = vmatmul.f32.gmra.mxu1 %v2093_v27 }
 0x1d0   : > { %1252 = vst [vmem:[%s2028_s22 + $0x138] sm:$0xff] %v1129_v26 }
 0x1d3   : > { %1066 = vmatmul.f32.gmra.mxu2 %v2110_v37  ;;  %1179 = vmatmul.f32.gmra.mxu3 %v2110_v37 }
 0x1d4   : > { %v793_v16 = vpop.f32.mrf.mxu0  ;;  %v906_v5 = vpop.f32.mrf.mxu1 }
 0x1d5   : > { %1257 = vst [vmem:[%s2028_s22 + $0x160] sm:$0xff] %v793_v16 }
 0x1d6   : > { %v1019_v6 = vpop.f32.mrf.mxu2  ;;  %v1132_v10 = vpop.f32.mrf.mxu3  ;;  %1258 = vst [vmem:[%s2028_s22 + $0x168] sm:$0xff] %v906_v5 }
 0x1d7   : > { %1259 = vst [vmem:[%s2028_s22 + $0x170] sm:$0xff] %v1019_v6  ;;  %840 = vmatmul.f32.gmra.mxu0 %v2110_v37  ;;  %953 = vmatmul.f32.gmra.mxu1 %v2110_v37 }
 0x1d8   : > { %1260 = vst [vmem:[%s2028_s22 + $0x178] sm:$0xff] %v1132_v10 }
 0x1db   : > { %1069 = vmatmul.f32.gmra.mxu2 %v2127_v48  ;;  %1182 = vmatmul.f32.gmra.mxu3 %v2127_v48 }
 0x1dc   : > { %v796_v27 = vpop.f32.mrf.mxu0  ;;  %v909_v29 = vpop.f32.mrf.mxu1 }
 0x1dd   : > { %1265 = vst [vmem:[%s2028_s22 + $0x1a0] sm:$0xff] %v796_v27 }
 0x1de   : > { %v1022_v11 = vpop.f32.mrf.mxu2  ;;  %v1135_v13 = vpop.f32.mrf.mxu3  ;;  %1266 = vst [vmem:[%s2028_s22 + $0x1a8] sm:$0xff] %v909_v29 }
 0x1df   : > { %1267 = vst [vmem:[%s2028_s22 + $0x1b0] sm:$0xff] %v1022_v11  ;;  %843 = vmatmul.f32.gmra.mxu0 %v2127_v48  ;;  %956 = vmatmul.f32.gmra.mxu1 %v2127_v48 }
 0x1e0   : > { %1268 = vst [vmem:[%s2028_s22 + $0x1b8] sm:$0xff] %v1135_v13 }
 0x1e3   : > { %1072 = vmatmul.f32.gmra.mxu2 %v2144_v58  ;;  %1185 = vmatmul.f32.gmra.mxu3 %v2144_v58 }
 0x1e4   : > { %v799_v37 = vpop.f32.mrf.mxu0  ;;  %v912_v15 = vpop.f32.mrf.mxu1 }
 0x1e5   : > { %1273 = vst [vmem:[%s2028_s22 + $0x1e0] sm:$0xff] %v799_v37 }
 0x1e6   : > { %v1025_v32 = vpop.f32.mrf.mxu2  ;;  %v1138_v18 = vpop.f32.mrf.mxu3  ;;  %1274 = vst [vmem:[%s2028_s22 + $0x1e8] sm:$0xff] %v912_v15 }
 0x1e7   : > { %1275 = vst [vmem:[%s2028_s22 + $0x1f0] sm:$0xff] %v1025_v32  ;;  %846 = vmatmul.f32.gmra.mxu0 %v2144_v58  ;;  %959 = vmatmul.f32.gmra.mxu1 %v2144_v58 }
 0x1e8   : > { %1276 = vst [vmem:[%s2028_s22 + $0x1f8] sm:$0xff] %v1138_v18 }
 0x1eb   : > { %1075 = vmatmul.f32.gmra.mxu2 %v2161_v3  ;;  %1188 = vmatmul.f32.gmra.mxu3 %v2161_v3 }
 0x1ec   : > { %v802_v48 = vpop.f32.mrf.mxu0  ;;  %v915_v19 = vpop.f32.mrf.mxu1 }
 0x1ed   : > { %1281 = vst [vmem:[%s2028_s22 + $0x220] sm:$0xff] %v802_v48 }
 0x1ee   : > { %v1028_v21 = vpop.f32.mrf.mxu2  ;;  %v1141_v35 = vpop.f32.mrf.mxu3  ;;  %1282 = vst [vmem:[%s2028_s22 + $0x228] sm:$0xff] %v915_v19 }
 0x1ef   : > { %1283 = vst [vmem:[%s2028_s22 + $0x230] sm:$0xff] %v1028_v21  ;;  %849 = vmatmul.f32.gmra.mxu0 %v2161_v3  ;;  %962 = vmatmul.f32.gmra.mxu1 %v2161_v3 }
 0x1f0   : > { %1284 = vst [vmem:[%s2028_s22 + $0x238] sm:$0xff] %v1141_v35 }
 0x1f3   : > { %1078 = vmatmul.f32.gmra.mxu2 %v2178_v12  ;;  %1191 = vmatmul.f32.gmra.mxu3 %v2178_v12 }
 0x1f4   : > { %v805_v58 = vpop.f32.mrf.mxu0  ;;  %v918_v22 = vpop.f32.mrf.mxu1 }
 0x1f5   : > { %1289 = vst [vmem:[%s2028_s22 + $0x260] sm:$0xff] %v805_v58 }
 0x1f6   : > { %v1031_v25 = vpop.f32.mrf.mxu2  ;;  %v1144_v28 = vpop.f32.mrf.mxu3  ;;  %1290 = vst [vmem:[%s2028_s22 + $0x268] sm:$0xff] %v918_v22 }
 0x1f7   : > { %1291 = vst [vmem:[%s2028_s22 + $0x270] sm:$0xff] %v1031_v25  ;;  %852 = vmatmul.f32.gmra.mxu0 %v2178_v12  ;;  %965 = vmatmul.f32.gmra.mxu1 %v2178_v12 }
 0x1f8   : > { %1292 = vst [vmem:[%s2028_s22 + $0x278] sm:$0xff] %v1144_v28 }
 0x1fb   : > { %1081 = vmatmul.f32.gmra.mxu2 %v2195_v24  ;;  %1194 = vmatmul.f32.gmra.mxu3 %v2195_v24 }
 0x1fc   : > { %v808_v3 = vpop.f32.mrf.mxu0  ;;  %v921_v38 = vpop.f32.mrf.mxu1 }
 0x1fd   : > { %1297 = vst [vmem:[%s2028_s22 + $0x2a0] sm:$0xff] %v808_v3 }
 0x1fe   : > { %v1034_v30 = vpop.f32.mrf.mxu2  ;;  %v1147_v31 = vpop.f32.mrf.mxu3  ;;  %1298 = vst [vmem:[%s2028_s22 + $0x2a8] sm:$0xff] %v921_v38 }
 0x1ff   : > { %1299 = vst [vmem:[%s2028_s22 + $0x2b0] sm:$0xff] %v1034_v30  ;;  %855 = vmatmul.f32.gmra.mxu0 %v2195_v24  ;;  %968 = vmatmul.f32.gmra.mxu1 %v2195_v24 }
 0x200   : > { %1300 = vst [vmem:[%s2028_s22 + $0x2b8] sm:$0xff] %v1147_v31 }
 0x203   : > { %1084 = vmatmul.f32.gmra.mxu2 %v2212_v36  ;;  %1197 = vmatmul.f32.gmra.mxu3 %v2212_v36 }
 0x204   : > { %v811_v12 = vpop.f32.mrf.mxu0  ;;  %v924_v60 = vpop.f32.mrf.mxu1 }
 0x205   : > { %1305 = vst [vmem:[%s2028_s22 + $0x2e0] sm:$0xff] %v811_v12 }
 0x206   : > { %v1037_v41 = vpop.f32.mrf.mxu2  ;;  %v1150_v33 = vpop.f32.mrf.mxu3  ;;  %1306 = vst [vmem:[%s2028_s22 + $0x2e8] sm:$0xff] %v924_v60 }
 0x207   : > { %1307 = vst [vmem:[%s2028_s22 + $0x2f0] sm:$0xff] %v1037_v41  ;;  %858 = vmatmul.f32.gmra.mxu0 %v2212_v36  ;;  %971 = vmatmul.f32.gmra.mxu1 %v2212_v36 }
 0x208   : > { %1308 = vst [vmem:[%s2028_s22 + $0x2f8] sm:$0xff] %v1150_v33 }
 0x20b   : > { %1087 = vmatmul.f32.gmra.mxu2 %v2229_v49  ;;  %1200 = vmatmul.f32.gmra.mxu3 %v2229_v49 }
 0x20c   : > { %v814_v24 = vpop.f32.mrf.mxu0  ;;  %v927_v34 = vpop.f32.mrf.mxu1 }
 0x20d   : > { %1313 = vst [vmem:[%s2028_s22 + $0x320] sm:$0xff] %v814_v24 }
 0x20e   : > { %v1040_v39 = vpop.f32.mrf.mxu2  ;;  %v1153_v44 = vpop.f32.mrf.mxu3  ;;  %1314 = vst [vmem:[%s2028_s22 + $0x328] sm:$0xff] %v927_v34 }
 0x20f   : > { %1315 = vst [vmem:[%s2028_s22 + $0x330] sm:$0xff] %v1040_v39  ;;  %861 = vmatmul.f32.gmra.mxu0 %v2229_v49  ;;  %974 = vmatmul.f32.gmra.mxu1 %v2229_v49 }
 0x210   : > { %1316 = vst [vmem:[%s2028_s22 + $0x338] sm:$0xff] %v1153_v44 }
 0x213   : > { %1090 = vmatmul.f32.gmra.mxu2 %v2240_v57  ;;  %1203 = vmatmul.f32.gmra.mxu3 %v2240_v57 }
 0x214   : > { %v817_v36 = vpop.f32.mrf.mxu0  ;;  %v930_v9 = vpop.f32.mrf.mxu1 }
 0x215   : > { %1321 = vst [vmem:[%s2028_s22 + $0x360] sm:$0xff] %v817_v36 }
 0x216   : > { %v1043_v40 = vpop.f32.mrf.mxu2  ;;  %v1156_v42 = vpop.f32.mrf.mxu3  ;;  %1322 = vst [vmem:[%s2028_s22 + $0x368] sm:$0xff] %v930_v9 }
 0x217   : > { %1323 = vst [vmem:[%s2028_s22 + $0x370] sm:$0xff] %v1043_v40  ;;  %864 = vmatmul.f32.gmra.mxu0 %v2240_v57  ;;  %977 = vmatmul.f32.gmra.mxu1 %v2240_v57 }
 0x218   : > { %1324 = vst [vmem:[%s2028_s22 + $0x378] sm:$0xff] %v1156_v42 }
 0x21b   : > { %1093 = vmatmul.f32.gmra.mxu2 %v2251_v1  ;;  %1206 = vmatmul.f32.gmra.mxu3 %v2251_v1 }
 0x21c   : > { %v820_v49 = vpop.f32.mrf.mxu0  ;;  %v933_v47 = vpop.f32.mrf.mxu1 }
 0x21d   : > { %1329 = vst [vmem:[%s2028_s22 + $0x3a0] sm:$0xff] %v820_v49 }
 0x21e   : > { %v1046_v43 = vpop.f32.mrf.mxu2  ;;  %v1159_v14 = vpop.f32.mrf.mxu3  ;;  %1330 = vst [vmem:[%s2028_s22 + $0x3a8] sm:$0xff] %v933_v47 }
 0x21f   : > { %1331 = vst [vmem:[%s2028_s22 + $0x3b0] sm:$0xff] %v1046_v43  ;;  %867 = vmatmul.f32.gmra.mxu0 %v2251_v1  ;;  %980 = vmatmul.f32.gmra.mxu1 %v2251_v1 }
 0x220   : > { %1332 = vst [vmem:[%s2028_s22 + $0x3b8] sm:$0xff] %v1159_v14 }
 0x223   : > { %1096 = vmatmul.f32.gmra.mxu2 %v2262_v8  ;;  %1209 = vmatmul.f32.gmra.mxu3 %v2262_v8 }
 0x224   : > { %v823_v57 = vpop.f32.mrf.mxu0  ;;  %v936_v45 = vpop.f32.mrf.mxu1 }
 0x225   : > { %1337 = vst [vmem:[%s2028_s22 + $0x3e0] sm:$0xff] %v823_v57 }
 0x226   : > { %v1049_v50 = vpop.f32.mrf.mxu2  ;;  %v1162_v46 = vpop.f32.mrf.mxu3  ;;  %1338 = vst [vmem:[%s2028_s22 + $0x3e8] sm:$0xff] %v936_v45 }
 0x227   : > { %1339 = vst [vmem:[%s2028_s22 + $0x3f0] sm:$0xff] %v1049_v50  ;;  %870 = vmatmul.f32.gmra.mxu0 %v2262_v8  ;;  %983 = vmatmul.f32.gmra.mxu1 %v2262_v8 }
 0x228   : > { %1340 = vst [vmem:[%s2028_s22 + $0x3f8] sm:$0xff] %v1162_v46 }
 0x22c   : > { %v826_v1 = vpop.f32.mrf.mxu0  ;;  %v939_v51 = vpop.f32.mrf.mxu1 }
 0x22d   : > { %1345 = vst [vmem:[%s2028_s22 + $0x420] sm:$0xff] %v826_v1 }
 0x22e   : > { %v1052_v17 = vpop.f32.mrf.mxu2  ;;  %v1165_v53 = vpop.f32.mrf.mxu3  ;;  %1346 = vst [vmem:[%s2028_s22 + $0x428] sm:$0xff] %v939_v51 }
 0x22f   : > { %1347 = vst [vmem:[%s2028_s22 + $0x430] sm:$0xff] %v1052_v17 }
 0x230   : > { %1348 = vst [vmem:[%s2028_s22 + $0x438] sm:$0xff] %v1165_v53 }
 0x234   : > { %v829_v52 = vpop.f32.mrf.mxu0  ;;  %v942_v54 = vpop.f32.mrf.mxu1 }
 0x235   : > { %1353 = vst [vmem:[%s2028_s22 + $0x460] sm:$0xff] %v829_v52 }
 0x236   : > { %v1055_v8 = vpop.f32.mrf.mxu2  ;;  %v1168_v55 = vpop.f32.mrf.mxu3  ;;  %1354 = vst [vmem:[%s2028_s22 + $0x468] sm:$0xff] %v942_v54 }
 0x237   : > { %1355 = vst [vmem:[%s2028_s22 + $0x470] sm:$0xff] %v1055_v8 }
 0x238   : > { %1356 = vst [vmem:[%s2028_s22 + $0x478] sm:$0xff] %v1168_v55 }
 0x23c   : > { %v832_v56 = vpop.f32.mrf.mxu0  ;;  %v945_v20 = vpop.f32.mrf.mxu1 }
 0x23d   : > { %1361 = vst [vmem:[%s2028_s22 + $0x4a0] sm:$0xff] %v832_v56 }
 0x23e   : > { %v1058_v59 = vpop.f32.mrf.mxu2  ;;  %v1171_v61 = vpop.f32.mrf.mxu3  ;;  %1362 = vst [vmem:[%s2028_s22 + $0x4a8] sm:$0xff] %v945_v20 }
 0x23f   : > { %1363 = vst [vmem:[%s2028_s22 + $0x4b0] sm:$0xff] %v1058_v59 }
 0x240   : > { %1364 = vst [vmem:[%s2028_s22 + $0x4b8] sm:$0xff] %v1171_v61 }
 0x244   : > { %v835_v0 = vpop.f32.mrf.mxu0  ;;  %v948_v62 = vpop.f32.mrf.mxu1 }
 0x245   : > { %1369 = vst [vmem:[%s2028_s22 + $0x4e0] sm:$0xff] %v835_v0 }
 0x246   : > { %v1061_v23 = vpop.f32.mrf.mxu2  ;;  %v1174_v63 = vpop.f32.mrf.mxu3  ;;  %1370 = vst [vmem:[%s2028_s22 + $0x4e8] sm:$0xff] %v948_v62 }
 0x247   : > { %1371 = vst [vmem:[%s2028_s22 + $0x4f0] sm:$0xff] %v1061_v23 }
 0x248   : > { %1372 = vst [vmem:[%s2028_s22 + $0x4f8] sm:$0xff] %v1174_v63 }
 0x24c   : > { %v838_v7 = vpop.f32.mrf.mxu0  ;;  %v951_v2 = vpop.f32.mrf.mxu1 }
 0x24d   : > { %1377 = vst [vmem:[%s2028_s22 + $0x520] sm:$0xff] %v838_v7 }
 0x24e   : > { %v1064_v4 = vpop.f32.mrf.mxu2  ;;  %v1177_v26 = vpop.f32.mrf.mxu3  ;;  %1378 = vst [vmem:[%s2028_s22 + $0x528] sm:$0xff] %v951_v2 }
 0x24f   : > { %1379 = vst [vmem:[%s2028_s22 + $0x530] sm:$0xff] %v1064_v4 }
 0x250   : > { %1380 = vst [vmem:[%s2028_s22 + $0x538] sm:$0xff] %v1177_v26 }
 0x254   : > { %v841_v16 = vpop.f32.mrf.mxu0  ;;  %v954_v5 = vpop.f32.mrf.mxu1 }
 0x255   : > { %1385 = vst [vmem:[%s2028_s22 + $0x560] sm:$0xff] %v841_v16 }
 0x256   : > { %v1067_v6 = vpop.f32.mrf.mxu2  ;;  %v1180_v10 = vpop.f32.mrf.mxu3  ;;  %1386 = vst [vmem:[%s2028_s22 + $0x568] sm:$0xff] %v954_v5 }
 0x257   : > { %1387 = vst [vmem:[%s2028_s22 + $0x570] sm:$0xff] %v1067_v6 }
 0x258   : > { %1388 = vst [vmem:[%s2028_s22 + $0x578] sm:$0xff] %v1180_v10 }
 0x25c   : > { %v844_v27 = vpop.f32.mrf.mxu0  ;;  %v957_v29 = vpop.f32.mrf.mxu1 }
 0x25d   : > { %1393 = vst [vmem:[%s2028_s22 + $0x5a0] sm:$0xff] %v844_v27 }
 0x25e   : > { %v1070_v11 = vpop.f32.mrf.mxu2  ;;  %v1183_v13 = vpop.f32.mrf.mxu3  ;;  %1394 = vst [vmem:[%s2028_s22 + $0x5a8] sm:$0xff] %v957_v29 }
 0x25f   : > { %1395 = vst [vmem:[%s2028_s22 + $0x5b0] sm:$0xff] %v1070_v11 }
 0x260   : > { %1396 = vst [vmem:[%s2028_s22 + $0x5b8] sm:$0xff] %v1183_v13 }
 0x264   : > { %v847_v37 = vpop.f32.mrf.mxu0  ;;  %v960_v15 = vpop.f32.mrf.mxu1 }
 0x265   : > { %1401 = vst [vmem:[%s2028_s22 + $0x5e0] sm:$0xff] %v847_v37 }
 0x266   : > { %v1073_v32 = vpop.f32.mrf.mxu2  ;;  %v1186_v18 = vpop.f32.mrf.mxu3  ;;  %1402 = vst [vmem:[%s2028_s22 + $0x5e8] sm:$0xff] %v960_v15 }
 0x267   : > { %1403 = vst [vmem:[%s2028_s22 + $0x5f0] sm:$0xff] %v1073_v32 }
 0x268   : > { %1404 = vst [vmem:[%s2028_s22 + $0x5f8] sm:$0xff] %v1186_v18 }
 0x26c   : > { %v850_v48 = vpop.f32.mrf.mxu0  ;;  %v963_v19 = vpop.f32.mrf.mxu1 }
 0x26d   : > { %1409 = vst [vmem:[%s2028_s22 + $0x620] sm:$0xff] %v850_v48 }
 0x26e   : > { %v1076_v21 = vpop.f32.mrf.mxu2  ;;  %v1189_v35 = vpop.f32.mrf.mxu3  ;;  %1410 = vst [vmem:[%s2028_s22 + $0x628] sm:$0xff] %v963_v19 }
 0x26f   : > { %1411 = vst [vmem:[%s2028_s22 + $0x630] sm:$0xff] %v1076_v21 }
 0x270   : > { %1412 = vst [vmem:[%s2028_s22 + $0x638] sm:$0xff] %v1189_v35 }
 0x274   : > { %v853_v58 = vpop.f32.mrf.mxu0  ;;  %v966_v22 = vpop.f32.mrf.mxu1 }
 0x275   : > { %1417 = vst [vmem:[%s2028_s22 + $0x660] sm:$0xff] %v853_v58 }
 0x276   : > { %v1079_v25 = vpop.f32.mrf.mxu2  ;;  %v1192_v28 = vpop.f32.mrf.mxu3  ;;  %1418 = vst [vmem:[%s2028_s22 + $0x668] sm:$0xff] %v966_v22 }
 0x277   : > { %1419 = vst [vmem:[%s2028_s22 + $0x670] sm:$0xff] %v1079_v25 }
 0x278   : > { %1420 = vst [vmem:[%s2028_s22 + $0x678] sm:$0xff] %v1192_v28 }
 0x27c   : > { %v856_v3 = vpop.f32.mrf.mxu0  ;;  %v969_v38 = vpop.f32.mrf.mxu1 }
 0x27d   : > { %1425 = vst [vmem:[%s2028_s22 + $0x6a0] sm:$0xff] %v856_v3 }
 0x27e   : > { %v1082_v30 = vpop.f32.mrf.mxu2  ;;  %v1195_v31 = vpop.f32.mrf.mxu3  ;;  %1426 = vst [vmem:[%s2028_s22 + $0x6a8] sm:$0xff] %v969_v38 }
 0x27f   : > { %1427 = vst [vmem:[%s2028_s22 + $0x6b0] sm:$0xff] %v1082_v30 }
 0x280   : > { %1428 = vst [vmem:[%s2028_s22 + $0x6b8] sm:$0xff] %v1195_v31 }
 0x284   : > { %v859_v12 = vpop.f32.mrf.mxu0  ;;  %v972_v60 = vpop.f32.mrf.mxu1 }
 0x285   : > { %1433 = vst [vmem:[%s2028_s22 + $0x6e0] sm:$0xff] %v859_v12 }
 0x286   : > { %v1085_v41 = vpop.f32.mrf.mxu2  ;;  %v1198_v33 = vpop.f32.mrf.mxu3  ;;  %1434 = vst [vmem:[%s2028_s22 + $0x6e8] sm:$0xff] %v972_v60 }
 0x287   : > { %1435 = vst [vmem:[%s2028_s22 + $0x6f0] sm:$0xff] %v1085_v41 }
 0x288   : > { %1436 = vst [vmem:[%s2028_s22 + $0x6f8] sm:$0xff] %v1198_v33 }
 0x28c   : > { %v862_v24 = vpop.f32.mrf.mxu0  ;;  %v975_v34 = vpop.f32.mrf.mxu1 }
 0x28d   : > { %1441 = vst [vmem:[%s2028_s22 + $0x720] sm:$0xff] %v862_v24 }
 0x28e   : > { %v1088_v39 = vpop.f32.mrf.mxu2  ;;  %v1201_v44 = vpop.f32.mrf.mxu3  ;;  %1442 = vst [vmem:[%s2028_s22 + $0x728] sm:$0xff] %v975_v34 }
 0x28f   : > { %1443 = vst [vmem:[%s2028_s22 + $0x730] sm:$0xff] %v1088_v39 }
 0x290   : > { %1444 = vst [vmem:[%s2028_s22 + $0x738] sm:$0xff] %v1201_v44 }
 0x294   : > { %v865_v36 = vpop.f32.mrf.mxu0  ;;  %v978_v9 = vpop.f32.mrf.mxu1 }
 0x295   : > { %1449 = vst [vmem:[%s2028_s22 + $0x760] sm:$0xff] %v865_v36 }
 0x296   : > { %v1091_v40 = vpop.f32.mrf.mxu2  ;;  %v1204_v42 = vpop.f32.mrf.mxu3  ;;  %1450 = vst [vmem:[%s2028_s22 + $0x768] sm:$0xff] %v978_v9 }
 0x297   : > { %1451 = vst [vmem:[%s2028_s22 + $0x770] sm:$0xff] %v1091_v40 }
 0x298   : > { %1452 = vst [vmem:[%s2028_s22 + $0x778] sm:$0xff] %v1204_v42 }
 0x29c   : > { %v868_v49 = vpop.f32.mrf.mxu0  ;;  %v981_v47 = vpop.f32.mrf.mxu1 }
 0x29d   : > { %1457 = vst [vmem:[%s2028_s22 + $0x7a0] sm:$0xff] %v868_v49 }
 0x29e   : > { %v1094_v43 = vpop.f32.mrf.mxu2  ;;  %v1207_v14 = vpop.f32.mrf.mxu3  ;;  %1458 = vst [vmem:[%s2028_s22 + $0x7a8] sm:$0xff] %v981_v47 }
 0x29f   : > { %1459 = vst [vmem:[%s2028_s22 + $0x7b0] sm:$0xff] %v1094_v43 }
 0x2a0   : > { %1460 = vst [vmem:[%s2028_s22 + $0x7b8] sm:$0xff] %v1207_v14 }
 0x2a4   : > { %v871_v57 = vpop.f32.mrf.mxu0  ;;  %v984_v45 = vpop.f32.mrf.mxu1 }
 0x2a5   : > { %1465 = vst [vmem:[%s2028_s22 + $0x7e0] sm:$0xff] %v871_v57 }
 0x2a6   : > { %v1097_v50 = vpop.f32.mrf.mxu2  ;;  %v1210_v46 = vpop.f32.mrf.mxu3  ;;  %1466 = vst [vmem:[%s2028_s22 + $0x7e8] sm:$0xff] %v984_v45 }
 0x2a7   : > { %1467 = vst [vmem:[%s2028_s22 + $0x7f0] sm:$0xff] %v1097_v50 }
 0x2a8   : > { %1468 = vst [vmem:[%s2028_s22 + $0x7f8] sm:$0xff] %v1210_v46 }
 0x2a9 PF: > { %s12_s9 = sadd.s32 1, %s1554_s9  }
 0x2aa   : > { %p9_p4 = scmp.ge.s32.totalorder %s12_s9, 6  }
 0x2ac   :  { %11 = sbr.rel (!%p9_p4) target bundleno = 1 (0x1), region = 58 }

// kernel: generator_forward.8
= control target key start
LH: loop header
LB: loop body
LE: loop exit
PB: predicated region body
PF: predicated region fallthrough
CT: control target
= control target key end

     0   :  { %s1239_s18 = smov 0   ;;  %s1754_s0 = inlined_call_operand.vmem [shape: f32[4096,64], index: 0, kind: input, shape index: {}]   ;;  %s1755_s1 = inlined_call_operand.vmem [shape: f32[1,64], index: 1, kind: input, shape index: {}]   ;;  %s1756_s2 = inlined_call_operand.vmem [shape: f32[1,64], index: 2, kind: input, shape index: {}]   ;;  %s1757_s3 = inlined_call_operand.vmem [shape: f32[1,64], index: 3, kind: input, shape index: {}]   ;;  %s1758_s4 = inlined_call_operand.vmem [shape: f32[64,16], index: 4, kind: input, shape index: {}]   ;;  %s1759_s5 = inlined_call_operand.vmem [shape: f32[4096,16], index: 5, kind: output, shape index: {}]  }
   0x1 LB: > { %s1091_s19 = sadd.s32 4294967295, %s1207_s18   ;;  %p1095_p0 = scmp.ge.s32.totalorder %s1207_s18, 1  ;;  %s1207_s18 = sphi %s1239_s18, %s15_s18  }
   0x2   : > { %p188_p1 = scmp.lt.s32.totalorder %s1207_s18, 9 }
   0x4   : > { %p189_p2 = pnand %p1095_p0, %p188_p1 }
   0x5   : > { %s1096_s24 = sshll.u32 (!%p189_p2), %s1091_s19, 6 }
   0x6   : > { %192 = sbr.rel (%p189_p2) target bundleno = 281 (0x119), region = 40  ;;  %p217_p3 = scmp.lt.s32.totalorder (!%p189_p2), %s1096_s24, 511 }
   0xb   : > { %v567_v0 = vld [vmem:[%s1758_s4 + $0x38] sm:$0xff]  ;;  %v566_v1 = vld [vmem:[%s1758_s4 + $0x30] sm:$0xff]  ;;  %v565_v2 = vld [vmem:[%s1758_s4 + $0x28] sm:$0xff]  ;;  %s1761_s24 = smov (!%p217_p3, %s1096_s24), 511  ;;  %vm568_vm0 = vcmask 523264   ;;  %vm970_vm1 = vcmask 130048  }
   0xc   : > { %1167 = vmatpush.msra.mxu2 %v567_v0  ;;  %1168 = vmatpush.msra.mxu3 %v567_v0  ;;  %v564_v3 = vld [vmem:[%s1758_s4 + $0x20] sm:$0xff]  ;;  %v563_v5 = vld [vmem:[%s1758_s4 + $0x18] sm:$0xff]  ;;  %s1097_s8 = sshll.u32 %s1761_s24, 3  ;;  %v562_v6 = vld [vmem:[%s1758_s4 + $0x10] sm:$0xff] }
   0xd   : > { %769 = vmatpush.msra.mxu0 %v567_v0  ;;  %1166 = vmatpush.msra.mxu1 %v567_v0  ;;  %v1264_v4 = vld [vmem:[%s1755_s1] ss:$0 sm:$0xff]  ;;  %s1278_s13 = scalar_lea.vmem %s1754_s0, %s1097_s8  ;;  %v561_v21 = vld [vmem:[%s1758_s4 + $0x8] sm:$0xff]  ;;  %s1621_s26 = scalar_lea.vmem %s1759_s5, %s1097_s8 }
   0xe   : > { %1170 = vmatpush.msra.mxu2 %v566_v1  ;;  %1171 = vmatpush.msra.mxu3 %v566_v1  ;;  %v1283_v7 = vld [vmem:[%s1756_s2] ss:$0 sm:$0xff]  ;;  %v261_v16 = vld [vmem:[%s1278_s13 + $0x108] sm:$0xff]  ;;  %v262_v35 = vld [vmem:[%s1278_s13 + $0x110] sm:$0xff] }
   0xf   : > { %770 = vmatpush.msra.mxu0 %v566_v1  ;;  %1169 = vmatpush.msra.mxu1 %v566_v1  ;;  %v1288_v8 = vld [vmem:[%s1757_s3] ss:$0 sm:$0xff]  ;;  %v277_v17 = vld [vmem:[%s1278_s13 + $0x188] sm:$0xff]  ;;  %v329_v19 = vadd.f32 %v1264_v4, %v261_v16  ;;  %v278_v36 = vld [vmem:[%s1278_s13 + $0x190] sm:$0xff]  ;;  %v330_v48 = vadd.f32 %v1264_v4, %v262_v35 }
  0x10   : > { %1173 = vmatpush.msra.mxu2 %v565_v2  ;;  %1174 = vmatpush.msra.mxu3 %v565_v2  ;;  %v260_v9 = vld [vmem:[%s1278_s13 + $0x100] sm:$0xff]  ;;  %v345_v20 = vadd.f32 %v1264_v4, %v277_v17  ;;  %v229_v28 = vld [vmem:[%s1278_s13 + $0x8] sm:$0xff]  ;;  %v230_v41 = vld [vmem:[%s1278_s13 + $0x10] sm:$0xff]  ;;  %v346_v49 = vadd.f32 %v1264_v4, %v278_v36 }
  0x11   : > { %771 = vmatpush.msra.mxu0 %v565_v2  ;;  %1172 = vmatpush.msra.mxu1 %v565_v2  ;;  %v276_v10 = vld [vmem:[%s1278_s13 + $0x180] sm:$0xff]  ;;  %v328_v12 = vadd.f32 %v1264_v4, %v260_v9  ;;  %v397_v26 = vmul.f32 %v1283_v7, %v329_v19  ;;  %v245_v33 = vld [vmem:[%s1278_s13 + $0x88] sm:$0xff]  ;;  %v297_v40 = vadd.f32 %v1264_v4, %v229_v28  ;;  %v246_v46 = vld [vmem:[%s1278_s13 + $0x90] sm:$0xff] }
  0x12   : > { %1176 = vmatpush.msra.mxu2 %v564_v3  ;;  %1177 = vmatpush.msra.mxu3 %v564_v3  ;;  %v228_v11 = vld [vmem:[%s1278_s13] sm:$0xff]  ;;  %v344_v13 = vadd.f32 %v1264_v4, %v276_v10  ;;  %v413_v27 = vmul.f32 %v1283_v7, %v345_v20  ;;  %v313_v45 = vadd.f32 %v1264_v4, %v245_v33  ;;  %v263_v59 = vld [vmem:[%s1278_s13 + $0x118] sm:$0xff] }
  0x13   : > { %772 = vmatpush.msra.mxu0 %v564_v3  ;;  %1175 = vmatpush.msra.mxu1 %v564_v3  ;;  %v296_v14 = vadd.f32 %v1264_v4, %v228_v11  ;;  %v244_v15 = vld [vmem:[%s1278_s13 + $0x80] sm:$0xff]  ;;  %v396_v22 = vmul.f32 %v1283_v7, %v328_v12  ;;  %v465_v43 = vadd.f32 %v1288_v8, %v397_v26  ;;  %v279_v61 = vld [vmem:[%s1278_s13 + $0x198] sm:$0xff] }
  0x14   : > { %1179 = vmatpush.msra.mxu2 %v563_v5  ;;  %1180 = vmatpush.msra.mxu3 %v563_v5  ;;  %v312_v18 = vadd.f32 %v1264_v4, %v244_v15  ;;  %v412_v23 = vmul.f32 %v1283_v7, %v344_v13  ;;  %v560_v29 = vld [vmem:[%s1758_s4] sm:$0xff]  ;;  %v481_v44 = vadd.f32 %v1288_v8, %v413_v27  ;;  %v231_v2 = vld [vmem:[%s1278_s13 + $0x18] sm:$0xff] }
  0x15   : > { %773 = vmatpush.msra.mxu0 %v563_v5  ;;  %1178 = vmatpush.msra.mxu1 %v563_v5  ;;  %v364_v24 = vmul.f32 %v1283_v7, %v296_v14  ;;  %v464_v30 = vadd.f32 %v1288_v8, %v396_v22  ;;  %v365_v47 = vmul.f32 %v1283_v7, %v297_v40  ;;  %v529_v55 = vmax.f32 %v465_v43, 0.0  ;;  %v247_v3 = vld [vmem:[%s1278_s13 + $0x98] sm:$0xff]  ;;  %v280_v19 = vld [vmem:[%s1278_s13 + $0x1a0] sm:$0xff]  ;;  %v281_v40 = vld [vmem:[%s1278_s13 + $0x1a8] sm:$0xff] }
  0x16   : > { %1182 = vmatpush.msra.mxu2 %v562_v6  ;;  %1183 = vmatpush.msra.mxu3 %v562_v6  ;;  %v380_v25 = vmul.f32 %v1283_v7, %v312_v18  ;;  %v480_v31 = vadd.f32 %v1288_v8, %v412_v23  ;;  %v381_v50 = vmul.f32 %v1283_v7, %v313_v45  ;;  %v545_v56 = vmax.f32 %v481_v44, 0.0  ;;  %v264_v18 = vld [vmem:[%s1278_s13 + $0x120] sm:$0xff]  ;;  %v233_v45 = vld [vmem:[%s1278_s13 + $0x28] sm:$0xff] }
  0x17   : > { %774 = vmatpush.msra.mxu0 %v562_v6  ;;  %1181 = vmatpush.msra.mxu1 %v562_v6  ;;  %v432_v32 = vadd.f32 %v1288_v8, %v364_v24  ;;  %v528_v37 = vmax.f32 %v464_v30, 0.0  ;;  %v298_v51 = vadd.f32 %v1264_v4, %v230_v41  ;;  %v433_v52 = vadd.f32 %v1288_v8, %v365_v47  ;;  %v232_v24 = vld [vmem:[%s1278_s13 + $0x20] sm:$0xff] }
  0x18   : > { %1185 = vmatpush.msra.mxu2 %v561_v21  ;;  %1186 = vmatpush.msra.mxu3 %v561_v21  ;;  %v448_v34 = vadd.f32 %v1288_v8, %v380_v25  ;;  %v544_v38 = vmax.f32 %v480_v31, 0.0  ;;  %v314_v53 = vadd.f32 %v1264_v4, %v246_v46  ;;  %v449_v54 = vadd.f32 %v1288_v8, %v381_v50  ;;  %v248_v26 = vld [vmem:[%s1278_s13 + $0xa0] sm:$0xff]  ;;  %v249_v46 = vld [vmem:[%s1278_s13 + $0xa8] sm:$0xff] }
  0x19   : > { %775 = vmatpush.msra.mxu0 %v561_v21  ;;  %1184 = vmatpush.msra.mxu1 %v561_v21  ;;  %v496_v39 = vmax.f32 %v432_v32, 0.0  ;;  %v398_v57 = vmul.f32 %v1283_v7, %v330_v48  ;;  %v414_v58 = vmul.f32 %v1283_v7, %v346_v49  ;;  %v366_v60 = vmul.f32 %v1283_v7, %v298_v51 }
  0x1a   : > { %1188 = vmatpush.msra.mxu2 %v560_v29  ;;  %1189 = vmatpush.msra.mxu3 %v560_v29  ;;  %v512_v42 = vmax.f32 %v448_v34, 0.0  ;;  %v497_v62 = vmax.f32 %v433_v52, 0.0  ;;  %v513_v63 = vmax.f32 %v449_v54, 0.0  ;;  %v382_v0 = vmul.f32 %v1283_v7, %v314_v53 }
  0x1b   : > { %1132 = vmatmul.msk.f32.vlgmr.msra.gmra.mxu2 %vm568_vm0, %v528_v37  ;;  %1148 = vmatmul.msk.f32.vlgmr.msra.gmra.mxu3 %vm568_vm0, %v544_v38  ;;  %v331_v1 = vadd.f32 %v1264_v4, %v263_v59  ;;  %v466_v5 = vadd.f32 %v1288_v8, %v398_v57  ;;  %v482_v6 = vadd.f32 %v1288_v8, %v414_v58  ;;  %v265_v38 = vld [vmem:[%s1278_s13 + $0x128] sm:$0xff]  ;;  %v266_v58 = vld [vmem:[%s1278_s13 + $0x130] sm:$0xff] }
  0x1c   : > { %776 = vmatpush.msra.mxu0 %v560_v29  ;;  %1187 = vmatpush.msra.mxu1 %v560_v29  ;;  %v347_v9 = vadd.f32 %v1264_v4, %v279_v61  ;;  %v434_v10 = vadd.f32 %v1288_v8, %v366_v60  ;;  %v450_v11 = vadd.f32 %v1288_v8, %v382_v0  ;;  %v282_v59 = vld [vmem:[%s1278_s13 + $0x1b0] sm:$0xff] }
  0x1d   : > { %1100 = vmatmul.msk.f32.vlgmr.msra.gmra.mxu0 %vm568_vm0, %v496_v39  ;;  %1116 = vmatmul.msk.f32.vlgmr.msra.gmra.mxu1 %vm568_vm0, %v512_v42  ;;  %v299_v12 = vadd.f32 %v1264_v4, %v231_v2  ;;  %v315_v13 = vadd.f32 %v1264_v4, %v247_v3  ;;  %v399_v14 = vmul.f32 %v1283_v7, %v331_v1  ;;  %v530_v15 = vmax.f32 %v466_v5, 0.0  ;;  %v234_v0 = vld [vmem:[%s1278_s13 + $0x30] sm:$0xff] }
  0x1e   : > { %v546_v16 = vmax.f32 %v482_v6, 0.0  ;;  %v415_v17 = vmul.f32 %v1283_v7, %v347_v9  ;;  %v498_v20 = vmax.f32 %v434_v10, 0.0  ;;  %v514_v21 = vmax.f32 %v450_v11, 0.0  ;;  %v250_v2 = vld [vmem:[%s1278_s13 + $0xb0] sm:$0xff] }
  0x1f   : > { %v367_v22 = vmul.f32 %v1283_v7, %v299_v12  ;;  %v383_v23 = vmul.f32 %v1283_v7, %v315_v13  ;;  %v467_v25 = vadd.f32 %v1288_v8, %v399_v14  ;;  %v332_v28 = vadd.f32 %v1264_v4, %v264_v18 }
  0x20   : > { %v483_v27 = vadd.f32 %v1288_v8, %v415_v17  ;;  %v348_v29 = vadd.f32 %v1264_v4, %v280_v19  ;;  %v300_v30 = vadd.f32 %v1264_v4, %v232_v24  ;;  %v316_v33 = vadd.f32 %v1264_v4, %v248_v26  ;;  %v267_v17 = vld [vmem:[%s1278_s13 + $0x138] sm:$0xff] }
  0x21   : > { %v435_v31 = vadd.f32 %v1288_v8, %v367_v22  ;;  %v451_v32 = vadd.f32 %v1288_v8, %v383_v23  ;;  %v531_v34 = vmax.f32 %v467_v25, 0.0  ;;  %v400_v36 = vmul.f32 %v1283_v7, %v332_v28  ;;  %v283_v19 = vld [vmem:[%s1278_s13 + $0x1b8] sm:$0xff] }
  0x22   : > { %v547_v35 = vmax.f32 %v483_v27, 0.0  ;;  %v416_v37 = vmul.f32 %v1283_v7, %v348_v29  ;;  %v368_v39 = vmul.f32 %v1283_v7, %v300_v30  ;;  %v384_v43 = vmul.f32 %v1283_v7, %v316_v33  ;;  %v235_v24 = vld [vmem:[%s1278_s13 + $0x38] sm:$0xff] }
  0x23   : > { %1133 = vmatmul.msk.f32.gmra.mxu2 %vm568_vm0, %v529_v55  ;;  %1149 = vmatmul.msk.f32.gmra.mxu3 %vm568_vm0, %v545_v56  ;;  %v499_v41 = vmax.f32 %v435_v31, 0.0  ;;  %v515_v42 = vmax.f32 %v451_v32, 0.0  ;;  %v333_v44 = vadd.f32 %v1264_v4, %v265_v38  ;;  %v468_v47 = vadd.f32 %v1288_v8, %v400_v36  ;;  %v251_v25 = vld [vmem:[%s1278_s13 + $0xb8] sm:$0xff]  ;;  %v284_v38 = vld [vmem:[%s1278_s13 + $0x1c0] sm:$0xff] }
  0x24   : > { %v484_v48 = vadd.f32 %v1288_v8, %v416_v37  ;;  %v349_v49 = vadd.f32 %v1264_v4, %v281_v40  ;;  %v436_v50 = vadd.f32 %v1288_v8, %v368_v39  ;;  %v452_v51 = vadd.f32 %v1288_v8, %v384_v43  ;;  %v268_v37 = vld [vmem:[%s1278_s13 + $0x140] sm:$0xff] }
  0x25   : > { %1101 = vmatmul.msk.f32.gmra.mxu0 %vm568_vm0, %v497_v62  ;;  %1117 = vmatmul.msk.f32.gmra.mxu1 %vm568_vm0, %v513_v63  ;;  %v301_v52 = vadd.f32 %v1264_v4, %v233_v45  ;;  %v317_v53 = vadd.f32 %v1264_v4, %v249_v46  ;;  %v401_v54 = vmul.f32 %v1283_v7, %v333_v44  ;;  %v532_v55 = vmax.f32 %v468_v47, 0.0  ;;  %v236_v43 = vld [vmem:[%s1278_s13 + $0x40] sm:$0xff] }
  0x26   : > { %v548_v56 = vmax.f32 %v484_v48, 0.0  ;;  %v417_v57 = vmul.f32 %v1283_v7, %v349_v49  ;;  %v500_v60 = vmax.f32 %v436_v50, 0.0  ;;  %v516_v61 = vmax.f32 %v452_v51, 0.0  ;;  %v252_v45 = vld [vmem:[%s1278_s13 + $0xc0] sm:$0xff] }
  0x27   : > { %v369_v62 = vmul.f32 %v1283_v7, %v301_v52  ;;  %v385_v63 = vmul.f32 %v1283_v7, %v317_v53  ;;  %v469_v1 = vadd.f32 %v1288_v8, %v401_v54  ;;  %v334_v5 = vadd.f32 %v1264_v4, %v266_v58  ;;  %v269_v58 = vld [vmem:[%s1278_s13 + $0x148] sm:$0xff] }
  0x28   : > { %v485_v3 = vadd.f32 %v1288_v8, %v417_v57  ;;  %v350_v6 = vadd.f32 %v1264_v4, %v282_v59  ;;  %v302_v9 = vadd.f32 %v1264_v4, %v234_v0  ;;  %v318_v12 = vadd.f32 %v1264_v4, %v250_v2  ;;  %v285_v59 = vld [vmem:[%s1278_s13 + $0x1c8] sm:$0xff] }
  0x29   : > { %v437_v10 = vadd.f32 %v1288_v8, %v369_v62  ;;  %v453_v11 = vadd.f32 %v1288_v8, %v385_v63  ;;  %v533_v13 = vmax.f32 %v469_v1, 0.0  ;;  %v335_v23 = vadd.f32 %v1264_v4, %v267_v17  ;;  %v237_v0 = vld [vmem:[%s1278_s13 + $0x48] sm:$0xff]  ;;  %v286_v17 = vld [vmem:[%s1278_s13 + $0x1d0] sm:$0xff] }
  0x2a   : > { %v549_v14 = vmax.f32 %v485_v3, 0.0  ;;  %v370_v18 = vmul.f32 %v1283_v7, %v302_v9  ;;  %v386_v22 = vmul.f32 %v1283_v7, %v318_v12  ;;  %v351_v28 = vadd.f32 %v1264_v4, %v283_v19  ;;  %v253_v1 = vld [vmem:[%s1278_s13 + $0xc8] sm:$0xff] }
  0x2b   : > { %1134 = vmatmul.msk.f32.gmra.mxu2 %vm568_vm0, %v530_v15  ;;  %1150 = vmatmul.msk.f32.gmra.mxu3 %vm568_vm0, %v546_v16  ;;  %v402_v15 = vmul.f32 %v1283_v7, %v334_v5  ;;  %v418_v16 = vmul.f32 %v1283_v7, %v350_v6  ;;  %v303_v31 = vadd.f32 %v1264_v4, %v235_v24  ;;  %v254_v24 = vld [vmem:[%s1278_s13 + $0xd0] sm:$0xff] }
  0x2c   : > { %v438_v29 = vadd.f32 %v1288_v8, %v370_v18  ;;  %v454_v30 = vadd.f32 %v1288_v8, %v386_v22  ;;  %v319_v32 = vadd.f32 %v1264_v4, %v251_v25  ;;  %v419_v36 = vmul.f32 %v1283_v7, %v351_v28  ;;  %v238_v22 = vld [vmem:[%s1278_s13 + $0x50] sm:$0xff] }
  0x2d   : > { %1102 = vmatmul.msk.f32.gmra.mxu0 %vm568_vm0, %v498_v20  ;;  %1118 = vmatmul.msk.f32.gmra.mxu1 %vm568_vm0, %v514_v21  ;;  %v501_v20 = vmax.f32 %v437_v10, 0.0  ;;  %v517_v21 = vmax.f32 %v453_v11, 0.0  ;;  %v470_v26 = vadd.f32 %v1288_v8, %v402_v15  ;;  %v486_v27 = vadd.f32 %v1288_v8, %v418_v16  ;;  %v270_v16 = vld [vmem:[%s1278_s13 + $0x150] sm:$0xff] }
  0x2e   : > { %v502_v39 = vmax.f32 %v438_v29, 0.0  ;;  %v518_v40 = vmax.f32 %v454_v30, 0.0  ;;  %v336_v44 = vadd.f32 %v1264_v4, %v268_v37  ;;  %v487_v47 = vadd.f32 %v1288_v8, %v419_v36  ;;  %v271_v37 = vld [vmem:[%s1278_s13 + $0x158] sm:$0xff] }
  0x2f   : > { %v534_v33 = vmax.f32 %v470_v26, 0.0  ;;  %v352_v48 = vadd.f32 %v1264_v4, %v284_v38  ;;  %v304_v49 = vadd.f32 %v1264_v4, %v236_v43  ;;  %v320_v52 = vadd.f32 %v1264_v4, %v252_v45  ;;  %v287_v38 = vld [vmem:[%s1278_s13 + $0x1d8] sm:$0xff] }
  0x30   : > { %v404_v53 = vmul.f32 %v1283_v7, %v336_v44  ;;  %v337_v3 = vadd.f32 %v1264_v4, %v269_v58  ;;  %v353_v5 = vadd.f32 %v1264_v4, %v285_v59  ;;  %v305_v10 = vadd.f32 %v1264_v4, %v237_v0  ;;  %v239_v43 = vld [vmem:[%s1278_s13 + $0x58] sm:$0xff]  ;;  %v256_v0 = vld [vmem:[%s1278_s13 + $0xe0] sm:$0xff] }
  0x31   : > { %v372_v57 = vmul.f32 %v1283_v7, %v304_v49  ;;  %v388_v62 = vmul.f32 %v1283_v7, %v320_v52  ;;  %v321_v11 = vadd.f32 %v1264_v4, %v253_v1  ;;  %v306_v28 = vadd.f32 %v1264_v4, %v238_v22  ;;  %v255_v44 = vld [vmem:[%s1278_s13 + $0xd8] sm:$0xff]  ;;  %v241_v22 = vld [vmem:[%s1278_s13 + $0x68] sm:$0xff] }
  0x32   : > { %v472_v63 = vadd.f32 %v1288_v8, %v404_v53  ;;  %v421_v15 = vmul.f32 %v1283_v7, %v353_v5 }
  0x33   : > { %1135 = vmatmul.msk.f32.gmra.mxu2 %vm568_vm0, %v531_v34  ;;  %1151 = vmatmul.msk.f32.gmra.mxu3 %vm568_vm0, %v547_v35  ;;  %v550_v34 = vmax.f32 %v486_v27, 0.0  ;;  %v403_v35 = vmul.f32 %v1283_v7, %v335_v23  ;;  %v440_v6 = vadd.f32 %v1288_v8, %v372_v57  ;;  %v456_v9 = vadd.f32 %v1288_v8, %v388_v62  ;;  %v288_v57 = vld [vmem:[%s1278_s13 + $0x1e0] sm:$0xff] }
  0x34   : > { %v536_v12 = vmax.f32 %v472_v63, 0.0  ;;  %v338_v23 = vadd.f32 %v1264_v4, %v270_v16  ;;  %v489_v26 = vadd.f32 %v1288_v8, %v421_v15  ;;  %v354_v27 = vadd.f32 %v1264_v4, %v286_v17  ;;  %v240_v62 = vld [vmem:[%s1278_s13 + $0x60] sm:$0xff]  ;;  %v273_v16 = vld [vmem:[%s1278_s13 + $0x168] sm:$0xff] }
  0x35   : > { %1103 = vmatmul.msk.f32.gmra.mxu0 %vm568_vm0, %v499_v41  ;;  %1119 = vmatmul.msk.f32.gmra.mxu1 %vm568_vm0, %v515_v42  ;;  %v371_v41 = vmul.f32 %v1283_v7, %v303_v31  ;;  %v387_v42 = vmul.f32 %v1283_v7, %v319_v32  ;;  %v471_v46 = vadd.f32 %v1288_v8, %v403_v35  ;;  %v504_v18 = vmax.f32 %v440_v6, 0.0  ;;  %v289_v17 = vld [vmem:[%s1278_s13 + $0x1e8] sm:$0xff] }
  0x36   : > { %v520_v19 = vmax.f32 %v456_v9, 0.0  ;;  %v322_v31 = vadd.f32 %v1264_v4, %v254_v24  ;;  %v406_v32 = vmul.f32 %v1283_v7, %v338_v23  ;;  %v422_v35 = vmul.f32 %v1283_v7, %v354_v27  ;;  %v257_v23 = vld [vmem:[%s1278_s13 + $0xe8] sm:$0xff] }
  0x37   : > { %v439_v50 = vadd.f32 %v1288_v8, %v371_v41  ;;  %v455_v51 = vadd.f32 %v1288_v8, %v387_v42  ;;  %v535_v54 = vmax.f32 %v471_v46, 0.0  ;;  %v374_v36 = vmul.f32 %v1283_v7, %v306_v28 }
  0x38   : > { %v390_v41 = vmul.f32 %v1283_v7, %v322_v31  ;;  %v474_v42 = vadd.f32 %v1288_v8, %v406_v32  ;;  %v490_v45 = vadd.f32 %v1288_v8, %v422_v35  ;;  %v339_v46 = vadd.f32 %v1264_v4, %v271_v37  ;;  %v274_v35 = vld [vmem:[%s1278_s13 + $0x170] sm:$0xff] }
  0x39   : > { %v308_v5 = vadd.f32 %v1264_v4, %v240_v62  ;;  %v243_v62 = vld [vmem:[%s1278_s13 + $0x78] sm:$0xff] }
  0x3a   : > { %v458_v49 = vadd.f32 %v1288_v8, %v390_v41  ;;  %v538_v52 = vmax.f32 %v474_v42, 0.0  ;;  %v554_v53 = vmax.f32 %v490_v45, 0.0  ;;  %v242_v41 = vld [vmem:[%s1278_s13 + $0x70] sm:$0xff]  ;;  %v342_v42 = vadd.f32 %v1264_v4, %v274_v35 }
  0x3b   : > { %1136 = vmatmul.msk.f32.gmra.mxu2 %vm568_vm0, %v532_v55  ;;  %1152 = vmatmul.msk.f32.gmra.mxu3 %vm568_vm0, %v548_v56  ;;  %v551_v55 = vmax.f32 %v487_v47, 0.0  ;;  %v420_v56 = vmul.f32 %v1283_v7, %v352_v48  ;;  %v355_v47 = vadd.f32 %v1264_v4, %v287_v38  ;;  %v442_v48 = vadd.f32 %v1288_v8, %v374_v36  ;;  %v290_v36 = vld [vmem:[%s1278_s13 + $0x1f0] sm:$0xff] }
  0x3c   : > { %v522_v59 = vmax.f32 %v458_v49, 0.0  ;;  %v376_v15 = vmul.f32 %v1283_v7, %v308_v5 }
  0x3d   : > { %1104 = vmatmul.msk.f32.gmra.mxu0 %vm568_vm0, %v500_v60  ;;  %1120 = vmatmul.msk.f32.gmra.mxu1 %vm568_vm0, %v516_v61  ;;  %v503_v60 = vmax.f32 %v439_v50, 0.0  ;;  %v519_v61 = vmax.f32 %v455_v51, 0.0  ;;  %v488_v2 = vadd.f32 %v1288_v8, %v420_v56  ;;  %v307_v50 = vadd.f32 %v1264_v4, %v239_v43  ;;  %v272_v56 = vld [vmem:[%s1278_s13 + $0x160] sm:$0xff]  ;;  %v258_v43 = vld [vmem:[%s1278_s13 + $0xf0] sm:$0xff] }
  0x3e   : > { %v323_v51 = vadd.f32 %v1264_v4, %v255_v44  ;;  %v506_v58 = vmax.f32 %v442_v48, 0.0  ;;  %v340_v63 = vadd.f32 %v1264_v4, %v272_v56  ;;  %v444_v27 = vadd.f32 %v1288_v8, %v376_v15  ;;  %v275_v56 = vld [vmem:[%s1278_s13 + $0x178] sm:$0xff] }
  0x40   : > { %v508_v37 = vmax.f32 %v444_v27, 0.0 }
  0x43   : > { %1137 = vmatmul.msk.f32.gmra.mxu2 %vm568_vm0, %v533_v13  ;;  %1153 = vmatmul.msk.f32.gmra.mxu3 %vm568_vm0, %v549_v14  ;;  %v552_v13 = vmax.f32 %v488_v2, 0.0  ;;  %v405_v14 = vmul.f32 %v1283_v7, %v337_v3  ;;  %v356_v3 = vadd.f32 %v1264_v4, %v288_v57  ;;  %v291_v57 = vld [vmem:[%s1278_s13 + $0x1f8] sm:$0xff] }
  0x45   : > { %1105 = vmatmul.msk.f32.gmra.mxu0 %vm568_vm0, %v501_v20  ;;  %1121 = vmatmul.msk.f32.gmra.mxu1 %vm568_vm0, %v517_v21  ;;  %v373_v20 = vmul.f32 %v1283_v7, %v305_v10  ;;  %v389_v21 = vmul.f32 %v1283_v7, %v321_v11  ;;  %v473_v25 = vadd.f32 %v1288_v8, %v405_v14 }
  0x46   : > { %v324_v10 = vadd.f32 %v1264_v4, %v256_v0  ;;  %v408_v11 = vmul.f32 %v1283_v7, %v340_v63  ;;  %v424_v14 = vmul.f32 %v1283_v7, %v356_v3  ;;  %v259_v63 = vld [vmem:[%s1278_s13 + $0xf8] sm:$0xff] }
  0x47   : > { %v441_v29 = vadd.f32 %v1288_v8, %v373_v20  ;;  %v457_v30 = vadd.f32 %v1288_v8, %v389_v21 }
  0x48   : > { %v392_v20 = vmul.f32 %v1283_v7, %v324_v10  ;;  %v476_v21 = vadd.f32 %v1288_v8, %v408_v11  ;;  %v492_v24 = vadd.f32 %v1288_v8, %v424_v14 }
  0x4a   : > { %v460_v28 = vadd.f32 %v1288_v8, %v392_v20  ;;  %v540_v31 = vmax.f32 %v476_v21, 0.0  ;;  %v556_v32 = vmax.f32 %v492_v24, 0.0 }
  0x4b   : > { %1138 = vmatmul.msk.f32.gmra.mxu2 %vm568_vm0, %v534_v33  ;;  %1154 = vmatmul.msk.f32.gmra.mxu3 %vm568_vm0, %v550_v34  ;;  %v537_v33 = vmax.f32 %v473_v25, 0.0  ;;  %v553_v34 = vmax.f32 %v489_v26, 0.0  ;;  %v341_v25 = vadd.f32 %v1264_v4, %v273_v16  ;;  %v357_v26 = vadd.f32 %v1264_v4, %v289_v17 }
  0x4c   : > { %v524_v38 = vmax.f32 %v460_v28, 0.0 }
  0x4d   : > { %1106 = vmatmul.msk.f32.gmra.mxu0 %vm568_vm0, %v502_v39  ;;  %1122 = vmatmul.msk.f32.gmra.mxu1 %vm568_vm0, %v518_v40  ;;  %v505_v39 = vmax.f32 %v441_v29, 0.0  ;;  %v521_v40 = vmax.f32 %v457_v30, 0.0  ;;  %v309_v29 = vadd.f32 %v1264_v4, %v241_v22  ;;  %v325_v30 = vadd.f32 %v1264_v4, %v257_v23 }
  0x53   : > { %1139 = vmatmul.msk.f32.gmra.mxu2 %vm568_vm0, %v535_v54  ;;  %1155 = vmatmul.msk.f32.gmra.mxu3 %vm568_vm0, %v551_v55  ;;  %v407_v54 = vmul.f32 %v1283_v7, %v339_v46  ;;  %v423_v55 = vmul.f32 %v1283_v7, %v355_v47  ;;  %v358_v46 = vadd.f32 %v1264_v4, %v290_v36 }
  0x54   : > { %v310_v47 = vadd.f32 %v1264_v4, %v242_v41 }
  0x55   : > { %1107 = vmatmul.msk.f32.gmra.mxu0 %vm568_vm0, %v503_v60  ;;  %1123 = vmatmul.msk.f32.gmra.mxu1 %vm568_vm0, %v519_v61  ;;  %v375_v60 = vmul.f32 %v1283_v7, %v307_v50  ;;  %v391_v61 = vmul.f32 %v1283_v7, %v323_v51  ;;  %v475_v1 = vadd.f32 %v1288_v8, %v407_v54 }
  0x56   : > { %v491_v2 = vadd.f32 %v1288_v8, %v423_v55  ;;  %v326_v50 = vadd.f32 %v1264_v4, %v258_v43  ;;  %v410_v51 = vmul.f32 %v1283_v7, %v342_v42  ;;  %v426_v54 = vmul.f32 %v1283_v7, %v358_v46 }
  0x57   : > { %v443_v6 = vadd.f32 %v1288_v8, %v375_v60  ;;  %v459_v9 = vadd.f32 %v1288_v8, %v391_v61  ;;  %v378_v55 = vmul.f32 %v1283_v7, %v310_v47 }
  0x58   : > { %v394_v60 = vmul.f32 %v1283_v7, %v326_v50  ;;  %v478_v61 = vadd.f32 %v1288_v8, %v410_v51  ;;  %v494_v0 = vadd.f32 %v1288_v8, %v426_v54 }
  0x59   : > { %v446_v3 = vadd.f32 %v1288_v8, %v378_v55 }
  0x5a   : > { %v462_v5 = vadd.f32 %v1288_v8, %v394_v60  ;;  %v542_v10 = vmax.f32 %v478_v61, 0.0  ;;  %v558_v11 = vmax.f32 %v494_v0, 0.0 }
  0x5b   : > { %1140 = vmatmul.msk.f32.gmra.mxu2 %vm568_vm0, %v536_v12  ;;  %1156 = vmatmul.msk.f32.gmra.mxu3 %vm568_vm0, %v552_v13  ;;  %v539_v12 = vmax.f32 %v475_v1, 0.0  ;;  %v555_v13 = vmax.f32 %v491_v2, 0.0  ;;  %v343_v1 = vadd.f32 %v1264_v4, %v275_v56  ;;  %v359_v2 = vadd.f32 %v1264_v4, %v291_v57 }
  0x5c   : > { %v510_v14 = vmax.f32 %v446_v3, 0.0  ;;  %v526_v15 = vmax.f32 %v462_v5, 0.0 }
  0x5d   : > { %1108 = vmatmul.msk.f32.gmra.mxu0 %vm568_vm0, %v504_v18  ;;  %1124 = vmatmul.msk.f32.gmra.mxu1 %vm568_vm0, %v520_v19  ;;  %v507_v18 = vmax.f32 %v443_v6, 0.0  ;;  %v523_v19 = vmax.f32 %v459_v9, 0.0  ;;  %v311_v6 = vadd.f32 %v1264_v4, %v243_v62  ;;  %v327_v9 = vadd.f32 %v1264_v4, %v259_v63 }
  0x5f   : > { %v379_v16 = vmul.f32 %v1283_v7, %v311_v6  ;;  %v395_v17 = vmul.f32 %v1283_v7, %v327_v9 }
  0x61   : > { %v463_v20 = vadd.f32 %v1288_v8, %v395_v17 }
  0x63   : > { %1141 = vmatmul.msk.f32.gmra.mxu2 %vm568_vm0, %v537_v33  ;;  %1157 = vmatmul.msk.f32.gmra.mxu3 %vm568_vm0, %v553_v34  ;;  %v409_v33 = vmul.f32 %v1283_v7, %v341_v25  ;;  %v425_v34 = vmul.f32 %v1283_v7, %v357_v26  ;;  %v527_v23 = vmax.f32 %v463_v20, 0.0 }
  0x65   : > { %1109 = vmatmul.msk.f32.gmra.mxu0 %vm568_vm0, %v505_v39  ;;  %1125 = vmatmul.msk.f32.gmra.mxu1 %vm568_vm0, %v521_v40  ;;  %v377_v39 = vmul.f32 %v1283_v7, %v309_v29  ;;  %v393_v40 = vmul.f32 %v1283_v7, %v325_v30  ;;  %v477_v44 = vadd.f32 %v1288_v8, %v409_v33 }
  0x66   : > { %v493_v45 = vadd.f32 %v1288_v8, %v425_v34 }
  0x67   : > { %v445_v48 = vadd.f32 %v1288_v8, %v377_v39  ;;  %v461_v49 = vadd.f32 %v1288_v8, %v393_v40 }
  0x6b   : > { %1142 = vmatmul.msk.f32.gmra.mxu2 %vm568_vm0, %v538_v52  ;;  %1158 = vmatmul.msk.f32.gmra.mxu3 %vm568_vm0, %v554_v53  ;;  %v541_v52 = vmax.f32 %v477_v44, 0.0  ;;  %v557_v53 = vmax.f32 %v493_v45, 0.0 }
  0x6d   : > { %1110 = vmatmul.msk.f32.gmra.mxu0 %vm568_vm0, %v506_v58  ;;  %1126 = vmatmul.msk.f32.gmra.mxu1 %vm568_vm0, %v522_v59  ;;  %v509_v58 = vmax.f32 %v445_v48, 0.0  ;;  %v525_v59 = vmax.f32 %v461_v49, 0.0 }
  0x73   : > { %1143 = vmatmul.msk.f32.gmra.mxu2 %vm568_vm0, %v539_v12  ;;  %1159 = vmatmul.msk.f32.gmra.mxu3 %vm568_vm0, %v555_v13  ;;  %v411_v12 = vmul.f32 %v1283_v7, %v343_v1  ;;  %v427_v13 = vmul.f32 %v1283_v7, %v359_v2 }
  0x75   : > { %1111 = vmatmul.msk.f32.gmra.mxu0 %vm568_vm0, %v507_v18  ;;  %1127 = vmatmul.msk.f32.gmra.mxu1 %vm568_vm0, %v523_v19  ;;  %v479_v18 = vadd.f32 %v1288_v8, %v411_v12  ;;  %v495_v4 = vadd.f32 %v1288_v8, %v427_v13  ;;  %v447_v19 = vadd.f32 %v1288_v8, %v379_v16 }
  0x77   : > { %v543_v21 = vmax.f32 %v479_v18, 0.0  ;;  %v559_v22 = vmax.f32 %v495_v4, 0.0  ;;  %v511_v7 = vmax.f32 %v447_v19, 0.0 }
  0x7b   : > { %1144 = vmatmul.msk.f32.gmra.mxu2 %vm568_vm0, %v540_v31  ;;  %1160 = vmatmul.msk.f32.gmra.mxu3 %vm568_vm0, %v556_v32 }
  0x7d   : > { %1112 = vmatmul.msk.f32.gmra.mxu0 %vm568_vm0, %v508_v37  ;;  %1128 = vmatmul.msk.f32.gmra.mxu1 %vm568_vm0, %v524_v38 }
  0x83   : > { %1145 = vmatmul.msk.f32.gmra.mxu2 %vm568_vm0, %v541_v52  ;;  %1161 = vmatmul.msk.f32.gmra.mxu3 %vm568_vm0, %v557_v53 }
  0x85   : > { %1113 = vmatmul.msk.f32.gmra.mxu0 %vm568_vm0, %v509_v58  ;;  %1129 = vmatmul.msk.f32.gmra.mxu1 %vm568_vm0, %v525_v59 }
  0x8b   : > { %1146 = vmatmul.msk.f32.gmra.mxu2 %vm568_vm0, %v542_v10  ;;  %1162 = vmatmul.msk.f32.gmra.mxu3 %vm568_vm0, %v558_v11 }
  0x8d   : > { %1114 = vmatmul.msk.f32.gmra.mxu0 %vm568_vm0, %v510_v14  ;;  %1130 = vmatmul.msk.f32.gmra.mxu1 %vm568_vm0, %v526_v15 }
  0x93   : > { %1147 = vmatmul.msk.f32.gmra.mxu2 %vm568_vm0, %v543_v21  ;;  %1163 = vmatmul.msk.f32.gmra.mxu3 %vm568_vm0, %v559_v22 }
  0x95   : > { %1115 = vmatmul.msk.f32.gmra.mxu0 %vm568_vm0, %v511_v7  ;;  %1131 = vmatmul.msk.f32.gmra.mxu1 %vm568_vm0, %v527_v23 }
  0x9a   : > { %v778_v8 = vpop.f32.mrf.mxu0  ;;  %v826_v24 = vpop.f32.mrf.mxu1 }
  0x9b   : > { %971 = vst.msk [vmem:[%s1621_s26] sm:$0xff] %vm970_vm1, %v778_v8 }
  0x9c   : > { %987 = vst.msk [vmem:[%s1621_s26 + $0x80] sm:$0xff] %vm970_vm1, %v826_v24 }
  0x9e   : > { %v874_v25 = vpop.f32.mrf.mxu2  ;;  %v922_v26 = vpop.f32.mrf.mxu3 }
  0x9f   : > { %1003 = vst.msk [vmem:[%s1621_s26 + $0x100] sm:$0xff] %vm970_vm1, %v874_v25 }
  0xa0   : > { %1019 = vst.msk [vmem:[%s1621_s26 + $0x180] sm:$0xff] %vm970_vm1, %v922_v26 }
  0xa2   : > { %v781_v27 = vpop.f32.mrf.mxu0  ;;  %v829_v28 = vpop.f32.mrf.mxu1 }
  0xa3   : > { %972 = vst.msk [vmem:[%s1621_s26 + $0x8] sm:$0xff] %vm970_vm1, %v781_v27 }
  0xa4   : > { %988 = vst.msk [vmem:[%s1621_s26 + $0x88] sm:$0xff] %vm970_vm1, %v829_v28 }
  0xa6   : > { %v877_v29 = vpop.f32.mrf.mxu2  ;;  %v925_v30 = vpop.f32.mrf.mxu3 }
  0xa7   : > { %1004 = vst.msk [vmem:[%s1621_s26 + $0x108] sm:$0xff] %vm970_vm1, %v877_v29 }
  0xa8   : > { %1020 = vst.msk [vmem:[%s1621_s26 + $0x188] sm:$0xff] %vm970_vm1, %v925_v30 }
  0xaa   : > { %v784_v31 = vpop.f32.mrf.mxu0  ;;  %v832_v32 = vpop.f32.mrf.mxu1 }
  0xab   : > { %973 = vst.msk [vmem:[%s1621_s26 + $0x10] sm:$0xff] %vm970_vm1, %v784_v31 }
  0xac   : > { %989 = vst.msk [vmem:[%s1621_s26 + $0x90] sm:$0xff] %vm970_vm1, %v832_v32 }
  0xae   : > { %v880_v33 = vpop.f32.mrf.mxu2  ;;  %v928_v34 = vpop.f32.mrf.mxu3 }
  0xaf   : > { %1005 = vst.msk [vmem:[%s1621_s26 + $0x110] sm:$0xff] %vm970_vm1, %v880_v33 }
  0xb0   : > { %1021 = vst.msk [vmem:[%s1621_s26 + $0x190] sm:$0xff] %vm970_vm1, %v928_v34 }
  0xb2   : > { %v787_v35 = vpop.f32.mrf.mxu0  ;;  %v835_v36 = vpop.f32.mrf.mxu1 }
  0xb3   : > { %974 = vst.msk [vmem:[%s1621_s26 + $0x18] sm:$0xff] %vm970_vm1, %v787_v35 }
  0xb4   : > { %990 = vst.msk [vmem:[%s1621_s26 + $0x98] sm:$0xff] %vm970_vm1, %v835_v36 }
  0xb6   : > { %v883_v37 = vpop.f32.mrf.mxu2  ;;  %v931_v38 = vpop.f32.mrf.mxu3 }
  0xb7   : > { %1006 = vst.msk [vmem:[%s1621_s26 + $0x118] sm:$0xff] %vm970_vm1, %v883_v37 }
  0xb8   : > { %1022 = vst.msk [vmem:[%s1621_s26 + $0x198] sm:$0xff] %vm970_vm1, %v931_v38 }
  0xba   : > { %v790_v39 = vpop.f32.mrf.mxu0  ;;  %v838_v40 = vpop.f32.mrf.mxu1 }
  0xbb   : > { %975 = vst.msk [vmem:[%s1621_s26 + $0x20] sm:$0xff] %vm970_vm1, %v790_v39 }
  0xbc   : > { %991 = vst.msk [vmem:[%s1621_s26 + $0xa0] sm:$0xff] %vm970_vm1, %v838_v40 }
  0xbe   : > { %v886_v41 = vpop.f32.mrf.mxu2  ;;  %v934_v42 = vpop.f32.mrf.mxu3 }
  0xbf   : > { %1007 = vst.msk [vmem:[%s1621_s26 + $0x120] sm:$0xff] %vm970_vm1, %v886_v41 }
  0xc0   : > { %1023 = vst.msk [vmem:[%s1621_s26 + $0x1a0] sm:$0xff] %vm970_vm1, %v934_v42 }
  0xc2   : > { %v793_v43 = vpop.f32.mrf.mxu0  ;;  %v841_v44 = vpop.f32.mrf.mxu1 }
  0xc3   : > { %976 = vst.msk [vmem:[%s1621_s26 + $0x28] sm:$0xff] %vm970_vm1, %v793_v43 }
  0xc4   : > { %992 = vst.msk [vmem:[%s1621_s26 + $0xa8] sm:$0xff] %vm970_vm1, %v841_v44 }
  0xc6   : > { %v889_v45 = vpop.f32.mrf.mxu2  ;;  %v937_v46 = vpop.f32.mrf.mxu3 }
  0xc7   : > { %1008 = vst.msk [vmem:[%s1621_s26 + $0x128] sm:$0xff] %vm970_vm1, %v889_v45 }
  0xc8   : > { %1024 = vst.msk [vmem:[%s1621_s26 + $0x1a8] sm:$0xff] %vm970_vm1, %v937_v46 }
  0xca   : > { %v796_v47 = vpop.f32.mrf.mxu0  ;;  %v844_v48 = vpop.f32.mrf.mxu1 }
  0xcb   : > { %977 = vst.msk [vmem:[%s1621_s26 + $0x30] sm:$0xff] %vm970_vm1, %v796_v47 }
  0xcc   : > { %993 = vst.msk [vmem:[%s1621_s26 + $0xb0] sm:$0xff] %vm970_vm1, %v844_v48 }
  0xce   : > { %v892_v49 = vpop.f32.mrf.mxu2  ;;  %v940_v50 = vpop.f32.mrf.mxu3 }
  0xcf   : > { %1009 = vst.msk [vmem:[%s1621_s26 + $0x130] sm:$0xff] %vm970_vm1, %v892_v49 }
  0xd0   : > { %1025 = vst.msk [vmem:[%s1621_s26 + $0x1b0] sm:$0xff] %vm970_vm1, %v940_v50 }
  0xd2   : > { %v799_v51 = vpop.f32.mrf.mxu0  ;;  %v847_v52 = vpop.f32.mrf.mxu1 }
  0xd3   : > { %978 = vst.msk [vmem:[%s1621_s26 + $0x38] sm:$0xff] %vm970_vm1, %v799_v51 }
  0xd4   : > { %994 = vst.msk [vmem:[%s1621_s26 + $0xb8] sm:$0xff] %vm970_vm1, %v847_v52 }
  0xd6   : > { %v895_v53 = vpop.f32.mrf.mxu2  ;;  %v943_v54 = vpop.f32.mrf.mxu3 }
  0xd7   : > { %1010 = vst.msk [vmem:[%s1621_s26 + $0x138] sm:$0xff] %vm970_vm1, %v895_v53 }
  0xd8   : > { %1026 = vst.msk [vmem:[%s1621_s26 + $0x1b8] sm:$0xff] %vm970_vm1, %v943_v54 }
  0xda   : > { %v802_v55 = vpop.f32.mrf.mxu0  ;;  %v850_v56 = vpop.f32.mrf.mxu1 }
  0xdb   : > { %979 = vst.msk [vmem:[%s1621_s26 + $0x40] sm:$0xff] %vm970_vm1, %v802_v55 }
  0xdc   : > { %995 = vst.msk [vmem:[%s1621_s26 + $0xc0] sm:$0xff] %vm970_vm1, %v850_v56 }
  0xde   : > { %v898_v57 = vpop.f32.mrf.mxu2  ;;  %v946_v58 = vpop.f32.mrf.mxu3 }
  0xdf   : > { %1011 = vst.msk [vmem:[%s1621_s26 + $0x140] sm:$0xff] %vm970_vm1, %v898_v57 }
  0xe0   : > { %1027 = vst.msk [vmem:[%s1621_s26 + $0x1c0] sm:$0xff] %vm970_vm1, %v946_v58 }
  0xe2   : > { %v805_v59 = vpop.f32.mrf.mxu0  ;;  %v853_v60 = vpop.f32.mrf.mxu1 }
  0xe3   : > { %980 = vst.msk [vmem:[%s1621_s26 + $0x48] sm:$0xff] %vm970_vm1, %v805_v59 }
  0xe4   : > { %996 = vst.msk [vmem:[%s1621_s26 + $0xc8] sm:$0xff] %vm970_vm1, %v853_v60 }
  0xe6   : > { %v901_v61 = vpop.f32.mrf.mxu2  ;;  %v949_v62 = vpop.f32.mrf.mxu3 }
  0xe7   : > { %1012 = vst.msk [vmem:[%s1621_s26 + $0x148] sm:$0xff] %vm970_vm1, %v901_v61 }
  0xe8   : > { %1028 = vst.msk [vmem:[%s1621_s26 + $0x1c8] sm:$0xff] %vm970_vm1, %v949_v62 }
  0xea   : > { %v808_v63 = vpop.f32.mrf.mxu0  ;;  %v856_v0 = vpop.f32.mrf.mxu1 }
  0xeb   : > { %981 = vst.msk [vmem:[%s1621_s26 + $0x50] sm:$0xff] %vm970_vm1, %v808_v63 }
  0xec   : > { %997 = vst.msk [vmem:[%s1621_s26 + $0xd0] sm:$0xff] %vm970_vm1, %v856_v0 }
  0xee   : > { %v904_v1 = vpop.f32.mrf.mxu2  ;;  %v952_v2 = vpop.f32.mrf.mxu3 }
  0xef   : > { %1013 = vst.msk [vmem:[%s1621_s26 + $0x150] sm:$0xff] %vm970_vm1, %v904_v1 }
  0xf0   : > { %1029 = vst.msk [vmem:[%s1621_s26 + $0x1d0] sm:$0xff] %vm970_vm1, %v952_v2 }
  0xf2   : > { %v811_v3 = vpop.f32.mrf.mxu0  ;;  %v859_v5 = vpop.f32.mrf.mxu1 }
  0xf3   : > { %982 = vst.msk [vmem:[%s1621_s26 + $0x58] sm:$0xff] %vm970_vm1, %v811_v3 }
  0xf4   : > { %998 = vst.msk [vmem:[%s1621_s26 + $0xd8] sm:$0xff] %vm970_vm1, %v859_v5 }
  0xf6   : > { %v907_v6 = vpop.f32.mrf.mxu2  ;;  %v955_v9 = vpop.f32.mrf.mxu3 }
  0xf7   : > { %1014 = vst.msk [vmem:[%s1621_s26 + $0x158] sm:$0xff] %vm970_vm1, %v907_v6 }
  0xf8   : > { %1030 = vst.msk [vmem:[%s1621_s26 + $0x1d8] sm:$0xff] %vm970_vm1, %v955_v9 }
  0xfa   : > { %v814_v10 = vpop.f32.mrf.mxu0  ;;  %v862_v11 = vpop.f32.mrf.mxu1 }
  0xfb   : > { %983 = vst.msk [vmem:[%s1621_s26 + $0x60] sm:$0xff] %vm970_vm1, %v814_v10 }
  0xfc   : > { %999 = vst.msk [vmem:[%s1621_s26 + $0xe0] sm:$0xff] %vm970_vm1, %v862_v11 }
  0xfe   : > { %v910_v12 = vpop.f32.mrf.mxu2  ;;  %v958_v13 = vpop.f32.mrf.mxu3 }
  0xff   : > { %1015 = vst.msk [vmem:[%s1621_s26 + $0x160] sm:$0xff] %vm970_vm1, %v910_v12 }
 0x100   : > { %1031 = vst.msk [vmem:[%s1621_s26 + $0x1e0] sm:$0xff] %vm970_vm1, %v958_v13 }
 0x102   : > { %v817_v14 = vpop.f32.mrf.mxu0  ;;  %v865_v15 = vpop.f32.mrf.mxu1 }
 0x103   : > { %984 = vst.msk [vmem:[%s1621_s26 + $0x68] sm:$0xff] %vm970_vm1, %v817_v14 }
 0x104   : > { %1000 = vst.msk [vmem:[%s1621_s26 + $0xe8] sm:$0xff] %vm970_vm1, %v865_v15 }
 0x106   : > { %v913_v16 = vpop.f32.mrf.mxu2  ;;  %v961_v17 = vpop.f32.mrf.mxu3 }
 0x107   : > { %1016 = vst.msk [vmem:[%s1621_s26 + $0x168] sm:$0xff] %vm970_vm1, %v913_v16 }
 0x108   : > { %1032 = vst.msk [vmem:[%s1621_s26 + $0x1e8] sm:$0xff] %vm970_vm1, %v961_v17 }
 0x10a   : > { %v820_v18 = vpop.f32.mrf.mxu0  ;;  %v868_v4 = vpop.f32.mrf.mxu1 }
 0x10b   : > { %985 = vst.msk [vmem:[%s1621_s26 + $0x70] sm:$0xff] %vm970_vm1, %v820_v18 }
 0x10c   : > { %1001 = vst.msk [vmem:[%s1621_s26 + $0xf0] sm:$0xff] %vm970_vm1, %v868_v4 }
 0x10e   : > { %v916_v19 = vpop.f32.mrf.mxu2  ;;  %v964_v20 = vpop.f32.mrf.mxu3 }
 0x10f   : > { %1017 = vst.msk [vmem:[%s1621_s26 + $0x170] sm:$0xff] %vm970_vm1, %v916_v19 }
 0x110   : > { %1033 = vst.msk [vmem:[%s1621_s26 + $0x1f0] sm:$0xff] %vm970_vm1, %v964_v20 }
 0x112   : > { %v823_v21 = vpop.f32.mrf.mxu0  ;;  %v871_v22 = vpop.f32.mrf.mxu1 }
 0x113   : > { %986 = vst.msk [vmem:[%s1621_s26 + $0x78] sm:$0xff] %vm970_vm1, %v823_v21 }
 0x114   : > { %1002 = vst.msk [vmem:[%s1621_s26 + $0xf8] sm:$0xff] %vm970_vm1, %v871_v22 }
 0x116   : > { %v919_v7 = vpop.f32.mrf.mxu2  ;;  %v967_v23 = vpop.f32.mrf.mxu3 }
 0x117   : > { %1018 = vst.msk [vmem:[%s1621_s26 + $0x178] sm:$0xff] %vm970_vm1, %v919_v7 }
 0x118   : > { %1034 = vst.msk [vmem:[%s1621_s26 + $0x1f8] sm:$0xff] %vm970_vm1, %v967_v23 }
 0x119 PF: > { %s15_s18 = sadd.s32 1, %s1207_s18  }
 0x11a   : > { %p12_p4 = scmp.ge.s32.totalorder %s15_s18, 10  }
 0x11c   :  { %14 = sbr.rel (!%p12_p4) target bundleno = 1 (0x1), region = 70 }

// kernel: generator_forward.9
= control target key start
LH: loop header
LB: loop body
LE: loop exit
PB: predicated region body
PF: predicated region fallthrough
CT: control target
= control target key end

     0   :  { %s417_s11 = smov 0   ;;  %s484_s0 = inlined_call_operand.vmem [shape: f32[8,1,2048], index: 0, kind: input, shape index: {}]   ;;  %s485_s1 = inlined_call_operand.<no memory space> [shape: f32[1,1], index: 1, kind: input, shape index: {}]   ;;  %s486_s2 = inlined_call_operand.vmem [shape: f32[8,1,2048], index: 2, kind: output, shape index: {}]  }
   0x1   :  { %v7_v0 = vstv %s485_s1 }
   0x2   :  { %8 = vst [vmem:[#allocation2] sm:$0x1] %v7_v0 }
   0x3 LB: > { %s366_s12 = sadd.s32 4294967295, %s397_s11   ;;  %p370_p0 = scmp.ge.s32.totalorder %s397_s11, 1  ;;  %s397_s11 = sphi %s417_s11, %s14_s11  }
   0x4   : > { %p113_p1 = scmp.lt.s32.totalorder %s397_s11, 9 }
   0x6   : > { %p114_p2 = pnand %p370_p0, %p113_p1 }
   0x7   : > { %p133_p3 = scmp.lt.s32.totalorder (!%p114_p2), %s366_s12, 7 }
   0x8   : > { %117 = sbr.rel (%p114_p2) target bundleno = 384 (0x180), region = 28 }
   0xd   : > { %v143_v1 = vld [vmem:[#allocation2] sm:$0x1]  ;;  %s488_s12 = smov (!%p133_p3, %s366_s12), 7  ;;  %vm182_vm0 = vcmask 1040384  }
   0xe   : > { %375 = vpush %v143_v1  ;;  %s371_s1 = sshll.u32 %s488_s12, 4 }
   0xf   : > { %s136_s15 = scalar_lea.vmem %s484_s0, %s371_s1  ;;  %s140_s19 = scalar_lea.vmem %s486_s2, %s371_s1 }
  0x10   : > { %v141_v2 = vld [vmem:[%s136_s15] sm:$0xff]  ;;  %v142_v3 = vld [vmem:[%s136_s15 + $0x8] sm:$0xff] }
  0x3f   : > { %s376_s16 = spop %375 }
  0x40   : > { %v145_v4 = vstv %s376_s16 }
  0x41   : > { %v146_v5 = vadd.f32 %v145_v4, %v141_v2  ;;  %v147_v6 = vadd.f32 %v145_v4, %v142_v3 }
  0x43   : > { %v150_v7 = vperm.slane %v146_v5, 0  ;;  %v151_v8 = vperm.slane %v146_v5, 1  ;;  %v152_v9 = vperm.slane %v146_v5, 2  ;;  %v153_v10 = vperm.slane %v146_v5, 3 }
  0x44   : > { %v154_v11 = vperm.slane %v146_v5, 4  ;;  %v155_v12 = vperm.slane %v146_v5, 5  ;;  %v156_v13 = vperm.slane %v146_v5, 6  ;;  %v157_v14 = vperm.slane %v146_v5, 7 }
  0x45   : > { %v158_v15 = vperm.slane %v147_v6, 0  ;;  %v159_v16 = vperm.slane %v147_v6, 1  ;;  %v160_v17 = vperm.slane %v147_v6, 2  ;;  %v161_v18 = vperm.slane %v147_v6, 3 }
  0x46   : > { %v162_v19 = vperm.slane %v147_v6, 4  ;;  %v163_v20 = vperm.slane %v147_v6, 5  ;;  %v164_v21 = vperm.slane %v147_v6, 6  ;;  %v165_v22 = vperm.slane %v147_v6, 7 }
  0x47   : > { %v183_v23 = vsel %vm182_vm0, %v150_v7, -inf  ;;  %v184_v24 = vsel %vm182_vm0, %v151_v8, -inf  ;;  %v185_v25 = vsel %vm182_vm0, %v152_v9, -inf  ;;  %v186_v26 = vsel %vm182_vm0, %v153_v10, -inf }
  0x48   : > { %v187_v27 = vsel %vm182_vm0, %v154_v11, -inf  ;;  %v189_v28 = vsel %vm182_vm0, %v155_v12, -inf  ;;  %v191_v29 = vsel %vm182_vm0, %v156_v13, -inf  ;;  %v193_v30 = vsel %vm182_vm0, %v157_v14, -inf }
  0x49   : > { %v188_v31 = vmax.f32 %v183_v23, %v187_v27  ;;  %v190_v32 = vmax.f32 %v184_v24, %v189_v28  ;;  %v192_v33 = vmax.f32 %v185_v25, %v191_v29  ;;  %v194_v34 = vmax.f32 %v186_v26, %v193_v30 }
  0x4a   : > { %v195_v35 = vsel %vm182_vm0, %v158_v15, -inf  ;;  %v197_v36 = vsel %vm182_vm0, %v159_v16, -inf  ;;  %v199_v37 = vsel %vm182_vm0, %v160_v17, -inf  ;;  %v201_v38 = vsel %vm182_vm0, %v161_v18, -inf }
  0x4b   : > { %v196_v39 = vmax.f32 %v188_v31, %v195_v35  ;;  %v198_v40 = vmax.f32 %v190_v32, %v197_v36  ;;  %v200_v41 = vmax.f32 %v192_v33, %v199_v37  ;;  %v202_v42 = vmax.f32 %v194_v34, %v201_v38 }
  0x4c   : > { %v203_v43 = vsel %vm182_vm0, %v162_v19, -inf  ;;  %v205_v44 = vsel %vm182_vm0, %v163_v20, -inf  ;;  %v207_v45 = vsel %vm182_vm0, %v164_v21, -inf  ;;  %v209_v46 = vsel %vm182_vm0, %v165_v22, -inf }
  0x4d   : > { %v204_v47 = vmax.f32 %v196_v39, %v203_v43  ;;  %v206_v48 = vmax.f32 %v198_v40, %v205_v44  ;;  %v208_v49 = vmax.f32 %v200_v41, %v207_v45  ;;  %v210_v50 = vmax.f32 %v202_v42, %v209_v46 }
  0x4f   : > { %v211_v51 = vmax.f32 %v204_v47, %v206_v48  ;;  %v212_v52 = vmax.f32 %v208_v49, %v210_v50 }
  0x51   : > { %v213_v53 = vmax.f32 %v211_v51, %v212_v52 }
  0x53   : > { %214 = vmax.xlane.f32.xlu0 %v213_v53 }
  0xc6   : > { %v215_v54 = vpop.xlane.xlu0 %214 }
  0xc7   : > { %v217_v55 = vperm.slane %v215_v54, 0 }
  0xc9   : > { %v219_v56 = vsub.f32 %v146_v5, %v217_v55  ;;  %v220_v58 = vsub.f32 %v147_v6, %v217_v55 }
  0xcb   : > { %v221_v57 = vmul.f32 1.442695, %v219_v56  ;;  %v223_v62 = vmul.f32 1.442695, %v220_v58 }
  0xcd   : > { %385 = vpow2.f32 %v221_v57 }
  0xce   : > { %387 = vpow2.f32 %v223_v62 }
  0xd3   : > { %v449_v59 = vpop.eup %385 }
  0xd4   : > { %v227_v60 = vperm.slane %v449_v59, 0  ;;  %v228_v61 = vperm.slane %v449_v59, 1  ;;  %v229_v63 = vperm.slane %v449_v59, 2  ;;  %v230_v0 = vperm.slane %v449_v59, 3  ;;  %v388_v12 = vpop.eup %387 }
  0xd5   : > { %v231_v4 = vperm.slane %v449_v59, 4  ;;  %v232_v7 = vperm.slane %v449_v59, 5  ;;  %v233_v10 = vperm.slane %v449_v59, 6  ;;  %v234_v14 = vperm.slane %v449_v59, 7 }
  0xd6   : > { %v259_v1 = vsel %vm182_vm0, %v227_v60, 0.0  ;;  %v260_v2 = vsel %vm182_vm0, %v228_v61, 0.0  ;;  %v262_v5 = vsel %vm182_vm0, %v229_v63, 0.0  ;;  %v264_v8 = vsel %vm182_vm0, %v230_v0, 0.0 }
  0xd7   : > { %v261_v3 = vadd.f32 %v260_v2, %v259_v1  ;;  %v266_v11 = vsel %vm182_vm0, %v231_v4, 0.0  ;;  %v268_v15 = vsel %vm182_vm0, %v232_v7, 0.0  ;;  %v235_v17 = vperm.slane %v388_v12, 0 }
  0xd8   : > { %v270_v18 = vsel %vm182_vm0, %v233_v10, 0.0  ;;  %v236_v20 = vperm.slane %v388_v12, 1  ;;  %v272_v21 = vsel %vm182_vm0, %v234_v14, 0.0  ;;  %v237_v23 = vperm.slane %v388_v12, 2 }
  0xd9   : > { %v263_v6 = vadd.f32 %v262_v5, %v261_v3  ;;  %v274_v24 = vsel %vm182_vm0, %v235_v17, 0.0  ;;  %v238_v26 = vperm.slane %v388_v12, 3  ;;  %v239_v29 = vperm.slane %v388_v12, 4 }
  0xda   : > { %v276_v27 = vsel %vm182_vm0, %v236_v20, 0.0  ;;  %v278_v30 = vsel %vm182_vm0, %v237_v23, 0.0  ;;  %v240_v32 = vperm.slane %v388_v12, 5  ;;  %v241_v35 = vperm.slane %v388_v12, 6 }
  0xdb   : > { %v265_v9 = vadd.f32 %v264_v8, %v263_v6  ;;  %v280_v33 = vsel %vm182_vm0, %v238_v26, 0.0  ;;  %v282_v36 = vsel %vm182_vm0, %v239_v29, 0.0  ;;  %v242_v38 = vperm.slane %v388_v12, 7 }
  0xdc   : > { %v284_v39 = vsel %vm182_vm0, %v240_v32, 0.0  ;;  %v286_v41 = vsel %vm182_vm0, %v241_v35, 0.0 }
  0xdd   : > { %v267_v13 = vadd.f32 %v266_v11, %v265_v9  ;;  %v288_v43 = vsel %vm182_vm0, %v242_v38, 0.0 }
  0xdf   : > { %v269_v16 = vadd.f32 %v268_v15, %v267_v13 }
  0xe1   : > { %v271_v19 = vadd.f32 %v270_v18, %v269_v16 }
  0xe3   : > { %v273_v22 = vadd.f32 %v272_v21, %v271_v19 }
  0xe5   : > { %v275_v25 = vadd.f32 %v274_v24, %v273_v22 }
  0xe7   : > { %v277_v28 = vadd.f32 %v276_v27, %v275_v25 }
  0xe9   : > { %v279_v31 = vadd.f32 %v278_v30, %v277_v28 }
  0xeb   : > { %v281_v34 = vadd.f32 %v280_v33, %v279_v31 }
  0xed   : > { %v283_v37 = vadd.f32 %v282_v36, %v281_v34 }
  0xef   : > { %v285_v40 = vadd.f32 %v284_v39, %v283_v37 }
  0xf1   : > { %v287_v42 = vadd.f32 %v286_v41, %v285_v40 }
  0xf3   : > { %v289_v44 = vadd.f32 %v288_v43, %v287_v42 }
  0xf5   : > { %290 = vadd.xlane.f32.xlu0 %v289_v44 }
 0x168   : > { %v291_v45 = vpop.xlane.xlu0 %290 }
 0x169   : > { %389 = vrcp.f32 %v291_v45  ;;  %v303_v49 = vand.u32 2147483648, %v291_v45  ;;  %v301_v51 = vand.u32 2147483647, %v291_v45  ;;  %vm297_vm2 = vweird.f32 %v291_v45 }
 0x16b   : > { %v304_v53 = vor.u32 1.1754944e-38, %v303_v49  ;;  %vm302_vm4 = vcmp.eq.f32.partialorder %v301_v51, 8.507059e+37 }
 0x16f   : > { %v390_v46 = vpop.eup %389 }
 0x170   : > { %v293_v47 = vmul.f32 %v390_v46, %v291_v45  ;;  %vm298_vm1 = vweird.f32 %v390_v46 }
 0x171   : > { %vm299_vm3 = vmor %vm297_vm2, %vm298_vm1 }
 0x172   : > { %v294_v48 = vsub.f32 1.0, %v293_v47 }
 0x174   : > { %v295_v50 = vmul.f32 %v390_v46, %v294_v48 }
 0x176   : > { %v296_v52 = vadd.f32 %v390_v46, %v295_v50 }
 0x178   : > { %v300_v54 = vsel %vm299_vm3, %v390_v46, %v296_v52 }
 0x179   : > { %v305_v55 = vsel %vm302_vm4, %v304_v53, %v300_v54 }
 0x17a   : > { %v307_v56 = vperm.slane %v305_v55, 0 }
 0x17c   : > { %v309_v57 = vmul.f32 %v449_v59, %v307_v56  ;;  %v310_v58 = vmul.f32 %v388_v12, %v307_v56 }
 0x17e   : > { %311 = vst [vmem:[%s140_s19] sm:$0xff] %v309_v57 }
 0x17f   : > { %312 = vst [vmem:[%s140_s19 + $0x8] sm:$0xff] %v310_v58 }
 0x180 PF: > { %s14_s11 = sadd.s32 1, %s397_s11  }
 0x181   : > { %p11_p4 = scmp.ge.s32.totalorder %s14_s11, 10  }
 0x183   :  { %13 = sbr.rel (!%p11_p4) target bundleno = 3 (0x3), region = 58 }

</bundles_post_ra>
